<compile_context>
chip_gen: v7x
topology: tpu7x:2x2x1
jax: 0.10.0
libtpu: 0.0.40
codegen_flags: <defaults>
</compile_context>

<pallas_src>
import functools
import math

import numpy as np
import jax
import jax.numpy as jnp
from jax.experimental import pallas as pl
from jax.experimental.pallas import tpu as pltpu

PAD = 0
LN_EPS = 1e-6          # ShuttleNet uses nn.LayerNorm(d_model, eps=1e-6)
NEG_INF = -1e9
N_HEAD = 2             # hard-coded in the reference ShotGenDecoder


# --------------------------------------------------------------------------- fused kernel
def _shotgen_fused_kernel(xas_p_ref, xas_r_ref, enc_p_ref, enc_r_ref,
                          valid_p_ref, valid_r_ref, sel_ref, wts_ref,
                          w64_p_ref, w32_p_ref, vec_p_ref,
                          w64_r_ref, w32_r_ref, vec_r_ref,
                          wfuse_ref, out_ref,
                          *, B, T, Th, TeP, TeR, D, H):
    f32 = jnp.float32
    dk = D                      # d_k == d_v == d_model in the reference config
    hdk = H * dk                # width of the fused per-stream Q/K/V projections (== 2*D)
    d_inner = 2 * D             # FFN hidden width

    def layer_norm(v, g, beta):
        # single-pass mean / mean-of-squares (one fewer XLU reduction than two-pass form)
        mu = jnp.mean(v, axis=-1, keepdims=True)
        ms = jnp.mean(v * v, axis=-1, keepdims=True)
        return (v - mu) * jax.lax.rsqrt(ms - mu * mu + LN_EPS) * g + beta

    def softmax_rows(s):
        s = s - jnp.max(s, axis=-1, keepdims=True)
        e = jnp.exp(s)
        return e / jnp.sum(e, axis=-1, keepdims=True)   # exact reciprocal (validation-friendly)

    def causal_pad_mask(valid_row, tt):
        # additive (tt, tt) causal+pad mask built in-kernel (VPU-only; no DMA'd mask input)
        r = jax.lax.broadcasted_iota(jnp.int32, (tt, tt), 0)
        c = jax.lax.broadcasted_iota(jnp.int32, (tt, tt), 1)
        ok = (c <= r) & (valid_row > 0.5)
        return jnp.where(ok, 0.0, NEG_INF).astype(f32)

    def decoder_layer(x2d, valid, enc2d, nb, tt, te, w64, w32, vecs):
        # x2d:(nb*tt, 2D) = [dec_area | dec_shot](+PE), valid:(nb, tt), enc2d:(nb*te, D)
        resid = x2d[:, :D] + x2d[:, D:2 * D]            # dec_area + dec_shot

        # ---- Type-area self-attention: one fused QKV matmul over all batch*time rows ----
        qkv = jnp.dot(x2d, w64[:, :3 * hdk], preferred_element_type=f32)       # (rows, 3*hdk)
        blocks = []
        for bi in range(nb):                                                    # static unroll
            rs = bi * tt
            qb = qkv[rs:rs + tt, 0:hdk]
            kb = qkv[rs:rs + tt, hdk:2 * hdk]
            vb = qkv[rs:rs + tt, 2 * hdk:3 * hdk]
            m = causal_pad_mask(valid[bi:bi + 1, :], tt)
            heads = []
            for h in range(H):
                sl = slice(h * dk, (h + 1) * dk)
                s = jax.lax.dot_general(qb[:, sl], kb[:, sl],
                                        (((1,), (1,)), ((), ())),
                                        preferred_element_type=f32) + m
                heads.append(jnp.dot(softmax_rows(s), vb[:, sl],
                                     preferred_element_type=f32))
            blocks.append(jnp.concatenate(heads, axis=-1))                      # (tt, hdk)
        att = jnp.concatenate(blocks, axis=0)                                   # (rows, hdk)
        o1 = jnp.dot(att, w64[:, 3 * hdk:3 * hdk + D], preferred_element_type=f32)
        x1 = layer_norm(o1 + resid, vecs[0:1, :D], vecs[1:2, :D])

        # ---- Encoder-decoder attention (no mask in the reference forward) ----
        q2 = jnp.dot(x1, w32[:, 0:hdk], preferred_element_type=f32)             # (rows, hdk)
        kv2 = jnp.dot(enc2d, w32[:, hdk:3 * hdk], preferred_element_type=f32)   # (nb*te, 2*hdk)
        blocks = []
        for bi in range(nb):
            rs, es = bi * tt, bi * te
            qb = q2[rs:rs + tt, :]
            kb = kv2[es:es + te, 0:hdk]
            vb = kv2[es:es + te, hdk:2 * hdk]
            heads = []
            for h in range(H):
                sl = slice(h * dk, (h + 1) * dk)
                s = jax.lax.dot_general(qb[:, sl], kb[:, sl],
                                        (((1,), (1,)), ((), ())),
                                        preferred_element_type=f32)
                heads.append(jnp.dot(softmax_rows(s), vb[:, sl],
                                     preferred_element_type=f32))
            blocks.append(jnp.concatenate(heads, axis=-1))
        att2 = jnp.concatenate(blocks, axis=0)
        o2 = jnp.dot(att2, w64[:, 3 * hdk + D:3 * hdk + 2 * D], preferred_element_type=f32)
        x2 = layer_norm(o2 + x1, vecs[2:3, :D], vecs[3:4, :D])

        # ---- Position-wise FFN ----
        h1 = jnp.maximum(
            jnp.dot(x2, w32[:, 3 * hdk:3 * hdk + d_inner], preferred_element_type=f32)
            + vecs[4:5, :d_inner], 0.0)
        y = jnp.dot(h1, w64[:, 3 * hdk + 2 * D:3 * hdk + 3 * D],
                    preferred_element_type=f32) + vecs[5:6, :D]
        return layer_norm(y + x2, vecs[6:7, :D], vecs[7:8, :D])

    # Player layer: A-half and B-half stacked along the batch axis (same weights).
    dec_p = decoder_layer(xas_p_ref[...], valid_p_ref[...], enc_p_ref[...],
                          2 * B, Th, TeP, w64_p_ref[...], w32_p_ref[...], vec_p_ref[...])
    # Rally layer: full-length sequences.
    dec_r = decoder_layer(xas_r_ref[...], valid_r_ref[...], enc_r_ref[...],
                          B, T, TeR, w64_r_ref[...], w32_r_ref[...], vec_r_ref[...])

    # alternatemerge via 0/1 selector matmuls (replicates the reference (A,A,'A')/(B,B,'B') quirk).
    sel = sel_ref[...]
    merged_A = jnp.dot(sel[:, :B * Th], dec_p[:B * Th, :], preferred_element_type=f32)
    merged_B = jnp.dot(sel[:, B * Th:], dec_p[B * Th:, :], preferred_element_type=f32)

    # Gated fusion: X=[xA|xB|xL]; block-diag tanh matmul + one fused gate matmul.
    X = jnp.concatenate([merged_A, merged_B, dec_r], axis=-1)                   # (B*T, 3D)
    wf = wfuse_ref[...]
    HH = jnp.tanh(jnp.dot(X, wf[:, :3 * D], preferred_element_type=f32))        # [hA|hB|hL]
    GG = jax.nn.sigmoid(jnp.dot(X, wf[:, 3 * D:], preferred_element_type=f32))  # [g1|g2|g3]
    Z = wts_ref[...] * (GG * HH)                                                # (B*T, 3D)
    out_ref[...] = jax.nn.sigmoid(Z[:, :D] + Z[:, D:2 * D] + Z[:, 2 * D:3 * D])


# --------------------------------------------------------------------------- weight packing
def _pack_layer_slabs(layer_p, d_model):
    """Pack one DecoderLayer's 18 small tensors into 3 lane-dense slabs (trace-time)."""
    D = d_model
    H = N_HEAD
    sa, ea, ff = layer_p["slf_attn"], layer_p["enc_attn"], layer_p["ffn"]
    d_inner = ff["w1"].shape[1]
    # slab packing requires d_k == d_v == d_model, n_head == 2, d_inner == 2*d_model
    assert sa["w_qs_area"].shape == (D, H * D) and sa["fc"].shape == (H * D, D)
    assert ea["w_qs"].shape == (D, H * D) and ea["fc"].shape == (H * D, D)
    assert ff["w1"].shape == (D, 2 * D) and ff["w2"].shape == (2 * D, D)

    scale_slf = 1.0 / (2.0 * math.sqrt(D))       # TypeArea disentangled-score temperature
    scale_enc = 1.0 / math.sqrt(D)

    # rows 0:D -> area weights, D:2D -> shot weights (matches the [dec_area|dec_shot] input)
    wq_s = jnp.concatenate([sa["w_qs_area"], sa["w_qs_shot"]], 0) * scale_slf
    wk_s = jnp.concatenate([sa["w_ks_area"], sa["w_ks_shot"]], 0)
    wv_s = jnp.concatenate([sa["w_vs_area"], sa["w_vs_shot"]], 0)
    qkv_slf = jnp.concatenate([wq_s, wk_s, wv_s], 1)                         # (2D, 3*H*dk)

    slab64 = jnp.concatenate([qkv_slf, sa["fc"], ea["fc"], ff["w2"]], 1)     # (2D, 3*H*dk+3D)
    qkv_enc = jnp.concatenate([ea["w_qs"] * scale_enc, ea["w_ks"], ea["w_vs"]], 1)
    slab32 = jnp.concatenate([qkv_enc, ff["w1"]], 1)                         # (D, 3*H*dk+2D)

    def row(v):
        return jnp.pad(v, (0, d_inner - v.shape[0])).reshape(1, d_inner)

    vecs = jnp.concatenate([row(sa["ln_g"]), row(sa["ln_b"]),
                            row(ea["ln_g"]), row(ea["ln_b"]),
                            row(ff["b1"]), row(ff["b2"]),
                            row(ff["ln_g"]), row(ff["ln_b"])], 0)            # (8, d_inner)
    return slab64, slab32, vecs


def _pack_fusion_slab(gf_p, d_model):
    D = d_model
    z = jnp.zeros((D, D), jnp.float32)
    wh = jnp.concatenate([
        jnp.concatenate([gf_p["hidden1"], z, z], 1),
        jnp.concatenate([z, gf_p["hidden2"], z], 1),
        jnp.concatenate([z, z, gf_p["hidden3"]], 1)], 0)                     # block-diag (3D,3D)
    wg = jnp.concatenate([gf_p["gated1"], gf_p["gated2"], gf_p["gated3"]], 1)  # (3D, 3D)
    return jnp.concatenate([wh, wg], 1)                                      # (3D, 6D)


def _merge_selectors(b, t, th):
    """0/1 matrices realizing alternatemerge(decode_A,decode_A,'A') / (decode_B,decode_B,'B')."""
    sel_a = np.zeros((b * t, b * th), np.float32)
    sel_b = np.zeros((b * t, b * th), np.float32)
    for bb in range(b):
        for tt in range(t):
            sel_a[bb * t + tt, bb * th + tt // 2] = 1.0
            if tt >= 1:
                sel_b[bb * t + tt, bb * th + (tt - 1) // 2] = 1.0
    return np.concatenate([sel_a, sel_b], axis=1)                            # (b*t, 2*b*th)


# --------------------------------------------------------------------------- forward
def sinusoid_table(n_position, d_hid):
    pos = jnp.arange(n_position, dtype=jnp.float32)[:, None]
    idx = jnp.arange(d_hid, dtype=jnp.float32)[None, :]
    angle = pos / jnp.power(10000.0, 2.0 * jnp.floor(idx / 2.0) / d_hid)
    even = (jnp.arange(d_hid)[None, :] % 2) == 0
    return jnp.where(even, jnp.sin(angle), jnp.cos(angle)).astype(jnp.float32)


def shotgen_decoder_forward(params, cfg, input_shot, input_x, input_y, input_player,
                            encode_local_output, encode_global_A, encode_global_B,
                            trg_mask=None):
    d_model = cfg["encode_dim"]
    b, t = input_shot.shape
    if t < 2 or t % 2 != 0:
        # TODO(synk): odd-length / single-step rallies hit different alternatemerge branches
        # (unequal A/B half lengths); not covered by the fused kernel.
        raise NotImplementedError("fused ShotGenDecoder requires an even sequence length >= 2")
    th = t // 2
    assert encode_global_A.shape == encode_global_B.shape

    # ---- tiny embedding / PE / split glue (plain JAX; single dispatch afterwards) ----
    area = jnp.stack([input_x, input_y], axis=-1).astype(jnp.float32)
    emb_area = jax.nn.relu(jnp.einsum("btc,cd->btd", area, params["area_w"]) + params["area_b"])
    emb_shot = params["shot_emb"][input_shot]
    emb_player = params["player_emb"][input_player]
    h_a = emb_area + emb_player
    h_s = emb_shot + emb_player

    enc_len = cfg["encode_length"]
    pe = params["pos_table"][enc_len:enc_len + t]                    # 'decode'-mode positions
    pe_h = pe[:th]

    # A/B halves stacked along the batch axis (same player-layer weights, same shapes)
    ha_p = jnp.concatenate([h_a[:, ::2], h_a[:, 1::2]], 0)
    hs_p = jnp.concatenate([h_s[:, ::2], h_s[:, 1::2]], 0)
    xas_p = jnp.concatenate([ha_p + pe_h[None], hs_p + pe_h[None]], -1).reshape(2 * b * th,
                                                                                2 * d_model)
    xas_r = jnp.concatenate([h_a + pe[None], h_s + pe[None]], -1).reshape(b * t, 2 * d_model)

    enc_p = jnp.concatenate([encode_global_A, encode_global_B], 0)
    te_p = enc_p.shape[1]
    enc_p = enc_p.reshape(2 * b * te_p, d_model).astype(jnp.float32)
    te_r = encode_local_output.shape[1]
    enc_r = encode_local_output.reshape(b * te_r, d_model).astype(jnp.float32)

    valid_r = (input_shot != PAD).astype(jnp.float32)                # key-pad validity
    valid_p = jnp.concatenate([valid_r[:, ::2], valid_r[:, 1::2]], 0)

    sel = jnp.asarray(_merge_selectors(b, t, th))
    gf = params["gated_fusion"]
    wts = jnp.concatenate([jnp.tile(gf["w_A"][:t], (b, 1)),
                           jnp.tile(gf["w_B"][:t], (b, 1)),
                           jnp.tile(gf["w_L"][:t], (b, 1))], -1)     # (b*t, 3D)

    # ---- weight slabs (tiny trace-time concats; can be hoisted out of jit for fixed weights)
    w64_p, w32_p, vec_p = _pack_layer_slabs(params["player_layer"], d_model)
    w64_r, w32_r, vec_r = _pack_layer_slabs(params["rally_layer"], d_model)
    wfuse = _pack_fusion_slab(gf, d_model)

    kernel = functools.partial(_shotgen_fused_kernel, B=b, T=t, Th=th,
                               TeP=te_p, TeR=te_r, D=d_model, H=N_HEAD)
    vmem = lambda: pl.BlockSpec(memory_space=pltpu.MemorySpace.VMEM)
    out2d = pl.pallas_call(
        kernel,
        out_shape=jax.ShapeDtypeStruct((b * t, d_model), jnp.float32),
        in_specs=[vmem() for _ in range(15)],
        out_specs=vmem(),
    )(xas_p, xas_r, enc_p, enc_r, valid_p, valid_r, sel, wts,
      w64_p, w32_p, vec_p, w64_r, w32_r, vec_r, wfuse)
    return out2d.reshape(b, t, d_model)


# --------------------------------------------------------------------------- pure-JAX reference
def reference_forward(params, cfg, input_shot, input_x, input_y, input_player,
                      encode_local_output, encode_global_A, encode_global_B):
    """Plain-JAX mirror of the PyTorch ShotGenDecoder (eval mode); used for validation."""
    D = cfg["encode_dim"]
    H = N_HEAD
    dk = D
    b, t = input_shot.shape
    th = t // 2

    area = jnp.stack([input_x, input_y], axis=-1).astype(jnp.float32)
    emb_area = jax.nn.relu(jnp.einsum("btc,cd->btd", area, params["area_w"]) + params["area_b"])
    emb_shot = params["shot_emb"][input_shot]
    emb_player = params["player_emb"][input_player]
    h_a = emb_area + emb_player
    h_s = emb_shot + emb_player

    def add_mask(seq):
        pad = (seq != PAD)[:, None, :]
        causal = jnp.tril(jnp.ones((1, seq.shape[1], seq.shape[1]), bool))
        return jnp.where(pad & causal, 0.0, NEG_INF).astype(jnp.float32)

    enc_len = cfg["encode_length"]
    pos = params["pos_table"]

    def layer_norm(x, g, beta):
        mu = jnp.mean(x, -1, keepdims=True)
        var = jnp.mean(jnp.square(x - mu), -1, keepdims=True)
        return (x - mu) / jnp.sqrt(var + LN_EPS) * g + beta

    def split_heads(x):
        bb, tt, _ = x.shape
        return x.reshape(bb, tt, H, dk).transpose(0, 2, 1, 3)

    def merge_heads(x):
        bb, _, tt, _ = x.shape
        return x.transpose(0, 2, 1, 3).reshape(bb, tt, H * dk)

    def attend(q, k, v, scale, mask):
        s = jnp.einsum("bhqd,bhkd->bhqk", q, k) * scale
        if mask is not None:
            s = s + mask[:, None]
        return jnp.einsum("bhqk,bhkd->bhqd", jax.nn.softmax(s, -1), v)

    def type_area_mha(da, ds, p, mask):
        q = split_heads(da @ p["w_qs_area"] + ds @ p["w_qs_shot"])
        k = split_heads(da @ p["w_ks_area"] + ds @ p["w_ks_shot"])
        v = split_heads(da @ p["w_vs_area"] + ds @ p["w_vs_shot"])
        o = merge_heads(attend(q, k, v, 1.0 / (2.0 * math.sqrt(dk)), mask)) @ p["fc"]
        return layer_norm(o + (da + ds), p["ln_g"], p["ln_b"])

    def mha(qx, kvx, p, mask):
        q = split_heads(qx @ p["w_qs"])
        k = split_heads(kvx @ p["w_ks"])
        v = split_heads(kvx @ p["w_vs"])
        o = merge_heads(attend(q, k, v, 1.0 / math.sqrt(dk), mask)) @ p["fc"]
        return layer_norm(o + qx, p["ln_g"], p["ln_b"])

    def ffn(x, p):
        y = jax.nn.relu(x @ p["w1"] + p["b1"]) @ p["w2"] + p["b2"]
        return layer_norm(y + x, p["ln_g"], p["ln_b"])

    def dec_layer(lp, ha, hs, enc, mask):
        tt = ha.shape[1]
        pe = pos[enc_len:enc_len + tt][None]
        da, ds = ha + pe, hs + pe
        x = type_area_mha(da, ds, lp["slf_attn"], mask)
        x = mha(x, enc, lp["enc_attn"], None)
        return ffn(x, lp["ffn"])

    dec_A = dec_layer(params["player_layer"], h_a[:, ::2], h_s[:, ::2],
                      encode_global_A, add_mask(input_shot[:, ::2]))
    dec_B = dec_layer(params["player_layer"], h_a[:, 1::2], h_s[:, 1::2],
                      encode_global_B, add_mask(input_shot[:, 1::2]))
    dec_L = dec_layer(params["rally_layer"], h_a, h_s,
                      encode_local_output, add_mask(input_shot))

    mA = jnp.zeros((b, t, D), jnp.float32)
    mA = mA.at[:, ::2].set(dec_A).at[:, 1::2].set(dec_A)      # reference (A, A, 'A') quirk
    mB = jnp.zeros((b, t, D), jnp.float32)
    mB = mB.at[:, 1::2].set(dec_B).at[:, 2::2].set(dec_B[:, :th - 1])

    gf = params["gated_fusion"]
    hA = jnp.tanh(mA @ gf["hidden1"])
    hB = jnp.tanh(mB @ gf["hidden2"])
    hL = jnp.tanh(dec_L @ gf["hidden3"])
    xcat = jnp.concatenate([mA, mB, dec_L], -1)
    z = (gf["w_A"][:t] * (jax.nn.sigmoid(xcat @ gf["gated1"]) * hA)
         + gf["w_B"][:t] * (jax.nn.sigmoid(xcat @ gf["gated2"]) * hB)
         + gf["w_L"][:t] * (jax.nn.sigmoid(xcat @ gf["gated3"]) * hL))
    return jax.nn.sigmoid(z)


# --------------------------------------------------------------------------- params
def init_params(key, cfg):
    d_model = cfg["encode_dim"]
    n_head = N_HEAD
    d_k = d_v = d_model
    d_inner = d_model * 2
    keys = iter(jax.random.split(key, 64))

    def nrm(shape, scale=0.1):
        return scale * jax.random.normal(next(keys), shape, jnp.float32)

    def mha_params():
        return {"w_qs": nrm((d_model, n_head * d_k)), "w_ks": nrm((d_model, n_head * d_k)),
                "w_vs": nrm((d_model, n_head * d_v)), "fc": nrm((n_head * d_v, d_model)),
                "ln_g": jnp.ones((d_model,), jnp.float32),
                "ln_b": jnp.zeros((d_model,), jnp.float32)}

    def typearea_params():
        return {"w_qs_area": nrm((d_model, n_head * d_k)), "w_ks_area": nrm((d_model, n_head * d_k)),
                "w_vs_area": nrm((d_model, n_head * d_v)), "w_qs_shot": nrm((d_model, n_head * d_k)),
                "w_ks_shot": nrm((d_model, n_head * d_k)), "w_vs_shot": nrm((d_model, n_head * d_v)),
                "fc": nrm((n_head * d_v, d_model)),
                "ln_g": jnp.ones((d_model,), jnp.float32),
                "ln_b": jnp.zeros((d_model,), jnp.float32)}

    def ffn_params():
        return {"w1": nrm((d_model, d_inner)), "b1": jnp.zeros((d_inner,), jnp.float32),
                "w2": nrm((d_inner, d_model)), "b2": jnp.zeros((d_model,), jnp.float32),
                "ln_g": jnp.ones((d_model,), jnp.float32),
                "ln_b": jnp.zeros((d_model,), jnp.float32)}

    def dec_layer_params():
        return {"slf_attn": typearea_params(), "enc_attn": mha_params(), "ffn": ffn_params()}

    decode_length = cfg["max_ball_round"] - cfg["encode_length"]
    return {
        "area_w": nrm((2, cfg["area_dim"])),
        "area_b": jnp.zeros((cfg["area_dim"],), jnp.float32),
        "shot_emb": nrm((cfg["shot_num"], cfg["shot_dim"])).at[PAD].set(0.0),     # padding_idx=0
        "player_emb": nrm((cfg["player_num"], cfg["player_dim"])).at[PAD].set(0.0),
        "pos_table": sinusoid_table(cfg["max_ball_round"], cfg["shot_dim"]),
        "player_layer": dec_layer_params(),
        "rally_layer": dec_layer_params(),
        "gated_fusion": {
            "hidden1": nrm((d_model, d_model)), "hidden2": nrm((d_model, d_model)),
            "hidden3": nrm((d_model, d_model)),
            "gated1": nrm((3 * d_model, d_model)), "gated2": nrm((3 * d_model, d_model)),
            "gated3": nrm((3 * d_model, d_model)),
            # torch init is zeros; small deterministic randoms avoid a constant output
            "w_A": nrm((decode_length, d_model)), "w_B": nrm((decode_length, d_model)),
            "w_L": nrm((decode_length, d_model)),
        },
    }


# --------------------------------------------------------------------------- main
if __name__ == "__main__":
    # exact f32 matmuls for the XLA reference path (kernel matmuls accumulate in f32 anyway)
    jax.config.update("jax_default_matmul_precision", "highest")

    cfg = dict(area_dim=32, shot_dim=32, player_dim=32, encode_dim=32,
               shot_num=12, player_num=4, encode_length=4, max_ball_round=16)
    key = jax.random.PRNGKey(0)
    kp, k1, k2, k3, k4, k5, k6, k7 = jax.random.split(key, 8)
    params = init_params(kp, cfg)

    B, T = 2, 8
    enc_len = cfg["encode_length"]
    input_shot = jax.random.randint(k1, (B, T), 1, cfg["shot_num"]).astype(jnp.int32)
    input_x = jax.random.uniform(k2, (B, T), jnp.float32)
    input_y = jax.random.uniform(k3, (B, T), jnp.float32)
    input_player = jax.random.randint(k4, (B, T), 1, cfg["player_num"]).astype(jnp.int32)
    encode_local_output = jax.random.normal(k5, (B, enc_len, cfg["encode_dim"]), jnp.float32)
    encode_global_A = jax.random.normal(k6, (B, enc_len // 2, cfg["encode_dim"]), jnp.float32)
    encode_global_B = jax.random.normal(k7, (B, enc_len // 2, cfg["encode_dim"]), jnp.float32)

    args = (input_shot, input_x, input_y, input_player,
            encode_local_output, encode_global_A, encode_global_B)

    fwd = jax.jit(lambda p, *a: shotgen_decoder_forward(p, cfg, *a))
    out = jax.block_until_ready(fwd(params, *args))
    assert out.shape == (B, T, cfg["encode_dim"])
    assert bool(jnp.all(jnp.isfinite(out)))

    ref = jax.block_until_ready(
        jax.jit(lambda p, *a: reference_forward(p, cfg, *a))(params, *args))
    err = float(jnp.max(jnp.abs(out - ref)))
    assert err < 5e-4, f"kernel/reference mismatch: max abs err = {err}"
    print("KERNEL_OK")
</pallas_src>

<mosaic_0001>
module attributes {stable_mosaic.version = 11 : i64} {
  func.func @_shotgen_fused_kernel(%arg0: memref<16x64xf32, #tpu.memory_space<vmem>>, %arg1: memref<16x64xf32, #tpu.memory_space<vmem>>, %arg2: memref<8x32xf32, #tpu.memory_space<vmem>>, %arg3: memref<8x32xf32, #tpu.memory_space<vmem>>, %arg4: memref<4x4xf32, #tpu.memory_space<vmem>>, %arg5: memref<2x8xf32, #tpu.memory_space<vmem>>, %arg6: memref<16x16xf32, #tpu.memory_space<vmem>>, %arg7: memref<16x96xf32, #tpu.memory_space<vmem>>, %arg8: memref<64x288xf32, #tpu.memory_space<vmem>>, %arg9: memref<32x256xf32, #tpu.memory_space<vmem>>, %arg10: memref<8x64xf32, #tpu.memory_space<vmem>>, %arg11: memref<64x288xf32, #tpu.memory_space<vmem>>, %arg12: memref<32x256xf32, #tpu.memory_space<vmem>>, %arg13: memref<8x64xf32, #tpu.memory_space<vmem>>, %arg14: memref<96x192xf32, #tpu.memory_space<vmem>>, %arg15: memref<16x32xf32, #tpu.memory_space<vmem>>) attributes {dimension_semantics = [], scalar_prefetch = 0 : i64, scratch_operands = 0 : i64, tpu.core_type = #tpu.core_type<tc>} {
    %c0 = arith.constant 0 : index
    %c0_0 = arith.constant 0 : index
    %0 = vector.load %arg0[%c0, %c0_0] : memref<16x64xf32, #tpu.memory_space<vmem>>, vector<16x64xf32>
    %c0_1 = arith.constant 0 : index
    %c0_2 = arith.constant 0 : index
    %1 = vector.load %arg4[%c0_1, %c0_2] : memref<4x4xf32, #tpu.memory_space<vmem>>, vector<4x4xf32>
    %c0_3 = arith.constant 0 : index
    %c0_4 = arith.constant 0 : index
    %2 = vector.load %arg2[%c0_3, %c0_4] : memref<8x32xf32, #tpu.memory_space<vmem>>, vector<8x32xf32>
    %c0_5 = arith.constant 0 : index
    %c0_6 = arith.constant 0 : index
    %3 = vector.load %arg8[%c0_5, %c0_6] : memref<64x288xf32, #tpu.memory_space<vmem>>, vector<64x288xf32>
    %c0_7 = arith.constant 0 : index
    %c0_8 = arith.constant 0 : index
    %4 = vector.load %arg9[%c0_7, %c0_8] : memref<32x256xf32, #tpu.memory_space<vmem>>, vector<32x256xf32>
    %c0_9 = arith.constant 0 : index
    %c0_10 = arith.constant 0 : index
    %5 = vector.load %arg10[%c0_9, %c0_10] : memref<8x64xf32, #tpu.memory_space<vmem>>, vector<8x64xf32>
    %6 = vector.extract_strided_slice %0 {offsets = [0, 0], sizes = [16, 32], strides = [1, 1]} : vector<16x64xf32> to vector<16x32xf32>
    %7 = vector.extract_strided_slice %0 {offsets = [0, 32], sizes = [16, 32], strides = [1, 1]} : vector<16x64xf32> to vector<16x32xf32>
    %8 = arith.addf %6, %7 : vector<16x32xf32>
    %9 = vector.extract_strided_slice %3 {offsets = [0, 0], sizes = [64, 192], strides = [1, 1]} : vector<64x288xf32> to vector<64x192xf32>
    %cst = arith.constant dense<0.000000e+00> : vector<16x192xf32>
    %10 = tpu.matmul %0, %9, %cst {dimension_numbers = #tpu.dot_dimension_numbers<[1], [0], [0], [1], [0, 0, 1, 1], [], []>, precision = #tpu.contract_precision<fp32>} : vector<16x64xf32>, vector<64x192xf32>, vector<16x192xf32> -> vector<16x192xf32>
    %11 = vector.extract_strided_slice %10 {offsets = [0, 0], sizes = [4, 64], strides = [1, 1]} : vector<16x192xf32> to vector<4x64xf32>
    %12 = vector.extract_strided_slice %10 {offsets = [0, 64], sizes = [4, 64], strides = [1, 1]} : vector<16x192xf32> to vector<4x64xf32>
    %13 = vector.extract_strided_slice %10 {offsets = [0, 128], sizes = [4, 64], strides = [1, 1]} : vector<16x192xf32> to vector<4x64xf32>
    %14 = vector.extract_strided_slice %1 {offsets = [0, 0], sizes = [1, 4], strides = [1, 1]} : vector<4x4xf32> to vector<1x4xf32>
    %15 = tpu.iota {dimensions = array<i32: 0>} : vector<4x4xi32>
    %16 = tpu.iota {dimensions = array<i32: 1>} : vector<4x4xi32>
    %17 = arith.cmpi sle, %16, %15 : vector<4x4xi32>
    %cst_11 = arith.constant 5.000000e-01 : f32
    %18 = vector.broadcast %cst_11 : f32 to vector<1x4xf32>
    %19 = arith.cmpf ogt, %14, %18 : vector<1x4xf32>
    %20 = vector.broadcast %19 : vector<1x4xi1> to vector<4x4xi1>
    %21 = arith.andi %17, %20 : vector<4x4xi1>
    %cst_12 = arith.constant 0.000000e+00 : f32
    %cst_13 = arith.constant -1.000000e+09 : f32
    %22 = vector.broadcast %cst_12 : f32 to vector<4x4xf32>
    %23 = vector.broadcast %cst_13 : f32 to vector<4x4xf32>
    %24 = arith.select %21, %22, %23 : vector<4x4xi1>, vector<4x4xf32>
    %25 = vector.extract_strided_slice %11 {offsets = [0, 0], sizes = [4, 32], strides = [1, 1]} : vector<4x64xf32> to vector<4x32xf32>
    %26 = vector.extract_strided_slice %12 {offsets = [0, 0], sizes = [4, 32], strides = [1, 1]} : vector<4x64xf32> to vector<4x32xf32>
    %cst_14 = arith.constant dense<0.000000e+00> : vector<4x4xf32>
    %27 = tpu.matmul %25, %26, %cst_14 {dimension_numbers = #tpu.dot_dimension_numbers<[1], [1], [0], [0], [0, 0, 1, 0], [], []>, precision = #tpu.contract_precision<fp32>} : vector<4x32xf32>, vector<4x32xf32>, vector<4x4xf32> -> vector<4x4xf32>
    %28 = arith.addf %27, %24 : vector<4x4xf32>
    %cst_15 = arith.constant dense<0xFF800000> : vector<4xf32>
    %29 = vector.multi_reduction <maximumf>, %28, %cst_15 [1] : vector<4x4xf32> to vector<4xf32>
    %30 = vector.shape_cast %29 : vector<4xf32> to vector<4x1xf32>
    %31 = vector.broadcast %30 : vector<4x1xf32> to vector<4x4xf32>
    %32 = arith.subf %28, %31 : vector<4x4xf32>
    %33 = math.exp %32 : vector<4x4xf32>
    %cst_16 = arith.constant dense<0.000000e+00> : vector<4xf32>
    %34 = vector.multi_reduction <add>, %33, %cst_16 [1] : vector<4x4xf32> to vector<4xf32>
    %35 = vector.shape_cast %34 : vector<4xf32> to vector<4x1xf32>
    %36 = vector.broadcast %35 : vector<4x1xf32> to vector<4x4xf32>
    %37 = arith.divf %33, %36 : vector<4x4xf32>
    %38 = vector.extract_strided_slice %13 {offsets = [0, 0], sizes = [4, 32], strides = [1, 1]} : vector<4x64xf32> to vector<4x32xf32>
    %cst_17 = arith.constant dense<0.000000e+00> : vector<4x32xf32>
    %39 = tpu.matmul %37, %38, %cst_17 {dimension_numbers = #tpu.dot_dimension_numbers<[1], [0], [0], [1], [0, 0, 1, 1], [], []>, precision = #tpu.contract_precision<fp32>} : vector<4x4xf32>, vector<4x32xf32>, vector<4x32xf32> -> vector<4x32xf32>
    %40 = vector.extract_strided_slice %11 {offsets = [0, 32], sizes = [4, 32], strides = [1, 1]} : vector<4x64xf32> to vector<4x32xf32>
    %41 = vector.extract_strided_slice %12 {offsets = [0, 32], sizes = [4, 32], strides = [1, 1]} : vector<4x64xf32> to vector<4x32xf32>
    %cst_18 = arith.constant dense<0.000000e+00> : vector<4x4xf32>
    %42 = tpu.matmul %40, %41, %cst_18 {dimension_numbers = #tpu.dot_dimension_numbers<[1], [1], [0], [0], [0, 0, 1, 0], [], []>, precision = #tpu.contract_precision<fp32>} : vector<4x32xf32>, vector<4x32xf32>, vector<4x4xf32> -> vector<4x4xf32>
    %43 = arith.addf %42, %24 : vector<4x4xf32>
    %cst_19 = arith.constant dense<0xFF800000> : vector<4xf32>
    %44 = vector.multi_reduction <maximumf>, %43, %cst_19 [1] : vector<4x4xf32> to vector<4xf32>
    %45 = vector.shape_cast %44 : vector<4xf32> to vector<4x1xf32>
    %46 = vector.broadcast %45 : vector<4x1xf32> to vector<4x4xf32>
    %47 = arith.subf %43, %46 : vector<4x4xf32>
    %48 = math.exp %47 : vector<4x4xf32>
    %cst_20 = arith.constant dense<0.000000e+00> : vector<4xf32>
    %49 = vector.multi_reduction <add>, %48, %cst_20 [1] : vector<4x4xf32> to vector<4xf32>
    %50 = vector.shape_cast %49 : vector<4xf32> to vector<4x1xf32>
    %51 = vector.broadcast %50 : vector<4x1xf32> to vector<4x4xf32>
    %52 = arith.divf %48, %51 : vector<4x4xf32>
    %53 = vector.extract_strided_slice %13 {offsets = [0, 32], sizes = [4, 32], strides = [1, 1]} : vector<4x64xf32> to vector<4x32xf32>
    %cst_21 = arith.constant dense<0.000000e+00> : vector<4x32xf32>
    %54 = tpu.matmul %52, %53, %cst_21 {dimension_numbers = #tpu.dot_dimension_numbers<[1], [0], [0], [1], [0, 0, 1, 1], [], []>, precision = #tpu.contract_precision<fp32>} : vector<4x4xf32>, vector<4x32xf32>, vector<4x32xf32> -> vector<4x32xf32>
    %55 = tpu.concatenate %39, %54 in 1 : vector<4x32xf32>, vector<4x32xf32> -> vector<4x64xf32>
    %56 = vector.extract_strided_slice %10 {offsets = [4, 0], sizes = [4, 64], strides = [1, 1]} : vector<16x192xf32> to vector<4x64xf32>
    %57 = vector.extract_strided_slice %10 {offsets = [4, 64], sizes = [4, 64], strides = [1, 1]} : vector<16x192xf32> to vector<4x64xf32>
    %58 = vector.extract_strided_slice %10 {offsets = [4, 128], sizes = [4, 64], strides = [1, 1]} : vector<16x192xf32> to vector<4x64xf32>
    %59 = vector.extract_strided_slice %1 {offsets = [1, 0], sizes = [1, 4], strides = [1, 1]} : vector<4x4xf32> to vector<1x4xf32>
    %60 = tpu.iota {dimensions = array<i32: 0>} : vector<4x4xi32>
    %61 = tpu.iota {dimensions = array<i32: 1>} : vector<4x4xi32>
    %62 = arith.cmpi sle, %61, %60 : vector<4x4xi32>
    %cst_22 = arith.constant 5.000000e-01 : f32
    %63 = vector.broadcast %cst_22 : f32 to vector<1x4xf32>
    %64 = arith.cmpf ogt, %59, %63 : vector<1x4xf32>
    %65 = vector.broadcast %64 : vector<1x4xi1> to vector<4x4xi1>
    %66 = arith.andi %62, %65 : vector<4x4xi1>
    %cst_23 = arith.constant 0.000000e+00 : f32
    %cst_24 = arith.constant -1.000000e+09 : f32
    %67 = vector.broadcast %cst_23 : f32 to vector<4x4xf32>
    %68 = vector.broadcast %cst_24 : f32 to vector<4x4xf32>
    %69 = arith.select %66, %67, %68 : vector<4x4xi1>, vector<4x4xf32>
    %70 = vector.extract_strided_slice %56 {offsets = [0, 0], sizes = [4, 32], strides = [1, 1]} : vector<4x64xf32> to vector<4x32xf32>
    %71 = vector.extract_strided_slice %57 {offsets = [0, 0], sizes = [4, 32], strides = [1, 1]} : vector<4x64xf32> to vector<4x32xf32>
    %cst_25 = arith.constant dense<0.000000e+00> : vector<4x4xf32>
    %72 = tpu.matmul %70, %71, %cst_25 {dimension_numbers = #tpu.dot_dimension_numbers<[1], [1], [0], [0], [0, 0, 1, 0], [], []>, precision = #tpu.contract_precision<fp32>} : vector<4x32xf32>, vector<4x32xf32>, vector<4x4xf32> -> vector<4x4xf32>
    %73 = arith.addf %72, %69 : vector<4x4xf32>
    %cst_26 = arith.constant dense<0xFF800000> : vector<4xf32>
    %74 = vector.multi_reduction <maximumf>, %73, %cst_26 [1] : vector<4x4xf32> to vector<4xf32>
    %75 = vector.shape_cast %74 : vector<4xf32> to vector<4x1xf32>
    %76 = vector.broadcast %75 : vector<4x1xf32> to vector<4x4xf32>
    %77 = arith.subf %73, %76 : vector<4x4xf32>
    %78 = math.exp %77 : vector<4x4xf32>
    %cst_27 = arith.constant dense<0.000000e+00> : vector<4xf32>
    %79 = vector.multi_reduction <add>, %78, %cst_27 [1] : vector<4x4xf32> to vector<4xf32>
    %80 = vector.shape_cast %79 : vector<4xf32> to vector<4x1xf32>
    %81 = vector.broadcast %80 : vector<4x1xf32> to vector<4x4xf32>
    %82 = arith.divf %78, %81 : vector<4x4xf32>
    %83 = vector.extract_strided_slice %58 {offsets = [0, 0], sizes = [4, 32], strides = [1, 1]} : vector<4x64xf32> to vector<4x32xf32>
    %cst_28 = arith.constant dense<0.000000e+00> : vector<4x32xf32>
    %84 = tpu.matmul %82, %83, %cst_28 {dimension_numbers = #tpu.dot_dimension_numbers<[1], [0], [0], [1], [0, 0, 1, 1], [], []>, precision = #tpu.contract_precision<fp32>} : vector<4x4xf32>, vector<4x32xf32>, vector<4x32xf32> -> vector<4x32xf32>
    %85 = vector.extract_strided_slice %56 {offsets = [0, 32], sizes = [4, 32], strides = [1, 1]} : vector<4x64xf32> to vector<4x32xf32>
    %86 = vector.extract_strided_slice %57 {offsets = [0, 32], sizes = [4, 32], strides = [1, 1]} : vector<4x64xf32> to vector<4x32xf32>
    %cst_29 = arith.constant dense<0.000000e+00> : vector<4x4xf32>
    %87 = tpu.matmul %85, %86, %cst_29 {dimension_numbers = #tpu.dot_dimension_numbers<[1], [1], [0], [0], [0, 0, 1, 0], [], []>, precision = #tpu.contract_precision<fp32>} : vector<4x32xf32>, vector<4x32xf32>, vector<4x4xf32> -> vector<4x4xf32>
    %88 = arith.addf %87, %69 : vector<4x4xf32>
    %cst_30 = arith.constant dense<0xFF800000> : vector<4xf32>
    %89 = vector.multi_reduction <maximumf>, %88, %cst_30 [1] : vector<4x4xf32> to vector<4xf32>
    %90 = vector.shape_cast %89 : vector<4xf32> to vector<4x1xf32>
    %91 = vector.broadcast %90 : vector<4x1xf32> to vector<4x4xf32>
    %92 = arith.subf %88, %91 : vector<4x4xf32>
    %93 = math.exp %92 : vector<4x4xf32>
    %cst_31 = arith.constant dense<0.000000e+00> : vector<4xf32>
    %94 = vector.multi_reduction <add>, %93, %cst_31 [1] : vector<4x4xf32> to vector<4xf32>
    %95 = vector.shape_cast %94 : vector<4xf32> to vector<4x1xf32>
    %96 = vector.broadcast %95 : vector<4x1xf32> to vector<4x4xf32>
    %97 = arith.divf %93, %96 : vector<4x4xf32>
    %98 = vector.extract_strided_slice %58 {offsets = [0, 32], sizes = [4, 32], strides = [1, 1]} : vector<4x64xf32> to vector<4x32xf32>
    %cst_32 = arith.constant dense<0.000000e+00> : vector<4x32xf32>
    %99 = tpu.matmul %97, %98, %cst_32 {dimension_numbers = #tpu.dot_dimension_numbers<[1], [0], [0], [1], [0, 0, 1, 1], [], []>, precision = #tpu.contract_precision<fp32>} : vector<4x4xf32>, vector<4x32xf32>, vector<4x32xf32> -> vector<4x32xf32>
    %100 = tpu.concatenate %84, %99 in 1 : vector<4x32xf32>, vector<4x32xf32> -> vector<4x64xf32>
    %101 = vector.extract_strided_slice %10 {offsets = [8, 0], sizes = [4, 64], strides = [1, 1]} : vector<16x192xf32> to vector<4x64xf32>
    %102 = vector.extract_strided_slice %10 {offsets = [8, 64], sizes = [4, 64], strides = [1, 1]} : vector<16x192xf32> to vector<4x64xf32>
    %103 = vector.extract_strided_slice %10 {offsets = [8, 128], sizes = [4, 64], strides = [1, 1]} : vector<16x192xf32> to vector<4x64xf32>
    %104 = vector.extract_strided_slice %1 {offsets = [2, 0], sizes = [1, 4], strides = [1, 1]} : vector<4x4xf32> to vector<1x4xf32>
    %105 = tpu.iota {dimensions = array<i32: 0>} : vector<4x4xi32>
    %106 = tpu.iota {dimensions = array<i32: 1>} : vector<4x4xi32>
    %107 = arith.cmpi sle, %106, %105 : vector<4x4xi32>
    %cst_33 = arith.constant 5.000000e-01 : f32
    %108 = vector.broadcast %cst_33 : f32 to vector<1x4xf32>
    %109 = arith.cmpf ogt, %104, %108 : vector<1x4xf32>
    %110 = vector.broadcast %109 : vector<1x4xi1> to vector<4x4xi1>
    %111 = arith.andi %107, %110 : vector<4x4xi1>
    %cst_34 = arith.constant 0.000000e+00 : f32
    %cst_35 = arith.constant -1.000000e+09 : f32
    %112 = vector.broadcast %cst_34 : f32 to vector<4x4xf32>
    %113 = vector.broadcast %cst_35 : f32 to vector<4x4xf32>
    %114 = arith.select %111, %112, %113 : vector<4x4xi1>, vector<4x4xf32>
    %115 = vector.extract_strided_slice %101 {offsets = [0, 0], sizes = [4, 32], strides = [1, 1]} : vector<4x64xf32> to vector<4x32xf32>
    %116 = vector.extract_strided_slice %102 {offsets = [0, 0], sizes = [4, 32], strides = [1, 1]} : vector<4x64xf32> to vector<4x32xf32>
    %cst_36 = arith.constant dense<0.000000e+00> : vector<4x4xf32>
    %117 = tpu.matmul %115, %116, %cst_36 {dimension_numbers = #tpu.dot_dimension_numbers<[1], [1], [0], [0], [0, 0, 1, 0], [], []>, precision = #tpu.contract_precision<fp32>} : vector<4x32xf32>, vector<4x32xf32>, vector<4x4xf32> -> vector<4x4xf32>
    %118 = arith.addf %117, %114 : vector<4x4xf32>
    %cst_37 = arith.constant dense<0xFF800000> : vector<4xf32>
    %119 = vector.multi_reduction <maximumf>, %118, %cst_37 [1] : vector<4x4xf32> to vector<4xf32>
    %120 = vector.shape_cast %119 : vector<4xf32> to vector<4x1xf32>
    %121 = vector.broadcast %120 : vector<4x1xf32> to vector<4x4xf32>
    %122 = arith.subf %118, %121 : vector<4x4xf32>
    %123 = math.exp %122 : vector<4x4xf32>
    %cst_38 = arith.constant dense<0.000000e+00> : vector<4xf32>
    %124 = vector.multi_reduction <add>, %123, %cst_38 [1] : vector<4x4xf32> to vector<4xf32>
    %125 = vector.shape_cast %124 : vector<4xf32> to vector<4x1xf32>
    %126 = vector.broadcast %125 : vector<4x1xf32> to vector<4x4xf32>
    %127 = arith.divf %123, %126 : vector<4x4xf32>
    %128 = vector.extract_strided_slice %103 {offsets = [0, 0], sizes = [4, 32], strides = [1, 1]} : vector<4x64xf32> to vector<4x32xf32>
    %cst_39 = arith.constant dense<0.000000e+00> : vector<4x32xf32>
    %129 = tpu.matmul %127, %128, %cst_39 {dimension_numbers = #tpu.dot_dimension_numbers<[1], [0], [0], [1], [0, 0, 1, 1], [], []>, precision = #tpu.contract_precision<fp32>} : vector<4x4xf32>, vector<4x32xf32>, vector<4x32xf32> -> vector<4x32xf32>
    %130 = vector.extract_strided_slice %101 {offsets = [0, 32], sizes = [4, 32], strides = [1, 1]} : vector<4x64xf32> to vector<4x32xf32>
    %131 = vector.extract_strided_slice %102 {offsets = [0, 32], sizes = [4, 32], strides = [1, 1]} : vector<4x64xf32> to vector<4x32xf32>
    %cst_40 = arith.constant dense<0.000000e+00> : vector<4x4xf32>
    %132 = tpu.matmul %130, %131, %cst_40 {dimension_numbers = #tpu.dot_dimension_numbers<[1], [1], [0], [0], [0, 0, 1, 0], [], []>, precision = #tpu.contract_precision<fp32>} : vector<4x32xf32>, vector<4x32xf32>, vector<4x4xf32> -> vector<4x4xf32>
    %133 = arith.addf %132, %114 : vector<4x4xf32>
    %cst_41 = arith.constant dense<0xFF800000> : vector<4xf32>
    %134 = vector.multi_reduction <maximumf>, %133, %cst_41 [1] : vector<4x4xf32> to vector<4xf32>
    %135 = vector.shape_cast %134 : vector<4xf32> to vector<4x1xf32>
    %136 = vector.broadcast %135 : vector<4x1xf32> to vector<4x4xf32>
    %137 = arith.subf %133, %136 : vector<4x4xf32>
    %138 = math.exp %137 : vector<4x4xf32>
    %cst_42 = arith.constant dense<0.000000e+00> : vector<4xf32>
    %139 = vector.multi_reduction <add>, %138, %cst_42 [1] : vector<4x4xf32> to vector<4xf32>
    %140 = vector.shape_cast %139 : vector<4xf32> to vector<4x1xf32>
    %141 = vector.broadcast %140 : vector<4x1xf32> to vector<4x4xf32>
    %142 = arith.divf %138, %141 : vector<4x4xf32>
    %143 = vector.extract_strided_slice %103 {offsets = [0, 32], sizes = [4, 32], strides = [1, 1]} : vector<4x64xf32> to vector<4x32xf32>
    %cst_43 = arith.constant dense<0.000000e+00> : vector<4x32xf32>
    %144 = tpu.matmul %142, %143, %cst_43 {dimension_numbers = #tpu.dot_dimension_numbers<[1], [0], [0], [1], [0, 0, 1, 1], [], []>, precision = #tpu.contract_precision<fp32>} : vector<4x4xf32>, vector<4x32xf32>, vector<4x32xf32> -> vector<4x32xf32>
    %145 = tpu.concatenate %129, %144 in 1 : vector<4x32xf32>, vector<4x32xf32> -> vector<4x64xf32>
    %146 = vector.extract_strided_slice %10 {offsets = [12, 0], sizes = [4, 64], strides = [1, 1]} : vector<16x192xf32> to vector<4x64xf32>
    %147 = vector.extract_strided_slice %10 {offsets = [12, 64], sizes = [4, 64], strides = [1, 1]} : vector<16x192xf32> to vector<4x64xf32>
    %148 = vector.extract_strided_slice %10 {offsets = [12, 128], sizes = [4, 64], strides = [1, 1]} : vector<16x192xf32> to vector<4x64xf32>
    %149 = vector.extract_strided_slice %1 {offsets = [3, 0], sizes = [1, 4], strides = [1, 1]} : vector<4x4xf32> to vector<1x4xf32>
    %150 = tpu.iota {dimensions = array<i32: 0>} : vector<4x4xi32>
    %151 = tpu.iota {dimensions = array<i32: 1>} : vector<4x4xi32>
    %152 = arith.cmpi sle, %151, %150 : vector<4x4xi32>
    %cst_44 = arith.constant 5.000000e-01 : f32
    %153 = vector.broadcast %cst_44 : f32 to vector<1x4xf32>
    %154 = arith.cmpf ogt, %149, %153 : vector<1x4xf32>
    %155 = vector.broadcast %154 : vector<1x4xi1> to vector<4x4xi1>
    %156 = arith.andi %152, %155 : vector<4x4xi1>
    %cst_45 = arith.constant 0.000000e+00 : f32
    %cst_46 = arith.constant -1.000000e+09 : f32
    %157 = vector.broadcast %cst_45 : f32 to vector<4x4xf32>
    %158 = vector.broadcast %cst_46 : f32 to vector<4x4xf32>
    %159 = arith.select %156, %157, %158 : vector<4x4xi1>, vector<4x4xf32>
    %160 = vector.extract_strided_slice %146 {offsets = [0, 0], sizes = [4, 32], strides = [1, 1]} : vector<4x64xf32> to vector<4x32xf32>
    %161 = vector.extract_strided_slice %147 {offsets = [0, 0], sizes = [4, 32], strides = [1, 1]} : vector<4x64xf32> to vector<4x32xf32>
    %cst_47 = arith.constant dense<0.000000e+00> : vector<4x4xf32>
    %162 = tpu.matmul %160, %161, %cst_47 {dimension_numbers = #tpu.dot_dimension_numbers<[1], [1], [0], [0], [0, 0, 1, 0], [], []>, precision = #tpu.contract_precision<fp32>} : vector<4x32xf32>, vector<4x32xf32>, vector<4x4xf32> -> vector<4x4xf32>
    %163 = arith.addf %162, %159 : vector<4x4xf32>
    %cst_48 = arith.constant dense<0xFF800000> : vector<4xf32>
    %164 = vector.multi_reduction <maximumf>, %163, %cst_48 [1] : vector<4x4xf32> to vector<4xf32>
    %165 = vector.shape_cast %164 : vector<4xf32> to vector<4x1xf32>
    %166 = vector.broadcast %165 : vector<4x1xf32> to vector<4x4xf32>
    %167 = arith.subf %163, %166 : vector<4x4xf32>
    %168 = math.exp %167 : vector<4x4xf32>
    %cst_49 = arith.constant dense<0.000000e+00> : vector<4xf32>
    %169 = vector.multi_reduction <add>, %168, %cst_49 [1] : vector<4x4xf32> to vector<4xf32>
    %170 = vector.shape_cast %169 : vector<4xf32> to vector<4x1xf32>
    %171 = vector.broadcast %170 : vector<4x1xf32> to vector<4x4xf32>
    %172 = arith.divf %168, %171 : vector<4x4xf32>
    %173 = vector.extract_strided_slice %148 {offsets = [0, 0], sizes = [4, 32], strides = [1, 1]} : vector<4x64xf32> to vector<4x32xf32>
    %cst_50 = arith.constant dense<0.000000e+00> : vector<4x32xf32>
    %174 = tpu.matmul %172, %173, %cst_50 {dimension_numbers = #tpu.dot_dimension_numbers<[1], [0], [0], [1], [0, 0, 1, 1], [], []>, precision = #tpu.contract_precision<fp32>} : vector<4x4xf32>, vector<4x32xf32>, vector<4x32xf32> -> vector<4x32xf32>
    %175 = vector.extract_strided_slice %146 {offsets = [0, 32], sizes = [4, 32], strides = [1, 1]} : vector<4x64xf32> to vector<4x32xf32>
    %176 = vector.extract_strided_slice %147 {offsets = [0, 32], sizes = [4, 32], strides = [1, 1]} : vector<4x64xf32> to vector<4x32xf32>
    %cst_51 = arith.constant dense<0.000000e+00> : vector<4x4xf32>
    %177 = tpu.matmul %175, %176, %cst_51 {dimension_numbers = #tpu.dot_dimension_numbers<[1], [1], [0], [0], [0, 0, 1, 0], [], []>, precision = #tpu.contract_precision<fp32>} : vector<4x32xf32>, vector<4x32xf32>, vector<4x4xf32> -> vector<4x4xf32>
    %178 = arith.addf %177, %159 : vector<4x4xf32>
    %cst_52 = arith.constant dense<0xFF800000> : vector<4xf32>
    %179 = vector.multi_reduction <maximumf>, %178, %cst_52 [1] : vector<4x4xf32> to vector<4xf32>
    %180 = vector.shape_cast %179 : vector<4xf32> to vector<4x1xf32>
    %181 = vector.broadcast %180 : vector<4x1xf32> to vector<4x4xf32>
    %182 = arith.subf %178, %181 : vector<4x4xf32>
    %183 = math.exp %182 : vector<4x4xf32>
    %cst_53 = arith.constant dense<0.000000e+00> : vector<4xf32>
    %184 = vector.multi_reduction <add>, %183, %cst_53 [1] : vector<4x4xf32> to vector<4xf32>
    %185 = vector.shape_cast %184 : vector<4xf32> to vector<4x1xf32>
    %186 = vector.broadcast %185 : vector<4x1xf32> to vector<4x4xf32>
    %187 = arith.divf %183, %186 : vector<4x4xf32>
    %188 = vector.extract_strided_slice %148 {offsets = [0, 32], sizes = [4, 32], strides = [1, 1]} : vector<4x64xf32> to vector<4x32xf32>
    %cst_54 = arith.constant dense<0.000000e+00> : vector<4x32xf32>
    %189 = tpu.matmul %187, %188, %cst_54 {dimension_numbers = #tpu.dot_dimension_numbers<[1], [0], [0], [1], [0, 0, 1, 1], [], []>, precision = #tpu.contract_precision<fp32>} : vector<4x4xf32>, vector<4x32xf32>, vector<4x32xf32> -> vector<4x32xf32>
    %190 = tpu.concatenate %174, %189 in 1 : vector<4x32xf32>, vector<4x32xf32> -> vector<4x64xf32>
    %191 = tpu.concatenate %55, %100, %145, %190 in 0 : vector<4x64xf32>, vector<4x64xf32>, vector<4x64xf32>, vector<4x64xf32> -> vector<16x64xf32>
    %192 = vector.extract_strided_slice %3 {offsets = [0, 192], sizes = [64, 32], strides = [1, 1]} : vector<64x288xf32> to vector<64x32xf32>
    %cst_55 = arith.constant dense<0.000000e+00> : vector<16x32xf32>
    %193 = tpu.matmul %191, %192, %cst_55 {dimension_numbers = #tpu.dot_dimension_numbers<[1], [0], [0], [1], [0, 0, 1, 1], [], []>, precision = #tpu.contract_precision<fp32>} : vector<16x64xf32>, vector<64x32xf32>, vector<16x32xf32> -> vector<16x32xf32>
    %194 = arith.addf %193, %8 : vector<16x32xf32>
    %195 = vector.extract_strided_slice %5 {offsets = [0, 0], sizes = [1, 32], strides = [1, 1]} : vector<8x64xf32> to vector<1x32xf32>
    %196 = vector.extract_strided_slice %5 {offsets = [1, 0], sizes = [1, 32], strides = [1, 1]} : vector<8x64xf32> to vector<1x32xf32>
    %cst_56 = arith.constant dense<0.000000e+00> : vector<16xf32>
    %197 = vector.multi_reduction <add>, %194, %cst_56 [1] : vector<16x32xf32> to vector<16xf32>
    %198 = vector.shape_cast %197 : vector<16xf32> to vector<16x1xf32>
    %cst_57 = arith.constant 3.200000e+01 : f32
    %199 = vector.broadcast %cst_57 : f32 to vector<16x1xf32>
    %200 = arith.divf %198, %199 : vector<16x1xf32>
    %201 = arith.mulf %194, %194 : vector<16x32xf32>
    %cst_58 = arith.constant dense<0.000000e+00> : vector<16xf32>
    %202 = vector.multi_reduction <add>, %201, %cst_58 [1] : vector<16x32xf32> to vector<16xf32>
    %203 = vector.shape_cast %202 : vector<16xf32> to vector<16x1xf32>
    %cst_59 = arith.constant 3.200000e+01 : f32
    %204 = vector.broadcast %cst_59 : f32 to vector<16x1xf32>
    %205 = arith.divf %203, %204 : vector<16x1xf32>
    %206 = vector.broadcast %200 : vector<16x1xf32> to vector<16x32xf32>
    %207 = arith.subf %194, %206 : vector<16x32xf32>
    %208 = arith.mulf %200, %200 : vector<16x1xf32>
    %209 = arith.subf %205, %208 : vector<16x1xf32>
    %cst_60 = arith.constant 9.99999997E-7 : f32
    %210 = vector.broadcast %cst_60 : f32 to vector<16x1xf32>
    %211 = arith.addf %209, %210 : vector<16x1xf32>
    %212 = math.rsqrt %211 : vector<16x1xf32>
    %213 = vector.broadcast %212 : vector<16x1xf32> to vector<16x32xf32>
    %214 = arith.mulf %207, %213 : vector<16x32xf32>
    %215 = vector.broadcast %195 : vector<1x32xf32> to vector<16x32xf32>
    %216 = arith.mulf %214, %215 : vector<16x32xf32>
    %217 = vector.broadcast %196 : vector<1x32xf32> to vector<16x32xf32>
    %218 = arith.addf %216, %217 : vector<16x32xf32>
    %219 = vector.extract_strided_slice %4 {offsets = [0, 0], sizes = [32, 64], strides = [1, 1]} : vector<32x256xf32> to vector<32x64xf32>
    %cst_61 = arith.constant dense<0.000000e+00> : vector<16x64xf32>
    %220 = tpu.matmul %218, %219, %cst_61 {dimension_numbers = #tpu.dot_dimension_numbers<[1], [0], [0], [1], [0, 0, 1, 1], [], []>, precision = #tpu.contract_precision<fp32>} : vector<16x32xf32>, vector<32x64xf32>, vector<16x64xf32> -> vector<16x64xf32>
    %221 = vector.extract_strided_slice %4 {offsets = [0, 64], sizes = [32, 128], strides = [1, 1]} : vector<32x256xf32> to vector<32x128xf32>
    %cst_62 = arith.constant dense<0.000000e+00> : vector<8x128xf32>
    %222 = tpu.matmul %2, %221, %cst_62 {dimension_numbers = #tpu.dot_dimension_numbers<[1], [0], [0], [1], [0, 0, 1, 1], [], []>, precision = #tpu.contract_precision<fp32>} : vector<8x32xf32>, vector<32x128xf32>, vector<8x128xf32> -> vector<8x128xf32>
    %223 = vector.extract_strided_slice %220 {offsets = [0, 0], sizes = [4, 64], strides = [1, 1]} : vector<16x64xf32> to vector<4x64xf32>
    %224 = vector.extract_strided_slice %222 {offsets = [0, 0], sizes = [2, 64], strides = [1, 1]} : vector<8x128xf32> to vector<2x64xf32>
    %225 = vector.extract_strided_slice %222 {offsets = [0, 64], sizes = [2, 64], strides = [1, 1]} : vector<8x128xf32> to vector<2x64xf32>
    %226 = vector.extract_strided_slice %223 {offsets = [0, 0], sizes = [4, 32], strides = [1, 1]} : vector<4x64xf32> to vector<4x32xf32>
    %227 = vector.extract_strided_slice %224 {offsets = [0, 0], sizes = [2, 32], strides = [1, 1]} : vector<2x64xf32> to vector<2x32xf32>
    %cst_63 = arith.constant dense<0.000000e+00> : vector<4x2xf32>
    %228 = tpu.matmul %226, %227, %cst_63 {dimension_numbers = #tpu.dot_dimension_numbers<[1], [1], [0], [0], [0, 0, 1, 0], [], []>, precision = #tpu.contract_precision<fp32>} : vector<4x32xf32>, vector<2x32xf32>, vector<4x2xf32> -> vector<4x2xf32>
    %cst_64 = arith.constant dense<0xFF800000> : vector<4xf32>
    %229 = vector.multi_reduction <maximumf>, %228, %cst_64 [1] : vector<4x2xf32> to vector<4xf32>
    %230 = vector.shape_cast %229 : vector<4xf32> to vector<4x1xf32>
    %231 = vector.broadcast %230 : vector<4x1xf32> to vector<4x2xf32>
    %232 = arith.subf %228, %231 : vector<4x2xf32>
    %233 = math.exp %232 : vector<4x2xf32>
    %cst_65 = arith.constant dense<0.000000e+00> : vector<4xf32>
    %234 = vector.multi_reduction <add>, %233, %cst_65 [1] : vector<4x2xf32> to vector<4xf32>
    %235 = vector.shape_cast %234 : vector<4xf32> to vector<4x1xf32>
    %236 = vector.broadcast %235 : vector<4x1xf32> to vector<4x2xf32>
    %237 = arith.divf %233, %236 : vector<4x2xf32>
    %238 = vector.extract_strided_slice %225 {offsets = [0, 0], sizes = [2, 32], strides = [1, 1]} : vector<2x64xf32> to vector<2x32xf32>
    %cst_66 = arith.constant dense<0.000000e+00> : vector<4x32xf32>
    %239 = tpu.matmul %237, %238, %cst_66 {dimension_numbers = #tpu.dot_dimension_numbers<[1], [0], [0], [1], [0, 0, 1, 1], [], []>, precision = #tpu.contract_precision<fp32>} : vector<4x2xf32>, vector<2x32xf32>, vector<4x32xf32> -> vector<4x32xf32>
    %240 = vector.extract_strided_slice %223 {offsets = [0, 32], sizes = [4, 32], strides = [1, 1]} : vector<4x64xf32> to vector<4x32xf32>
    %241 = vector.extract_strided_slice %224 {offsets = [0, 32], sizes = [2, 32], strides = [1, 1]} : vector<2x64xf32> to vector<2x32xf32>
    %cst_67 = arith.constant dense<0.000000e+00> : vector<4x2xf32>
    %242 = tpu.matmul %240, %241, %cst_67 {dimension_numbers = #tpu.dot_dimension_numbers<[1], [1], [0], [0], [0, 0, 1, 0], [], []>, precision = #tpu.contract_precision<fp32>} : vector<4x32xf32>, vector<2x32xf32>, vector<4x2xf32> -> vector<4x2xf32>
    %cst_68 = arith.constant dense<0xFF800000> : vector<4xf32>
    %243 = vector.multi_reduction <maximumf>, %242, %cst_68 [1] : vector<4x2xf32> to vector<4xf32>
    %244 = vector.shape_cast %243 : vector<4xf32> to vector<4x1xf32>
    %245 = vector.broadcast %244 : vector<4x1xf32> to vector<4x2xf32>
    %246 = arith.subf %242, %245 : vector<4x2xf32>
    %247 = math.exp %246 : vector<4x2xf32>
    %cst_69 = arith.constant dense<0.000000e+00> : vector<4xf32>
    %248 = vector.multi_reduction <add>, %247, %cst_69 [1] : vector<4x2xf32> to vector<4xf32>
    %249 = vector.shape_cast %248 : vector<4xf32> to vector<4x1xf32>
    %250 = vector.broadcast %249 : vector<4x1xf32> to vector<4x2xf32>
    %251 = arith.divf %247, %250 : vector<4x2xf32>
    %252 = vector.extract_strided_slice %225 {offsets = [0, 32], sizes = [2, 32], strides = [1, 1]} : vector<2x64xf32> to vector<2x32xf32>
    %cst_70 = arith.constant dense<0.000000e+00> : vector<4x32xf32>
    %253 = tpu.matmul %251, %252, %cst_70 {dimension_numbers = #tpu.dot_dimension_numbers<[1], [0], [0], [1], [0, 0, 1, 1], [], []>, precision = #tpu.contract_precision<fp32>} : vector<4x2xf32>, vector<2x32xf32>, vector<4x32xf32> -> vector<4x32xf32>
    %254 = tpu.concatenate %239, %253 in 1 : vector<4x32xf32>, vector<4x32xf32> -> vector<4x64xf32>
    %255 = vector.extract_strided_slice %220 {offsets = [4, 0], sizes = [4, 64], strides = [1, 1]} : vector<16x64xf32> to vector<4x64xf32>
    %256 = vector.extract_strided_slice %222 {offsets = [2, 0], sizes = [2, 64], strides = [1, 1]} : vector<8x128xf32> to vector<2x64xf32>
    %257 = vector.extract_strided_slice %222 {offsets = [2, 64], sizes = [2, 64], strides = [1, 1]} : vector<8x128xf32> to vector<2x64xf32>
    %258 = vector.extract_strided_slice %255 {offsets = [0, 0], sizes = [4, 32], strides = [1, 1]} : vector<4x64xf32> to vector<4x32xf32>
    %259 = vector.extract_strided_slice %256 {offsets = [0, 0], sizes = [2, 32], strides = [1, 1]} : vector<2x64xf32> to vector<2x32xf32>
    %cst_71 = arith.constant dense<0.000000e+00> : vector<4x2xf32>
    %260 = tpu.matmul %258, %259, %cst_71 {dimension_numbers = #tpu.dot_dimension_numbers<[1], [1], [0], [0], [0, 0, 1, 0], [], []>, precision = #tpu.contract_precision<fp32>} : vector<4x32xf32>, vector<2x32xf32>, vector<4x2xf32> -> vector<4x2xf32>
    %cst_72 = arith.constant dense<0xFF800000> : vector<4xf32>
    %261 = vector.multi_reduction <maximumf>, %260, %cst_72 [1] : vector<4x2xf32> to vector<4xf32>
    %262 = vector.shape_cast %261 : vector<4xf32> to vector<4x1xf32>
    %263 = vector.broadcast %262 : vector<4x1xf32> to vector<4x2xf32>
    %264 = arith.subf %260, %263 : vector<4x2xf32>
    %265 = math.exp %264 : vector<4x2xf32>
    %cst_73 = arith.constant dense<0.000000e+00> : vector<4xf32>
    %266 = vector.multi_reduction <add>, %265, %cst_73 [1] : vector<4x2xf32> to vector<4xf32>
    %267 = vector.shape_cast %266 : vector<4xf32> to vector<4x1xf32>
    %268 = vector.broadcast %267 : vector<4x1xf32> to vector<4x2xf32>
    %269 = arith.divf %265, %268 : vector<4x2xf32>
    %270 = vector.extract_strided_slice %257 {offsets = [0, 0], sizes = [2, 32], strides = [1, 1]} : vector<2x64xf32> to vector<2x32xf32>
    %cst_74 = arith.constant dense<0.000000e+00> : vector<4x32xf32>
    %271 = tpu.matmul %269, %270, %cst_74 {dimension_numbers = #tpu.dot_dimension_numbers<[1], [0], [0], [1], [0, 0, 1, 1], [], []>, precision = #tpu.contract_precision<fp32>} : vector<4x2xf32>, vector<2x32xf32>, vector<4x32xf32> -> vector<4x32xf32>
    %272 = vector.extract_strided_slice %255 {offsets = [0, 32], sizes = [4, 32], strides = [1, 1]} : vector<4x64xf32> to vector<4x32xf32>
    %273 = vector.extract_strided_slice %256 {offsets = [0, 32], sizes = [2, 32], strides = [1, 1]} : vector<2x64xf32> to vector<2x32xf32>
    %cst_75 = arith.constant dense<0.000000e+00> : vector<4x2xf32>
    %274 = tpu.matmul %272, %273, %cst_75 {dimension_numbers = #tpu.dot_dimension_numbers<[1], [1], [0], [0], [0, 0, 1, 0], [], []>, precision = #tpu.contract_precision<fp32>} : vector<4x32xf32>, vector<2x32xf32>, vector<4x2xf32> -> vector<4x2xf32>
    %cst_76 = arith.constant dense<0xFF800000> : vector<4xf32>
    %275 = vector.multi_reduction <maximumf>, %274, %cst_76 [1] : vector<4x2xf32> to vector<4xf32>
    %276 = vector.shape_cast %275 : vector<4xf32> to vector<4x1xf32>
    %277 = vector.broadcast %276 : vector<4x1xf32> to vector<4x2xf32>
    %278 = arith.subf %274, %277 : vector<4x2xf32>
    %279 = math.exp %278 : vector<4x2xf32>
    %cst_77 = arith.constant dense<0.000000e+00> : vector<4xf32>
    %280 = vector.multi_reduction <add>, %279, %cst_77 [1] : vector<4x2xf32> to vector<4xf32>
    %281 = vector.shape_cast %280 : vector<4xf32> to vector<4x1xf32>
    %282 = vector.broadcast %281 : vector<4x1xf32> to vector<4x2xf32>
    %283 = arith.divf %279, %282 : vector<4x2xf32>
    %284 = vector.extract_strided_slice %257 {offsets = [0, 32], sizes = [2, 32], strides = [1, 1]} : vector<2x64xf32> to vector<2x32xf32>
    %cst_78 = arith.constant dense<0.000000e+00> : vector<4x32xf32>
    %285 = tpu.matmul %283, %284, %cst_78 {dimension_numbers = #tpu.dot_dimension_numbers<[1], [0], [0], [1], [0, 0, 1, 1], [], []>, precision = #tpu.contract_precision<fp32>} : vector<4x2xf32>, vector<2x32xf32>, vector<4x32xf32> -> vector<4x32xf32>
    %286 = tpu.concatenate %271, %285 in 1 : vector<4x32xf32>, vector<4x32xf32> -> vector<4x64xf32>
    %287 = vector.extract_strided_slice %220 {offsets = [8, 0], sizes = [4, 64], strides = [1, 1]} : vector<16x64xf32> to vector<4x64xf32>
    %288 = vector.extract_strided_slice %222 {offsets = [4, 0], sizes = [2, 64], strides = [1, 1]} : vector<8x128xf32> to vector<2x64xf32>
    %289 = vector.extract_strided_slice %222 {offsets = [4, 64], sizes = [2, 64], strides = [1, 1]} : vector<8x128xf32> to vector<2x64xf32>
    %290 = vector.extract_strided_slice %287 {offsets = [0, 0], sizes = [4, 32], strides = [1, 1]} : vector<4x64xf32> to vector<4x32xf32>
    %291 = vector.extract_strided_slice %288 {offsets = [0, 0], sizes = [2, 32], strides = [1, 1]} : vector<2x64xf32> to vector<2x32xf32>
    %cst_79 = arith.constant dense<0.000000e+00> : vector<4x2xf32>
    %292 = tpu.matmul %290, %291, %cst_79 {dimension_numbers = #tpu.dot_dimension_numbers<[1], [1], [0], [0], [0, 0, 1, 0], [], []>, precision = #tpu.contract_precision<fp32>} : vector<4x32xf32>, vector<2x32xf32>, vector<4x2xf32> -> vector<4x2xf32>
    %cst_80 = arith.constant dense<0xFF800000> : vector<4xf32>
    %293 = vector.multi_reduction <maximumf>, %292, %cst_80 [1] : vector<4x2xf32> to vector<4xf32>
    %294 = vector.shape_cast %293 : vector<4xf32> to vector<4x1xf32>
    %295 = vector.broadcast %294 : vector<4x1xf32> to vector<4x2xf32>
    %296 = arith.subf %292, %295 : vector<4x2xf32>
    %297 = math.exp %296 : vector<4x2xf32>
    %cst_81 = arith.constant dense<0.000000e+00> : vector<4xf32>
    %298 = vector.multi_reduction <add>, %297, %cst_81 [1] : vector<4x2xf32> to vector<4xf32>
    %299 = vector.shape_cast %298 : vector<4xf32> to vector<4x1xf32>
    %300 = vector.broadcast %299 : vector<4x1xf32> to vector<4x2xf32>
    %301 = arith.divf %297, %300 : vector<4x2xf32>
    %302 = vector.extract_strided_slice %289 {offsets = [0, 0], sizes = [2, 32], strides = [1, 1]} : vector<2x64xf32> to vector<2x32xf32>
    %cst_82 = arith.constant dense<0.000000e+00> : vector<4x32xf32>
    %303 = tpu.matmul %301, %302, %cst_82 {dimension_numbers = #tpu.dot_dimension_numbers<[1], [0], [0], [1], [0, 0, 1, 1], [], []>, precision = #tpu.contract_precision<fp32>} : vector<4x2xf32>, vector<2x32xf32>, vector<4x32xf32> -> vector<4x32xf32>
    %304 = vector.extract_strided_slice %287 {offsets = [0, 32], sizes = [4, 32], strides = [1, 1]} : vector<4x64xf32> to vector<4x32xf32>
    %305 = vector.extract_strided_slice %288 {offsets = [0, 32], sizes = [2, 32], strides = [1, 1]} : vector<2x64xf32> to vector<2x32xf32>
    %cst_83 = arith.constant dense<0.000000e+00> : vector<4x2xf32>
    %306 = tpu.matmul %304, %305, %cst_83 {dimension_numbers = #tpu.dot_dimension_numbers<[1], [1], [0], [0], [0, 0, 1, 0], [], []>, precision = #tpu.contract_precision<fp32>} : vector<4x32xf32>, vector<2x32xf32>, vector<4x2xf32> -> vector<4x2xf32>
    %cst_84 = arith.constant dense<0xFF800000> : vector<4xf32>
    %307 = vector.multi_reduction <maximumf>, %306, %cst_84 [1] : vector<4x2xf32> to vector<4xf32>
    %308 = vector.shape_cast %307 : vector<4xf32> to vector<4x1xf32>
    %309 = vector.broadcast %308 : vector<4x1xf32> to vector<4x2xf32>
    %310 = arith.subf %306, %309 : vector<4x2xf32>
    %311 = math.exp %310 : vector<4x2xf32>
    %cst_85 = arith.constant dense<0.000000e+00> : vector<4xf32>
    %312 = vector.multi_reduction <add>, %311, %cst_85 [1] : vector<4x2xf32> to vector<4xf32>
    %313 = vector.shape_cast %312 : vector<4xf32> to vector<4x1xf32>
    %314 = vector.broadcast %313 : vector<4x1xf32> to vector<4x2xf32>
    %315 = arith.divf %311, %314 : vector<4x2xf32>
    %316 = vector.extract_strided_slice %289 {offsets = [0, 32], sizes = [2, 32], strides = [1, 1]} : vector<2x64xf32> to vector<2x32xf32>
    %cst_86 = arith.constant dense<0.000000e+00> : vector<4x32xf32>
    %317 = tpu.matmul %315, %316, %cst_86 {dimension_numbers = #tpu.dot_dimension_numbers<[1], [0], [0], [1], [0, 0, 1, 1], [], []>, precision = #tpu.contract_precision<fp32>} : vector<4x2xf32>, vector<2x32xf32>, vector<4x32xf32> -> vector<4x32xf32>
    %318 = tpu.concatenate %303, %317 in 1 : vector<4x32xf32>, vector<4x32xf32> -> vector<4x64xf32>
    %319 = vector.extract_strided_slice %220 {offsets = [12, 0], sizes = [4, 64], strides = [1, 1]} : vector<16x64xf32> to vector<4x64xf32>
    %320 = vector.extract_strided_slice %222 {offsets = [6, 0], sizes = [2, 64], strides = [1, 1]} : vector<8x128xf32> to vector<2x64xf32>
    %321 = vector.extract_strided_slice %222 {offsets = [6, 64], sizes = [2, 64], strides = [1, 1]} : vector<8x128xf32> to vector<2x64xf32>
    %322 = vector.extract_strided_slice %319 {offsets = [0, 0], sizes = [4, 32], strides = [1, 1]} : vector<4x64xf32> to vector<4x32xf32>
    %323 = vector.extract_strided_slice %320 {offsets = [0, 0], sizes = [2, 32], strides = [1, 1]} : vector<2x64xf32> to vector<2x32xf32>
    %cst_87 = arith.constant dense<0.000000e+00> : vector<4x2xf32>
    %324 = tpu.matmul %322, %323, %cst_87 {dimension_numbers = #tpu.dot_dimension_numbers<[1], [1], [0], [0], [0, 0, 1, 0], [], []>, precision = #tpu.contract_precision<fp32>} : vector<4x32xf32>, vector<2x32xf32>, vector<4x2xf32> -> vector<4x2xf32>
    %cst_88 = arith.constant dense<0xFF800000> : vector<4xf32>
    %325 = vector.multi_reduction <maximumf>, %324, %cst_88 [1] : vector<4x2xf32> to vector<4xf32>
    %326 = vector.shape_cast %325 : vector<4xf32> to vector<4x1xf32>
    %327 = vector.broadcast %326 : vector<4x1xf32> to vector<4x2xf32>
    %328 = arith.subf %324, %327 : vector<4x2xf32>
    %329 = math.exp %328 : vector<4x2xf32>
    %cst_89 = arith.constant dense<0.000000e+00> : vector<4xf32>
    %330 = vector.multi_reduction <add>, %329, %cst_89 [1] : vector<4x2xf32> to vector<4xf32>
    %331 = vector.shape_cast %330 : vector<4xf32> to vector<4x1xf32>
    %332 = vector.broadcast %331 : vector<4x1xf32> to vector<4x2xf32>
    %333 = arith.divf %329, %332 : vector<4x2xf32>
    %334 = vector.extract_strided_slice %321 {offsets = [0, 0], sizes = [2, 32], strides = [1, 1]} : vector<2x64xf32> to vector<2x32xf32>
    %cst_90 = arith.constant dense<0.000000e+00> : vector<4x32xf32>
    %335 = tpu.matmul %333, %334, %cst_90 {dimension_numbers = #tpu.dot_dimension_numbers<[1], [0], [0], [1], [0, 0, 1, 1], [], []>, precision = #tpu.contract_precision<fp32>} : vector<4x2xf32>, vector<2x32xf32>, vector<4x32xf32> -> vector<4x32xf32>
    %336 = vector.extract_strided_slice %319 {offsets = [0, 32], sizes = [4, 32], strides = [1, 1]} : vector<4x64xf32> to vector<4x32xf32>
    %337 = vector.extract_strided_slice %320 {offsets = [0, 32], sizes = [2, 32], strides = [1, 1]} : vector<2x64xf32> to vector<2x32xf32>
    %cst_91 = arith.constant dense<0.000000e+00> : vector<4x2xf32>
    %338 = tpu.matmul %336, %337, %cst_91 {dimension_numbers = #tpu.dot_dimension_numbers<[1], [1], [0], [0], [0, 0, 1, 0], [], []>, precision = #tpu.contract_precision<fp32>} : vector<4x32xf32>, vector<2x32xf32>, vector<4x2xf32> -> vector<4x2xf32>
    %cst_92 = arith.constant dense<0xFF800000> : vector<4xf32>
    %339 = vector.multi_reduction <maximumf>, %338, %cst_92 [1] : vector<4x2xf32> to vector<4xf32>
    %340 = vector.shape_cast %339 : vector<4xf32> to vector<4x1xf32>
    %341 = vector.broadcast %340 : vector<4x1xf32> to vector<4x2xf32>
    %342 = arith.subf %338, %341 : vector<4x2xf32>
    %343 = math.exp %342 : vector<4x2xf32>
    %cst_93 = arith.constant dense<0.000000e+00> : vector<4xf32>
    %344 = vector.multi_reduction <add>, %343, %cst_93 [1] : vector<4x2xf32> to vector<4xf32>
    %345 = vector.shape_cast %344 : vector<4xf32> to vector<4x1xf32>
    %346 = vector.broadcast %345 : vector<4x1xf32> to vector<4x2xf32>
    %347 = arith.divf %343, %346 : vector<4x2xf32>
    %348 = vector.extract_strided_slice %321 {offsets = [0, 32], sizes = [2, 32], strides = [1, 1]} : vector<2x64xf32> to vector<2x32xf32>
    %cst_94 = arith.constant dense<0.000000e+00> : vector<4x32xf32>
    %349 = tpu.matmul %347, %348, %cst_94 {dimension_numbers = #tpu.dot_dimension_numbers<[1], [0], [0], [1], [0, 0, 1, 1], [], []>, precision = #tpu.contract_precision<fp32>} : vector<4x2xf32>, vector<2x32xf32>, vector<4x32xf32> -> vector<4x32xf32>
    %350 = tpu.concatenate %335, %349 in 1 : vector<4x32xf32>, vector<4x32xf32> -> vector<4x64xf32>
    %351 = tpu.concatenate %254, %286, %318, %350 in 0 : vector<4x64xf32>, vector<4x64xf32>, vector<4x64xf32>, vector<4x64xf32> -> vector<16x64xf32>
    %352 = vector.extract_strided_slice %3 {offsets = [0, 224], sizes = [64, 32], strides = [1, 1]} : vector<64x288xf32> to vector<64x32xf32>
    %cst_95 = arith.constant dense<0.000000e+00> : vector<16x32xf32>
    %353 = tpu.matmul %351, %352, %cst_95 {dimension_numbers = #tpu.dot_dimension_numbers<[1], [0], [0], [1], [0, 0, 1, 1], [], []>, precision = #tpu.contract_precision<fp32>} : vector<16x64xf32>, vector<64x32xf32>, vector<16x32xf32> -> vector<16x32xf32>
    %354 = arith.addf %353, %218 : vector<16x32xf32>
    %355 = vector.extract_strided_slice %5 {offsets = [2, 0], sizes = [1, 32], strides = [1, 1]} : vector<8x64xf32> to vector<1x32xf32>
    %356 = vector.extract_strided_slice %5 {offsets = [3, 0], sizes = [1, 32], strides = [1, 1]} : vector<8x64xf32> to vector<1x32xf32>
    %cst_96 = arith.constant dense<0.000000e+00> : vector<16xf32>
    %357 = vector.multi_reduction <add>, %354, %cst_96 [1] : vector<16x32xf32> to vector<16xf32>
    %358 = vector.shape_cast %357 : vector<16xf32> to vector<16x1xf32>
    %cst_97 = arith.constant 3.200000e+01 : f32
    %359 = vector.broadcast %cst_97 : f32 to vector<16x1xf32>
    %360 = arith.divf %358, %359 : vector<16x1xf32>
    %361 = arith.mulf %354, %354 : vector<16x32xf32>
    %cst_98 = arith.constant dense<0.000000e+00> : vector<16xf32>
    %362 = vector.multi_reduction <add>, %361, %cst_98 [1] : vector<16x32xf32> to vector<16xf32>
    %363 = vector.shape_cast %362 : vector<16xf32> to vector<16x1xf32>
    %cst_99 = arith.constant 3.200000e+01 : f32
    %364 = vector.broadcast %cst_99 : f32 to vector<16x1xf32>
    %365 = arith.divf %363, %364 : vector<16x1xf32>
    %366 = vector.broadcast %360 : vector<16x1xf32> to vector<16x32xf32>
    %367 = arith.subf %354, %366 : vector<16x32xf32>
    %368 = arith.mulf %360, %360 : vector<16x1xf32>
    %369 = arith.subf %365, %368 : vector<16x1xf32>
    %cst_100 = arith.constant 9.99999997E-7 : f32
    %370 = vector.broadcast %cst_100 : f32 to vector<16x1xf32>
    %371 = arith.addf %369, %370 : vector<16x1xf32>
    %372 = math.rsqrt %371 : vector<16x1xf32>
    %373 = vector.broadcast %372 : vector<16x1xf32> to vector<16x32xf32>
    %374 = arith.mulf %367, %373 : vector<16x32xf32>
    %375 = vector.broadcast %355 : vector<1x32xf32> to vector<16x32xf32>
    %376 = arith.mulf %374, %375 : vector<16x32xf32>
    %377 = vector.broadcast %356 : vector<1x32xf32> to vector<16x32xf32>
    %378 = arith.addf %376, %377 : vector<16x32xf32>
    %379 = vector.extract_strided_slice %4 {offsets = [0, 192], sizes = [32, 64], strides = [1, 1]} : vector<32x256xf32> to vector<32x64xf32>
    %cst_101 = arith.constant dense<0.000000e+00> : vector<16x64xf32>
    %380 = tpu.matmul %378, %379, %cst_101 {dimension_numbers = #tpu.dot_dimension_numbers<[1], [0], [0], [1], [0, 0, 1, 1], [], []>, precision = #tpu.contract_precision<fp32>} : vector<16x32xf32>, vector<32x64xf32>, vector<16x64xf32> -> vector<16x64xf32>
    %381 = vector.extract_strided_slice %5 {offsets = [4, 0], sizes = [1, 64], strides = [1, 1]} : vector<8x64xf32> to vector<1x64xf32>
    %382 = vector.broadcast %381 : vector<1x64xf32> to vector<16x64xf32>
    %383 = arith.addf %380, %382 : vector<16x64xf32>
    %cst_102 = arith.constant 0.000000e+00 : f32
    %384 = vector.broadcast %cst_102 : f32 to vector<16x64xf32>
    %385 = arith.maximumf %383, %384 : vector<16x64xf32>
    %386 = vector.extract_strided_slice %3 {offsets = [0, 256], sizes = [64, 32], strides = [1, 1]} : vector<64x288xf32> to vector<64x32xf32>
    %cst_103 = arith.constant dense<0.000000e+00> : vector<16x32xf32>
    %387 = tpu.matmul %385, %386, %cst_103 {dimension_numbers = #tpu.dot_dimension_numbers<[1], [0], [0], [1], [0, 0, 1, 1], [], []>, precision = #tpu.contract_precision<fp32>} : vector<16x64xf32>, vector<64x32xf32>, vector<16x32xf32> -> vector<16x32xf32>
    %388 = vector.extract_strided_slice %5 {offsets = [5, 0], sizes = [1, 32], strides = [1, 1]} : vector<8x64xf32> to vector<1x32xf32>
    %389 = vector.broadcast %388 : vector<1x32xf32> to vector<16x32xf32>
    %390 = arith.addf %387, %389 : vector<16x32xf32>
    %391 = arith.addf %390, %378 : vector<16x32xf32>
    %392 = vector.extract_strided_slice %5 {offsets = [6, 0], sizes = [1, 32], strides = [1, 1]} : vector<8x64xf32> to vector<1x32xf32>
    %393 = vector.extract_strided_slice %5 {offsets = [7, 0], sizes = [1, 32], strides = [1, 1]} : vector<8x64xf32> to vector<1x32xf32>
    %cst_104 = arith.constant dense<0.000000e+00> : vector<16xf32>
    %394 = vector.multi_reduction <add>, %391, %cst_104 [1] : vector<16x32xf32> to vector<16xf32>
    %395 = vector.shape_cast %394 : vector<16xf32> to vector<16x1xf32>
    %cst_105 = arith.constant 3.200000e+01 : f32
    %396 = vector.broadcast %cst_105 : f32 to vector<16x1xf32>
    %397 = arith.divf %395, %396 : vector<16x1xf32>
    %398 = arith.mulf %391, %391 : vector<16x32xf32>
    %cst_106 = arith.constant dense<0.000000e+00> : vector<16xf32>
    %399 = vector.multi_reduction <add>, %398, %cst_106 [1] : vector<16x32xf32> to vector<16xf32>
    %400 = vector.shape_cast %399 : vector<16xf32> to vector<16x1xf32>
    %cst_107 = arith.constant 3.200000e+01 : f32
    %401 = vector.broadcast %cst_107 : f32 to vector<16x1xf32>
    %402 = arith.divf %400, %401 : vector<16x1xf32>
    %403 = vector.broadcast %397 : vector<16x1xf32> to vector<16x32xf32>
    %404 = arith.subf %391, %403 : vector<16x32xf32>
    %405 = arith.mulf %397, %397 : vector<16x1xf32>
    %406 = arith.subf %402, %405 : vector<16x1xf32>
    %cst_108 = arith.constant 9.99999997E-7 : f32
    %407 = vector.broadcast %cst_108 : f32 to vector<16x1xf32>
    %408 = arith.addf %406, %407 : vector<16x1xf32>
    %409 = math.rsqrt %408 : vector<16x1xf32>
    %410 = vector.broadcast %409 : vector<16x1xf32> to vector<16x32xf32>
    %411 = arith.mulf %404, %410 : vector<16x32xf32>
    %412 = vector.broadcast %392 : vector<1x32xf32> to vector<16x32xf32>
    %413 = arith.mulf %411, %412 : vector<16x32xf32>
    %414 = vector.broadcast %393 : vector<1x32xf32> to vector<16x32xf32>
    %415 = arith.addf %413, %414 : vector<16x32xf32>
    %c0_109 = arith.constant 0 : index
    %c0_110 = arith.constant 0 : index
    %416 = vector.load %arg1[%c0_109, %c0_110] : memref<16x64xf32, #tpu.memory_space<vmem>>, vector<16x64xf32>
    %c0_111 = arith.constant 0 : index
    %c0_112 = arith.constant 0 : index
    %417 = vector.load %arg5[%c0_111, %c0_112] : memref<2x8xf32, #tpu.memory_space<vmem>>, vector<2x8xf32>
    %c0_113 = arith.constant 0 : index
    %c0_114 = arith.constant 0 : index
    %418 = vector.load %arg3[%c0_113, %c0_114] : memref<8x32xf32, #tpu.memory_space<vmem>>, vector<8x32xf32>
    %c0_115 = arith.constant 0 : index
    %c0_116 = arith.constant 0 : index
    %419 = vector.load %arg11[%c0_115, %c0_116] : memref<64x288xf32, #tpu.memory_space<vmem>>, vector<64x288xf32>
    %c0_117 = arith.constant 0 : index
    %c0_118 = arith.constant 0 : index
    %420 = vector.load %arg12[%c0_117, %c0_118] : memref<32x256xf32, #tpu.memory_space<vmem>>, vector<32x256xf32>
    %c0_119 = arith.constant 0 : index
    %c0_120 = arith.constant 0 : index
    %421 = vector.load %arg13[%c0_119, %c0_120] : memref<8x64xf32, #tpu.memory_space<vmem>>, vector<8x64xf32>
    %422 = vector.extract_strided_slice %416 {offsets = [0, 0], sizes = [16, 32], strides = [1, 1]} : vector<16x64xf32> to vector<16x32xf32>
    %423 = vector.extract_strided_slice %416 {offsets = [0, 32], sizes = [16, 32], strides = [1, 1]} : vector<16x64xf32> to vector<16x32xf32>
    %424 = arith.addf %422, %423 : vector<16x32xf32>
    %425 = vector.extract_strided_slice %419 {offsets = [0, 0], sizes = [64, 192], strides = [1, 1]} : vector<64x288xf32> to vector<64x192xf32>
    %cst_121 = arith.constant dense<0.000000e+00> : vector<16x192xf32>
    %426 = tpu.matmul %416, %425, %cst_121 {dimension_numbers = #tpu.dot_dimension_numbers<[1], [0], [0], [1], [0, 0, 1, 1], [], []>, precision = #tpu.contract_precision<fp32>} : vector<16x64xf32>, vector<64x192xf32>, vector<16x192xf32> -> vector<16x192xf32>
    %427 = vector.extract_strided_slice %426 {offsets = [0, 0], sizes = [8, 64], strides = [1, 1]} : vector<16x192xf32> to vector<8x64xf32>
    %428 = vector.extract_strided_slice %426 {offsets = [0, 64], sizes = [8, 64], strides = [1, 1]} : vector<16x192xf32> to vector<8x64xf32>
    %429 = vector.extract_strided_slice %426 {offsets = [0, 128], sizes = [8, 64], strides = [1, 1]} : vector<16x192xf32> to vector<8x64xf32>
    %430 = vector.extract_strided_slice %417 {offsets = [0, 0], sizes = [1, 8], strides = [1, 1]} : vector<2x8xf32> to vector<1x8xf32>
    %431 = tpu.iota {dimensions = array<i32: 0>} : vector<8x8xi32>
    %432 = tpu.iota {dimensions = array<i32: 1>} : vector<8x8xi32>
    %433 = arith.cmpi sle, %432, %431 : vector<8x8xi32>
    %cst_122 = arith.constant 5.000000e-01 : f32
    %434 = vector.broadcast %cst_122 : f32 to vector<1x8xf32>
    %435 = arith.cmpf ogt, %430, %434 : vector<1x8xf32>
    %436 = vector.broadcast %435 : vector<1x8xi1> to vector<8x8xi1>
    %437 = arith.andi %433, %436 : vector<8x8xi1>
    %cst_123 = arith.constant 0.000000e+00 : f32
    %cst_124 = arith.constant -1.000000e+09 : f32
    %438 = vector.broadcast %cst_123 : f32 to vector<8x8xf32>
    %439 = vector.broadcast %cst_124 : f32 to vector<8x8xf32>
    %440 = arith.select %437, %438, %439 : vector<8x8xi1>, vector<8x8xf32>
    %441 = vector.extract_strided_slice %427 {offsets = [0, 0], sizes = [8, 32], strides = [1, 1]} : vector<8x64xf32> to vector<8x32xf32>
    %442 = vector.extract_strided_slice %428 {offsets = [0, 0], sizes = [8, 32], strides = [1, 1]} : vector<8x64xf32> to vector<8x32xf32>
    %cst_125 = arith.constant dense<0.000000e+00> : vector<8x8xf32>
    %443 = tpu.matmul %441, %442, %cst_125 {dimension_numbers = #tpu.dot_dimension_numbers<[1], [1], [0], [0], [0, 0, 1, 0], [], []>, precision = #tpu.contract_precision<fp32>} : vector<8x32xf32>, vector<8x32xf32>, vector<8x8xf32> -> vector<8x8xf32>
    %444 = arith.addf %443, %440 : vector<8x8xf32>
    %cst_126 = arith.constant dense<0xFF800000> : vector<8xf32>
    %445 = vector.multi_reduction <maximumf>, %444, %cst_126 [1] : vector<8x8xf32> to vector<8xf32>
    %446 = vector.shape_cast %445 : vector<8xf32> to vector<8x1xf32>
    %447 = vector.broadcast %446 : vector<8x1xf32> to vector<8x8xf32>
    %448 = arith.subf %444, %447 : vector<8x8xf32>
    %449 = math.exp %448 : vector<8x8xf32>
    %cst_127 = arith.constant dense<0.000000e+00> : vector<8xf32>
    %450 = vector.multi_reduction <add>, %449, %cst_127 [1] : vector<8x8xf32> to vector<8xf32>
    %451 = vector.shape_cast %450 : vector<8xf32> to vector<8x1xf32>
    %452 = vector.broadcast %451 : vector<8x1xf32> to vector<8x8xf32>
    %453 = arith.divf %449, %452 : vector<8x8xf32>
    %454 = vector.extract_strided_slice %429 {offsets = [0, 0], sizes = [8, 32], strides = [1, 1]} : vector<8x64xf32> to vector<8x32xf32>
    %cst_128 = arith.constant dense<0.000000e+00> : vector<8x32xf32>
    %455 = tpu.matmul %453, %454, %cst_128 {dimension_numbers = #tpu.dot_dimension_numbers<[1], [0], [0], [1], [0, 0, 1, 1], [], []>, precision = #tpu.contract_precision<fp32>} : vector<8x8xf32>, vector<8x32xf32>, vector<8x32xf32> -> vector<8x32xf32>
    %456 = vector.extract_strided_slice %427 {offsets = [0, 32], sizes = [8, 32], strides = [1, 1]} : vector<8x64xf32> to vector<8x32xf32>
    %457 = vector.extract_strided_slice %428 {offsets = [0, 32], sizes = [8, 32], strides = [1, 1]} : vector<8x64xf32> to vector<8x32xf32>
    %cst_129 = arith.constant dense<0.000000e+00> : vector<8x8xf32>
    %458 = tpu.matmul %456, %457, %cst_129 {dimension_numbers = #tpu.dot_dimension_numbers<[1], [1], [0], [0], [0, 0, 1, 0], [], []>, precision = #tpu.contract_precision<fp32>} : vector<8x32xf32>, vector<8x32xf32>, vector<8x8xf32> -> vector<8x8xf32>
    %459 = arith.addf %458, %440 : vector<8x8xf32>
    %cst_130 = arith.constant dense<0xFF800000> : vector<8xf32>
    %460 = vector.multi_reduction <maximumf>, %459, %cst_130 [1] : vector<8x8xf32> to vector<8xf32>
    %461 = vector.shape_cast %460 : vector<8xf32> to vector<8x1xf32>
    %462 = vector.broadcast %461 : vector<8x1xf32> to vector<8x8xf32>
    %463 = arith.subf %459, %462 : vector<8x8xf32>
    %464 = math.exp %463 : vector<8x8xf32>
    %cst_131 = arith.constant dense<0.000000e+00> : vector<8xf32>
    %465 = vector.multi_reduction <add>, %464, %cst_131 [1] : vector<8x8xf32> to vector<8xf32>
    %466 = vector.shape_cast %465 : vector<8xf32> to vector<8x1xf32>
    %467 = vector.broadcast %466 : vector<8x1xf32> to vector<8x8xf32>
    %468 = arith.divf %464, %467 : vector<8x8xf32>
    %469 = vector.extract_strided_slice %429 {offsets = [0, 32], sizes = [8, 32], strides = [1, 1]} : vector<8x64xf32> to vector<8x32xf32>
    %cst_132 = arith.constant dense<0.000000e+00> : vector<8x32xf32>
    %470 = tpu.matmul %468, %469, %cst_132 {dimension_numbers = #tpu.dot_dimension_numbers<[1], [0], [0], [1], [0, 0, 1, 1], [], []>, precision = #tpu.contract_precision<fp32>} : vector<8x8xf32>, vector<8x32xf32>, vector<8x32xf32> -> vector<8x32xf32>
    %471 = tpu.concatenate %455, %470 in 1 : vector<8x32xf32>, vector<8x32xf32> -> vector<8x64xf32>
    %472 = vector.extract_strided_slice %426 {offsets = [8, 0], sizes = [8, 64], strides = [1, 1]} : vector<16x192xf32> to vector<8x64xf32>
    %473 = vector.extract_strided_slice %426 {offsets = [8, 64], sizes = [8, 64], strides = [1, 1]} : vector<16x192xf32> to vector<8x64xf32>
    %474 = vector.extract_strided_slice %426 {offsets = [8, 128], sizes = [8, 64], strides = [1, 1]} : vector<16x192xf32> to vector<8x64xf32>
    %475 = vector.extract_strided_slice %417 {offsets = [1, 0], sizes = [1, 8], strides = [1, 1]} : vector<2x8xf32> to vector<1x8xf32>
    %476 = tpu.iota {dimensions = array<i32: 0>} : vector<8x8xi32>
    %477 = tpu.iota {dimensions = array<i32: 1>} : vector<8x8xi32>
    %478 = arith.cmpi sle, %477, %476 : vector<8x8xi32>
    %cst_133 = arith.constant 5.000000e-01 : f32
    %479 = vector.broadcast %cst_133 : f32 to vector<1x8xf32>
    %480 = arith.cmpf ogt, %475, %479 : vector<1x8xf32>
    %481 = vector.broadcast %480 : vector<1x8xi1> to vector<8x8xi1>
    %482 = arith.andi %478, %481 : vector<8x8xi1>
    %cst_134 = arith.constant 0.000000e+00 : f32
    %cst_135 = arith.constant -1.000000e+09 : f32
    %483 = vector.broadcast %cst_134 : f32 to vector<8x8xf32>
    %484 = vector.broadcast %cst_135 : f32 to vector<8x8xf32>
    %485 = arith.select %482, %483, %484 : vector<8x8xi1>, vector<8x8xf32>
    %486 = vector.extract_strided_slice %472 {offsets = [0, 0], sizes = [8, 32], strides = [1, 1]} : vector<8x64xf32> to vector<8x32xf32>
    %487 = vector.extract_strided_slice %473 {offsets = [0, 0], sizes = [8, 32], strides = [1, 1]} : vector<8x64xf32> to vector<8x32xf32>
    %cst_136 = arith.constant dense<0.000000e+00> : vector<8x8xf32>
    %488 = tpu.matmul %486, %487, %cst_136 {dimension_numbers = #tpu.dot_dimension_numbers<[1], [1], [0], [0], [0, 0, 1, 0], [], []>, precision = #tpu.contract_precision<fp32>} : vector<8x32xf32>, vector<8x32xf32>, vector<8x8xf32> -> vector<8x8xf32>
    %489 = arith.addf %488, %485 : vector<8x8xf32>
    %cst_137 = arith.constant dense<0xFF800000> : vector<8xf32>
    %490 = vector.multi_reduction <maximumf>, %489, %cst_137 [1] : vector<8x8xf32> to vector<8xf32>
    %491 = vector.shape_cast %490 : vector<8xf32> to vector<8x1xf32>
    %492 = vector.broadcast %491 : vector<8x1xf32> to vector<8x8xf32>
    %493 = arith.subf %489, %492 : vector<8x8xf32>
    %494 = math.exp %493 : vector<8x8xf32>
    %cst_138 = arith.constant dense<0.000000e+00> : vector<8xf32>
    %495 = vector.multi_reduction <add>, %494, %cst_138 [1] : vector<8x8xf32> to vector<8xf32>
    %496 = vector.shape_cast %495 : vector<8xf32> to vector<8x1xf32>
    %497 = vector.broadcast %496 : vector<8x1xf32> to vector<8x8xf32>
    %498 = arith.divf %494, %497 : vector<8x8xf32>
    %499 = vector.extract_strided_slice %474 {offsets = [0, 0], sizes = [8, 32], strides = [1, 1]} : vector<8x64xf32> to vector<8x32xf32>
    %cst_139 = arith.constant dense<0.000000e+00> : vector<8x32xf32>
    %500 = tpu.matmul %498, %499, %cst_139 {dimension_numbers = #tpu.dot_dimension_numbers<[1], [0], [0], [1], [0, 0, 1, 1], [], []>, precision = #tpu.contract_precision<fp32>} : vector<8x8xf32>, vector<8x32xf32>, vector<8x32xf32> -> vector<8x32xf32>
    %501 = vector.extract_strided_slice %472 {offsets = [0, 32], sizes = [8, 32], strides = [1, 1]} : vector<8x64xf32> to vector<8x32xf32>
    %502 = vector.extract_strided_slice %473 {offsets = [0, 32], sizes = [8, 32], strides = [1, 1]} : vector<8x64xf32> to vector<8x32xf32>
    %cst_140 = arith.constant dense<0.000000e+00> : vector<8x8xf32>
    %503 = tpu.matmul %501, %502, %cst_140 {dimension_numbers = #tpu.dot_dimension_numbers<[1], [1], [0], [0], [0, 0, 1, 0], [], []>, precision = #tpu.contract_precision<fp32>} : vector<8x32xf32>, vector<8x32xf32>, vector<8x8xf32> -> vector<8x8xf32>
    %504 = arith.addf %503, %485 : vector<8x8xf32>
    %cst_141 = arith.constant dense<0xFF800000> : vector<8xf32>
    %505 = vector.multi_reduction <maximumf>, %504, %cst_141 [1] : vector<8x8xf32> to vector<8xf32>
    %506 = vector.shape_cast %505 : vector<8xf32> to vector<8x1xf32>
    %507 = vector.broadcast %506 : vector<8x1xf32> to vector<8x8xf32>
    %508 = arith.subf %504, %507 : vector<8x8xf32>
    %509 = math.exp %508 : vector<8x8xf32>
    %cst_142 = arith.constant dense<0.000000e+00> : vector<8xf32>
    %510 = vector.multi_reduction <add>, %509, %cst_142 [1] : vector<8x8xf32> to vector<8xf32>
    %511 = vector.shape_cast %510 : vector<8xf32> to vector<8x1xf32>
    %512 = vector.broadcast %511 : vector<8x1xf32> to vector<8x8xf32>
    %513 = arith.divf %509, %512 : vector<8x8xf32>
    %514 = vector.extract_strided_slice %474 {offsets = [0, 32], sizes = [8, 32], strides = [1, 1]} : vector<8x64xf32> to vector<8x32xf32>
    %cst_143 = arith.constant dense<0.000000e+00> : vector<8x32xf32>
    %515 = tpu.matmul %513, %514, %cst_143 {dimension_numbers = #tpu.dot_dimension_numbers<[1], [0], [0], [1], [0, 0, 1, 1], [], []>, precision = #tpu.contract_precision<fp32>} : vector<8x8xf32>, vector<8x32xf32>, vector<8x32xf32> -> vector<8x32xf32>
    %516 = tpu.concatenate %500, %515 in 1 : vector<8x32xf32>, vector<8x32xf32> -> vector<8x64xf32>
    %517 = tpu.concatenate %471, %516 in 0 : vector<8x64xf32>, vector<8x64xf32> -> vector<16x64xf32>
    %518 = vector.extract_strided_slice %419 {offsets = [0, 192], sizes = [64, 32], strides = [1, 1]} : vector<64x288xf32> to vector<64x32xf32>
    %cst_144 = arith.constant dense<0.000000e+00> : vector<16x32xf32>
    %519 = tpu.matmul %517, %518, %cst_144 {dimension_numbers = #tpu.dot_dimension_numbers<[1], [0], [0], [1], [0, 0, 1, 1], [], []>, precision = #tpu.contract_precision<fp32>} : vector<16x64xf32>, vector<64x32xf32>, vector<16x32xf32> -> vector<16x32xf32>
    %520 = arith.addf %519, %424 : vector<16x32xf32>
    %521 = vector.extract_strided_slice %421 {offsets = [0, 0], sizes = [1, 32], strides = [1, 1]} : vector<8x64xf32> to vector<1x32xf32>
    %522 = vector.extract_strided_slice %421 {offsets = [1, 0], sizes = [1, 32], strides = [1, 1]} : vector<8x64xf32> to vector<1x32xf32>
    %cst_145 = arith.constant dense<0.000000e+00> : vector<16xf32>
    %523 = vector.multi_reduction <add>, %520, %cst_145 [1] : vector<16x32xf32> to vector<16xf32>
    %524 = vector.shape_cast %523 : vector<16xf32> to vector<16x1xf32>
    %cst_146 = arith.constant 3.200000e+01 : f32
    %525 = vector.broadcast %cst_146 : f32 to vector<16x1xf32>
    %526 = arith.divf %524, %525 : vector<16x1xf32>
    %527 = arith.mulf %520, %520 : vector<16x32xf32>
    %cst_147 = arith.constant dense<0.000000e+00> : vector<16xf32>
    %528 = vector.multi_reduction <add>, %527, %cst_147 [1] : vector<16x32xf32> to vector<16xf32>
    %529 = vector.shape_cast %528 : vector<16xf32> to vector<16x1xf32>
    %cst_148 = arith.constant 3.200000e+01 : f32
    %530 = vector.broadcast %cst_148 : f32 to vector<16x1xf32>
    %531 = arith.divf %529, %530 : vector<16x1xf32>
    %532 = vector.broadcast %526 : vector<16x1xf32> to vector<16x32xf32>
    %533 = arith.subf %520, %532 : vector<16x32xf32>
    %534 = arith.mulf %526, %526 : vector<16x1xf32>
    %535 = arith.subf %531, %534 : vector<16x1xf32>
    %cst_149 = arith.constant 9.99999997E-7 : f32
    %536 = vector.broadcast %cst_149 : f32 to vector<16x1xf32>
    %537 = arith.addf %535, %536 : vector<16x1xf32>
    %538 = math.rsqrt %537 : vector<16x1xf32>
    %539 = vector.broadcast %538 : vector<16x1xf32> to vector<16x32xf32>
    %540 = arith.mulf %533, %539 : vector<16x32xf32>
    %541 = vector.broadcast %521 : vector<1x32xf32> to vector<16x32xf32>
    %542 = arith.mulf %540, %541 : vector<16x32xf32>
    %543 = vector.broadcast %522 : vector<1x32xf32> to vector<16x32xf32>
    %544 = arith.addf %542, %543 : vector<16x32xf32>
    %545 = vector.extract_strided_slice %420 {offsets = [0, 0], sizes = [32, 64], strides = [1, 1]} : vector<32x256xf32> to vector<32x64xf32>
    %cst_150 = arith.constant dense<0.000000e+00> : vector<16x64xf32>
    %546 = tpu.matmul %544, %545, %cst_150 {dimension_numbers = #tpu.dot_dimension_numbers<[1], [0], [0], [1], [0, 0, 1, 1], [], []>, precision = #tpu.contract_precision<fp32>} : vector<16x32xf32>, vector<32x64xf32>, vector<16x64xf32> -> vector<16x64xf32>
    %547 = vector.extract_strided_slice %420 {offsets = [0, 64], sizes = [32, 128], strides = [1, 1]} : vector<32x256xf32> to vector<32x128xf32>
    %cst_151 = arith.constant dense<0.000000e+00> : vector<8x128xf32>
    %548 = tpu.matmul %418, %547, %cst_151 {dimension_numbers = #tpu.dot_dimension_numbers<[1], [0], [0], [1], [0, 0, 1, 1], [], []>, precision = #tpu.contract_precision<fp32>} : vector<8x32xf32>, vector<32x128xf32>, vector<8x128xf32> -> vector<8x128xf32>
    %549 = vector.extract_strided_slice %546 {offsets = [0, 0], sizes = [8, 64], strides = [1, 1]} : vector<16x64xf32> to vector<8x64xf32>
    %550 = vector.extract_strided_slice %548 {offsets = [0, 0], sizes = [4, 64], strides = [1, 1]} : vector<8x128xf32> to vector<4x64xf32>
    %551 = vector.extract_strided_slice %548 {offsets = [0, 64], sizes = [4, 64], strides = [1, 1]} : vector<8x128xf32> to vector<4x64xf32>
    %552 = vector.extract_strided_slice %549 {offsets = [0, 0], sizes = [8, 32], strides = [1, 1]} : vector<8x64xf32> to vector<8x32xf32>
    %553 = vector.extract_strided_slice %550 {offsets = [0, 0], sizes = [4, 32], strides = [1, 1]} : vector<4x64xf32> to vector<4x32xf32>
    %cst_152 = arith.constant dense<0.000000e+00> : vector<8x4xf32>
    %554 = tpu.matmul %552, %553, %cst_152 {dimension_numbers = #tpu.dot_dimension_numbers<[1], [1], [0], [0], [0, 0, 1, 0], [], []>, precision = #tpu.contract_precision<fp32>} : vector<8x32xf32>, vector<4x32xf32>, vector<8x4xf32> -> vector<8x4xf32>
    %cst_153 = arith.constant dense<0xFF800000> : vector<8xf32>
    %555 = vector.multi_reduction <maximumf>, %554, %cst_153 [1] : vector<8x4xf32> to vector<8xf32>
    %556 = vector.shape_cast %555 : vector<8xf32> to vector<8x1xf32>
    %557 = vector.broadcast %556 : vector<8x1xf32> to vector<8x4xf32>
    %558 = arith.subf %554, %557 : vector<8x4xf32>
    %559 = math.exp %558 : vector<8x4xf32>
    %cst_154 = arith.constant dense<0.000000e+00> : vector<8xf32>
    %560 = vector.multi_reduction <add>, %559, %cst_154 [1] : vector<8x4xf32> to vector<8xf32>
    %561 = vector.shape_cast %560 : vector<8xf32> to vector<8x1xf32>
    %562 = vector.broadcast %561 : vector<8x1xf32> to vector<8x4xf32>
    %563 = arith.divf %559, %562 : vector<8x4xf32>
    %564 = vector.extract_strided_slice %551 {offsets = [0, 0], sizes = [4, 32], strides = [1, 1]} : vector<4x64xf32> to vector<4x32xf32>
    %cst_155 = arith.constant dense<0.000000e+00> : vector<8x32xf32>
    %565 = tpu.matmul %563, %564, %cst_155 {dimension_numbers = #tpu.dot_dimension_numbers<[1], [0], [0], [1], [0, 0, 1, 1], [], []>, precision = #tpu.contract_precision<fp32>} : vector<8x4xf32>, vector<4x32xf32>, vector<8x32xf32> -> vector<8x32xf32>
    %566 = vector.extract_strided_slice %549 {offsets = [0, 32], sizes = [8, 32], strides = [1, 1]} : vector<8x64xf32> to vector<8x32xf32>
    %567 = vector.extract_strided_slice %550 {offsets = [0, 32], sizes = [4, 32], strides = [1, 1]} : vector<4x64xf32> to vector<4x32xf32>
    %cst_156 = arith.constant dense<0.000000e+00> : vector<8x4xf32>
    %568 = tpu.matmul %566, %567, %cst_156 {dimension_numbers = #tpu.dot_dimension_numbers<[1], [1], [0], [0], [0, 0, 1, 0], [], []>, precision = #tpu.contract_precision<fp32>} : vector<8x32xf32>, vector<4x32xf32>, vector<8x4xf32> -> vector<8x4xf32>
    %cst_157 = arith.constant dense<0xFF800000> : vector<8xf32>
    %569 = vector.multi_reduction <maximumf>, %568, %cst_157 [1] : vector<8x4xf32> to vector<8xf32>
    %570 = vector.shape_cast %569 : vector<8xf32> to vector<8x1xf32>
    %571 = vector.broadcast %570 : vector<8x1xf32> to vector<8x4xf32>
    %572 = arith.subf %568, %571 : vector<8x4xf32>
    %573 = math.exp %572 : vector<8x4xf32>
    %cst_158 = arith.constant dense<0.000000e+00> : vector<8xf32>
    %574 = vector.multi_reduction <add>, %573, %cst_158 [1] : vector<8x4xf32> to vector<8xf32>
    %575 = vector.shape_cast %574 : vector<8xf32> to vector<8x1xf32>
    %576 = vector.broadcast %575 : vector<8x1xf32> to vector<8x4xf32>
    %577 = arith.divf %573, %576 : vector<8x4xf32>
    %578 = vector.extract_strided_slice %551 {offsets = [0, 32], sizes = [4, 32], strides = [1, 1]} : vector<4x64xf32> to vector<4x32xf32>
    %cst_159 = arith.constant dense<0.000000e+00> : vector<8x32xf32>
    %579 = tpu.matmul %577, %578, %cst_159 {dimension_numbers = #tpu.dot_dimension_numbers<[1], [0], [0], [1], [0, 0, 1, 1], [], []>, precision = #tpu.contract_precision<fp32>} : vector<8x4xf32>, vector<4x32xf32>, vector<8x32xf32> -> vector<8x32xf32>
    %580 = tpu.concatenate %565, %579 in 1 : vector<8x32xf32>, vector<8x32xf32> -> vector<8x64xf32>
    %581 = vector.extract_strided_slice %546 {offsets = [8, 0], sizes = [8, 64], strides = [1, 1]} : vector<16x64xf32> to vector<8x64xf32>
    %582 = vector.extract_strided_slice %548 {offsets = [4, 0], sizes = [4, 64], strides = [1, 1]} : vector<8x128xf32> to vector<4x64xf32>
    %583 = vector.extract_strided_slice %548 {offsets = [4, 64], sizes = [4, 64], strides = [1, 1]} : vector<8x128xf32> to vector<4x64xf32>
    %584 = vector.extract_strided_slice %581 {offsets = [0, 0], sizes = [8, 32], strides = [1, 1]} : vector<8x64xf32> to vector<8x32xf32>
    %585 = vector.extract_strided_slice %582 {offsets = [0, 0], sizes = [4, 32], strides = [1, 1]} : vector<4x64xf32> to vector<4x32xf32>
    %cst_160 = arith.constant dense<0.000000e+00> : vector<8x4xf32>
    %586 = tpu.matmul %584, %585, %cst_160 {dimension_numbers = #tpu.dot_dimension_numbers<[1], [1], [0], [0], [0, 0, 1, 0], [], []>, precision = #tpu.contract_precision<fp32>} : vector<8x32xf32>, vector<4x32xf32>, vector<8x4xf32> -> vector<8x4xf32>
    %cst_161 = arith.constant dense<0xFF800000> : vector<8xf32>
    %587 = vector.multi_reduction <maximumf>, %586, %cst_161 [1] : vector<8x4xf32> to vector<8xf32>
    %588 = vector.shape_cast %587 : vector<8xf32> to vector<8x1xf32>
    %589 = vector.broadcast %588 : vector<8x1xf32> to vector<8x4xf32>
    %590 = arith.subf %586, %589 : vector<8x4xf32>
    %591 = math.exp %590 : vector<8x4xf32>
    %cst_162 = arith.constant dense<0.000000e+00> : vector<8xf32>
    %592 = vector.multi_reduction <add>, %591, %cst_162 [1] : vector<8x4xf32> to vector<8xf32>
    %593 = vector.shape_cast %592 : vector<8xf32> to vector<8x1xf32>
    %594 = vector.broadcast %593 : vector<8x1xf32> to vector<8x4xf32>
    %595 = arith.divf %591, %594 : vector<8x4xf32>
    %596 = vector.extract_strided_slice %583 {offsets = [0, 0], sizes = [4, 32], strides = [1, 1]} : vector<4x64xf32> to vector<4x32xf32>
    %cst_163 = arith.constant dense<0.000000e+00> : vector<8x32xf32>
    %597 = tpu.matmul %595, %596, %cst_163 {dimension_numbers = #tpu.dot_dimension_numbers<[1], [0], [0], [1], [0, 0, 1, 1], [], []>, precision = #tpu.contract_precision<fp32>} : vector<8x4xf32>, vector<4x32xf32>, vector<8x32xf32> -> vector<8x32xf32>
    %598 = vector.extract_strided_slice %581 {offsets = [0, 32], sizes = [8, 32], strides = [1, 1]} : vector<8x64xf32> to vector<8x32xf32>
    %599 = vector.extract_strided_slice %582 {offsets = [0, 32], sizes = [4, 32], strides = [1, 1]} : vector<4x64xf32> to vector<4x32xf32>
    %cst_164 = arith.constant dense<0.000000e+00> : vector<8x4xf32>
    %600 = tpu.matmul %598, %599, %cst_164 {dimension_numbers = #tpu.dot_dimension_numbers<[1], [1], [0], [0], [0, 0, 1, 0], [], []>, precision = #tpu.contract_precision<fp32>} : vector<8x32xf32>, vector<4x32xf32>, vector<8x4xf32> -> vector<8x4xf32>
    %cst_165 = arith.constant dense<0xFF800000> : vector<8xf32>
    %601 = vector.multi_reduction <maximumf>, %600, %cst_165 [1] : vector<8x4xf32> to vector<8xf32>
    %602 = vector.shape_cast %601 : vector<8xf32> to vector<8x1xf32>
    %603 = vector.broadcast %602 : vector<8x1xf32> to vector<8x4xf32>
    %604 = arith.subf %600, %603 : vector<8x4xf32>
    %605 = math.exp %604 : vector<8x4xf32>
    %cst_166 = arith.constant dense<0.000000e+00> : vector<8xf32>
    %606 = vector.multi_reduction <add>, %605, %cst_166 [1] : vector<8x4xf32> to vector<8xf32>
    %607 = vector.shape_cast %606 : vector<8xf32> to vector<8x1xf32>
    %608 = vector.broadcast %607 : vector<8x1xf32> to vector<8x4xf32>
    %609 = arith.divf %605, %608 : vector<8x4xf32>
    %610 = vector.extract_strided_slice %583 {offsets = [0, 32], sizes = [4, 32], strides = [1, 1]} : vector<4x64xf32> to vector<4x32xf32>
    %cst_167 = arith.constant dense<0.000000e+00> : vector<8x32xf32>
    %611 = tpu.matmul %609, %610, %cst_167 {dimension_numbers = #tpu.dot_dimension_numbers<[1], [0], [0], [1], [0, 0, 1, 1], [], []>, precision = #tpu.contract_precision<fp32>} : vector<8x4xf32>, vector<4x32xf32>, vector<8x32xf32> -> vector<8x32xf32>
    %612 = tpu.concatenate %597, %611 in 1 : vector<8x32xf32>, vector<8x32xf32> -> vector<8x64xf32>
    %613 = tpu.concatenate %580, %612 in 0 : vector<8x64xf32>, vector<8x64xf32> -> vector<16x64xf32>
    %614 = vector.extract_strided_slice %419 {offsets = [0, 224], sizes = [64, 32], strides = [1, 1]} : vector<64x288xf32> to vector<64x32xf32>
    %cst_168 = arith.constant dense<0.000000e+00> : vector<16x32xf32>
    %615 = tpu.matmul %613, %614, %cst_168 {dimension_numbers = #tpu.dot_dimension_numbers<[1], [0], [0], [1], [0, 0, 1, 1], [], []>, precision = #tpu.contract_precision<fp32>} : vector<16x64xf32>, vector<64x32xf32>, vector<16x32xf32> -> vector<16x32xf32>
    %616 = arith.addf %615, %544 : vector<16x32xf32>
    %617 = vector.extract_strided_slice %421 {offsets = [2, 0], sizes = [1, 32], strides = [1, 1]} : vector<8x64xf32> to vector<1x32xf32>
    %618 = vector.extract_strided_slice %421 {offsets = [3, 0], sizes = [1, 32], strides = [1, 1]} : vector<8x64xf32> to vector<1x32xf32>
    %cst_169 = arith.constant dense<0.000000e+00> : vector<16xf32>
    %619 = vector.multi_reduction <add>, %616, %cst_169 [1] : vector<16x32xf32> to vector<16xf32>
    %620 = vector.shape_cast %619 : vector<16xf32> to vector<16x1xf32>
    %cst_170 = arith.constant 3.200000e+01 : f32
    %621 = vector.broadcast %cst_170 : f32 to vector<16x1xf32>
    %622 = arith.divf %620, %621 : vector<16x1xf32>
    %623 = arith.mulf %616, %616 : vector<16x32xf32>
    %cst_171 = arith.constant dense<0.000000e+00> : vector<16xf32>
    %624 = vector.multi_reduction <add>, %623, %cst_171 [1] : vector<16x32xf32> to vector<16xf32>
    %625 = vector.shape_cast %624 : vector<16xf32> to vector<16x1xf32>
    %cst_172 = arith.constant 3.200000e+01 : f32
    %626 = vector.broadcast %cst_172 : f32 to vector<16x1xf32>
    %627 = arith.divf %625, %626 : vector<16x1xf32>
    %628 = vector.broadcast %622 : vector<16x1xf32> to vector<16x32xf32>
    %629 = arith.subf %616, %628 : vector<16x32xf32>
    %630 = arith.mulf %622, %622 : vector<16x1xf32>
    %631 = arith.subf %627, %630 : vector<16x1xf32>
    %cst_173 = arith.constant 9.99999997E-7 : f32
    %632 = vector.broadcast %cst_173 : f32 to vector<16x1xf32>
    %633 = arith.addf %631, %632 : vector<16x1xf32>
    %634 = math.rsqrt %633 : vector<16x1xf32>
    %635 = vector.broadcast %634 : vector<16x1xf32> to vector<16x32xf32>
    %636 = arith.mulf %629, %635 : vector<16x32xf32>
    %637 = vector.broadcast %617 : vector<1x32xf32> to vector<16x32xf32>
    %638 = arith.mulf %636, %637 : vector<16x32xf32>
    %639 = vector.broadcast %618 : vector<1x32xf32> to vector<16x32xf32>
    %640 = arith.addf %638, %639 : vector<16x32xf32>
    %641 = vector.extract_strided_slice %420 {offsets = [0, 192], sizes = [32, 64], strides = [1, 1]} : vector<32x256xf32> to vector<32x64xf32>
    %cst_174 = arith.constant dense<0.000000e+00> : vector<16x64xf32>
    %642 = tpu.matmul %640, %641, %cst_174 {dimension_numbers = #tpu.dot_dimension_numbers<[1], [0], [0], [1], [0, 0, 1, 1], [], []>, precision = #tpu.contract_precision<fp32>} : vector<16x32xf32>, vector<32x64xf32>, vector<16x64xf32> -> vector<16x64xf32>
    %643 = vector.extract_strided_slice %421 {offsets = [4, 0], sizes = [1, 64], strides = [1, 1]} : vector<8x64xf32> to vector<1x64xf32>
    %644 = vector.broadcast %643 : vector<1x64xf32> to vector<16x64xf32>
    %645 = arith.addf %642, %644 : vector<16x64xf32>
    %cst_175 = arith.constant 0.000000e+00 : f32
    %646 = vector.broadcast %cst_175 : f32 to vector<16x64xf32>
    %647 = arith.maximumf %645, %646 : vector<16x64xf32>
    %648 = vector.extract_strided_slice %419 {offsets = [0, 256], sizes = [64, 32], strides = [1, 1]} : vector<64x288xf32> to vector<64x32xf32>
    %cst_176 = arith.constant dense<0.000000e+00> : vector<16x32xf32>
    %649 = tpu.matmul %647, %648, %cst_176 {dimension_numbers = #tpu.dot_dimension_numbers<[1], [0], [0], [1], [0, 0, 1, 1], [], []>, precision = #tpu.contract_precision<fp32>} : vector<16x64xf32>, vector<64x32xf32>, vector<16x32xf32> -> vector<16x32xf32>
    %650 = vector.extract_strided_slice %421 {offsets = [5, 0], sizes = [1, 32], strides = [1, 1]} : vector<8x64xf32> to vector<1x32xf32>
    %651 = vector.broadcast %650 : vector<1x32xf32> to vector<16x32xf32>
    %652 = arith.addf %649, %651 : vector<16x32xf32>
    %653 = arith.addf %652, %640 : vector<16x32xf32>
    %654 = vector.extract_strided_slice %421 {offsets = [6, 0], sizes = [1, 32], strides = [1, 1]} : vector<8x64xf32> to vector<1x32xf32>
    %655 = vector.extract_strided_slice %421 {offsets = [7, 0], sizes = [1, 32], strides = [1, 1]} : vector<8x64xf32> to vector<1x32xf32>
    %cst_177 = arith.constant dense<0.000000e+00> : vector<16xf32>
    %656 = vector.multi_reduction <add>, %653, %cst_177 [1] : vector<16x32xf32> to vector<16xf32>
    %657 = vector.shape_cast %656 : vector<16xf32> to vector<16x1xf32>
    %cst_178 = arith.constant 3.200000e+01 : f32
    %658 = vector.broadcast %cst_178 : f32 to vector<16x1xf32>
    %659 = arith.divf %657, %658 : vector<16x1xf32>
    %660 = arith.mulf %653, %653 : vector<16x32xf32>
    %cst_179 = arith.constant dense<0.000000e+00> : vector<16xf32>
    %661 = vector.multi_reduction <add>, %660, %cst_179 [1] : vector<16x32xf32> to vector<16xf32>
    %662 = vector.shape_cast %661 : vector<16xf32> to vector<16x1xf32>
    %cst_180 = arith.constant 3.200000e+01 : f32
    %663 = vector.broadcast %cst_180 : f32 to vector<16x1xf32>
    %664 = arith.divf %662, %663 : vector<16x1xf32>
    %665 = vector.broadcast %659 : vector<16x1xf32> to vector<16x32xf32>
    %666 = arith.subf %653, %665 : vector<16x32xf32>
    %667 = arith.mulf %659, %659 : vector<16x1xf32>
    %668 = arith.subf %664, %667 : vector<16x1xf32>
    %cst_181 = arith.constant 9.99999997E-7 : f32
    %669 = vector.broadcast %cst_181 : f32 to vector<16x1xf32>
    %670 = arith.addf %668, %669 : vector<16x1xf32>
    %671 = math.rsqrt %670 : vector<16x1xf32>
    %672 = vector.broadcast %671 : vector<16x1xf32> to vector<16x32xf32>
    %673 = arith.mulf %666, %672 : vector<16x32xf32>
    %674 = vector.broadcast %654 : vector<1x32xf32> to vector<16x32xf32>
    %675 = arith.mulf %673, %674 : vector<16x32xf32>
    %676 = vector.broadcast %655 : vector<1x32xf32> to vector<16x32xf32>
    %677 = arith.addf %675, %676 : vector<16x32xf32>
    %c0_182 = arith.constant 0 : index
    %c0_183 = arith.constant 0 : index
    %678 = vector.load %arg6[%c0_182, %c0_183] : memref<16x16xf32, #tpu.memory_space<vmem>>, vector<16x16xf32>
    %679 = vector.extract_strided_slice %678 {offsets = [0, 0], sizes = [16, 8], strides = [1, 1]} : vector<16x16xf32> to vector<16x8xf32>
    %680 = vector.extract_strided_slice %415 {offsets = [0, 0], sizes = [8, 32], strides = [1, 1]} : vector<16x32xf32> to vector<8x32xf32>
    %cst_184 = arith.constant dense<0.000000e+00> : vector<16x32xf32>
    %681 = tpu.matmul %679, %680, %cst_184 {dimension_numbers = #tpu.dot_dimension_numbers<[1], [0], [0], [1], [0, 0, 1, 1], [], []>, precision = #tpu.contract_precision<fp32>} : vector<16x8xf32>, vector<8x32xf32>, vector<16x32xf32> -> vector<16x32xf32>
    %682 = vector.extract_strided_slice %678 {offsets = [0, 8], sizes = [16, 8], strides = [1, 1]} : vector<16x16xf32> to vector<16x8xf32>
    %683 = vector.extract_strided_slice %415 {offsets = [8, 0], sizes = [8, 32], strides = [1, 1]} : vector<16x32xf32> to vector<8x32xf32>
    %cst_185 = arith.constant dense<0.000000e+00> : vector<16x32xf32>
    %684 = tpu.matmul %682, %683, %cst_185 {dimension_numbers = #tpu.dot_dimension_numbers<[1], [0], [0], [1], [0, 0, 1, 1], [], []>, precision = #tpu.contract_precision<fp32>} : vector<16x8xf32>, vector<8x32xf32>, vector<16x32xf32> -> vector<16x32xf32>
    %685 = tpu.concatenate %681, %684, %677 in 1 : vector<16x32xf32>, vector<16x32xf32>, vector<16x32xf32> -> vector<16x96xf32>
    %c0_186 = arith.constant 0 : index
    %c0_187 = arith.constant 0 : index
    %686 = vector.load %arg14[%c0_186, %c0_187] : memref<96x192xf32, #tpu.memory_space<vmem>>, vector<96x192xf32>
    %687 = vector.extract_strided_slice %686 {offsets = [0, 0], sizes = [96, 96], strides = [1, 1]} : vector<96x192xf32> to vector<96x96xf32>
    %cst_188 = arith.constant dense<0.000000e+00> : vector<16x96xf32>
    %688 = tpu.matmul %685, %687, %cst_188 {dimension_numbers = #tpu.dot_dimension_numbers<[1], [0], [0], [1], [0, 0, 1, 1], [], []>, precision = #tpu.contract_precision<fp32>} : vector<16x96xf32>, vector<96x96xf32>, vector<16x96xf32> -> vector<16x96xf32>
    %689 = math.tanh %688 : vector<16x96xf32>
    %690 = vector.extract_strided_slice %686 {offsets = [0, 96], sizes = [96, 96], strides = [1, 1]} : vector<96x192xf32> to vector<96x96xf32>
    %cst_189 = arith.constant dense<0.000000e+00> : vector<16x96xf32>
    %691 = tpu.matmul %685, %690, %cst_189 {dimension_numbers = #tpu.dot_dimension_numbers<[1], [0], [0], [1], [0, 0, 1, 1], [], []>, precision = #tpu.contract_precision<fp32>} : vector<16x96xf32>, vector<96x96xf32>, vector<16x96xf32> -> vector<16x96xf32>
    %692 = arith.negf %691 : vector<16x96xf32>
    %693 = math.exp %692 : vector<16x96xf32>
    %cst_190 = arith.constant 1.000000e+00 : f32
    %694 = vector.broadcast %cst_190 : f32 to vector<16x96xf32>
    %695 = arith.addf %694, %693 : vector<16x96xf32>
    %696 = arith.divf %694, %695 : vector<16x96xf32>
    %c0_191 = arith.constant 0 : index
    %c0_192 = arith.constant 0 : index
    %697 = vector.load %arg7[%c0_191, %c0_192] : memref<16x96xf32, #tpu.memory_space<vmem>>, vector<16x96xf32>
    %698 = arith.mulf %696, %689 : vector<16x96xf32>
    %699 = arith.mulf %697, %698 : vector<16x96xf32>
    %700 = vector.extract_strided_slice %699 {offsets = [0, 0], sizes = [16, 32], strides = [1, 1]} : vector<16x96xf32> to vector<16x32xf32>
    %701 = vector.extract_strided_slice %699 {offsets = [0, 32], sizes = [16, 32], strides = [1, 1]} : vector<16x96xf32> to vector<16x32xf32>
    %702 = arith.addf %700, %701 : vector<16x32xf32>
    %703 = vector.extract_strided_slice %699 {offsets = [0, 64], sizes = [16, 32], strides = [1, 1]} : vector<16x96xf32> to vector<16x32xf32>
    %704 = arith.addf %702, %703 : vector<16x32xf32>
    %705 = arith.negf %704 : vector<16x32xf32>
    %706 = math.exp %705 : vector<16x32xf32>
    %cst_193 = arith.constant 1.000000e+00 : f32
    %707 = vector.broadcast %cst_193 : f32 to vector<16x32xf32>
    %708 = arith.addf %707, %706 : vector<16x32xf32>
    %709 = arith.divf %707, %708 : vector<16x32xf32>
    %c0_194 = arith.constant 0 : index
    %c0_195 = arith.constant 0 : index
    %710 = vector.load %arg15[%c0_194, %c0_195] : memref<16x32xf32, #tpu.memory_space<vmem>>, vector<16x32xf32>
    tpu.vector_store %arg15[%c0_194, %c0_195], %709 {strides = array<i32>} : memref<16x32xf32, #tpu.memory_space<vmem>>, vector<16x32xf32>,
    return
  }
}

</mosaic_0001>

<bundles_post_ra>
// kernel: _lambda_.1
= control target key start
LH: loop header
LB: loop body
LE: loop exit
PB: predicated region body
PF: predicated region fallthrough
CT: control target
= control target key end

     0   :  { %vm98_vm0 = vcmask 523264   ;;  %v43804_v9 = vmov 0.0   ;;  %s43768_s0 = inlined_call_operand.vmem [shape: f32[16,64], index: 0, kind: input, shape index: {}]   ;;  %s43769_s1 = inlined_call_operand.vmem [shape: f32[16,64], index: 1, kind: input, shape index: {}]   ;;  %s43770_s2 = inlined_call_operand.vmem [shape: f32[8,32], index: 2, kind: input, shape index: {}]   ;;  %s43771_s3 = inlined_call_operand.vmem [shape: f32[8,32], index: 3, kind: input, shape index: {}]   ;;  %s43772_s4 = inlined_call_operand.vmem [shape: f32[4,4], index: 4, kind: input, shape index: {}]   ;;  %s43773_s5 = inlined_call_operand.vmem [shape: f32[2,8], index: 5, kind: input, shape index: {}]   ;;  %s43774_s6 = inlined_call_operand.vmem [shape: f32[16,16], index: 6, kind: input, shape index: {}]   ;;  %s43775_s7 = inlined_call_operand.vmem [shape: f32[16,96], index: 7, kind: input, shape index: {}]   ;;  %s43776_s8 = inlined_call_operand.vmem [shape: f32[64,288], index: 8, kind: input, shape index: {}]   ;;  %s43777_s9 = inlined_call_operand.vmem [shape: f32[32,256], index: 9, kind: input, shape index: {}]   ;;  %s43778_s10 = inlined_call_operand.vmem [shape: f32[8,64], index: 10, kind: input, shape index: {}]   ;;  %s43779_s11 = inlined_call_operand.vmem [shape: f32[64,288], index: 11, kind: input, shape index: {}]   ;;  %s43780_s12 = inlined_call_operand.vmem [shape: f32[32,256], index: 12, kind: input, shape index: {}]   ;;  %s43781_s13 = inlined_call_operand.vmem [shape: f32[8,64], index: 13, kind: input, shape index: {}]   ;;  %s43782_s14 = inlined_call_operand.vmem [shape: f32[96,192], index: 14, kind: input, shape index: {}]   ;;  %s43783_s15 = inlined_call_operand.hbm [shape: f32[16,32], index: 15, kind: output, shape index: {}]  }
   0x1   :  { %v56_v0 = vld [vmem:[%s43776_s8 + $0x8] sm:$0xff]  ;;  %v59_v1 = vld [vmem:[%s43776_s8 + $0x20] sm:$0xff]  ;;  %v58_v5 = vld [vmem:[%s43776_s8 + $0x18] sm:$0xff]  ;;  %183 = vmatprep.mubr.f32.mxu0 %v43804_v9  ;;  %34593 = vmatprep.subr.mxu1 %v43804_v9 }
   0x2   :  { %v55_v2 = vld [vmem:[%s43776_s8] sm:$0xff]  ;;  %v103_v3 = vand.u32 4294901760, %v56_v0  ;;  %v107_v4 = vand.u32 4294901760, %v59_v1  ;;  %v62_v7 = vld [vmem:[%s43776_s8 + $0x38] sm:$0xff]  ;;  %v65_v8 = vld [vmem:[%s43776_s8 + $0x50] sm:$0xff]  ;;  %v109_v10 = vand.u32 4294901760, %v58_v5 }
   0x3   :  { %v105_v6 = vand.u32 4294901760, %v55_v2  ;;  %v111_v11 = vand.u32 4294901760, %v62_v7  ;;  %v115_v12 = vand.u32 4294901760, %v65_v8  ;;  %v61_v13 = vld [vmem:[%s43776_s8 + $0x30] sm:$0xff]  ;;  %v64_v14 = vld [vmem:[%s43776_s8 + $0x48] sm:$0xff]  ;;  %v71_v20 = vld [vmem:[%s43776_s8 + $0x80] sm:$0xff] }
   0x4   :  { %v68_v15 = vld [vmem:[%s43776_s8 + $0x68] sm:$0xff]  ;;  %v39861_v16 = vpack.c.bf16 %v107_v4, %v103_v3  ;;  %v39863_v17 = vsub.f32 %v56_v0, %v103_v3  ;;  %v39865_v18 = vsub.f32 %v59_v1, %v107_v4  ;;  %v67_v21 = vld [vmem:[%s43776_s8 + $0x60] sm:$0xff]  ;;  %v70_v22 = vld [vmem:[%s43776_s8 + $0x78] sm:$0xff]  ;;  %v39880_v24 = vsub.f32 %v58_v5, %v109_v10 }
   0x5   :  { %v39867_v19 = vsub.f32 %v55_v2, %v105_v6  ;;  %v39878_v23 = vpack.c.bf16 %v109_v10, %v105_v6  ;;  %v39882_v25 = vpack.c.bf16 %v115_v12, %v111_v11  ;;  %v39884_v26 = vsub.f32 %v62_v7, %v111_v11  ;;  %v74_v27 = vld [vmem:[%s43776_s8 + $0x98] sm:$0xff]  ;;  %v77_v32 = vld [vmem:[%s43776_s8 + $0xb0] sm:$0xff] }
   0x6   :  { %37498 = vmatprep.subr.bf16.mxu0 %v39861_v16  ;;  %v39890_v28 = vsub.f32 %v65_v8, %v115_v12  ;;  %v113_v29 = vand.u32 4294901760, %v61_v13  ;;  %v117_v30 = vand.u32 4294901760, %v64_v14  ;;  %v119_v31 = vand.u32 4294901760, %v68_v15  ;;  %v73_v33 = vld [vmem:[%s43776_s8 + $0x90] sm:$0xff] }
   0x7   :  { %37500 = vmatpush1.bf16.msra.mxu0 %v39878_v23  ;;  %v123_v34 = vand.u32 4294901760, %v71_v20  ;;  %v121_v35 = vand.u32 4294901760, %v67_v21  ;;  %v125_v36 = vand.u32 4294901760, %v70_v22  ;;  %v127_v37 = vand.u32 4294901760, %v74_v27 }
   0x8   :  { %20 = vsyncpa [#allocation3], 0  ;;  %37502 = vmatprep.subr.bf16.mxu0 %v39882_v25  ;;  %v39900_v38 = vpack.c.bf16 %v117_v30, %v113_v29  ;;  %v39902_v39 = vsub.f32 %v61_v13, %v113_v29  ;;  %v39904_v40 = vsub.f32 %v64_v14, %v117_v30  ;;  %v39906_v41 = vsub.f32 %v68_v15, %v119_v31  ;;  %v76_v42 = vld [vmem:[%s43776_s8 + $0xa8] sm:$0xff]  ;;  %v51_v43 = vld [vmem:[%s43768_s0] sm:$0xff]  ;;  %s39742_s24 = smov 64   ;;  %s39746_s27 = smov 32  }
   0x9   :  { %v39914_v44 = vpack.c.bf16 %v123_v34, %v119_v31  ;;  %v39916_v45 = vsub.f32 %v71_v20, %v123_v34  ;;  %v39918_v46 = vpack.c.bf16 %v125_v36, %v121_v35  ;;  %v39920_v47 = vsub.f32 %v67_v21, %v121_v35 }
   0xa   :  { %v39922_v48 = vsub.f32 %v70_v22, %v125_v36  ;;  %v131_v49 = vand.u32 4294901760, %v77_v32  ;;  %v39924_v50 = vsub.f32 %v74_v27, %v127_v37  ;;  %v129_v51 = vand.u32 4294901760, %v73_v33 }
   0xb   :  { %37504 = vmatpush1.bf16.msra.mxu0 %v39900_v38  ;;  %v133_v52 = vand.u32 4294901760, %v76_v42  ;;  %v208_v53 = vand.u32 4294901760, %v39863_v17  ;;  %v220_v54 = vand.u32 4294901760, %v39865_v18  ;;  %v99_v55 = vsel %vm98_vm0, %v51_v43, 0 }
   0xc   :  { %37506 = vmatprep.subr.bf16.mxu0 %v39914_v44  ;;  %v39931_v56 = vpack.c.bf16 %v131_v49, %v127_v37  ;;  %v39933_v57 = vsub.f32 %v77_v32, %v131_v49  ;;  %v39935_v58 = vsub.f32 %v73_v33, %v129_v51  ;;  %v39937_v59 = vand.u32 4294901760, %v99_v55 }
   0xd   :  { %v39939_v60 = vpack.c.bf16 %v133_v52, %v129_v51  ;;  %v39941_v61 = vsub.f32 %v76_v42, %v133_v52  ;;  %v209_v62 = vsub.f32 %v39863_v17, %v208_v53  ;;  %v221_v63 = vsub.f32 %v39865_v18, %v220_v54  ;;  %v52_v42 = vld [vmem:[%s43768_s0 + $0x8] sm:$0xff] }
   0xe   :  { %v39950_v0 = vsub.f32 %v99_v55, %v39937_v59  ;;  %v214_v1 = vand.u32 4294901760, %v39867_v19  ;;  %v226_v2 = vand.u32 4294901760, %v39880_v24  ;;  %v232_v3 = vand.u32 4294901760, %v39884_v26 }
   0xf   :  { %37508 = vmatpush1.bf16.msra.mxu0 %v39918_v46  ;;  %v210_v4 = vand.u32 4294901760, %v209_v62  ;;  %v222_v5 = vand.u32 4294901760, %v221_v63  ;;  %v244_v6 = vand.u32 4294901760, %v39890_v28  ;;  %v238_v7 = vand.u32 4294901760, %v39902_v39 }
  0x10   :  { %37510 = vmatprep.subr.bf16.mxu0 %v39931_v56  ;;  %v186_v8 = vand.u32 4294901760, %v39950_v0  ;;  %v215_v10 = vsub.f32 %v39867_v19, %v214_v1  ;;  %v227_v11 = vsub.f32 %v39880_v24, %v226_v2  ;;  %v233_v12 = vsub.f32 %v39884_v26, %v232_v3 }
  0x11   :  { %v37513_v13 = vpack.c.bf16 %v222_v5, %v210_v4  ;;  %v245_v14 = vsub.f32 %v39890_v28, %v244_v6  ;;  %v239_v15 = vsub.f32 %v39902_v39, %v238_v7  ;;  %v250_v20 = vand.u32 4294901760, %v39904_v40 }
  0x12   :  { %v187_v21 = vsub.f32 %v39950_v0, %v186_v8  ;;  %v216_v22 = vand.u32 4294901760, %v215_v10  ;;  %v228_v27 = vand.u32 4294901760, %v227_v11  ;;  %v234_v29 = vand.u32 4294901760, %v233_v12 }
  0x13   :  { %37512 = vmatpush1.bf16.msra.mxu0 %v39939_v60  ;;  %v246_v30 = vand.u32 4294901760, %v245_v14  ;;  %v240_v31 = vand.u32 4294901760, %v239_v15  ;;  %v251_v32 = vsub.f32 %v39904_v40, %v250_v20  ;;  %v256_v33 = vand.u32 4294901760, %v39906_v41 }
  0x14   :  { %37514 = vmatprep.subr.bf16.mxu0 %v37513_v13  ;;  %v188_v34 = vand.u32 4294901760, %v187_v21  ;;  %v37515_v35 = vpack.c.bf16 %v228_v27, %v216_v22  ;;  %v268_v36 = vand.u32 4294901760, %v39916_v45  ;;  %v262_v37 = vand.u32 4294901760, %v39920_v47 }
  0x15   :  { %v37517_v43 = vpack.c.bf16 %v246_v30, %v234_v29  ;;  %v252_v49 = vand.u32 4294901760, %v251_v32  ;;  %v257_v51 = vsub.f32 %v39906_v41, %v256_v33  ;;  %v274_v52 = vand.u32 4294901760, %v39922_v48 }
  0x16   :  { %189 = vmatmul.mubr.f32.vlgmr.msra.gmra.mrb[0].mxu0 %v188_v34  ;;  %v269_v55 = vsub.f32 %v39916_v45, %v268_v36  ;;  %v263_v62 = vsub.f32 %v39920_v47, %v262_v37  ;;  %v280_v63 = vand.u32 4294901760, %v39924_v50  ;;  %v292_v4 = vand.u32 4294901760, %v39933_v57 }
  0x17   :  { %37516 = vmatpush1.bf16.msra.mxu0 %v37515_v35  ;;  %v37519_v5 = vpack.c.bf16 %v252_v49, %v240_v31  ;;  %v258_v10 = vand.u32 4294901760, %v257_v51  ;;  %v275_v11 = vsub.f32 %v39922_v48, %v274_v52  ;;  %194 = vmatprep.mubr.f32.mxu0 %v43804_v9  ;;  %v101_v12 = vsel %vm98_vm0, %v52_v42, 0 }
  0x18   :  { %37518 = vmatprep.subr.bf16.mxu0 %v37517_v43  ;;  %v270_v13 = vand.u32 4294901760, %v269_v55  ;;  %v264_v14 = vand.u32 4294901760, %v263_v62  ;;  %v281_v15 = vsub.f32 %v39924_v50, %v280_v63  ;;  %v293_v21 = vsub.f32 %v39933_v57, %v292_v4 }
  0x19   :  { %v276_v22 = vand.u32 4294901760, %v275_v11  ;;  %v40012_v27 = vand.u32 4294901760, %v101_v12  ;;  %v286_v29 = vand.u32 4294901760, %v39935_v58  ;;  %v298_v30 = vand.u32 4294901760, %v39941_v61 }
  0x1a   :  { %v37521_v31 = vpack.c.bf16 %v270_v13, %v258_v10  ;;  %v282_v32 = vand.u32 4294901760, %v281_v15  ;;  %v294_v34 = vand.u32 4294901760, %v293_v21  ;;  %v37533_v15 = vpack.c.bf16 %v39890_v28, %v39884_v26 }
  0x1b   :  { %37520 = vmatpush1.bf16.msra.mxu0 %v37519_v5  ;;  %v37523_v35 = vpack.c.bf16 %v276_v22, %v264_v14  ;;  %v196_v42 = vsub.f32 %v101_v12, %v40012_v27  ;;  %v287_v43 = vsub.f32 %v39935_v58, %v286_v29  ;;  %v299_v49 = vsub.f32 %v39941_v61, %v298_v30 }
  0x1c   :  { %37522 = vmatprep.subr.bf16.mxu0 %v37521_v31  ;;  %v37525_v51 = vpack.c.bf16 %v294_v34, %v282_v32  ;;  %v37529_v12 = vpack.c.bf16 %v39865_v18, %v39863_v17  ;;  %v37531_v14 = vpack.c.bf16 %v39880_v24, %v39867_v19  ;;  %v37535_v21 = vpack.c.bf16 %v39904_v40, %v39902_v39 }
  0x1d   :  { %v197_v55 = vand.u32 4294901760, %v196_v42  ;;  %v288_v62 = vand.u32 4294901760, %v287_v43  ;;  %v300_v11 = vand.u32 4294901760, %v299_v49  ;;  %v37537_v22 = vpack.c.bf16 %v39916_v45, %v39906_v41 }
  0x1e   :  { %v37539_v31 = vpack.c.bf16 %v39922_v48, %v39920_v47  ;;  %v37541_v32 = vpack.c.bf16 %v39933_v57, %v39924_v50  ;;  %v37543_v34 = vpack.c.bf16 %v39941_v61, %v39935_v58  ;;  %v37565_v43 = vpack.c.bf16 %v244_v6, %v232_v3 }
  0x1f   :  { %37524 = vmatpush1.bf16.msra.mxu0 %v37523_v35  ;;  %v198_v10 = vsub.f32 %v196_v42, %v197_v55  ;;  %v37527_v5 = vpack.c.bf16 %v300_v11, %v288_v62  ;;  %v37561_v35 = vpack.c.bf16 %v220_v54, %v208_v53  ;;  %v37567_v17 = vpack.c.bf16 %v250_v20, %v238_v7 }
  0x20   :  { %37526 = vmatprep.subr.bf16.mxu0 %v37525_v51  ;;  %v37569_v18 = vpack.c.bf16 %v268_v36, %v256_v33  ;;  %v37571_v19 = vpack.c.bf16 %v274_v52, %v262_v37  ;;  %v37573_v24 = vpack.c.bf16 %v292_v4, %v280_v63  ;;  %v37575_v26 = vpack.c.bf16 %v298_v30, %v286_v29 }
  0x21   :  { %v199_v13 = vand.u32 4294901760, %v198_v10  ;;  %vm39741_vm1 = vmmov 0   ;;  %vm1283_vm2 = vcmask 1043456   ;;  %vm816_vm3 = vcmask 261120  }
  0x22   :  { %34595 = vmatprep.mubr.msk.f32.mxu1 %vm39741_vm1, %v43804_v9  ;;  %v43788_v6 = vmov 0   ;;  %v43786_v36 = vmov -1e+09   ;;  %vm1267_vm8 = vcmask 27648   ;;  %vm1279_vm9 = vcmask 31744  }
  0x23   :  { %200 = vmatmul.mubr.f32.gmra.mrb[2].mxu0 %v199_v13 }
  0x24   :  { %37528 = vmatpush1.bf16.msra.mxu0 %v37527_v5  ;;  %350 = vmatprep.mubr.f32.mxu0 %v43804_v9 }
  0x25   :  { %37530 = vmatprep.subr.bf16.mxu0 %v37529_v12 }
  0x27   :  { %352 = vmatmul.mubr.f32.vlgmr.msra.gmra.mrb[0].mxu0 %v39937_v59 }
  0x28   :  { %37532 = vmatpush1.bf16.msra.mxu0 %v37531_v14  ;;  %357 = vmatprep.mubr.f32.mxu0 %v43804_v9 }
  0x29   :  { %37534 = vmatprep.subr.bf16.mxu0 %v37533_v15 }
  0x2b   :  { %359 = vmatmul.mubr.f32.gmra.mrb[2].mxu0 %v40012_v27 }
  0x2c   :  { %37536 = vmatpush1.bf16.msra.mxu0 %v37535_v21  ;;  %461 = vmatprep.mubr.f32.mxu0 %v43804_v9 }
  0x2d   :  { %37538 = vmatprep.subr.bf16.mxu0 %v37537_v22 }
  0x30   :  { %37540 = vmatpush1.bf16.msra.mxu0 %v37539_v31 }
  0x31   :  { %37542 = vmatprep.subr.bf16.mxu0 %v37541_v32 }
  0x34   :  { %37544 = vmatpush1.bf16.msra.mxu0 %v37543_v34 }
  0x35   :  { %37546 = vmatprep.subr.bf16.mxu0 %v39861_v16 }
  0x37   :  { %464 = vmatmul.mubr.f32.vlgmr.msra.gmra.mrb[0].mxu0 %v39950_v0  ;;  %v799_v0 = vlaneseq }
  0x38   :  { %37548 = vmatpush1.bf16.msra.mxu0 %v39878_v23  ;;  %469 = vmatprep.mubr.f32.mxu0 %v43804_v9 }
  0x39   :  { %37550 = vmatprep.subr.bf16.mxu0 %v39882_v25 }
  0x3b   :  { %472 = vmatmul.mubr.f32.gmra.mrb[2].mxu0 %v196_v42  ;;  %v37563_v42 = vpack.c.bf16 %v226_v2, %v214_v1  ;;  %v53_v1 = vld [vmem:[%s43772_s4] sm:$0xf]  ;;  %v40162_v2 = vshrl.u32 %v799_v0, 7  ;;  %s39745_s4 = smov 96  }
  0x3c   :  { %37552 = vmatpush1.bf16.msra.mxu0 %v39900_v38  ;;  %558 = vmatprep.mubr.f32.mxu0 %v43804_v9  ;;  %vm804_vm4 = vcmp.gt.f32.partialorder %v53_v1, 0.5 }
  0x3d   :  { %37554 = vmatprep.subr.bf16.mxu0 %v39914_v44  ;;  %v40165_v3 = vsub.s32 0, %v40162_v2  ;;  %v40168_v7 = vsel %vm804_vm4, 1, %v43788_v6  ;;  %vm10369_vm4 = vcmask 11264  }
  0x3f   :  { %v809_v20 = vrot.slane %v40168_v7, %v40165_v3 }
  0x40   :  { %37556 = vmatpush1.bf16.msra.mxu0 %v39918_v46 }
  0x41   :  { %37558 = vmatprep.subr.bf16.mxu0 %v39931_v56  ;;  %vm810_vm6 = vcmp.eq.s32.totalorder %v809_v20, 1 }
  0x44   :  { %37560 = vmatpush1.bf16.msra.mxu0 %v39939_v60 }
  0x45   :  { %37562 = vmatprep.subr.bf16.mxu0 %v37561_v35 }
  0x47   :  { %562 = vmatmul.mubr.f32.vlgmr.msra.gmra.mrb[0].mxu0 %v186_v8  ;;  %v802_v8 = vand.u32 127, %v799_v0 }
  0x48   :  { %37564 = vmatpush1.bf16.msra.mxu0 %v37563_v42  ;;  %567 = vmatprep.mubr.f32.mxu0 %v43804_v9 }
  0x49   :  { %37566 = vmatprep.subr.bf16.mxu0 %v37565_v43  ;;  %vm40173_vm5 = vcmp.le.s32.totalorder %v802_v8, %v40162_v2 }
  0x4a   :  { %vm811_vm7 = vmand %vm40173_vm5, %vm810_vm6  ;;  %vm10387_vm6 = vcmask 1041408  }
  0x4b   :  { %571 = vmatmul.mubr.f32.gmra.mrb[2].mxu0 %v197_v55  ;;  %v40180_v37 = vsel %vm811_vm7, 0.0, %v43786_v36  ;;  %vm10383_vm7 = vcmask 15360  }
  0x4c   :  { %37568 = vmatpush1.bf16.msra.mxu0 %v37567_v17  ;;  %689 = vmatprep.mubr.f32.mxu0 %v43804_v9 }
  0x4d   :  { %37570 = vmatprep.subr.bf16.mxu0 %v37569_v18 }
  0x50   :  { %37572 = vmatpush1.bf16.msra.mxu0 %v37571_v19 }
  0x51   :  { %37574 = vmatprep.subr.bf16.mxu0 %v37573_v24 }
  0x54   :  { %37576 = vmatpush1.bf16.msra.mxu0 %v37575_v26 }
  0x55   :  { %37578 = vmatprep.subr.bf16.mxu0 %v39861_v16 }
  0x57   :  { %691 = vmatmul.mubr.f32.vlgmr.msra.gmra.mrb[0].mxu0 %v39937_v59 }
  0x58   :  { %37580 = vmatpush1.bf16.msra.mxu0 %v39878_v23  ;;  %696 = vmatprep.mubr.f32.mxu0 %v43804_v9 }
  0x59   :  { %37582 = vmatprep.subr.bf16.mxu0 %v39882_v25 }
  0x5b   :  { %698 = vmatmul.mubr.f32.gmra.mrb[2].mxu0 %v40012_v27 }
  0x5c   :  { %37584 = vmatpush1.bf16.msra.mxu0 %v39900_v38  ;;  %784 = vmatprep.mubr.f32.mxu0 %v43804_v9 }
  0x5d   :  { %37586 = vmatprep.subr.bf16.mxu0 %v39914_v44 }
  0x60   :  { %37588 = vmatpush1.bf16.msra.mxu0 %v39918_v46 }
  0x61   :  { %37590 = vmatprep.subr.bf16.mxu0 %v39931_v56 }
  0x64   :  { %37592 = vmatpush1.bf16.msra.mxu0 %v39939_v60 }
  0x65   :  { %34743 = vmatprep.subr.mxu0 %v43804_v9 }
  0x67   :  { %786 = vmatmul.mubr.f32.vlgmr.msra.gmra.mrb[0].mxu0 %v39937_v59 }
  0x68   :  { %791 = vmatprep.mubr.f32.mxu0 %v43804_v9 }
  0x6b   :  { %793 = vmatmul.mubr.f32.gmra.mrb[2].mxu0 %v40012_v27 }
  0x6c   :  { %34745 = vmatprep.mubr.msk.f32.mxu0 %vm39741_vm1, %v43804_v9 }
 0x13a   :  { %v40111_v16 = vpop.f32.mrb[0].mxu0 }
 0x13b   :  { %814 = vrot.lane.b32.xlu0 %v40111_v16, %s39742_s24  ;;  %v40115_v23 = vpop.f32.mrb[1].mxu0  ;;  %v817_v41 = vsel %vm816_vm3, %v40111_v16, 0 }
 0x13c   :  { %v3127_v25 = vrot.slane %v40115_v23, 4  ;;  %v887_v44 = vand.u32 4294901760, %v817_v41  ;;  %v1285_v60 = vsel %vm1283_vm2, %v40115_v23, 0 }
 0x13d   :  { %v40153_v61 = vand.u32 4294901760, %v1285_v60 }
 0x13e   :  { %v40121_v28 = vsel %vm1283_vm2, %v3127_v25, 0  ;;  %v40123_v38 = vpop.f32.mrb[2].mxu0  ;;  %v888_v45 = vsub.f32 %v817_v41, %v887_v44 }
 0x13f   :  { %v40126_v39 = vand.u32 4294901760, %v40121_v28  ;;  %v40128_v40 = vpop.f32.mrb[3].mxu0  ;;  %v1365_v10 = vsub.f32 %v1285_v60, %v40153_v61  ;;  %v40237_v60 = vrot.slane %v40123_v38, 4 }
 0x140   :  { %v889_v46 = vand.u32 4294901760, %v888_v45 }
 0x141   :  { %34744 = vmatpush3.msra.mxu0 %v40126_v39  ;;  %v1366_v14 = vand.u32 4294901760, %v1365_v10 }
 0x142   :  { %34748 = vmatprep.subr.mxu0 %v43804_v9  ;;  %v890_v50 = vsub.f32 %v888_v45, %v889_v46 }
 0x143   :  { %v1367_v22 = vsub.f32 %v1365_v10, %v1366_v14 }
 0x144   :  { %v891_v56 = vand.u32 4294901760, %v890_v50 }
 0x145   :  { %v1368_v34 = vand.u32 4294901760, %v1367_v22 }
 0x1ad   :  { %v815_v47 = vpop.permute.xlu0 %814 }
 0x1ae   :  { %v819_v48 = vsel %vm816_vm3, %v815_v47, 0 }
 0x1af   :  { %v822_v53 = vand.u32 4294901760, %v819_v48 }
 0x1b1   :  { %v899_v54 = vsub.f32 %v819_v48, %v822_v53  ;;  %34594 = vmatpush3.xpose.msra.mxu1 %v822_v53 }
 0x1b2   :  { %34598 = vmatprep.subr.mxu1 %v43804_v9 }
 0x1b3   :  { %v900_v57 = vand.u32 4294901760, %v899_v54 }
 0x1b4   :  { %34596 = vmatmul.mubr.f32.vlgmr.msra.gmra.mrb[0].mxu1 %v891_v56 }
 0x1b5   :  { %v901_v58 = vsub.f32 %v899_v54, %v900_v57  ;;  %34600 = vmatprep.mubr.msk.f32.mxu1 %vm39741_vm1, %v43804_v9 }
 0x1b7   :  { %v902_v59 = vand.u32 4294901760, %v901_v58 }
 0x1b9   :  { %34599 = vmatpush3.xpose.msra.mxu1 %v902_v59  ;;  %v2663_v59 = vrot.slane %v40111_v16, 4 }
 0x1ba   :  { %34603 = vmatprep.subr.mxu1 %v43804_v9 }
 0x1bc   :  { %34601 = vmatmul.mubr.f32.vlgmr.msra.gmra.mrb[0].mxu1 %v887_v44 }
 0x1bd   :  { %34604 = vmatpush3.xpose.msra.mxu1 %v899_v54  ;;  %34605 = vmatprep.mubr.msk.f32.mxu1 %vm39741_vm1, %v43804_v9 }
 0x1be   :  { %34608 = vmatprep.subr.mxu1 %v43804_v9 }
 0x1c4   :  { %34606 = vmatmul.mubr.f32.vlgmr.msra.gmra.mrb[0].mxu1 %v888_v45 }
 0x1c5   :  { %34609 = vmatpush3.xpose.msra.mxu1 %v822_v53  ;;  %34610 = vmatprep.mubr.msk.f32.mxu1 %vm39741_vm1, %v43804_v9 }
 0x1c6   :  { %34613 = vmatprep.subr.mxu1 %v43804_v9 }
 0x1cc   :  { %34611 = vmatmul.mubr.f32.vlgmr.msra.gmra.mrb[0].mxu1 %v889_v46 }
 0x1cd   :  { %34614 = vmatpush3.xpose.msra.mxu1 %v900_v57  ;;  %34615 = vmatprep.mubr.msk.f32.mxu1 %vm39741_vm1, %v43804_v9 }
 0x1ce   :  { %34618 = vmatprep.subr.mxu1 %v43804_v9 }
 0x1d4   :  { %34616 = vmatmul.mubr.f32.vlgmr.msra.gmra.mrb[0].mxu1 %v887_v44 }
 0x1d5   :  { %34619 = vmatpush3.xpose.msra.mxu1 %v822_v53  ;;  %34620 = vmatprep.mubr.msk.f32.mxu1 %vm39741_vm1, %v43804_v9 }
 0x1d6   :  { %34623 = vmatprep.subr.mxu1 %v43804_v9 }
 0x1dc   :  { %34621 = vmatmul.mubr.f32.vlgmr.msra.gmra.mrb[0].mxu1 %v887_v44 }
 0x1dd   :  { %34624 = vmatpush3.msra.mxu1 %v40153_v61  ;;  %34625 = vmatprep.mubr.msk.f32.mxu1 %vm39741_vm1, %v43804_v9 }
 0x1de   :  { %34628 = vmatprep.subr.mxu1 %v43804_v9 }
 0x2af   :  { %v1263_v52 = vpop.f32.mrb[0].mxu1 }
 0x2b0   :  { %v38817_v63 = vadd.f32 %v1263_v52, %v40180_v37  ;;  %v34622_v4 = vpop.f32.mrb[1].mxu1 }
 0x2b2   :  { %v1268_v27 = vsel %vm1267_vm8, %v38817_v63, -inf }
 0x2b3   :  { %1269 = vmax.xlane.f32.xlu0 %v1268_v27 }
 0x340   :  { %v1270_v29 = vpop.xlane.xlu0 %1269 }
 0x341   :  { %v1271_v30 = vsub.f32 %v38817_v63, %v1270_v29 }
 0x343   :  { %v1272_v49 = vmul.f32 1.442695, %v1271_v30 }
 0x345   :  { %39537 = vpow2.f32 %v1272_v49 }
 0x34f   :  { %v39538_v51 = vpop.eup %39537 }
 0x350   :  { %v1274_v55 = vsel %vm1267_vm8, %v39538_v51, 0.0 }
 0x351   :  { %1275 = vadd.xlane.f32.xlu1 %v1274_v55 }
 0x362   :  { %1733 = vrot.lane.b32.xlu1 %v40111_v16, %s39745_s4 }
 0x366   :  { %1735 = vrot.lane.b32.xlu1 %v40111_v16, %s39746_s27 }
 0x3de   :  { %v1276_v62 = vpop.xlane.xlu1 %1275 }
 0x3df   :  { %39539 = vrcp.f32 %v1276_v62 }
 0x3e2   :  { %v1734_v35 = vpop.permute.xlu1 %1733 }
 0x3e3   :  { %v1737_v43 = vsel %vm816_vm3, %v1734_v35, 0 }
 0x3e4   :  { %v1807_v18 = vand.u32 4294901760, %v1737_v43 }
 0x3e6   :  { %v1736_v42 = vpop.permute.xlu1 %1735  ;;  %v1808_v24 = vsub.f32 %v1737_v43, %v1807_v18 }
 0x3e7   :  { %v1739_v17 = vsel %vm816_vm3, %v1736_v42, 0 }
 0x3e8   :  { %v1742_v19 = vand.u32 4294901760, %v1739_v17  ;;  %v1809_v41 = vand.u32 4294901760, %v1808_v24 }
 0x3e9   :  { %v39540_v11 = vpop.eup %39539 }
 0x3ea   :  { %v1278_v5 = vmul.f32 %v39540_v11, %v39538_v51  ;;  %v1819_v26 = vsub.f32 %v1739_v17, %v1742_v19  ;;  %v1810_v45 = vsub.f32 %v1808_v24, %v1809_v41 }
 0x3ec   :  { %v1281_v13 = vsel %vm1279_vm9, %v1278_v5, 0  ;;  %v1820_v44 = vand.u32 4294901760, %v1819_v26  ;;  %v1811_v47 = vand.u32 4294901760, %v1810_v45 }
 0x3ed   :  { %v1353_v12 = vand.u32 4294901760, %v1281_v13 }
 0x3ee   :  { %v1821_v46 = vsub.f32 %v1819_v26, %v1820_v44 }
 0x3ef   :  { %v1354_v15 = vsub.f32 %v1281_v13, %v1353_v12 }
 0x3f0   :  { %v1822_v48 = vand.u32 4294901760, %v1821_v46 }
 0x3f1   :  { %v1355_v21 = vand.u32 4294901760, %v1354_v15 }
 0x3f3   :  { %v1356_v31 = vsub.f32 %v1354_v15, %v1355_v21 }
 0x3f5   :  { %v1357_v32 = vand.u32 4294901760, %v1356_v31 }
 0x3f7   :  { %34626 = vmatmul.mubr.f32.vlgmr.msra.gmra.mrb[2].mxu1 %v1357_v32 }
 0x3f8   :  { %34629 = vmatpush3.msra.mxu1 %v1368_v34  ;;  %34630 = vmatprep.mubr.msk.f32.mxu1 %vm39741_vm1, %v43804_v9 }
 0x3f9   :  { %34633 = vmatprep.subr.mxu1 %v43804_v9 }
 0x3ff   :  { %34631 = vmatmul.mubr.f32.vlgmr.msra.gmra.mrb[2].mxu1 %v1353_v12 }
 0x400   :  { %34634 = vmatpush3.msra.mxu1 %v1365_v10  ;;  %34635 = vmatprep.mubr.msk.f32.mxu1 %vm39741_vm1, %v43804_v9 }
 0x401   :  { %34638 = vmatprep.subr.mxu1 %v43804_v9 }
 0x407   :  { %34636 = vmatmul.mubr.f32.vlgmr.msra.gmra.mrb[2].mxu1 %v1354_v15 }
 0x408   :  { %34639 = vmatpush3.msra.mxu1 %v40153_v61  ;;  %34640 = vmatprep.mubr.msk.f32.mxu1 %vm39741_vm1, %v43804_v9 }
 0x409   :  { %34643 = vmatprep.subr.mxu1 %v43804_v9 }
 0x40f   :  { %34641 = vmatmul.mubr.f32.vlgmr.msra.gmra.mrb[2].mxu1 %v1355_v21 }
 0x410   :  { %34644 = vmatpush3.msra.mxu1 %v1366_v14  ;;  %34645 = vmatprep.mubr.msk.f32.mxu1 %vm39741_vm1, %v43804_v9  ;;  %v2666_v14 = vsel %vm816_vm3, %v2663_v59, 0 }
 0x411   :  { %34648 = vmatprep.subr.mxu1 %v43804_v9  ;;  %v2736_v21 = vand.u32 4294901760, %v2666_v14 }
 0x413   :  { %v2737_v31 = vsub.f32 %v2666_v14, %v2736_v21 }
 0x415   :  { %v2738_v34 = vand.u32 4294901760, %v2737_v31 }
 0x417   :  { %34646 = vmatmul.mubr.f32.vlgmr.msra.gmra.mrb[2].mxu1 %v1353_v12  ;;  %v2739_v42 = vsub.f32 %v2737_v31, %v2738_v34 }
 0x418   :  { %34649 = vmatpush3.msra.mxu1 %v40153_v61  ;;  %34650 = vmatprep.mubr.msk.f32.mxu1 %vm39741_vm1, %v43804_v9 }
 0x419   :  { %34653 = vmatprep.subr.mxu1 %v43804_v9  ;;  %v2740_v17 = vand.u32 4294901760, %v2739_v42 }
 0x41f   :  { %34651 = vmatmul.mubr.f32.vlgmr.msra.gmra.mrb[2].mxu1 %v1353_v12 }
 0x420   :  { %34654 = vmatpush3.xpose.msra.mxu1 %v1742_v19  ;;  %34655 = vmatprep.mubr.msk.f32.mxu1 %vm39741_vm1, %v43804_v9 }
 0x421   :  { %34658 = vmatprep.subr.mxu1 %v43804_v9 }
 0x423   :  { %34656 = vmatmul.mubr.f32.vlgmr.msra.gmra.mrb[4].mxu1 %v1811_v47 }
 0x424   :  { %34659 = vmatpush3.xpose.msra.mxu1 %v1822_v48  ;;  %34660 = vmatprep.mubr.msk.f32.mxu1 %vm39741_vm1, %v43804_v9 }
 0x425   :  { %34663 = vmatprep.subr.mxu1 %v43804_v9 }
 0x42b   :  { %34661 = vmatmul.mubr.f32.vlgmr.msra.gmra.mrb[4].mxu1 %v1807_v18 }
 0x42c   :  { %34664 = vmatpush3.xpose.msra.mxu1 %v1819_v26  ;;  %34665 = vmatprep.mubr.msk.f32.mxu1 %vm39741_vm1, %v43804_v9 }
 0x42d   :  { %34668 = vmatprep.subr.mxu1 %v43804_v9 }
 0x433   :  { %34666 = vmatmul.mubr.f32.vlgmr.msra.gmra.mrb[4].mxu1 %v1808_v24 }
 0x434   :  { %34669 = vmatpush3.xpose.msra.mxu1 %v1742_v19  ;;  %34670 = vmatprep.mubr.msk.f32.mxu1 %vm39741_vm1, %v43804_v9 }
 0x435   :  { %34673 = vmatprep.subr.mxu1 %v43804_v9 }
 0x43b   :  { %34671 = vmatmul.mubr.f32.vlgmr.msra.gmra.mrb[4].mxu1 %v1809_v41 }
 0x43c   :  { %34674 = vmatpush3.xpose.msra.mxu1 %v1820_v44  ;;  %34675 = vmatprep.mubr.msk.f32.mxu1 %vm39741_vm1, %v43804_v9 }
 0x43d   :  { %34678 = vmatprep.subr.mxu1 %v43804_v9 }
 0x443   :  { %34676 = vmatmul.mubr.f32.vlgmr.msra.gmra.mrb[4].mxu1 %v1807_v18 }
 0x444   :  { %34679 = vmatpush3.xpose.msra.mxu1 %v1742_v19  ;;  %34680 = vmatprep.mubr.msk.f32.mxu1 %vm39741_vm1, %v43804_v9 }
 0x445   :  { %34683 = vmatprep.subr.mxu1 %v43804_v9 }
 0x44b   :  { %34681 = vmatmul.mubr.f32.vlgmr.msra.gmra.mrb[4].mxu1 %v1807_v18 }
 0x44c   :  { %34685 = vmatprep.mubr.msk.f32.mxu1 %vm39741_vm1, %v43804_v9 }
 0x4f2   :  { %v40230_v50 = vpop.f32.mrb[2].mxu1 }
 0x4f3   :  { %v34652_v53 = vpop.f32.mrb[3].mxu1 }
 0x51e   :  { %v2183_v54 = vpop.f32.mrb[4].mxu1 }
 0x51f   :  { %v38818_v56 = vadd.f32 %v2183_v54, %v40180_v37  ;;  %v34682_v57 = vpop.f32.mrb[5].mxu1 }
 0x521   :  { %v2187_v58 = vsel %vm1267_vm8, %v38818_v56, -inf }
 0x522   :  { %2188 = vmax.xlane.f32.xlu1 %v2187_v58 }
 0x533   :  { %3579 = vrot.lane.b32.xlu1 %v2663_v59, %s39745_s4 }
 0x537   :  { %6356 = vrot.lane.b32.xlu1 %v40237_v60, %s39742_s24 }
 0x53b   :  { %7273 = vrot.lane.b32.xlu1 %v40237_v60, %s39746_s27 }
 0x5af   :  { %v2189_v61 = vpop.xlane.xlu1 %2188 }
 0x5b0   :  { %v2190_v0 = vsub.f32 %v38818_v56, %v2189_v61  ;;  %v4512_v61 = vsel %vm816_vm3, %v40123_v38, 0 }
 0x5b2   :  { %v2191_v1 = vmul.f32 1.442695, %v2190_v0 }
 0x5b3   :  { %v3580_v19 = vpop.permute.xlu1 %3579 }
 0x5b4   :  { %39541 = vpow2.f32 %v2191_v1  ;;  %v3583_v26 = vsel %vm816_vm3, %v3580_v19, 0  ;;  %v4582_v1 = vand.u32 4294901760, %v4512_v61 }
 0x5b5   :  { %v3653_v44 = vand.u32 4294901760, %v3583_v26 }
 0x5b7   :  { %v3654_v46 = vsub.f32 %v3583_v26, %v3653_v44 }
 0x5b9   :  { %v3655_v48 = vand.u32 4294901760, %v3654_v46 }
 0x5bb   :  { %v3656_v54 = vsub.f32 %v3654_v46, %v3655_v48 }
 0x5bd   :  { %v3657_v57 = vand.u32 4294901760, %v3656_v54 }
 0x5be   :  { %v39542_v8 = vpop.eup %39541 }
 0x5bf   :  { %v2193_v20 = vsel %vm1267_vm8, %v39542_v8, 0.0 }
 0x5c0   :  { %2194 = vadd.xlane.f32.xlu0 %v2193_v20  ;;  %v4583_v20 = vsub.f32 %v4512_v61, %v4582_v1 }
 0x5d6   :  { %2198 = vrot.lane.b32.xlu0 %v40115_v23, %s39745_s4 }
 0x5da   :  { %2664 = vrot.lane.b32.xlu0 %v2663_v59, %s39742_s24 }
 0x5de   :  { %3581 = vrot.lane.b32.xlu0 %v2663_v59, %s39746_s27 }
 0x5e2   :  { %4510 = vrot.lane.b32.xlu0 %v40123_v38, %s39742_s24 }
 0x5e6   :  { %5425 = vrot.lane.b32.xlu0 %v40123_v38, %s39745_s4 }
 0x5ea   :  { %5427 = vrot.lane.b32.xlu0 %v40123_v38, %s39746_s27  ;;  %v4584_v38 = vand.u32 4294901760, %v4583_v20 }
 0x5ee   :  { %7271 = vrot.lane.b32.xlu0 %v40237_v60, %s39745_s4 }
 0x64d   :  { %v2195_v16 = vpop.xlane.xlu0 %2194 }
 0x64e   :  { %39543 = vrcp.f32 %v2195_v16 }
 0x651   :  { %v2199_v37 = vpop.permute.xlu0 %2198 }
 0x652   :  { %v2203_v52 = vsel %vm1283_vm2, %v2199_v37, 0 }
 0x653   :  { %v2206_v63 = vand.u32 4294901760, %v2203_v52 }
 0x655   :  { %34684 = vmatpush3.msra.mxu1 %v2206_v63  ;;  %v2283_v29 = vsub.f32 %v2203_v52, %v2206_v63  ;;  %v2665_v12 = vpop.permute.xlu0 %2664  ;;  %v4585_v52 = vsub.f32 %v4583_v20, %v4584_v38 }
 0x656   :  { %34688 = vmatprep.subr.mxu1 %v43804_v9  ;;  %v2668_v15 = vsel %vm816_vm3, %v2665_v12, 0 }
 0x657   :  { %v2284_v51 = vand.u32 4294901760, %v2283_v29  ;;  %v2671_v22 = vand.u32 4294901760, %v2668_v15 }
 0x658   :  { %v39544_v4 = vpop.eup %39543 }
 0x659   :  { %v2197_v27 = vmul.f32 %v39544_v4, %v39542_v8  ;;  %v2285_v11 = vsub.f32 %v2283_v29, %v2284_v51  ;;  %v2748_v32 = vsub.f32 %v2668_v15, %v2671_v22  ;;  %v3582_v24 = vpop.permute.xlu0 %3581  ;;  %v4586_v4 = vand.u32 4294901760, %v4585_v52 }
 0x65a   :  { %v3585_v41 = vsel %vm816_vm3, %v3582_v24, 0 }
 0x65b   :  { %v2201_v30 = vsel %vm1279_vm9, %v2197_v27, 0  ;;  %v2286_v13 = vand.u32 4294901760, %v2285_v11  ;;  %v2749_v35 = vand.u32 4294901760, %v2748_v32  ;;  %v3588_v45 = vand.u32 4294901760, %v3585_v41 }
 0x65c   :  { %v2271_v49 = vand.u32 4294901760, %v2201_v30 }
 0x65d   :  { %v2750_v43 = vsub.f32 %v2748_v32, %v2749_v35  ;;  %v3665_v47 = vsub.f32 %v3585_v41, %v3588_v45  ;;  %v4511_v59 = vpop.permute.xlu0 %4510 }
 0x65e   :  { %v2272_v55 = vsub.f32 %v2201_v30, %v2271_v49  ;;  %v4514_v0 = vsel %vm816_vm3, %v4511_v59, 0 }
 0x65f   :  { %v2751_v18 = vand.u32 4294901760, %v2750_v43  ;;  %v3666_v53 = vand.u32 4294901760, %v3665_v47  ;;  %v4517_v8 = vand.u32 4294901760, %v4514_v0 }
 0x660   :  { %v2273_v62 = vand.u32 4294901760, %v2272_v55 }
 0x661   :  { %v3667_v56 = vsub.f32 %v3665_v47, %v3666_v53  ;;  %v4594_v16 = vsub.f32 %v4514_v0, %v4517_v8 }
 0x662   :  { %v2274_v10 = vsub.f32 %v2272_v55, %v2273_v62 }
 0x663   :  { %v3668_v58 = vand.u32 4294901760, %v3667_v56  ;;  %v4595_v37 = vand.u32 4294901760, %v4594_v16 }
 0x664   :  { %v2275_v5 = vand.u32 4294901760, %v2274_v10 }
 0x666   :  { %34686 = vmatmul.mubr.f32.vlgmr.msra.gmra.mrb[6].mxu1 %v2275_v5 }
 0x667   :  { %34689 = vmatpush3.msra.mxu1 %v2286_v13  ;;  %34690 = vmatprep.mubr.msk.f32.mxu1 %vm39741_vm1, %v43804_v9 }
 0x668   :  { %34693 = vmatprep.subr.mxu1 %v43804_v9 }
 0x66e   :  { %34691 = vmatmul.mubr.f32.vlgmr.msra.gmra.mrb[6].mxu1 %v2271_v49 }
 0x66f   :  { %34694 = vmatpush3.msra.mxu1 %v2283_v29  ;;  %34695 = vmatprep.mubr.msk.f32.mxu1 %vm39741_vm1, %v43804_v9  ;;  %v5426_v29 = vpop.permute.xlu0 %5425 }
 0x670   :  { %34698 = vmatprep.subr.mxu1 %v43804_v9 }
 0x673   :  { %v5428_v30 = vpop.permute.xlu0 %5427 }
 0x676   :  { %34696 = vmatmul.mubr.f32.vlgmr.msra.gmra.mrb[6].mxu1 %v2272_v55 }
 0x677   :  { %34699 = vmatpush3.msra.mxu1 %v2206_v63  ;;  %34700 = vmatprep.mubr.msk.f32.mxu1 %vm39741_vm1, %v43804_v9  ;;  %v7272_v41 = vpop.permute.xlu0 %7271 }
 0x678   :  { %34703 = vmatprep.subr.mxu1 %v43804_v9 }
 0x67e   :  { %34701 = vmatmul.mubr.f32.vlgmr.msra.gmra.mrb[6].mxu1 %v2273_v62 }
 0x67f   :  { %34704 = vmatpush3.msra.mxu1 %v2284_v51  ;;  %34705 = vmatprep.mubr.msk.f32.mxu1 %vm39741_vm1, %v43804_v9  ;;  %v5431_v51 = vsel %vm816_vm3, %v5428_v30, 0 }
 0x680   :  { %34708 = vmatprep.subr.mxu1 %v43804_v9  ;;  %v5434_v62 = vand.u32 4294901760, %v5431_v51 }
 0x682   :  { %v5511_v10 = vsub.f32 %v5431_v51, %v5434_v62 }
 0x684   :  { %v5512_v13 = vand.u32 4294901760, %v5511_v10 }
 0x686   :  { %34706 = vmatmul.mubr.f32.vlgmr.msra.gmra.mrb[6].mxu1 %v2271_v49  ;;  %v5513_v14 = vsub.f32 %v5511_v10, %v5512_v13 }
 0x687   :  { %34709 = vmatpush3.msra.mxu1 %v2206_v63  ;;  %34710 = vmatprep.mubr.msk.f32.mxu1 %vm39741_vm1, %v43804_v9  ;;  %v4596_v63 = vsub.f32 %v4594_v16, %v4595_v37 }
 0x688   :  { %34713 = vmatprep.subr.mxu1 %v43804_v9 }
 0x689   :  { %v4597_v27 = vand.u32 4294901760, %v4596_v63 }
 0x68e   :  { %34711 = vmatmul.mubr.f32.vlgmr.msra.gmra.mrb[6].mxu1 %v2271_v49  ;;  %v5429_v49 = vsel %vm816_vm3, %v5426_v29, 0 }
 0x68f   :  { %34714 = vmatpush3.xpose.msra.mxu1 %v2671_v22  ;;  %34715 = vmatprep.mubr.msk.f32.mxu1 %vm39741_vm1, %v43804_v9  ;;  %v5499_v55 = vand.u32 4294901760, %v5429_v49 }
 0x690   :  { %34718 = vmatprep.subr.mxu1 %v43804_v9 }
 0x691   :  { %v5500_v11 = vsub.f32 %v5429_v49, %v5499_v55 }
 0x692   :  { %34716 = vmatmul.mubr.f32.vlgmr.msra.gmra.mrb[8].mxu1 %v2740_v17 }
 0x693   :  { %34719 = vmatpush3.xpose.msra.mxu1 %v2751_v18  ;;  %34720 = vmatprep.mubr.msk.f32.mxu1 %vm39741_vm1, %v43804_v9  ;;  %v5501_v5 = vand.u32 4294901760, %v5500_v11 }
 0x694   :  { %34723 = vmatprep.subr.mxu1 %v43804_v9 }
 0x695   :  { %v5502_v12 = vsub.f32 %v5500_v11, %v5501_v5 }
 0x697   :  { %v5503_v15 = vand.u32 4294901760, %v5502_v12 }
 0x69a   :  { %34721 = vmatmul.mubr.f32.vlgmr.msra.gmra.mrb[8].mxu1 %v2736_v21 }
 0x69b   :  { %34724 = vmatpush3.xpose.msra.mxu1 %v2748_v32  ;;  %34725 = vmatprep.mubr.msk.f32.mxu1 %vm39741_vm1, %v43804_v9 }
 0x69c   :  { %34728 = vmatprep.subr.mxu1 %v43804_v9 }
 0x6a2   :  { %34726 = vmatmul.mubr.f32.vlgmr.msra.gmra.mrb[8].mxu1 %v2737_v31  ;;  %v6358_v31 = vsel %vm816_vm3, %v40237_v60, 0 }
 0x6a3   :  { %34729 = vmatpush3.xpose.msra.mxu1 %v2671_v22  ;;  %34730 = vmatprep.mubr.msk.f32.mxu1 %vm39741_vm1, %v43804_v9 }
 0x6a4   :  { %34733 = vmatprep.subr.mxu1 %v43804_v9 }
 0x6aa   :  { %34731 = vmatmul.mubr.f32.vlgmr.msra.gmra.mrb[8].mxu1 %v2738_v34  ;;  %v6428_v34 = vand.u32 4294901760, %v6358_v31 }
 0x6ab   :  { %34734 = vmatpush3.xpose.msra.mxu1 %v2749_v35  ;;  %34735 = vmatprep.mubr.msk.f32.mxu1 %vm39741_vm1, %v43804_v9 }
 0x6ac   :  { %34738 = vmatprep.subr.mxu1 %v43804_v9  ;;  %v6429_v42 = vsub.f32 %v6358_v31, %v6428_v34 }
 0x6ae   :  { %v6430_v60 = vand.u32 4294901760, %v6429_v42 }
 0x6b0   :  { %v6431_v18 = vsub.f32 %v6429_v42, %v6430_v60 }
 0x6b2   :  { %34736 = vmatmul.mubr.f32.vlgmr.msra.gmra.mrb[8].mxu1 %v2736_v21  ;;  %v6432_v24 = vand.u32 4294901760, %v6431_v18 }
 0x6b3   :  { %34739 = vmatpush3.xpose.msra.mxu1 %v2671_v22  ;;  %34740 = vmatprep.mubr.msk.f32.mxu1 %vm39741_vm1, %v43804_v9  ;;  %v6357_v22 = vpop.permute.xlu1 %6356 }
 0x6b4   :  { %34773 = vmatprep.subr.mxu1 %v43804_v9  ;;  %v6360_v32 = vsel %vm816_vm3, %v6357_v22, 0 }
 0x6b5   :  { %v6363_v35 = vand.u32 4294901760, %v6360_v32 }
 0x6b7   :  { %v6440_v43 = vsub.f32 %v6360_v32, %v6363_v35 }
 0x6b9   :  { %v6441_v17 = vand.u32 4294901760, %v6440_v43 }
 0x6ba   :  { %34741 = vmatmul.mubr.f32.vlgmr.msra.gmra.mrb[8].mxu1 %v2736_v21  ;;  %v5514_v21 = vand.u32 4294901760, %v5513_v14 }
 0x6bb   :  { %34774 = vmatpush3.xpose.msra.mxu1 %v3588_v45  ;;  %34775 = vmatprep.mubr.msk.f32.mxu1 %vm39741_vm1, %v43804_v9  ;;  %v6442_v19 = vsub.f32 %v6440_v43, %v6441_v17 }
 0x6bc   :  { %34778 = vmatprep.subr.mxu1 %v43804_v9 }
 0x6bd   :  { %v6443_v26 = vand.u32 4294901760, %v6442_v19 }
 0x6be   :  { %34776 = vmatmul.mubr.f32.vlgmr.msra.gmra.mrb[10].mxu1 %v3657_v57 }
 0x6bf   :  { %34779 = vmatpush3.xpose.msra.mxu1 %v3668_v58  ;;  %34780 = vmatprep.mubr.msk.f32.mxu1 %vm39741_vm1, %v43804_v9 }
 0x6c0   :  { %34783 = vmatprep.subr.mxu1 %v43804_v9 }
 0x6c6   :  { %34781 = vmatmul.mubr.f32.vlgmr.msra.gmra.mrb[10].mxu1 %v3653_v44 }
 0x6c7   :  { %34784 = vmatpush3.xpose.msra.mxu1 %v3665_v47  ;;  %34785 = vmatprep.mubr.msk.f32.mxu1 %vm39741_vm1, %v43804_v9 }
 0x6c8   :  { %34788 = vmatprep.subr.mxu1 %v43804_v9 }
 0x6ce   :  { %34786 = vmatmul.mubr.f32.vlgmr.msra.gmra.mrb[10].mxu1 %v3654_v46 }
 0x6cf   :  { %34789 = vmatpush3.xpose.msra.mxu1 %v3588_v45  ;;  %34790 = vmatprep.mubr.msk.f32.mxu1 %vm39741_vm1, %v43804_v9 }
 0x6d0   :  { %34793 = vmatprep.subr.mxu1 %v43804_v9 }
 0x6d6   :  { %34791 = vmatmul.mubr.f32.vlgmr.msra.gmra.mrb[10].mxu1 %v3655_v48 }
 0x6d7   :  { %34794 = vmatpush3.xpose.msra.mxu1 %v3666_v53  ;;  %34795 = vmatprep.mubr.msk.f32.mxu1 %vm39741_vm1, %v43804_v9 }
 0x6d8   :  { %34798 = vmatprep.subr.mxu1 %v43804_v9 }
 0x6de   :  { %34796 = vmatmul.mubr.f32.vlgmr.msra.gmra.mrb[10].mxu1 %v3653_v44 }
 0x6df   :  { %34799 = vmatpush3.xpose.msra.mxu1 %v3588_v45  ;;  %34800 = vmatprep.mubr.msk.f32.mxu1 %vm39741_vm1, %v43804_v9  ;;  %v7275_v45 = vsel %vm816_vm3, %v7272_v41, 0 }
 0x6e0   :  { %34833 = vmatprep.subr.mxu1 %v43804_v9  ;;  %v7345_v47 = vand.u32 4294901760, %v7275_v45 }
 0x6e2   :  { %v7346_v53 = vsub.f32 %v7275_v45, %v7345_v47  ;;  %v40428_v45 = vsub.s32 3, %v40162_v2 }
 0x6e4   :  { %v7347_v58 = vand.u32 4294901760, %v7346_v53 }
 0x6e6   :  { %34801 = vmatmul.mubr.f32.vlgmr.msra.gmra.mrb[10].mxu1 %v3653_v44  ;;  %v7274_v44 = vpop.permute.xlu1 %7273  ;;  %v7348_v61 = vsub.f32 %v7346_v53, %v7347_v58 }
 0x6e7   :  { %34834 = vmatpush3.xpose.msra.mxu1 %v4517_v8  ;;  %34835 = vmatprep.mubr.msk.f32.mxu1 %vm39741_vm1, %v43804_v9  ;;  %v7277_v46 = vsel %vm816_vm3, %v7274_v44, 0 }
 0x6e8   :  { %34838 = vmatprep.subr.mxu1 %v43804_v9  ;;  %v7280_v48 = vand.u32 4294901760, %v7277_v46 }
 0x6ea   :  { %34836 = vmatmul.mubr.f32.vlgmr.msra.gmra.mrb[12].mxu1 %v4586_v4  ;;  %v7357_v54 = vsub.f32 %v7277_v46, %v7280_v48 }
 0x6eb   :  { %34839 = vmatpush3.xpose.msra.mxu1 %v4597_v27  ;;  %34840 = vmatprep.mubr.msk.f32.mxu1 %vm39741_vm1, %v43804_v9 }
 0x6ec   :  { %34843 = vmatprep.subr.mxu1 %v43804_v9  ;;  %v7358_v59 = vand.u32 4294901760, %v7357_v54 }
 0x6ee   :  { %v7359_v0 = vsub.f32 %v7357_v54, %v7358_v59 }
 0x6f2   :  { %34841 = vmatmul.mubr.f32.vlgmr.msra.gmra.mrb[12].mxu1 %v4582_v1 }
 0x6f3   :  { %34844 = vmatpush3.xpose.msra.mxu1 %v4594_v16  ;;  %34845 = vmatprep.mubr.msk.f32.mxu1 %vm39741_vm1, %v43804_v9 }
 0x6f4   :  { %34848 = vmatprep.subr.mxu1 %v43804_v9 }
 0x6fa   :  { %34846 = vmatmul.mubr.f32.vlgmr.msra.gmra.mrb[12].mxu1 %v4583_v20  ;;  %v40390_v20 = vsub.s32 1, %v40162_v2 }
 0x6fb   :  { %34849 = vmatpush3.xpose.msra.mxu1 %v4517_v8  ;;  %34850 = vmatprep.mubr.msk.f32.mxu1 %vm39741_vm1, %v43804_v9 }
 0x6fc   :  { %34853 = vmatprep.subr.mxu1 %v43804_v9  ;;  %v2659_v16 = vrot.slane %v40168_v7, %v40390_v20 }
 0x6fe   :  { %vm2660_vm10 = vcmp.eq.s32.totalorder %v2659_v16, 1 }
 0x6ff   :  { %vm2661_vm11 = vmand %vm40173_vm5, %vm2660_vm10 }
 0x702   :  { %34851 = vmatmul.mubr.f32.vlgmr.msra.gmra.mrb[12].mxu1 %v4584_v38  ;;  %v2662_v38 = vsel %vm2661_vm11, 0.0, %v43786_v36 }
 0x703   :  { %34854 = vmatpush3.xpose.msra.mxu1 %v4595_v37  ;;  %34855 = vmatprep.mubr.msk.f32.mxu1 %vm39741_vm1, %v43804_v9 }
 0x704   :  { %34858 = vmatprep.subr.mxu1 %v43804_v9 }
 0x70a   :  { %34856 = vmatmul.mubr.f32.vlgmr.msra.gmra.mrb[12].mxu1 %v4582_v1 }
 0x70b   :  { %34859 = vmatpush3.xpose.msra.mxu1 %v4517_v8  ;;  %34860 = vmatprep.mubr.msk.f32.mxu1 %vm39741_vm1, %v43804_v9  ;;  %v7360_v8 = vand.u32 4294901760, %v7359_v0 }
 0x70c   :  { %34893 = vmatprep.subr.mxu1 %v43804_v9 }
 0x712   :  { %34861 = vmatmul.mubr.f32.vlgmr.msra.gmra.mrb[12].mxu1 %v4582_v1  ;;  %v7349_v1 = vand.u32 4294901760, %v7348_v61 }
 0x713   :  { %34894 = vmatpush3.xpose.msra.mxu1 %v5434_v62  ;;  %34895 = vmatprep.mubr.msk.f32.mxu1 %vm39741_vm1, %v43804_v9 }
 0x714   :  { %34898 = vmatprep.subr.mxu1 %v43804_v9 }
 0x716   :  { %34896 = vmatmul.mubr.f32.vlgmr.msra.gmra.mrb[14].mxu1 %v5503_v15 }
 0x717   :  { %34899 = vmatpush3.xpose.msra.mxu1 %v5514_v21  ;;  %34900 = vmatprep.mubr.msk.f32.mxu1 %vm39741_vm1, %v43804_v9 }
 0x718   :  { %34903 = vmatprep.subr.mxu1 %v43804_v9 }
 0x71e   :  { %34901 = vmatmul.mubr.f32.vlgmr.msra.gmra.mrb[14].mxu1 %v5499_v55 }
 0x71f   :  { %34904 = vmatpush3.xpose.msra.mxu1 %v5511_v10  ;;  %34905 = vmatprep.mubr.msk.f32.mxu1 %vm39741_vm1, %v43804_v9  ;;  %v40408_v10 = vsub.s32 2, %v40162_v2 }
 0x720   :  { %34908 = vmatprep.subr.mxu1 %v43804_v9 }
 0x721   :  { %v4505_v12 = vrot.slane %v40168_v7, %v40408_v10 }
 0x723   :  { %vm4506_vm12 = vcmp.eq.s32.totalorder %v4505_v12, 1 }
 0x724   :  { %vm4507_vm13 = vmand %vm40173_vm5, %vm4506_vm12  ;;  %vm20323_vm12 = vcmask 64512  }
 0x725   :  { %v4508_v15 = vsel %vm4507_vm13, 0.0, %v43786_v36 }
 0x726   :  { %34906 = vmatmul.mubr.f32.vlgmr.msra.gmra.mrb[14].mxu1 %v5500_v11 }
 0x727   :  { %34909 = vmatpush3.xpose.msra.mxu1 %v5434_v62  ;;  %34910 = vmatprep.mubr.msk.f32.mxu1 %vm39741_vm1, %v43804_v9 }
 0x728   :  { %34913 = vmatprep.subr.mxu1 %v43804_v9 }
 0x72e   :  { %34911 = vmatmul.mubr.f32.vlgmr.msra.gmra.mrb[14].mxu1 %v5501_v5 }
 0x72f   :  { %34914 = vmatpush3.xpose.msra.mxu1 %v5512_v13  ;;  %34915 = vmatprep.mubr.msk.f32.mxu1 %vm39741_vm1, %v43804_v9 }
 0x730   :  { %34918 = vmatprep.subr.mxu1 %v43804_v9 }
 0x736   :  { %34916 = vmatmul.mubr.f32.vlgmr.msra.gmra.mrb[14].mxu1 %v5499_v55 }
 0x737   :  { %34919 = vmatpush3.xpose.msra.mxu1 %v5434_v62  ;;  %34920 = vmatprep.mubr.msk.f32.mxu1 %vm39741_vm1, %v43804_v9 }
 0x738   :  { %34953 = vmatprep.subr.mxu1 %v43804_v9 }
 0x73e   :  { %34921 = vmatmul.mubr.f32.vlgmr.msra.gmra.mrb[14].mxu1 %v5499_v55 }
 0x73f   :  { %34954 = vmatpush3.xpose.msra.mxu1 %v6363_v35  ;;  %34955 = vmatprep.mubr.msk.f32.mxu1 %vm39741_vm1, %v43804_v9 }
 0x740   :  { %34958 = vmatprep.subr.mxu1 %v43804_v9 }
 0x742   :  { %34956 = vmatmul.mubr.f32.vlgmr.msra.gmra.mrb[16].mxu1 %v6432_v24 }
 0x743   :  { %34959 = vmatpush3.xpose.msra.mxu1 %v6443_v26  ;;  %34960 = vmatprep.mubr.msk.f32.mxu1 %vm39741_vm1, %v43804_v9 }
 0x744   :  { %34963 = vmatprep.subr.mxu1 %v43804_v9 }
 0x74a   :  { %34961 = vmatmul.mubr.f32.vlgmr.msra.gmra.mrb[16].mxu1 %v6428_v34 }
 0x74b   :  { %34964 = vmatpush3.xpose.msra.mxu1 %v6440_v43  ;;  %34965 = vmatprep.mubr.msk.f32.mxu1 %vm39741_vm1, %v43804_v9 }
 0x74c   :  { %34968 = vmatprep.subr.mxu1 %v43804_v9 }
 0x752   :  { %34966 = vmatmul.mubr.f32.vlgmr.msra.gmra.mrb[16].mxu1 %v6429_v42 }
 0x753   :  { %34969 = vmatpush3.xpose.msra.mxu1 %v6363_v35  ;;  %34970 = vmatprep.mubr.msk.f32.mxu1 %vm39741_vm1, %v43804_v9 }
 0x754   :  { %34973 = vmatprep.subr.mxu1 %v43804_v9 }
 0x75a   :  { %34971 = vmatmul.mubr.f32.vlgmr.msra.gmra.mrb[16].mxu1 %v6430_v60 }
 0x75b   :  { %34974 = vmatpush3.xpose.msra.mxu1 %v6441_v17  ;;  %34975 = vmatprep.mubr.msk.f32.mxu1 %vm39741_vm1, %v43804_v9 }
 0x75c   :  { %34978 = vmatprep.subr.mxu1 %v43804_v9 }
 0x761   :  { %v40375_v56 = vpop.f32.mrb[6].mxu1 }
 0x762   :  { %v34712_v57 = vpop.f32.mrb[7].mxu1  ;;  %34976 = vmatmul.mubr.f32.vlgmr.msra.gmra.mrb[16].mxu1 %v6428_v34 }
 0x763   :  { %34979 = vmatpush3.xpose.msra.mxu1 %v6363_v35  ;;  %34980 = vmatprep.mubr.msk.f32.mxu1 %vm39741_vm1, %v43804_v9 }
 0x764   :  { %35013 = vmatprep.subr.mxu1 %v43804_v9 }
 0x76a   :  { %34981 = vmatmul.mubr.f32.vlgmr.msra.gmra.mrb[16].mxu1 %v6428_v34 }
 0x76b   :  { %35014 = vmatpush3.xpose.msra.mxu1 %v7280_v48  ;;  %35015 = vmatprep.mubr.msk.f32.mxu1 %vm39741_vm1, %v43804_v9 }
 0x76c   :  { %35018 = vmatprep.subr.mxu1 %v43804_v9 }
 0x76e   :  { %35016 = vmatmul.mubr.f32.vlgmr.msra.gmra.mrb[18].mxu1 %v7349_v1 }
 0x76f   :  { %35019 = vmatpush3.xpose.msra.mxu1 %v7360_v8  ;;  %35020 = vmatprep.mubr.msk.f32.mxu1 %vm39741_vm1, %v43804_v9 }
 0x770   :  { %35023 = vmatprep.subr.mxu1 %v43804_v9 }
 0x776   :  { %35021 = vmatmul.mubr.f32.vlgmr.msra.gmra.mrb[18].mxu1 %v7345_v47 }
 0x777   :  { %35024 = vmatpush3.xpose.msra.mxu1 %v7357_v54  ;;  %35025 = vmatprep.mubr.msk.f32.mxu1 %vm39741_vm1, %v43804_v9 }
 0x778   :  { %35028 = vmatprep.subr.mxu1 %v43804_v9 }
 0x77e   :  { %35026 = vmatmul.mubr.f32.vlgmr.msra.gmra.mrb[18].mxu1 %v7346_v53 }
 0x77f   :  { %35029 = vmatpush3.xpose.msra.mxu1 %v7280_v48  ;;  %35030 = vmatprep.mubr.msk.f32.mxu1 %vm39741_vm1, %v43804_v9 }
 0x780   :  { %35033 = vmatprep.subr.mxu1 %v43804_v9 }
 0x786   :  { %35031 = vmatmul.mubr.f32.vlgmr.msra.gmra.mrb[18].mxu1 %v7347_v58 }
 0x787   :  { %35034 = vmatpush3.xpose.msra.mxu1 %v7358_v59  ;;  %35035 = vmatprep.mubr.msk.f32.mxu1 %vm39741_vm1, %v43804_v9 }
 0x788   :  { %35038 = vmatprep.subr.mxu1 %v43804_v9 }
 0x78d   :  { %v3112_v37 = vpop.f32.mrb[8].mxu1 }
 0x78e   :  { %v38819_v52 = vadd.f32 %v3112_v37, %v2662_v38  ;;  %v34742_v63 = vpop.f32.mrb[9].mxu1  ;;  %35036 = vmatmul.mubr.f32.vlgmr.msra.gmra.mrb[18].mxu1 %v7345_v47 }
 0x78f   :  { %35039 = vmatpush3.xpose.msra.mxu1 %v7280_v48  ;;  %35040 = vmatprep.mubr.msk.f32.mxu1 %vm39741_vm1, %v43804_v9  ;;  %v6351_v48 = vrot.slane %v40168_v7, %v40428_v45 }
 0x790   :  { %v3116_v4 = vsel %vm1267_vm8, %v38819_v52, -inf }
 0x791   :  { %3117 = vmax.xlane.f32.xlu0 %v3116_v4  ;;  %vm6352_vm14 = vcmp.eq.s32.totalorder %v6351_v48, 1 }
 0x792   :  { %vm6353_vm15 = vmand %vm40173_vm5, %vm6352_vm14 }
 0x793   :  { %v6354_v7 = vsel %vm6353_vm15, 0.0, %v43786_v36 }
 0x796   :  { %35041 = vmatmul.mubr.f32.vlgmr.msra.gmra.mrb[18].mxu1 %v7345_v47 }
 0x7b9   :  { %v4029_v27 = vpop.f32.mrb[10].mxu1 }
 0x7ba   :  { %v38820_v29 = vadd.f32 %v4029_v27, %v2662_v38  ;;  %v34802_v30 = vpop.f32.mrb[11].mxu1 }
 0x7bc   :  { %v4033_v49 = vsel %vm1267_vm8, %v38820_v29, -inf }
 0x7bd   :  { %4034 = vmax.xlane.f32.xlu1 %v4033_v49 }
 0x7e5   :  { %v4958_v51 = vpop.f32.mrb[12].mxu1 }
 0x7e6   :  { %v34862_v55 = vpop.f32.mrb[13].mxu1  ;;  %v38821_v22 = vadd.f32 %v4958_v51, %v4508_v15 }
 0x7e8   :  { %v4962_v34 = vsel %vm1267_vm8, %v38821_v22, -inf }
 0x811   :  { %v5875_v62 = vpop.f32.mrb[14].mxu1 }
 0x812   :  { %v34922_v11 = vpop.f32.mrb[15].mxu1  ;;  %v38822_v32 = vadd.f32 %v5875_v62, %v4508_v15 }
 0x814   :  { %v5879_v35 = vsel %vm1267_vm8, %v38822_v32, -inf }
 0x81e   :  { %v3118_v5 = vpop.xlane.xlu0 %3117 }
 0x81f   :  { %v3119_v13 = vsub.f32 %v38819_v52, %v3118_v5 }
 0x821   :  { %v3120_v14 = vmul.f32 1.442695, %v3119_v13 }
 0x823   :  { %39545 = vpow2.f32 %v3120_v14 }
 0x82d   :  { %v39546_v21 = vpop.eup %39545 }
 0x82e   :  { %v3122_v31 = vsel %vm1267_vm8, %v39546_v21, 0.0 }
 0x82f   :  { %3123 = vadd.xlane.f32.xlu0 %v3122_v31 }
 0x833   :  { %4963 = vmax.xlane.f32.xlu0 %v4962_v34 }
 0x837   :  { %5880 = vmax.xlane.f32.xlu0 %v5879_v35 }
 0x83d   :  { %v6804_v42 = vpop.f32.mrb[16].mxu1 }
 0x83e   :  { %v34982_v43 = vpop.f32.mrb[17].mxu1  ;;  %v40440_v37 = vadd.f32 %v6804_v42, %v6354_v7 }
 0x84a   :  { %v4035_v60 = vpop.xlane.xlu1 %4034 }
 0x84b   :  { %v4036_v17 = vsub.f32 %v38820_v29, %v4035_v60  ;;  %v6808_v29 = vsel %vm1267_vm8, %v40440_v37, -inf  ;;  %v4977_v60 = vsel %vm1283_vm2, %v40128_v40, 0 }
 0x84d   :  { %v4037_v18 = vmul.f32 1.442695, %v4036_v17  ;;  %v40494_v17 = vand.u32 4294901760, %v4977_v60 }
 0x84f   :  { %39547 = vpow2.f32 %v4037_v18 }
 0x859   :  { %v40418_v19 = vpop.eup %39547 }
 0x85a   :  { %v4039_v24 = vsel %vm1267_vm8, %v40418_v19, 0.0 }
 0x85b   :  { %4040 = vadd.xlane.f32.xlu1 %v4039_v24 }
 0x869   :  { %v7721_v26 = vpop.f32.mrb[18].mxu1 }
 0x86a   :  { %v35042_v41 = vpop.f32.mrb[19].mxu1  ;;  %v40451_v49 = vadd.f32 %v7721_v26, %v6354_v7 }
 0x86c   :  { %4044 = vrot.lane.b32.xlu1 %v3127_v25, %s39745_s4  ;;  %v3211_v25 = vsub.f32 %v40121_v28, %v40126_v39  ;;  %v7725_v55 = vsel %vm1267_vm8, %v40451_v49, -inf }
 0x86e   :  { %v3212_v1 = vand.u32 4294901760, %v3211_v25 }
 0x870   :  { %5890 = vrot.lane.b32.xlu1 %v40128_v40, %s39745_s4  ;;  %v3213_v52 = vsub.f32 %v3211_v25, %v3212_v1 }
 0x872   :  { %v3214_v27 = vand.u32 4294901760, %v3213_v52  ;;  %v6819_v52 = vrot.slane %v40128_v40, 4 }
 0x8bc   :  { %v3124_v44 = vpop.xlane.xlu0 %3123 }
 0x8bd   :  { %39549 = vrcp.f32 %v3124_v44 }
 0x8c0   :  { %v4964_v46 = vpop.xlane.xlu0 %4963 }
 0x8c1   :  { %v4965_v47 = vsub.f32 %v38821_v22, %v4964_v46  ;;  %v5057_v46 = vsub.f32 %v4977_v60, %v40494_v17 }
 0x8c3   :  { %v4966_v53 = vmul.f32 1.442695, %v4965_v47 }
 0x8c4   :  { %v5881_v54 = vpop.xlane.xlu0 %5880 }
 0x8c5   :  { %39551 = vpow2.f32 %v4966_v53  ;;  %v5882_v57 = vsub.f32 %v38822_v32, %v5881_v54 }
 0x8c7   :  { %v39550_v58 = vpop.eup %39549  ;;  %v5883_v23 = vmul.f32 1.442695, %v5882_v57 }
 0x8c8   :  { %v3126_v59 = vmul.f32 %v39550_v58, %v39546_v21 }
 0x8c9   :  { %39553 = vpow2.f32 %v5883_v23  ;;  %v5058_v23 = vand.u32 4294901760, %v5057_v46 }
 0x8ca   :  { %v3129_v61 = vsel %vm1279_vm9, %v3126_v59, 0 }
 0x8cb   :  { %v3199_v0 = vand.u32 4294901760, %v3129_v61 }
 0x8cd   :  { %v3200_v8 = vsub.f32 %v3129_v61, %v3199_v0 }
 0x8cf   :  { %v40438_v16 = vpop.eup %39551  ;;  %v3201_v38 = vand.u32 4294901760, %v3200_v8 }
 0x8d0   :  { %v4968_v28 = vsel %vm1267_vm8, %v40438_v16, 0.0 }
 0x8d1   :  { %4969 = vadd.xlane.f32.xlu0 %v4968_v28  ;;  %v3202_v63 = vsub.f32 %v3200_v8, %v3201_v38 }
 0x8d3   :  { %v3203_v4 = vand.u32 4294901760, %v3202_v63  ;;  %v40446_v30 = vpop.eup %39553 }
 0x8d4   :  { %v5885_v51 = vsel %vm1267_vm8, %v40446_v30, 0.0 }
 0x8d5   :  { %34746 = vmatmul.mubr.f32.vlgmr.msra.gmra.mrb[4].mxu0 %v3203_v4  ;;  %6809 = vmax.xlane.f32.xlu0 %v6808_v29 }
 0x8d6   :  { %34749 = vmatpush3.msra.mxu0 %v3214_v27  ;;  %34750 = vmatprep.mubr.msk.f32.mxu0 %vm39741_vm1, %v43804_v9  ;;  %v39677_v27 = vld [vmem:[%s43776_s8 + $0x8] sm:$0xff] }
 0x8d7   :  { %34753 = vmatprep.subr.mxu0 %v43804_v9 }
 0x8d9   :  { %5886 = vadd.xlane.f32.xlu0 %v5885_v51 }
 0x8dd   :  { %34751 = vmatmul.mubr.f32.vlgmr.msra.gmra.mrb[4].mxu0 %v3199_v0  ;;  %7726 = vmax.xlane.f32.xlu0 %v7725_v55  ;;  %v39679_v55 = vld [vmem:[%s43776_s8 + $0x38] sm:$0xff] }
 0x8de   :  { %34754 = vmatpush3.msra.mxu0 %v3211_v25  ;;  %34755 = vmatprep.mubr.msk.f32.mxu0 %vm39741_vm1, %v43804_v9 }
 0x8df   :  { %34758 = vmatprep.subr.mxu0 %v43804_v9 }
 0x8e5   :  { %34756 = vmatmul.mubr.f32.vlgmr.msra.gmra.mrb[4].mxu0 %v3200_v8 }
 0x8e6   :  { %34759 = vmatpush3.msra.mxu0 %v40126_v39  ;;  %34760 = vmatprep.mubr.msk.f32.mxu0 %vm39741_vm1, %v43804_v9 }
 0x8e7   :  { %34763 = vmatprep.subr.mxu0 %v43804_v9 }
 0x8e8   :  { %v4041_v62 = vpop.xlane.xlu1 %4040 }
 0x8e9   :  { %39555 = vrcp.f32 %v4041_v62 }
 0x8ec   :  { %v4045_v11 = vpop.permute.xlu1 %4044 }
 0x8ed   :  { %v4049_v5 = vsel %vm1283_vm2, %v4045_v11, 0  ;;  %34761 = vmatmul.mubr.f32.vlgmr.msra.gmra.mrb[4].mxu0 %v3201_v38 }
 0x8ee   :  { %34764 = vmatpush3.msra.mxu0 %v3212_v1  ;;  %34765 = vmatprep.mubr.msk.f32.mxu0 %vm39741_vm1, %v43804_v9  ;;  %v4052_v13 = vand.u32 4294901760, %v4049_v5  ;;  %v5059_v1 = vsub.f32 %v5057_v46, %v5058_v23 }
 0x8ef   :  { %34768 = vmatprep.subr.mxu0 %v43804_v9 }
 0x8f0   :  { %v4129_v15 = vsub.f32 %v4049_v5, %v4052_v13  ;;  %v5891_v4 = vpop.permute.xlu1 %5890  ;;  %v39680_v5 = vld [vmem:[%s43776_s8 + $0x50] sm:$0xff] }
 0x8f1   :  { %v5895_v29 = vsel %vm1283_vm2, %v5891_v4, 0 }
 0x8f2   :  { %v4130_v31 = vand.u32 4294901760, %v4129_v15  ;;  %v5898_v51 = vand.u32 4294901760, %v5895_v29 }
 0x8f3   :  { %v39556_v12 = vpop.eup %39555 }
 0x8f4   :  { %v4043_v14 = vmul.f32 %v39556_v12, %v40418_v19  ;;  %v4131_v35 = vsub.f32 %v4129_v15, %v4130_v31  ;;  %v5975_v11 = vsub.f32 %v5895_v29, %v5898_v51 }
 0x8f5   :  { %34766 = vmatmul.mubr.f32.vlgmr.msra.gmra.mrb[4].mxu0 %v3199_v0 }
 0x8f6   :  { %34769 = vmatpush3.msra.mxu0 %v40126_v39  ;;  %34770 = vmatprep.mubr.msk.f32.mxu0 %vm39741_vm1, %v43804_v9  ;;  %v4047_v21 = vsel %vm1279_vm9, %v4043_v14, 0  ;;  %v4132_v43 = vand.u32 4294901760, %v4131_v35  ;;  %v5976_v12 = vand.u32 4294901760, %v5975_v11 }
 0x8f7   :  { %34803 = vmatprep.subr.mxu0 %v43804_v9  ;;  %v4117_v22 = vand.u32 4294901760, %v4047_v21 }
 0x8f9   :  { %v4118_v32 = vsub.f32 %v4047_v21, %v4117_v22 }
 0x8fb   :  { %v4119_v34 = vand.u32 4294901760, %v4118_v32 }
 0x8fd   :  { %34771 = vmatmul.mubr.f32.vlgmr.msra.gmra.mrb[4].mxu0 %v3199_v0  ;;  %v4120_v42 = vsub.f32 %v4118_v32, %v4119_v34 }
 0x8fe   :  { %34804 = vmatpush3.msra.mxu0 %v4052_v13  ;;  %34805 = vmatprep.mubr.msk.f32.mxu0 %vm39741_vm1, %v43804_v9 }
 0x8ff   :  { %34808 = vmatprep.subr.mxu0 %v43804_v9  ;;  %v4121_v39 = vand.u32 4294901760, %v4120_v42 }
 0x901   :  { %34806 = vmatmul.mubr.f32.vlgmr.msra.gmra.mrb[6].mxu0 %v4121_v39 }
 0x902   :  { %34809 = vmatpush3.msra.mxu0 %v4132_v43  ;;  %34810 = vmatprep.mubr.msk.f32.mxu0 %vm39741_vm1, %v43804_v9  ;;  %v39681_v43 = vld [vmem:[%s43776_s8 + $0x80] sm:$0xff] }
 0x903   :  { %34813 = vmatprep.subr.mxu0 %v43804_v9 }
 0x909   :  { %34811 = vmatmul.mubr.f32.vlgmr.msra.gmra.mrb[6].mxu0 %v4117_v22 }
 0x90a   :  { %34814 = vmatpush3.msra.mxu0 %v4129_v15  ;;  %34815 = vmatprep.mubr.msk.f32.mxu0 %vm39741_vm1, %v43804_v9  ;;  %v5977_v15 = vsub.f32 %v5975_v11, %v5976_v12 }
 0x90b   :  { %34818 = vmatprep.subr.mxu0 %v43804_v9 }
 0x911   :  { %34816 = vmatmul.mubr.f32.vlgmr.msra.gmra.mrb[6].mxu0 %v4118_v32 }
 0x912   :  { %34819 = vmatpush3.msra.mxu0 %v4052_v13  ;;  %34820 = vmatprep.mubr.msk.f32.mxu0 %vm39741_vm1, %v43804_v9 }
 0x913   :  { %34823 = vmatprep.subr.mxu0 %v43804_v9 }
 0x919   :  { %34821 = vmatmul.mubr.f32.vlgmr.msra.gmra.mrb[6].mxu0 %v4119_v34 }
 0x91a   :  { %34824 = vmatpush3.msra.mxu0 %v4130_v31  ;;  %34825 = vmatprep.mubr.msk.f32.mxu0 %vm39741_vm1, %v43804_v9 }
 0x91b   :  { %34828 = vmatprep.subr.mxu0 %v43804_v9 }
 0x921   :  { %34826 = vmatmul.mubr.f32.vlgmr.msra.gmra.mrb[6].mxu0 %v4117_v22 }
 0x922   :  { %34829 = vmatpush3.msra.mxu0 %v4052_v13  ;;  %34830 = vmatprep.mubr.msk.f32.mxu0 %vm39741_vm1, %v43804_v9 }
 0x923   :  { %34863 = vmatprep.subr.mxu0 %v43804_v9 }
 0x929   :  { %34831 = vmatmul.mubr.f32.vlgmr.msra.gmra.mrb[6].mxu0 %v4117_v22  ;;  %v5978_v22 = vand.u32 4294901760, %v5977_v15 }
 0x92a   :  { %34864 = vmatpush3.msra.mxu0 %v40494_v17  ;;  %34865 = vmatprep.mubr.msk.f32.mxu0 %vm39741_vm1, %v43804_v9 }
 0x92b   :  { %34868 = vmatprep.subr.mxu0 %v43804_v9 }
 0x95e   :  { %v4970_v18 = vpop.xlane.xlu0 %4969 }
 0x95f   :  { %39557 = vrcp.f32 %v4970_v18 }
 0x962   :  { %v6810_v19 = vpop.xlane.xlu0 %6809 }
 0x963   :  { %v6811_v24 = vsub.f32 %v40440_v37, %v6810_v19  ;;  %v40594_v19 = vld [vmem:[%s43768_s0 + $0x8] sm:$0xff] }
 0x965   :  { %v6812_v26 = vmul.f32 1.442695, %v6811_v24 }
 0x966   :  { %v5887_v41 = vpop.xlane.xlu0 %5886 }
 0x967   :  { %39559 = vpow2.f32 %v6812_v26 }
 0x969   :  { %v39558_v44 = vpop.eup %39557 }
 0x96a   :  { %v4972_v47 = vmul.f32 %v39558_v44, %v40438_v16  ;;  %v7727_v48 = vpop.xlane.xlu0 %7726  ;;  %v5060_v16 = vand.u32 4294901760, %v5059_v1 }
 0x96b   :  { %v7728_v53 = vsub.f32 %v40451_v49, %v7727_v48 }
 0x96c   :  { %v4974_v54 = vsel %vm1279_vm9, %v4972_v47, 0 }
 0x96d   :  { %v7729_v57 = vmul.f32 1.442695, %v7728_v53  ;;  %v5045_v58 = vand.u32 4294901760, %v4974_v54 }
 0x96f   :  { %39561 = vpow2.f32 %v7729_v57  ;;  %v5046_v25 = vsub.f32 %v4974_v54, %v5045_v58 }
 0x970   :  { %39563 = vrcp.f32 %v5887_v41 }
 0x971   :  { %v40505_v59 = vpop.eup %39559  ;;  %v5047_v61 = vand.u32 4294901760, %v5046_v25 }
 0x972   :  { %v6814_v0 = vsel %vm1267_vm8, %v40505_v59, 0.0 }
 0x973   :  { %6815 = vadd.xlane.f32.xlu0 %v6814_v0  ;;  %v5048_v7 = vsub.f32 %v5046_v25, %v5047_v61 }
 0x975   :  { %v5049_v8 = vand.u32 4294901760, %v5048_v7 }
 0x977   :  { %34866 = vmatmul.mubr.f32.vlgmr.msra.gmra.mrb[8].mxu0 %v5049_v8 }
 0x978   :  { %34869 = vmatpush3.msra.mxu0 %v5060_v16  ;;  %34870 = vmatprep.mubr.msk.f32.mxu0 %vm39741_vm1, %v43804_v9 }
 0x979   :  { %v40511_v38 = vpop.eup %39561  ;;  %34873 = vmatprep.subr.mxu0 %v43804_v9 }
 0x97a   :  { %v7731_v37 = vsel %vm1267_vm8, %v40511_v38, 0.0  ;;  %v39564_v28 = vpop.eup %39563 }
 0x97b   :  { %7732 = vadd.xlane.f32.xlu1 %v7731_v37  ;;  %v5889_v63 = vmul.f32 %v39564_v28, %v40446_v30  ;;  %v39678_v30 = vld [vmem:[%s43776_s8 + $0x20] sm:$0xff] }
 0x97d   :  { %v5893_v40 = vsel %vm1279_vm9, %v5889_v63, 0 }
 0x97e   :  { %v5963_v49 = vand.u32 4294901760, %v5893_v40 }
 0x97f   :  { %34871 = vmatmul.mubr.f32.vlgmr.msra.gmra.mrb[8].mxu0 %v5045_v58 }
 0x980   :  { %34874 = vmatpush3.msra.mxu0 %v5057_v46  ;;  %34875 = vmatprep.mubr.msk.f32.mxu0 %vm39741_vm1, %v43804_v9  ;;  %v5964_v62 = vsub.f32 %v5893_v40, %v5963_v49 }
 0x981   :  { %34878 = vmatprep.subr.mxu0 %v43804_v9 }
 0x982   :  { %v5965_v13 = vand.u32 4294901760, %v5964_v62 }
 0x984   :  { %v5966_v14 = vsub.f32 %v5964_v62, %v5965_v13 }
 0x986   :  { %v5967_v21 = vand.u32 4294901760, %v5966_v14 }
 0x987   :  { %34876 = vmatmul.mubr.f32.vlgmr.msra.gmra.mrb[8].mxu0 %v5046_v25 }
 0x988   :  { %34879 = vmatpush3.msra.mxu0 %v40494_v17  ;;  %34880 = vmatprep.mubr.msk.f32.mxu0 %vm39741_vm1, %v43804_v9 }
 0x989   :  { %7736 = vrot.lane.b32.xlu0 %v6819_v52, %s39745_s4  ;;  %34883 = vmatprep.subr.mxu0 %v43804_v9 }
 0x98d   :  { %8210 = vrot.lane.b32.xlu0 %v39677_v27, %s39742_s24 }
 0x98f   :  { %34881 = vmatmul.mubr.f32.vlgmr.msra.gmra.mrb[8].mxu0 %v5047_v61 }
 0x990   :  { %34884 = vmatpush3.msra.mxu0 %v5058_v23  ;;  %34885 = vmatprep.mubr.msk.f32.mxu0 %vm39741_vm1, %v43804_v9 }
 0x991   :  { %8212 = vrot.lane.b32.xlu0 %v39678_v30, %s39742_s24  ;;  %34888 = vmatprep.subr.mxu0 %v43804_v9 }
 0x995   :  { %8214 = vrot.lane.b32.xlu0 %v39679_v55, %s39742_s24 }
 0x997   :  { %34886 = vmatmul.mubr.f32.vlgmr.msra.gmra.mrb[8].mxu0 %v5045_v58 }
 0x998   :  { %34889 = vmatpush3.msra.mxu0 %v40494_v17  ;;  %34890 = vmatprep.mubr.msk.f32.mxu0 %vm39741_vm1, %v43804_v9  ;;  %v39682_v17 = vld [vmem:[%s43776_s8 + $0xb0] sm:$0xff] }
 0x999   :  { %8216 = vrot.lane.b32.xlu0 %v39680_v5, %s39742_s24  ;;  %34923 = vmatprep.subr.mxu0 %v43804_v9 }
 0x99d   :  { %2652 = vrot.lane.b32.xlu0 %v40375_v56, %s39746_s27  ;;  %v6823_v56 = vsel %vm1283_vm2, %v6819_v52, 0 }
 0x99e   :  { %v40572_v31 = vand.u32 4294901760, %v6823_v56 }
 0x99f   :  { %34891 = vmatmul.mubr.f32.vlgmr.msra.gmra.mrb[8].mxu0 %v5045_v58 }
 0x9a0   :  { %34924 = vmatpush3.msra.mxu0 %v5898_v51  ;;  %34925 = vmatprep.mubr.msk.f32.mxu0 %vm39741_vm1, %v43804_v9  ;;  %v6903_v26 = vsub.f32 %v6823_v56, %v40572_v31 }
 0x9a1   :  { %34928 = vmatprep.subr.mxu0 %v43804_v9 }
 0x9a2   :  { %v6904_v58 = vand.u32 4294901760, %v6903_v26 }
 0x9a3   :  { %34926 = vmatmul.mubr.f32.vlgmr.msra.gmra.mrb[10].mxu0 %v5967_v21 }
 0x9a4   :  { %34929 = vmatpush3.msra.mxu0 %v5978_v22  ;;  %34930 = vmatprep.mubr.msk.f32.mxu0 %vm39741_vm1, %v43804_v9  ;;  %v6905_v61 = vsub.f32 %v6903_v26, %v6904_v58 }
 0x9a5   :  { %34933 = vmatprep.subr.mxu0 %v43804_v9 }
 0x9a6   :  { %v6906_v37 = vand.u32 4294901760, %v6905_v61 }
 0x9ab   :  { %34931 = vmatmul.mubr.f32.vlgmr.msra.gmra.mrb[10].mxu0 %v5963_v49 }
 0x9ac   :  { %34934 = vmatpush3.msra.mxu0 %v5975_v11  ;;  %34935 = vmatprep.mubr.msk.f32.mxu0 %vm39741_vm1, %v43804_v9 }
 0x9ad   :  { %34938 = vmatprep.subr.mxu0 %v43804_v9 }
 0x9b3   :  { %34936 = vmatmul.mubr.f32.vlgmr.msra.gmra.mrb[10].mxu0 %v5964_v62 }
 0x9b4   :  { %34939 = vmatpush3.msra.mxu0 %v5898_v51  ;;  %34940 = vmatprep.mubr.msk.f32.mxu0 %vm39741_vm1, %v43804_v9 }
 0x9b5   :  { %34943 = vmatprep.subr.mxu0 %v43804_v9 }
 0x9bb   :  { %34941 = vmatmul.mubr.f32.vlgmr.msra.gmra.mrb[10].mxu0 %v5965_v13 }
 0x9bc   :  { %34944 = vmatpush3.msra.mxu0 %v5976_v12  ;;  %34945 = vmatprep.mubr.msk.f32.mxu0 %vm39741_vm1, %v43804_v9 }
 0x9bd   :  { %34948 = vmatprep.subr.mxu0 %v43804_v9 }
 0x9c3   :  { %34946 = vmatmul.mubr.f32.vlgmr.msra.gmra.mrb[10].mxu0 %v5963_v49 }
 0x9c4   :  { %34949 = vmatpush3.msra.mxu0 %v5898_v51  ;;  %34950 = vmatprep.mubr.msk.f32.mxu0 %vm39741_vm1, %v43804_v9 }
 0x9c5   :  { %34983 = vmatprep.subr.mxu0 %v43804_v9 }
 0x9cb   :  { %34951 = vmatmul.mubr.f32.vlgmr.msra.gmra.mrb[10].mxu0 %v5963_v49 }
 0x9cc   :  { %34984 = vmatpush3.msra.mxu0 %v40572_v31  ;;  %34985 = vmatprep.mubr.msk.f32.mxu0 %vm39741_vm1, %v43804_v9 }
 0x9cd   :  { %34988 = vmatprep.subr.mxu0 %v43804_v9 }
 0x9d0   :  { %v40578_v32 = vpop.f32.mrb[4].mxu0 }
 0x9d1   :  { %v34772_v34 = vpop.f32.mrb[5].mxu0 }
 0x9fc   :  { %v4493_v35 = vpop.f32.mrb[6].mxu0 }
 0x9fd   :  { %4498 = vrot.lane.b32.xlu1 %v4493_v35, %s39746_s27  ;;  %v34832_v42 = vpop.f32.mrb[7].mxu0 }
 0xa00   :  { %v6816_v39 = vpop.xlane.xlu0 %6815 }
 0xa01   :  { %39565 = vrcp.f32 %v6816_v39  ;;  %8220 = vrot.lane.b32.xlu1 %v39681_v43, %s39742_s24 }
 0xa04   :  { %v7737_v60 = vpop.permute.xlu0 %7736 }
 0xa05   :  { %8224 = vrot.lane.b32.xlu1 %v39682_v17, %s39742_s24  ;;  %v7741_v27 = vsel %vm1283_vm2, %v7737_v60, 0 }
 0xa06   :  { %v7744_v29 = vand.u32 4294901760, %v7741_v27 }
 0xa08   :  { %v40589_v18 = vpop.permute.xlu0 %8210  ;;  %v7733_v28 = vpop.xlane.xlu1 %7732  ;;  %v7821_v49 = vsub.f32 %v7741_v27, %v7744_v29 }
 0xa09   :  { %92 = vrot.lane.b32.xlu1 %v40594_v19, %s39745_s4  ;;  %v8241_v46 = vand.u32 4294901760, %v40589_v18  ;;  %39567 = vrcp.f32 %v7733_v28 }
 0xa0a   :  { %v7822_v51 = vand.u32 4294901760, %v7821_v49 }
 0xa0b   :  { %v39566_v24 = vpop.eup %39565 }
 0xa0c   :  { %v6818_v41 = vmul.f32 %v39566_v24, %v40505_v59  ;;  %v40600_v44 = vpop.permute.xlu0 %8212  ;;  %v7823_v62 = vsub.f32 %v7821_v49, %v7822_v51 }
 0xa0d   :  { %v8244_v47 = vand.u32 4294901760, %v40600_v44 }
 0xa0e   :  { %v6821_v48 = vsel %vm1279_vm9, %v6818_v41, 0  ;;  %v7824_v5 = vand.u32 4294901760, %v7823_v62 }
 0xa0f   :  { %v40609_v53 = vpack.c.bf16 %v8244_v47, %v8241_v46  ;;  %v6891_v54 = vand.u32 4294901760, %v6821_v48  ;;  %v8342_v41 = vsub.f32 %v40600_v44, %v8244_v47 }
 0xa10   :  { %v40611_v57 = vpop.permute.xlu0 %8214 }
 0xa11   :  { %v6892_v23 = vsub.f32 %v6821_v48, %v6891_v54  ;;  %37594 = vmatprep.subr.bf16.mxu1 %v40609_v53  ;;  %v8247_v0 = vand.u32 4294901760, %v40611_v57 }
 0xa12   :  { %37596 = vmatpush3.bf16.msra.mxu1 %v40609_v53 }
 0xa13   :  { %v6893_v25 = vand.u32 4294901760, %v6892_v23  ;;  %v39568_v52 = vpop.eup %39567 }
 0xa14   :  { %v40615_v59 = vpop.permute.xlu0 %8216  ;;  %v7735_v63 = vmul.f32 %v39568_v52, %v40511_v38 }
 0xa15   :  { %v8250_v1 = vand.u32 4294901760, %v40615_v59  ;;  %v6894_v7 = vsub.f32 %v6892_v23, %v6893_v25 }
 0xa16   :  { %v7739_v4 = vsel %vm1279_vm9, %v7735_v63, 0 }
 0xa17   :  { %v40623_v8 = vpack.c.bf16 %v8250_v1, %v8247_v0  ;;  %v6895_v16 = vand.u32 4294901760, %v6894_v7  ;;  %v7809_v40 = vand.u32 4294901760, %v7739_v4 }
 0xa18   :  { %v2653_v13 = vpop.permute.xlu0 %2652 }
 0xa19   :  { %34986 = vmatmul.mubr.f32.vlgmr.msra.gmra.mrb[12].mxu0 %v6895_v16  ;;  %37598 = vmatprep.subr.bf16.mxu1 %v40623_v8  ;;  %v7810_v30 = vsub.f32 %v7739_v4, %v7809_v40  ;;  %v2655_v21 = vsel %vm816_vm3, %v40230_v50, %v2653_v13 }
 0xa1a   :  { %34989 = vmatpush3.msra.mxu0 %v6906_v37  ;;  %34990 = vmatprep.mubr.msk.f32.mxu0 %vm39741_vm1, %v43804_v9 }
 0xa1b   :  { %34993 = vmatprep.subr.mxu0 %v43804_v9  ;;  %37600 = vmatpush3.bf16.msra.mxu1 %v40623_v8  ;;  %v7811_v38 = vand.u32 4294901760, %v7810_v30 }
 0xa1d   :  { %v7812_v55 = vsub.f32 %v7810_v30, %v7811_v38 }
 0xa1f   :  { %v7813_v11 = vand.u32 4294901760, %v7812_v55 }
 0xa21   :  { %34991 = vmatmul.mubr.f32.vlgmr.msra.gmra.mrb[12].mxu0 %v6891_v54 }
 0xa22   :  { %34994 = vmatpush3.msra.mxu0 %v6903_v26  ;;  %34995 = vmatprep.mubr.msk.f32.mxu0 %vm39741_vm1, %v43804_v9  ;;  %v8335_v26 = vsub.f32 %v40589_v18, %v8241_v46 }
 0xa23   :  { %34998 = vmatprep.subr.mxu0 %v43804_v9 }
 0xa24   :  { %v8336_v48 = vand.u32 4294901760, %v8335_v26  ;;  %v40692_v7 = vpack.c.bf16 %v8342_v41, %v8335_v26 }
 0xa29   :  { %34996 = vmatmul.mubr.f32.vlgmr.msra.gmra.mrb[12].mxu0 %v6892_v23  ;;  %v8356_v23 = vsub.f32 %v40615_v59, %v8250_v1 }
 0xa2a   :  { %34999 = vmatpush3.msra.mxu0 %v40572_v31  ;;  %35000 = vmatprep.mubr.msk.f32.mxu0 %vm39741_vm1, %v43804_v9 }
 0xa2b   :  { %35003 = vmatprep.subr.mxu0 %v43804_v9  ;;  %v8357_v44 = vand.u32 4294901760, %v8356_v23 }
 0xa2d   :  { %v8358_v52 = vsub.f32 %v8356_v23, %v8357_v44 }
 0xa31   :  { %35001 = vmatmul.mubr.f32.vlgmr.msra.gmra.mrb[12].mxu0 %v6893_v25  ;;  %v8337_v25 = vsub.f32 %v8335_v26, %v8336_v48 }
 0xa32   :  { %35004 = vmatpush3.msra.mxu0 %v6904_v58  ;;  %35005 = vmatprep.mubr.msk.f32.mxu0 %vm39741_vm1, %v43804_v9  ;;  %v8349_v58 = vsub.f32 %v40611_v57, %v8247_v0  ;;  %v8359_v0 = vand.u32 4294901760, %v8358_v52 }
 0xa33   :  { %35008 = vmatprep.subr.mxu0 %v43804_v9  ;;  %v8338_v16 = vand.u32 4294901760, %v8337_v25 }
 0xa34   :  { %v8350_v37 = vand.u32 4294901760, %v8349_v58  ;;  %v40696_v63 = vpack.c.bf16 %v8356_v23, %v8349_v58 }
 0xa36   :  { %v8351_v28 = vsub.f32 %v8349_v58, %v8350_v37  ;;  %v40698_v4 = vpack.c.bf16 %v8357_v44, %v8350_v37 }
 0xa38   :  { %v8352_v57 = vand.u32 4294901760, %v8351_v28 }
 0xa39   :  { %35006 = vmatmul.mubr.f32.vlgmr.msra.gmra.mrb[12].mxu0 %v6891_v54 }
 0xa3a   :  { %35009 = vmatpush3.msra.mxu0 %v40572_v31  ;;  %35010 = vmatprep.mubr.msk.f32.mxu0 %vm39741_vm1, %v43804_v9  ;;  %v37613_v59 = vpack.c.bf16 %v8359_v0, %v8352_v57 }
 0xa3b   :  { %35043 = vmatprep.subr.mxu0 %v43804_v9 }
 0xa41   :  { %35011 = vmatmul.mubr.f32.vlgmr.msra.gmra.mrb[12].mxu0 %v6891_v54  ;;  %v8343_v54 = vand.u32 4294901760, %v8342_v41 }
 0xa42   :  { %35044 = vmatpush3.msra.mxu0 %v7744_v29  ;;  %35045 = vmatprep.mubr.msk.f32.mxu0 %vm39741_vm1, %v43804_v9 }
 0xa43   :  { %35048 = vmatprep.subr.mxu0 %v43804_v9  ;;  %v8344_v61 = vsub.f32 %v8342_v41, %v8343_v54  ;;  %v40694_v46 = vpack.c.bf16 %v8343_v54, %v8336_v48 }
 0xa45   :  { %35046 = vmatmul.mubr.f32.vlgmr.msra.gmra.mrb[14].mxu0 %v7813_v11  ;;  %v8345_v18 = vand.u32 4294901760, %v8344_v61 }
 0xa46   :  { %35049 = vmatpush3.msra.mxu0 %v7824_v5  ;;  %35050 = vmatprep.mubr.msk.f32.mxu0 %vm39741_vm1, %v43804_v9 }
 0xa47   :  { %35053 = vmatprep.subr.mxu0 %v43804_v9  ;;  %v37609_v47 = vpack.c.bf16 %v8345_v18, %v8338_v16 }
 0xa4d   :  { %35051 = vmatmul.mubr.f32.vlgmr.msra.gmra.mrb[14].mxu0 %v7809_v40 }
 0xa4e   :  { %35054 = vmatpush3.msra.mxu0 %v7821_v49  ;;  %35055 = vmatprep.mubr.msk.f32.mxu0 %vm39741_vm1, %v43804_v9 }
 0xa4f   :  { %35058 = vmatprep.subr.mxu0 %v43804_v9 }
 0xa55   :  { %35056 = vmatmul.mubr.f32.vlgmr.msra.gmra.mrb[14].mxu0 %v7810_v30  ;;  %v40712_v30 = vld [vmem:[%s43768_s0] sm:$0xff] }
 0xa56   :  { %35059 = vmatpush3.msra.mxu0 %v7744_v29  ;;  %35060 = vmatprep.mubr.msk.f32.mxu0 %vm39741_vm1, %v43804_v9 }
 0xa57   :  { %35063 = vmatprep.subr.mxu0 %v43804_v9 }
 0xa5d   :  { %35061 = vmatmul.mubr.f32.vlgmr.msra.gmra.mrb[14].mxu0 %v7811_v38 }
 0xa5e   :  { %35064 = vmatpush3.msra.mxu0 %v7822_v51  ;;  %35065 = vmatprep.mubr.msk.f32.mxu0 %vm39741_vm1, %v43804_v9 }
 0xa5f   :  { %35068 = vmatprep.subr.mxu0 %v43804_v9 }
 0xa65   :  { %35066 = vmatmul.mubr.f32.vlgmr.msra.gmra.mrb[14].mxu0 %v7809_v40 }
 0xa66   :  { %35069 = vmatpush3.msra.mxu0 %v7744_v29  ;;  %35070 = vmatprep.mubr.msk.f32.mxu0 %vm39741_vm1, %v43804_v9  ;;  %v39685_v29 = vld [vmem:[%s43776_s8 + $0x98] sm:$0xff] }
 0xa6d   :  { %35071 = vmatmul.mubr.f32.vlgmr.msra.gmra.mrb[14].mxu0 %v7809_v40  ;;  %v39684_v40 = vld [vmem:[%s43776_s8 + $0x68] sm:$0xff] }
 0xa6f   :  { %v4499_v12 = vpop.permute.xlu1 %4498 }
 0xa70   :  { %v4501_v14 = vsel %vm816_vm3, %v40578_v32, %v4499_v12 }
 0xa71   :  { %v8195_v15 = vrot.slane %v4501_v14, 4 }
 0xa72   :  { %v5421_v22 = vpop.f32.mrb[8].mxu0 }
 0xa73   :  { %v8200_v56 = vsel %vm1283_vm2, %v2655_v21, %v8195_v15  ;;  %v34892_v31 = vpop.f32.mrb[9].mxu0  ;;  %v8221_v38 = vpop.permute.xlu1 %8220 }
 0xa74   :  { %v8235_v34 = vsel %vm98_vm0, %v8200_v56, 0  ;;  %v8256_v5 = vand.u32 4294901760, %v8221_v38 }
 0xa75   :  { %v40670_v35 = vand.u32 4294901760, %v8235_v34 }
 0xa76   :  { %v40722_v31 = vsub.f32 %v8221_v38, %v8256_v5 }
 0xa77   :  { %v40673_v42 = vsub.f32 %v8235_v34, %v40670_v35  ;;  %v8225_v12 = vpop.permute.xlu1 %8224 }
 0xa78   :  { %v8262_v34 = vand.u32 4294901760, %v8225_v12  ;;  %v8371_v26 = vand.u32 4294901760, %v40722_v31 }
 0xa79   :  { %v8315_v39 = vand.u32 4294901760, %v40673_v42 }
 0xa7a   :  { %v8384_v41 = vsub.f32 %v8225_v12, %v8262_v34  ;;  %v8372_v18 = vsub.f32 %v40722_v31, %v8371_v26 }
 0xa7b   :  { %v8316_v32 = vsub.f32 %v40673_v42, %v8315_v39  ;;  %v93_v38 = vpop.permute.xlu1 %92 }
 0xa7c   :  { %v8385_v16 = vand.u32 4294901760, %v8384_v41  ;;  %v8373_v28 = vand.u32 4294901760, %v8372_v18 }
 0xa7d   :  { %v8317_v43 = vand.u32 4294901760, %v8316_v32 }
 0xa7e   :  { %v8386_v52 = vsub.f32 %v8384_v41, %v8385_v16 }
 0xa7f   :  { %35089 = vmatprep.mubr.f32.mxu1 %v8317_v43 }
 0xa9e   :  { %v6339_v50 = vpop.f32.mrb[10].mxu0 }
 0xa9f   :  { %6344 = vrot.lane.b32.xlu0 %v6339_v50, %s39746_s27  ;;  %v34952_v60 = vpop.f32.mrb[11].mxu0 }
 0xb11   :  { %v6345_v49 = vpop.permute.xlu0 %6344 }
 0xb12   :  { %v6347_v11 = vsel %vm816_vm3, %v5421_v22, %v6345_v49 }
 0xb14   :  { %v7267_v17 = vpop.f32.mrb[12].mxu0 }
 0xb15   :  { %v35012_v24 = vpop.f32.mrb[13].mxu0 }
 0xb40   :  { %v8185_v1 = vpop.f32.mrb[14].mxu0 }
 0xb41   :  { %8190 = vrot.lane.b32.xlu0 %v8185_v1, %s39746_s27  ;;  %v35072_v27 = vpop.f32.mrb[15].mxu0  ;;  %v8387_v1 = vand.u32 4294901760, %v8386_v52 }
 0xb45   :  { %8218 = vrot.lane.b32.xlu0 %v39684_v40, %s39742_s24  ;;  %v85_v40 = vld [vmem:[%s43777_s9 + $0x30] sm:$0xff] }
 0xb49   :  { %8222 = vrot.lane.b32.xlu0 %v39685_v29, %s39742_s24  ;;  %v8879_v29 = vand.u32 4294901760, %v85_v40 }
 0xb4d   :  { %90 = vrot.lane.b32.xlu0 %v40712_v30, %s39745_s4 }
 0xbb3   :  { %v8191_v51 = vpop.permute.xlu0 %8190 }
 0xbb4   :  { %v8193_v55 = vsel %vm816_vm3, %v7267_v17, %v8191_v51 }
 0xbb5   :  { %v8198_v62 = vrot.slane %v8193_v55, 4  ;;  %v97_v55 = vadd.f32 %v40594_v19, %v93_v38 }
 0xbb7   :  { %v8201_v13 = vsel %vm1283_vm2, %v6347_v11, %v8198_v62  ;;  %v8219_v14 = vpop.permute.xlu0 %8218 }
 0xbb8   :  { %v8238_v15 = vsel %vm98_vm0, %v8201_v13, 0  ;;  %v8253_v21 = vand.u32 4294901760, %v8219_v14 }
 0xbb9   :  { %v40720_v56 = vand.u32 4294901760, %v8238_v15 }
 0xbba   :  { %v40724_v32 = vpack.c.bf16 %v8256_v5, %v8253_v21  ;;  %v40726_v43 = vsub.f32 %v8219_v14, %v8253_v21 }
 0xbbb   :  { %v8324_v50 = vsub.f32 %v8238_v15, %v40720_v56  ;;  %v8223_v22 = vpop.permute.xlu0 %8222 }
 0xbbc   :  { %v8364_v60 = vand.u32 4294901760, %v40726_v43  ;;  %v8259_v17 = vand.u32 4294901760, %v8223_v22  ;;  %37602 = vmatprep.subr.bf16.mxu1 %v40724_v32 }
 0xbbd   :  { %37604 = vmatpush3.bf16.msra.mxu1 %v40724_v32  ;;  %v8325_v24 = vand.u32 4294901760, %v8324_v50 }
 0xbbe   :  { %v40733_v48 = vpack.c.bf16 %v8262_v34, %v8259_v17  ;;  %v8377_v54 = vsub.f32 %v8223_v22, %v8259_v17  ;;  %v8365_v25 = vsub.f32 %v40726_v43, %v8364_v60  ;;  %v84_v34 = vld [vmem:[%s43777_s9 + $0x28] sm:$0xff]  ;;  %v8981_v17 = vsub.f32 %v85_v40, %v8879_v29 }
 0xbbf   :  { %v8326_v58 = vsub.f32 %v8324_v50, %v8325_v24  ;;  %v91_v51 = vpop.permute.xlu0 %90 }
 0xbc0   :  { %v8378_v23 = vand.u32 4294901760, %v8377_v54  ;;  %37606 = vmatprep.subr.bf16.mxu1 %v40733_v48  ;;  %v8366_v37 = vand.u32 4294901760, %v8365_v25  ;;  %v96_v62 = vadd.f32 %v40712_v30, %v91_v51  ;;  %v8982_v25 = vand.u32 4294901760, %v8981_v17 }
 0xbc1   :  { %37608 = vmatpush3.bf16.msra.mxu1 %v40733_v48  ;;  %v8327_v61 = vand.u32 4294901760, %v8326_v58 }
 0xbc2   :  { %37610 = vmatprep.subr.bf16.mxu1 %v37609_v47  ;;  %v8379_v44 = vsub.f32 %v8377_v54, %v8378_v23  ;;  %v37617_v57 = vpack.c.bf16 %v8373_v28, %v8366_v37  ;;  %v8983_v18 = vsub.f32 %v8981_v17, %v8982_v25 }
 0xbc4   :  { %35090 = vmatmul.mubr.f32.vlgmr.msra.gmra.mrb[20].mxu1 %v8327_v61  ;;  %v8380_v0 = vand.u32 4294901760, %v8379_v44  ;;  %v8984_v44 = vand.u32 4294901760, %v8983_v18 }
 0xbc5   :  { %37612 = vmatpush3.bf16.msra.mxu1 %v37609_v47  ;;  %35108 = vmatprep.mubr.f32.mxu1 %v40670_v35  ;;  %v37633_v47 = vpack.c.bf16 %v40722_v31, %v40726_v43  ;;  %v82_v31 = vld [vmem:[%s43777_s9 + $0x18] sm:$0xff] }
 0xbc6   :  { %37614 = vmatprep.subr.bf16.mxu1 %v37613_v59  ;;  %v37621_v27 = vpack.c.bf16 %v8387_v1, %v8380_v0  ;;  %v86_v43 = vld [vmem:[%s43777_s9 + $0x38] sm:$0xff] }
 0xbc9   :  { %37616 = vmatpush3.bf16.msra.mxu1 %v37613_v59  ;;  %v37637_v59 = vpack.c.bf16 %v8384_v41, %v8377_v54 }
 0xbca   :  { %37618 = vmatprep.subr.bf16.mxu1 %v37617_v57 }
 0xbcd   :  { %37620 = vmatpush3.bf16.msra.mxu1 %v37617_v57 }
 0xbce   :  { %37622 = vmatprep.subr.bf16.mxu1 %v37621_v27 }
 0xbd1   :  { %37624 = vmatpush3.bf16.msra.mxu1 %v37621_v27 }
 0xbd2   :  { %37626 = vmatprep.subr.bf16.mxu1 %v40692_v7 }
 0xbd4   :  { %35109 = vmatmul.mubr.f32.vlgmr.msra.gmra.mrb[20].mxu1 %v40720_v56 }
 0xbd5   :  { %37628 = vmatpush3.bf16.msra.mxu1 %v40692_v7  ;;  %35127 = vmatprep.mubr.f32.mxu1 %v40673_v42  ;;  %v37665_v42 = vpack.c.bf16 %v8371_v26, %v8364_v60 }
 0xbd6   :  { %37630 = vmatprep.subr.bf16.mxu1 %v40696_v63 }
 0xbd9   :  { %37632 = vmatpush3.bf16.msra.mxu1 %v40696_v63  ;;  %v83_v63 = vld [vmem:[%s43777_s9 + $0x20] sm:$0xff] }
 0xbda   :  { %37634 = vmatprep.subr.bf16.mxu1 %v37633_v47 }
 0xbdd   :  { %37636 = vmatpush3.bf16.msra.mxu1 %v37633_v47 }
 0xbde   :  { %37638 = vmatprep.subr.bf16.mxu1 %v37637_v59 }
 0xbe1   :  { %37640 = vmatpush3.bf16.msra.mxu1 %v37637_v59 }
 0xbe2   :  { %37642 = vmatprep.subr.bf16.mxu1 %v40609_v53 }
 0xbe4   :  { %35128 = vmatmul.mubr.f32.vlgmr.msra.gmra.mrb[20].mxu1 %v8324_v50 }
 0xbe5   :  { %37644 = vmatpush3.bf16.msra.mxu1 %v40609_v53  ;;  %35146 = vmatprep.mubr.f32.mxu1 %v8315_v39  ;;  %v37669_v39 = vpack.c.bf16 %v8385_v16, %v8378_v23 }
 0xbe6   :  { %37646 = vmatprep.subr.bf16.mxu1 %v40623_v8 }
 0xbe9   :  { %37648 = vmatpush3.bf16.msra.mxu1 %v40623_v8 }
 0xbea   :  { %37650 = vmatprep.subr.bf16.mxu1 %v40724_v32 }
 0xbed   :  { %37652 = vmatpush3.bf16.msra.mxu1 %v40724_v32 }
 0xbee   :  { %37654 = vmatprep.subr.bf16.mxu1 %v40733_v48 }
 0xbf1   :  { %37656 = vmatpush3.bf16.msra.mxu1 %v40733_v48 }
 0xbf2   :  { %37658 = vmatprep.subr.bf16.mxu1 %v40694_v46 }
 0xbf4   :  { %35147 = vmatmul.mubr.f32.vlgmr.msra.gmra.mrb[20].mxu1 %v8325_v24 }
 0xbf5   :  { %37660 = vmatpush3.bf16.msra.mxu1 %v40694_v46  ;;  %35165 = vmatprep.mubr.f32.mxu1 %v40670_v35 }
 0xbf6   :  { %37662 = vmatprep.subr.bf16.mxu1 %v40698_v4 }
 0xbf9   :  { %37664 = vmatpush3.bf16.msra.mxu1 %v40698_v4  ;;  %v8876_v4 = vand.u32 4294901760, %v83_v63 }
 0xbfa   :  { %37666 = vmatprep.subr.bf16.mxu1 %v37665_v42 }
 0xbfb   :  { %v40793_v49 = vpack.c.bf16 %v8879_v29, %v8876_v4  ;;  %v8974_v60 = vsub.f32 %v83_v63, %v8876_v4 }
 0xbfd   :  { %37668 = vmatpush3.bf16.msra.mxu1 %v37665_v42  ;;  %v8975_v23 = vand.u32 4294901760, %v8974_v60  ;;  %v40840_v57 = vpack.c.bf16 %v8981_v17, %v8974_v60 }
 0xbfe   :  { %37670 = vmatprep.subr.bf16.mxu1 %v37669_v39 }
 0xbff   :  { %v8976_v16 = vsub.f32 %v8974_v60, %v8975_v23  ;;  %v40844_v1 = vpack.c.bf16 %v8982_v25, %v8975_v23 }
 0xc01   :  { %37672 = vmatpush3.bf16.msra.mxu1 %v37669_v39  ;;  %v8977_v37 = vand.u32 4294901760, %v8976_v16 }
 0xc02   :  { %37674 = vmatprep.subr.bf16.mxu1 %v40609_v53 }
 0xc03   :  { %v40836_v28 = vpack.c.bf16 %v8984_v44, %v8977_v37 }
 0xc04   :  { %35166 = vmatmul.mubr.f32.vlgmr.msra.gmra.mrb[20].mxu1 %v40720_v56 }
 0xc05   :  { %37676 = vmatpush3.bf16.msra.mxu1 %v40609_v53  ;;  %35184 = vmatprep.mubr.f32.mxu1 %v40670_v35  ;;  %v79_v53 = vld [vmem:[%s43777_s9] sm:$0xff]  ;;  %v81_v35 = vld [vmem:[%s43777_s9 + $0x10] sm:$0xff] }
 0xc06   :  { %37678 = vmatprep.subr.bf16.mxu1 %v40623_v8  ;;  %v8873_v7 = vand.u32 4294901760, %v81_v35 }
 0xc08   :  { %v8967_v22 = vsub.f32 %v81_v35, %v8873_v7 }
 0xc09   :  { %37680 = vmatpush3.bf16.msra.mxu1 %v40623_v8  ;;  %v8870_v8 = vand.u32 4294901760, %v79_v53 }
 0xc0a   :  { %37682 = vmatprep.subr.bf16.mxu1 %v40724_v32  ;;  %v8968_v26 = vand.u32 4294901760, %v8967_v22 }
 0xc0b   :  { %v40783_v46 = vpack.c.bf16 %v8873_v7, %v8870_v8  ;;  %v8960_v50 = vsub.f32 %v79_v53, %v8870_v8 }
 0xc0d   :  { %37684 = vmatpush3.bf16.msra.mxu1 %v40724_v32  ;;  %37690 = vmatprep.subr.bf16.mxu0 %v40783_v46  ;;  %v80_v32 = vld [vmem:[%s43777_s9 + $0x8] sm:$0xff]  ;;  %v8961_v24 = vand.u32 4294901760, %v8960_v50  ;;  %v40838_v52 = vpack.c.bf16 %v8967_v22, %v8960_v50 }
 0xc0e   :  { %37686 = vmatprep.subr.bf16.mxu1 %v40733_v48  ;;  %37692 = vmatpush3.bf16.msra.mxu0 %v40783_v46 }
 0xc0f   :  { %37694 = vmatprep.subr.bf16.mxu0 %v40793_v49  ;;  %v8962_v41 = vsub.f32 %v8960_v50, %v8961_v24  ;;  %v40842_v0 = vpack.c.bf16 %v8968_v26, %v8961_v24 }
 0xc11   :  { %37688 = vmatpush3.bf16.msra.mxu1 %v40733_v48  ;;  %v8969_v48 = vsub.f32 %v8967_v22, %v8968_v26  ;;  %v8963_v54 = vand.u32 4294901760, %v8962_v41 }
 0xc12   :  { %35319 = vmatprep.subr.mxu1 %v43804_v9  ;;  %37696 = vmatpush3.bf16.msra.mxu0 %v40793_v49 }
 0xc13   :  { %v8970_v58 = vand.u32 4294901760, %v8969_v48 }
 0xc14   :  { %35185 = vmatmul.mubr.f32.vlgmr.msra.gmra.mrb[20].mxu1 %v40720_v56 }
 0xc15   :  { %35321 = vmatprep.mubr.msk.f32.mxu1 %vm39741_vm1, %v43804_v9  ;;  %v40833_v61 = vpack.c.bf16 %v8970_v58, %v8963_v54 }
 0xc17   :  { %37698 = vmatprep.subr.bf16.mxu0 %v40833_v61 }
 0xce7   :  { %v35186_v11 = vpop.f32.mrb[20].mxu1 }
 0xce8   :  { %v40799_v5 = vadd.f32 %v35186_v11, %v97_v55  ;;  %v8810_v13 = vpop.f32.mrb[21].mxu1 }
 0xce9   :  { %v40801_v12 = vadd.f32 %v8810_v13, %v96_v62 }
 0xcea   :  { %v8823_v14 = vsel %vm816_vm3, %v40799_v5, 0.0  ;;  %v8830_v30 = vmul.f32 %v40799_v5, %v40799_v5 }
 0xceb   :  { %8824 = vadd.xlane.f32.xlu1 %v8823_v14  ;;  %v8820_v15 = vsel %vm816_vm3, %v40801_v12, 0.0  ;;  %v8829_v21 = vmul.f32 %v40801_v12, %v40801_v12 }
 0xcec   :  { %8821 = vadd.xlane.f32.xlu0 %v8820_v15  ;;  %v8834_v56 = vsel %vm816_vm3, %v8830_v30, 0.0 }
 0xced   :  { %v8831_v19 = vsel %vm816_vm3, %v8829_v21, 0.0 }
 0xcf0   :  { %8832 = vadd.xlane.f32.xlu0 %v8831_v19 }
 0xcf4   :  { %8835 = vadd.xlane.f32.xlu0 %v8834_v56  ;;  %v87_v56 = vld [vmem:[%s43778_s10] sm:$0xff] }
 0xcf5   :  { %v8854_v17 = vrot.slane %v87_v56, %v40165_v3  ;;  %v8860_v48 = vrot.slane %v87_v56, %v40390_v20 }
 0xcfc   :  { %9405 = vrot.lane.b32.xlu1 %v79_v53, %s39742_s24 }
 0xd00   :  { %9409 = vrot.lane.b32.xlu1 %v81_v35, %s39742_s24 }
 0xd04   :  { %9411 = vrot.lane.b32.xlu1 %v82_v31, %s39742_s24 }
 0xd08   :  { %9415 = vrot.lane.b32.xlu1 %v84_v34, %s39742_s24 }
 0xd0a   :  { %9407 = vrot.lane.b32.xlu0 %v80_v32, %s39742_s24 }
 0xd0c   :  { %9419 = vrot.lane.b32.xlu1 %v86_v43, %s39742_s24 }
 0xd0e   :  { %9413 = vrot.lane.b32.xlu0 %v83_v63, %s39742_s24 }
 0xd12   :  { %9417 = vrot.lane.b32.xlu0 %v85_v40, %s39742_s24 }
 0xd78   :  { %v8825_v27 = vpop.xlane.xlu1 %8824 }
 0xd79   :  { %v8822_v47 = vpop.xlane.xlu0 %8821  ;;  %v8828_v53 = vmul.f32 0.03125, %v8825_v27 }
 0xd7a   :  { %v8827_v59 = vmul.f32 0.03125, %v8822_v47 }
 0xd7b   :  { %v8842_v40 = vmul.f32 %v8828_v53, %v8828_v53  ;;  %v8840_v23 = vsub.f32 %v40799_v5, %v8828_v53 }
 0xd7c   :  { %v40846_v42 = vpop.permute.xlu1 %9405  ;;  %v8841_v8 = vmul.f32 %v8827_v59, %v8827_v59  ;;  %v8839_v60 = vsub.f32 %v40801_v12, %v8827_v59 }
 0xd7d   :  { %v8833_v39 = vpop.xlane.xlu0 %8832 }
 0xd7e   :  { %v8837_v35 = vmul.f32 0.03125, %v8833_v39 }
 0xd80   :  { %v8843_v7 = vsub.f32 %v8837_v35, %v8841_v8  ;;  %v40848_v63 = vpop.permute.xlu1 %9409 }
 0xd81   :  { %v8836_v4 = vpop.xlane.xlu0 %8835 }
 0xd82   :  { %v8845_v29 = vadd.f32 1e-06, %v8843_v7  ;;  %v8838_v38 = vmul.f32 0.03125, %v8836_v4 }
 0xd84   :  { %39569 = vrsqrt.f32 %v8845_v29  ;;  %v8844_v51 = vsub.f32 %v8838_v38, %v8842_v40  ;;  %v40850_v55 = vpop.permute.xlu1 %9411 }
 0xd85   :  { %v17954_v62 = vand.u32 4294901760, %v40850_v55  ;;  %v40853_v11 = vpop.permute.xlu0 %9407 }
 0xd86   :  { %v8846_v13 = vadd.f32 1e-06, %v8844_v51  ;;  %v17951_v14 = vand.u32 4294901760, %v40853_v11 }
 0xd87   :  { %v40859_v15 = vsub.f32 %v40850_v55, %v17954_v62 }
 0xd88   :  { %39571 = vrsqrt.f32 %v8846_v13  ;;  %v40864_v21 = vsub.f32 %v40853_v11, %v17951_v14  ;;  %v40866_v19 = vpop.permute.xlu1 %9415 }
 0xd89   :  { %v17957_v30 = vand.u32 4294901760, %v40866_v19  ;;  %v18049_v34 = vand.u32 4294901760, %v40859_v15 }
 0xd8a   :  { %v18042_v31 = vand.u32 4294901760, %v40864_v21  ;;  %v40876_v32 = vpack.c.bf16 %v40859_v15, %v40864_v21 }
 0xd8b   :  { %v18055_v43 = vsub.f32 %v40866_v19, %v17957_v30 }
 0xd8c   :  { %v40881_v50 = vpop.permute.xlu1 %9419  ;;  %v40887_v22 = vpack.c.bf16 %v18049_v34, %v18042_v31 }
 0xd8d   :  { %v17960_v24 = vand.u32 4294901760, %v40881_v50  ;;  %v18056_v58 = vand.u32 4294901760, %v18055_v43 }
 0xd8e   :  { %v39570_v26 = vpop.eup %39569 }
 0xd8f   :  { %v8849_v41 = vmul.f32 %v39570_v26, %v8839_v60  ;;  %v18062_v54 = vsub.f32 %v40881_v50, %v17960_v24  ;;  %v18057_v37 = vsub.f32 %v18055_v43, %v18056_v58 }
 0xd91   :  { %v8855_v25 = vmul.f32 %v8854_v17, %v8849_v41  ;;  %v18063_v16 = vand.u32 4294901760, %v18062_v54  ;;  %v40897_v18 = vpack.c.bf16 %v18062_v54, %v18055_v43  ;;  %v18058_v59 = vand.u32 4294901760, %v18057_v37 }
 0xd92   :  { %v39572_v12 = vpop.eup %39571 }
 0xd93   :  { %v8850_v44 = vmul.f32 %v39572_v12, %v8840_v23  ;;  %v40899_v27 = vadd.f32 %v8860_v48, %v8855_v25  ;;  %v18064_v47 = vsub.f32 %v18062_v54, %v18063_v16  ;;  %v40901_v39 = vpack.c.bf16 %v18063_v16, %v18056_v58 }
 0xd95   :  { %v8864_v8 = vsel %vm816_vm3, %v40899_v27, 0  ;;  %v8856_v35 = vmul.f32 %v8854_v17, %v8850_v44  ;;  %v18065_v7 = vand.u32 4294901760, %v18064_v47 }
 0xd96   :  { %v8938_v4 = vand.u32 4294901760, %v8864_v8 }
 0xd97   :  { %v40905_v5 = vadd.f32 %v8860_v48, %v8856_v35  ;;  %v40907_v53 = vpack.c.bf16 %v18065_v7, %v18058_v59  ;;  %v43784_v35 = vmov 0.0|0.0  }
 0xd98   :  { %v8939_v40 = vsub.f32 %v8864_v8, %v8938_v4 }
 0xd99   :  { %v8867_v29 = vsel %vm816_vm3, %v40905_v5, 0 }
 0xd9a   :  { %v8940_v38 = vand.u32 4294901760, %v8939_v40  ;;  %v40911_v51 = vand.u32 4294901760, %v8867_v29 }
 0xd9c   :  { %v8941_v13 = vsub.f32 %v8939_v40, %v8940_v38  ;;  %v8949_v56 = vsub.f32 %v8867_v29, %v40911_v51 }
 0xd9e   :  { %v8942_v43 = vand.u32 4294901760, %v8941_v13  ;;  %v8950_v60 = vand.u32 4294901760, %v8949_v56 }
 0xda0   :  { %35195 = vmatprep.mubr.f32.mxu0 %v8942_v43  ;;  %v8951_v17 = vsub.f32 %v8949_v56, %v8950_v60 }
 0xda2   :  { %v8952_v26 = vand.u32 4294901760, %v8951_v17 }
 0xda4   :  { %35196 = vmatmul.mubr.f32.vlgmr.msra.gmra.mrb[16].mxu0 %v8952_v26 }
 0xda5   :  { %37700 = vmatpush3.bf16.msra.mxu0 %v40833_v61  ;;  %35206 = vmatprep.mubr.f32.mxu0 %v8938_v4  ;;  %v9414_v61 = vpop.permute.xlu0 %9413 }
 0xda6   :  { %37702 = vmatprep.subr.bf16.mxu0 %v40836_v28  ;;  %v9423_v23 = vsel %vm98_vm0, %v9414_v61, %v40866_v19 }
 0xda7   :  { %v9439_v16 = vand.u32 4294901760, %v9423_v23 }
 0xda9   :  { %37704 = vmatpush3.bf16.msra.mxu0 %v40836_v28  ;;  %v54_v28 = vld [vmem:[%s43770_s2] sm:$0xff]  ;;  %v9418_v41 = vpop.permute.xlu0 %9417  ;;  %v9527_v59 = vsub.f32 %v9423_v23, %v9439_v16 }
 0xdaa   :  { %37706 = vmatprep.subr.bf16.mxu0 %v40838_v52  ;;  %v9430_v48 = vsel %vm816_vm3, %v54_v28, 0 }
 0xdab   :  { %v40943_v25 = vand.u32 4294901760, %v9430_v48 }
 0xdac   :  { %35207 = vmatmul.mubr.f32.vlgmr.msra.gmra.mrb[16].mxu0 %v40911_v51 }
 0xdad   :  { %37708 = vmatpush3.bf16.msra.mxu0 %v40838_v52  ;;  %35217 = vmatprep.mubr.f32.mxu0 %v8939_v40  ;;  %v9422_v52 = vsel %vm98_vm0, %v40848_v63, %v40850_v55  ;;  %v9424_v63 = vsel %vm98_vm0, %v9418_v41, %v40881_v50  ;;  %v9502_v37 = vsub.f32 %v9430_v48, %v40943_v25  ;;  %v9528_v40 = vand.u32 4294901760, %v9527_v59 }
 0xdae   :  { %37710 = vmatprep.subr.bf16.mxu0 %v40840_v57  ;;  %v9436_v54 = vand.u32 4294901760, %v9422_v52  ;;  %v9442_v12 = vand.u32 4294901760, %v9424_v63  ;;  %v18050_v55 = vsub.f32 %v40859_v15, %v18049_v34 }
 0xdb0   :  { %v9534_v8 = vsub.f32 %v9424_v63, %v9442_v12 }
 0xdb1   :  { %37712 = vmatpush3.bf16.msra.mxu0 %v40840_v57  ;;  %v9421_v57 = vsel %vm98_vm0, %v40846_v42, %v40853_v11  ;;  %v9520_v42 = vsub.f32 %v9422_v52, %v9436_v54 }
 0xdb2   :  { %37714 = vmatprep.subr.bf16.mxu0 %v40783_v46  ;;  %v9433_v58 = vand.u32 4294901760, %v9421_v57  ;;  %v9535_v29 = vand.u32 4294901760, %v9534_v8 }
 0xdb3   :  { %v9521_v44 = vand.u32 4294901760, %v9520_v42 }
 0xdb4   :  { %35218 = vmatmul.mubr.f32.vlgmr.msra.gmra.mrb[16].mxu0 %v8949_v56  ;;  %v9529_v56 = vsub.f32 %v9527_v59, %v9528_v40  ;;  %v9536_v43 = vsub.f32 %v9534_v8, %v9535_v29  ;;  %v37765_v48 = vpack.c.bf16 %v9535_v29, %v9528_v40 }
 0xdb5   :  { %37716 = vmatpush3.bf16.msra.mxu0 %v40783_v46  ;;  %35228 = vmatprep.mubr.f32.mxu0 %v8940_v38  ;;  %v9522_v7 = vsub.f32 %v9520_v42, %v9521_v44  ;;  %v37738_v38 = vpack.c.bf16 %v9436_v54, %v9433_v58 }
 0xdb6   :  { %37718 = vmatprep.subr.bf16.mxu0 %v40793_v49  ;;  %v9530_v26 = vand.u32 4294901760, %v9529_v56  ;;  %v9537_v61 = vand.u32 4294901760, %v9536_v43 }
 0xdb9   :  { %37720 = vmatpush3.bf16.msra.mxu0 %v40793_v49 }
 0xdba   :  { %37722 = vmatprep.subr.bf16.mxu0 %v40842_v0 }
 0xdbc   :  { %35229 = vmatmul.mubr.f32.vlgmr.msra.gmra.mrb[16].mxu0 %v8950_v60 }
 0xdbd   :  { %37724 = vmatpush3.bf16.msra.mxu0 %v40842_v0  ;;  %35239 = vmatprep.mubr.f32.mxu0 %v8938_v4  ;;  %v9513_v0 = vsub.f32 %v9421_v57, %v9433_v58  ;;  %v37753_v57 = vpack.c.bf16 %v9534_v8, %v9527_v59 }
 0xdbe   :  { %37726 = vmatprep.subr.bf16.mxu0 %v40844_v1 }
 0xdbf   :  { %v9514_v47 = vand.u32 4294901760, %v9513_v0  ;;  %v37750_v52 = vpack.c.bf16 %v9520_v42, %v9513_v0 }
 0xdc1   :  { %37728 = vmatpush3.bf16.msra.mxu0 %v40844_v1  ;;  %v9503_v1 = vand.u32 4294901760, %v9502_v37  ;;  %v9515_v13 = vsub.f32 %v9513_v0, %v9514_v47  ;;  %v37762_v41 = vpack.c.bf16 %v9521_v44, %v9514_v47 }
 0xdc2   :  { %37730 = vmatprep.subr.bf16.mxu0 %v40783_v46 }
 0xdc3   :  { %v9516_v60 = vand.u32 4294901760, %v9515_v13 }
 0xdc4   :  { %35240 = vmatmul.mubr.f32.vlgmr.msra.gmra.mrb[16].mxu0 %v40911_v51 }
 0xdc5   :  { %37732 = vmatpush3.bf16.msra.mxu0 %v40783_v46  ;;  %35250 = vmatprep.mubr.f32.mxu0 %v8938_v4  ;;  %v9504_v46 = vsub.f32 %v9502_v37, %v9503_v1  ;;  %v9523_v4 = vand.u32 4294901760, %v9522_v7 }
 0xdc6   :  { %37734 = vmatprep.subr.bf16.mxu0 %v40793_v49 }
 0xdc7   :  { %v9505_v17 = vand.u32 4294901760, %v9504_v46  ;;  %v37744_v28 = vpack.c.bf16 %v9523_v4, %v9516_v60 }
 0xdc9   :  { %37736 = vmatpush3.bf16.msra.mxu0 %v40793_v49  ;;  %v37741_v49 = vpack.c.bf16 %v9442_v12, %v9439_v16 }
 0xdca   :  { %37737 = vmatprep.subr.bf16.mxu0 %v43784_v35 }
 0xdcc   :  { %35251 = vmatmul.mubr.f32.vlgmr.msra.gmra.mrb[16].mxu0 %v40911_v51  ;;  %v37747_v51 = vpack.c.bf16 %v9537_v61, %v9530_v26 }
 0xdcd   :  { %37739 = vmatpush3.bf16.msra.mxu0 %v37738_v38  ;;  %35261 = vmatprep.mubr.msk.f32.mxu0 %vm39741_vm1, %v43804_v9 }
 0xdce   :  { %37740 = vmatprep.subr.bf16.mxu0 %v43784_v35 }
 0xdd1   :  { %37742 = vmatpush3.bf16.msra.mxu0 %v37741_v49 }
 0xdd2   :  { %37743 = vmatprep.subr.bf16.mxu0 %v43784_v35 }
 0xdd4   :  { %35262 = vmatmul.mubr.f32.vlgmr.msra.gmra.mrb[18].mxu0 %v9505_v17 }
 0xdd5   :  { %37745 = vmatpush3.bf16.msra.mxu0 %v37744_v28  ;;  %35272 = vmatprep.mubr.msk.f32.mxu0 %vm39741_vm1, %v43804_v9 }
 0xdd6   :  { %37746 = vmatprep.subr.bf16.mxu0 %v43784_v35 }
 0xdd9   :  { %37748 = vmatpush3.bf16.msra.mxu0 %v37747_v51 }
 0xdda   :  { %37749 = vmatprep.subr.bf16.mxu0 %v43784_v35 }
 0xddc   :  { %35273 = vmatmul.mubr.f32.vlgmr.msra.gmra.mrb[18].mxu0 %v40943_v25 }
 0xddd   :  { %37751 = vmatpush3.bf16.msra.mxu0 %v37750_v52  ;;  %35283 = vmatprep.mubr.msk.f32.mxu0 %vm39741_vm1, %v43804_v9 }
 0xdde   :  { %37752 = vmatprep.subr.bf16.mxu0 %v43784_v35 }
 0xde1   :  { %37754 = vmatpush3.bf16.msra.mxu0 %v37753_v57 }
 0xde2   :  { %37755 = vmatprep.subr.bf16.mxu0 %v43784_v35 }
 0xde4   :  { %35284 = vmatmul.mubr.f32.vlgmr.msra.gmra.mrb[18].mxu0 %v9502_v37 }
 0xde5   :  { %37757 = vmatpush3.bf16.msra.mxu0 %v37738_v38  ;;  %35294 = vmatprep.mubr.msk.f32.mxu0 %vm39741_vm1, %v43804_v9 }
 0xde6   :  { %37758 = vmatprep.subr.bf16.mxu0 %v43784_v35 }
 0xde9   :  { %37760 = vmatpush3.bf16.msra.mxu0 %v37741_v49 }
 0xdea   :  { %37761 = vmatprep.subr.bf16.mxu0 %v43784_v35 }
 0xdec   :  { %35295 = vmatmul.mubr.f32.vlgmr.msra.gmra.mrb[18].mxu0 %v9503_v1 }
 0xded   :  { %37763 = vmatpush3.bf16.msra.mxu0 %v37762_v41  ;;  %35305 = vmatprep.mubr.msk.f32.mxu0 %vm39741_vm1, %v43804_v9 }
 0xdee   :  { %37764 = vmatprep.subr.bf16.mxu0 %v43784_v35 }
 0xdf1   :  { %37766 = vmatpush3.bf16.msra.mxu0 %v37765_v48 }
 0xdf2   :  { %37767 = vmatprep.subr.bf16.mxu0 %v43784_v35 }
 0xdf4   :  { %35306 = vmatmul.mubr.f32.vlgmr.msra.gmra.mrb[18].mxu0 %v40943_v25 }
 0xdf5   :  { %37769 = vmatpush3.bf16.msra.mxu0 %v37738_v38  ;;  %35316 = vmatprep.mubr.msk.f32.mxu0 %vm39741_vm1, %v43804_v9 }
 0xdf6   :  { %37770 = vmatprep.subr.bf16.mxu0 %v43784_v35 }
 0xdf9   :  { %37772 = vmatpush3.bf16.msra.mxu0 %v37741_v49 }
 0xdfa   :  { %35349 = vmatprep.subr.mxu0 %v43804_v9 }
 0xdfc   :  { %35317 = vmatmul.mubr.f32.vlgmr.msra.gmra.mrb[18].mxu0 %v40943_v25 }
 0xdfd   :  { %35351 = vmatprep.mubr.msk.f32.mxu0 %vm39741_vm1, %v43804_v9 }
 0xe9f   :  { %v40983_v54 = vpop.f32.mrb[16].mxu0 }
 0xea0   :  { %v40985_v58 = vpop.f32.mrb[17].mxu0  ;;  %v15437_v63 = vrot.slane %v40983_v54, 4 }
 0xea1   :  { %10836 = vrot.lane.b32.xlu0 %v40985_v58, %s39745_s4  ;;  %v11759_v23 = vrot.slane %v40985_v58, 4  ;;  %v9918_v25 = vsel %vm816_vm3, %v40985_v58, 0 }
 0xea2   :  { %v9989_v42 = vand.u32 4294901760, %v9918_v25 }
 0xea4   :  { %v9990_v0 = vsub.f32 %v9918_v25, %v9989_v42  ;;  %v11761_v25 = vsel %vm816_vm3, %v11759_v23, 0 }
 0xea5   :  { %12675 = vrot.lane.b32.xlu0 %v11759_v23, %s39745_s4 }
 0xea6   :  { %v9991_v16 = vand.u32 4294901760, %v9990_v0 }
 0xea8   :  { %v9992_v47 = vsub.f32 %v9990_v0, %v9991_v16 }
 0xea9   :  { %14514 = vrot.lane.b32.xlu0 %v40983_v54, %s39745_s4 }
 0xeaa   :  { %v9993_v7 = vand.u32 4294901760, %v9992_v47 }
 0xead   :  { %16353 = vrot.lane.b32.xlu0 %v15437_v63, %s39745_s4 }
 0xecf   :  { %v41001_v12 = vpop.f32.mrb[18].mxu0 }
 0xed0   :  { %10838 = vrot.lane.b32.xlu1 %v41001_v12, %s39745_s4  ;;  %v35318_v37 = vpop.f32.mrb[19].mxu0  ;;  %v9921_v44 = vsel %vm816_vm3, %v41001_v12, 0  ;;  %v41008_v8 = vrot.slane %v41001_v12, 2  ;;  %v41014_v29 = vrot.slane %v41001_v12, 4  ;;  %v41021_v46 = vrot.slane %v41001_v12, 6 }
 0xed1   :  { %v9924_v59 = vand.u32 4294901760, %v9921_v44 }
 0xed3   :  { %35320 = vmatpush3.xpose.msra.mxu1 %v9924_v59  ;;  %v10001_v1 = vsub.f32 %v9921_v44, %v9924_v59 }
 0xed4   :  { %12677 = vrot.lane.b32.xlu1 %v41008_v8, %s39745_s4  ;;  %35324 = vmatprep.subr.mxu1 %v43804_v9 }
 0xed5   :  { %v10002_v40 = vand.u32 4294901760, %v10001_v1 }
 0xed6   :  { %35322 = vmatmul.mubr.f32.vlgmr.msra.gmra.mrb[22].mxu1 %v9993_v7 }
 0xed7   :  { %v10003_v38 = vsub.f32 %v10001_v1, %v10002_v40  ;;  %35326 = vmatprep.mubr.msk.f32.mxu1 %vm39741_vm1, %v43804_v9 }
 0xed8   :  { %14516 = vrot.lane.b32.xlu1 %v41014_v29, %s39745_s4 }
 0xed9   :  { %v10004_v13 = vand.u32 4294901760, %v10003_v38 }
 0xedb   :  { %35325 = vmatpush3.xpose.msra.mxu1 %v10004_v13 }
 0xedc   :  { %16355 = vrot.lane.b32.xlu1 %v41021_v46, %s39745_s4  ;;  %35329 = vmatprep.subr.mxu1 %v43804_v9 }
 0xede   :  { %35327 = vmatmul.mubr.f32.vlgmr.msra.gmra.mrb[22].mxu1 %v9989_v42 }
 0xedf   :  { %35330 = vmatpush3.xpose.msra.mxu1 %v10001_v1  ;;  %35331 = vmatprep.mubr.msk.f32.mxu1 %vm39741_vm1, %v43804_v9 }
 0xee0   :  { %35334 = vmatprep.subr.mxu1 %v43804_v9 }
 0xee6   :  { %35332 = vmatmul.mubr.f32.vlgmr.msra.gmra.mrb[22].mxu1 %v9990_v0  ;;  %v11831_v0 = vand.u32 4294901760, %v11761_v25 }
 0xee7   :  { %35335 = vmatpush3.xpose.msra.mxu1 %v9924_v59  ;;  %35336 = vmatprep.mubr.msk.f32.mxu1 %vm39741_vm1, %v43804_v9 }
 0xee8   :  { %35339 = vmatprep.subr.mxu1 %v43804_v9  ;;  %v11832_v37 = vsub.f32 %v11761_v25, %v11831_v0 }
 0xeea   :  { %v11833_v58 = vand.u32 4294901760, %v11832_v37 }
 0xeec   :  { %v11834_v47 = vsub.f32 %v11832_v37, %v11833_v58 }
 0xeee   :  { %35337 = vmatmul.mubr.f32.vlgmr.msra.gmra.mrb[22].mxu1 %v9991_v16  ;;  %v11835_v1 = vand.u32 4294901760, %v11834_v47 }
 0xeef   :  { %35340 = vmatpush3.xpose.msra.mxu1 %v10002_v40  ;;  %35341 = vmatprep.mubr.msk.f32.mxu1 %vm39741_vm1, %v43804_v9 }
 0xef0   :  { %35344 = vmatprep.subr.mxu1 %v43804_v9 }
 0xef6   :  { %35342 = vmatmul.mubr.f32.vlgmr.msra.gmra.mrb[22].mxu1 %v9989_v42 }
 0xef7   :  { %35345 = vmatpush3.xpose.msra.mxu1 %v9924_v59  ;;  %35346 = vmatprep.mubr.msk.f32.mxu1 %vm39741_vm1, %v43804_v9 }
 0xef8   :  { %35379 = vmatprep.subr.mxu1 %v43804_v9 }
 0xefe   :  { %35347 = vmatmul.mubr.f32.vlgmr.msra.gmra.mrb[22].mxu1 %v9989_v42  ;;  %v11763_v42 = vsel %vm816_vm3, %v41008_v8, 0 }
 0xeff   :  { %35381 = vmatprep.mubr.msk.f32.mxu1 %vm39741_vm1, %v43804_v9  ;;  %v11766_v16 = vand.u32 4294901760, %v11763_v42 }
 0xf01   :  { %v11843_v44 = vsub.f32 %v11763_v42, %v11766_v16 }
 0xf03   :  { %v11844_v23 = vand.u32 4294901760, %v11843_v44 }
 0xf05   :  { %v11845_v59 = vsub.f32 %v11843_v44, %v11844_v23 }
 0xf07   :  { %v11846_v7 = vand.u32 4294901760, %v11845_v59 }
 0xf13   :  { %v10837_v4 = vpop.permute.xlu0 %10836 }
 0xf14   :  { %v10840_v56 = vsel %vm816_vm3, %v10837_v4, 0 }
 0xf15   :  { %v10910_v49 = vand.u32 4294901760, %v10840_v56 }
 0xf17   :  { %v10911_v43 = vsub.f32 %v10840_v56, %v10910_v49  ;;  %v12676_v40 = vpop.permute.xlu0 %12675 }
 0xf18   :  { %v12679_v13 = vsel %vm816_vm3, %v12676_v40, 0 }
 0xf19   :  { %v10912_v60 = vand.u32 4294901760, %v10911_v43  ;;  %v12749_v56 = vand.u32 4294901760, %v12679_v13 }
 0xf1b   :  { %v10913_v26 = vsub.f32 %v10911_v43, %v10912_v60  ;;  %v14515_v40 = vpop.permute.xlu0 %14514 }
 0xf1d   :  { %v10914_v52 = vand.u32 4294901760, %v10913_v26 }
 0xf42   :  { %v10839_v17 = vpop.permute.xlu1 %10838 }
 0xf43   :  { %v10842_v61 = vsel %vm816_vm3, %v10839_v17, 0 }
 0xf44   :  { %v10845_v28 = vand.u32 4294901760, %v10842_v61 }
 0xf46   :  { %v10922_v51 = vsub.f32 %v10842_v61, %v10845_v28  ;;  %35380 = vmatpush3.xpose.msra.mxu1 %v10845_v28  ;;  %v12678_v38 = vpop.permute.xlu1 %12677 }
 0xf47   :  { %35384 = vmatprep.subr.mxu1 %v43804_v9  ;;  %v12681_v4 = vsel %vm816_vm3, %v12678_v38, 0 }
 0xf48   :  { %v10923_v57 = vand.u32 4294901760, %v10922_v51 }
 0xf49   :  { %35382 = vmatmul.mubr.f32.vlgmr.msra.gmra.mrb[24].mxu1 %v10914_v52 }
 0xf4a   :  { %v10924_v41 = vsub.f32 %v10922_v51, %v10923_v57  ;;  %35386 = vmatprep.mubr.msk.f32.mxu1 %vm39741_vm1, %v43804_v9  ;;  %v14517_v38 = vpop.permute.xlu1 %14516 }
 0xf4c   :  { %v10925_v48 = vand.u32 4294901760, %v10924_v41  ;;  %v13602_v41 = vsel %vm816_vm3, %v41014_v29, 0 }
 0xf4d   :  { %v13605_v25 = vand.u32 4294901760, %v13602_v41 }
 0xf4e   :  { %35385 = vmatpush3.xpose.msra.mxu1 %v10925_v48 }
 0xf4f   :  { %35389 = vmatprep.subr.mxu1 %v43804_v9 }
 0xf51   :  { %35387 = vmatmul.mubr.f32.vlgmr.msra.gmra.mrb[24].mxu1 %v10910_v49 }
 0xf52   :  { %35390 = vmatpush3.xpose.msra.mxu1 %v10922_v51  ;;  %35391 = vmatprep.mubr.msk.f32.mxu1 %vm39741_vm1, %v43804_v9 }
 0xf53   :  { %35394 = vmatprep.subr.mxu1 %v43804_v9 }
 0xf59   :  { %35392 = vmatmul.mubr.f32.vlgmr.msra.gmra.mrb[24].mxu1 %v10911_v43  ;;  %v12750_v43 = vsub.f32 %v12679_v13, %v12749_v56  ;;  %v14518_v13 = vsel %vm816_vm3, %v14515_v40, 0 }
 0xf5a   :  { %35395 = vmatpush3.xpose.msra.mxu1 %v10845_v28  ;;  %35396 = vmatprep.mubr.msk.f32.mxu1 %vm39741_vm1, %v43804_v9 }
 0xf5b   :  { %35399 = vmatprep.subr.mxu1 %v43804_v9  ;;  %v12751_v17 = vand.u32 4294901760, %v12750_v43 }
 0xf5d   :  { %v12752_v61 = vsub.f32 %v12750_v43, %v12751_v17 }
 0xf5f   :  { %v12753_v51 = vand.u32 4294901760, %v12752_v61 }
 0xf61   :  { %35397 = vmatmul.mubr.f32.vlgmr.msra.gmra.mrb[24].mxu1 %v10912_v60 }
 0xf62   :  { %35400 = vmatpush3.xpose.msra.mxu1 %v10923_v57  ;;  %35401 = vmatprep.mubr.msk.f32.mxu1 %vm39741_vm1, %v43804_v9  ;;  %v13600_v57 = vsel %vm816_vm3, %v40983_v54, 0 }
 0xf63   :  { %35404 = vmatprep.subr.mxu1 %v43804_v9  ;;  %v13670_v48 = vand.u32 4294901760, %v13600_v57 }
 0xf65   :  { %v13671_v42 = vsub.f32 %v13600_v57, %v13670_v48  ;;  %v15439_v57 = vsel %vm816_vm3, %v15437_v63, 0 }
 0xf69   :  { %35402 = vmatmul.mubr.f32.vlgmr.msra.gmra.mrb[24].mxu1 %v10910_v49 }
 0xf6a   :  { %35405 = vmatpush3.xpose.msra.mxu1 %v10845_v28  ;;  %35406 = vmatprep.mubr.msk.f32.mxu1 %vm39741_vm1, %v43804_v9 }
 0xf6b   :  { %35439 = vmatprep.subr.mxu1 %v43804_v9 }
 0xf71   :  { %35407 = vmatmul.mubr.f32.vlgmr.msra.gmra.mrb[24].mxu1 %v10910_v49  ;;  %v12684_v49 = vand.u32 4294901760, %v12681_v4 }
 0xf72   :  { %35440 = vmatpush3.xpose.msra.mxu1 %v11766_v16  ;;  %35441 = vmatprep.mubr.msk.f32.mxu1 %vm39741_vm1, %v43804_v9 }
 0xf73   :  { %35444 = vmatprep.subr.mxu1 %v43804_v9  ;;  %v12761_v60 = vsub.f32 %v12681_v4, %v12684_v49  ;;  %v14520_v4 = vsel %vm816_vm3, %v14517_v38, 0 }
 0xf75   :  { %35442 = vmatmul.mubr.f32.vlgmr.msra.gmra.mrb[26].mxu1 %v11835_v1  ;;  %v12762_v26 = vand.u32 4294901760, %v12761_v60 }
 0xf76   :  { %35445 = vmatpush3.xpose.msra.mxu1 %v11846_v7  ;;  %35446 = vmatprep.mubr.msk.f32.mxu1 %vm39741_vm1, %v43804_v9 }
 0xf77   :  { %35449 = vmatprep.subr.mxu1 %v43804_v9  ;;  %v12763_v28 = vsub.f32 %v12761_v60, %v12762_v26 }
 0xf79   :  { %v12764_v52 = vand.u32 4294901760, %v12763_v28 }
 0xf7d   :  { %35447 = vmatmul.mubr.f32.vlgmr.msra.gmra.mrb[26].mxu1 %v11831_v0 }
 0xf7e   :  { %35450 = vmatpush3.xpose.msra.mxu1 %v11843_v44  ;;  %35451 = vmatprep.mubr.msk.f32.mxu1 %vm39741_vm1, %v43804_v9 }
 0xf7f   :  { %35454 = vmatprep.subr.mxu1 %v43804_v9 }
 0xf85   :  { %35452 = vmatmul.mubr.f32.vlgmr.msra.gmra.mrb[26].mxu1 %v11832_v37 }
 0xf86   :  { %35455 = vmatpush3.xpose.msra.mxu1 %v11766_v16  ;;  %35456 = vmatprep.mubr.msk.f32.mxu1 %vm39741_vm1, %v43804_v9 }
 0xf87   :  { %35459 = vmatprep.subr.mxu1 %v43804_v9 }
 0xf8d   :  { %35457 = vmatmul.mubr.f32.vlgmr.msra.gmra.mrb[26].mxu1 %v11833_v58 }
 0xf8e   :  { %35460 = vmatpush3.xpose.msra.mxu1 %v11844_v23  ;;  %35461 = vmatprep.mubr.msk.f32.mxu1 %vm39741_vm1, %v43804_v9 }
 0xf8f   :  { %35464 = vmatprep.subr.mxu1 %v43804_v9 }
 0xf95   :  { %35462 = vmatmul.mubr.f32.vlgmr.msra.gmra.mrb[26].mxu1 %v11831_v0 }
 0xf96   :  { %35465 = vmatpush3.xpose.msra.mxu1 %v11766_v16  ;;  %35466 = vmatprep.mubr.msk.f32.mxu1 %vm39741_vm1, %v43804_v9  ;;  %v13672_v16 = vand.u32 4294901760, %v13671_v42 }
 0xf97   :  { %35499 = vmatprep.subr.mxu1 %v43804_v9 }
 0xf98   :  { %v13673_v44 = vsub.f32 %v13671_v42, %v13672_v16 }
 0xf9a   :  { %v13674_v23 = vand.u32 4294901760, %v13673_v44 }
 0xf9d   :  { %35467 = vmatmul.mubr.f32.vlgmr.msra.gmra.mrb[26].mxu1 %v11831_v0  ;;  %v13682_v0 = vsub.f32 %v13602_v41, %v13605_v25  ;;  %v15441_v41 = vsel %vm816_vm3, %v41021_v46, 0 }
 0xf9e   :  { %35500 = vmatpush3.xpose.msra.mxu1 %v12684_v49  ;;  %35501 = vmatprep.mubr.msk.f32.mxu1 %vm39741_vm1, %v43804_v9 }
 0xf9f   :  { %35504 = vmatprep.subr.mxu1 %v43804_v9  ;;  %v13683_v37 = vand.u32 4294901760, %v13682_v0 }
 0xfa1   :  { %35502 = vmatmul.mubr.f32.vlgmr.msra.gmra.mrb[28].mxu1 %v12753_v51  ;;  %v13684_v58 = vsub.f32 %v13682_v0, %v13683_v37 }
 0xfa2   :  { %35505 = vmatpush3.xpose.msra.mxu1 %v12764_v52  ;;  %35506 = vmatprep.mubr.msk.f32.mxu1 %vm39741_vm1, %v43804_v9 }
 0xfa3   :  { %35509 = vmatprep.subr.mxu1 %v43804_v9  ;;  %v13685_v47 = vand.u32 4294901760, %v13684_v58 }
 0xfa9   :  { %35507 = vmatmul.mubr.f32.vlgmr.msra.gmra.mrb[28].mxu1 %v12749_v56 }
 0xfaa   :  { %35510 = vmatpush3.xpose.msra.mxu1 %v12761_v60  ;;  %35511 = vmatprep.mubr.msk.f32.mxu1 %vm39741_vm1, %v43804_v9 }
 0xfab   :  { %35514 = vmatprep.subr.mxu1 %v43804_v9 }
 0xfb1   :  { %35512 = vmatmul.mubr.f32.vlgmr.msra.gmra.mrb[28].mxu1 %v12750_v43 }
 0xfb2   :  { %35515 = vmatpush3.xpose.msra.mxu1 %v12684_v49  ;;  %35516 = vmatprep.mubr.msk.f32.mxu1 %vm39741_vm1, %v43804_v9 }
 0xfb3   :  { %35519 = vmatprep.subr.mxu1 %v43804_v9 }
 0xfb9   :  { %35517 = vmatmul.mubr.f32.vlgmr.msra.gmra.mrb[28].mxu1 %v12751_v17 }
 0xfba   :  { %35520 = vmatpush3.xpose.msra.mxu1 %v12762_v26  ;;  %35521 = vmatprep.mubr.msk.f32.mxu1 %vm39741_vm1, %v43804_v9 }
 0xfbb   :  { %35524 = vmatprep.subr.mxu1 %v43804_v9 }
 0xfc1   :  { %35522 = vmatmul.mubr.f32.vlgmr.msra.gmra.mrb[28].mxu1 %v12749_v56 }
 0xfc2   :  { %35525 = vmatpush3.xpose.msra.mxu1 %v12684_v49  ;;  %35526 = vmatprep.mubr.msk.f32.mxu1 %vm39741_vm1, %v43804_v9  ;;  %v14523_v49 = vand.u32 4294901760, %v14520_v4 }
 0xfc3   :  { %35559 = vmatprep.subr.mxu1 %v43804_v9 }
 0xfc4   :  { %v14600_v60 = vsub.f32 %v14520_v4, %v14523_v49 }
 0xfc6   :  { %v14601_v26 = vand.u32 4294901760, %v14600_v60 }
 0xfc8   :  { %v14602_v28 = vsub.f32 %v14600_v60, %v14601_v26 }
 0xfc9   :  { %35527 = vmatmul.mubr.f32.vlgmr.msra.gmra.mrb[28].mxu1 %v12749_v56  ;;  %v14588_v56 = vand.u32 4294901760, %v14518_v13 }
 0xfca   :  { %35560 = vmatpush3.xpose.msra.mxu1 %v13605_v25  ;;  %35561 = vmatprep.mubr.msk.f32.mxu1 %vm39741_vm1, %v43804_v9  ;;  %v14603_v52 = vand.u32 4294901760, %v14602_v28 }
 0xfcb   :  { %35564 = vmatprep.subr.mxu1 %v43804_v9  ;;  %v14589_v43 = vsub.f32 %v14518_v13, %v14588_v56 }
 0xfcd   :  { %35562 = vmatmul.mubr.f32.vlgmr.msra.gmra.mrb[30].mxu1 %v13674_v23  ;;  %v14590_v17 = vand.u32 4294901760, %v14589_v43  ;;  %v16354_v23 = vpop.permute.xlu0 %16353 }
 0xfce   :  { %35565 = vmatpush3.xpose.msra.mxu1 %v13685_v47  ;;  %35566 = vmatprep.mubr.msk.f32.mxu1 %vm39741_vm1, %v43804_v9  ;;  %v16356_v47 = vpop.permute.xlu1 %16355 }
 0xfcf   :  { %35569 = vmatprep.subr.mxu1 %v43804_v9  ;;  %v14591_v61 = vsub.f32 %v14589_v43, %v14590_v17 }
 0xfd1   :  { %v41111_v59 = vpop.f32.mrb[22].mxu1  ;;  %v14592_v51 = vand.u32 4294901760, %v14591_v61 }
 0xfd2   :  { %v35348_v1 = vpop.f32.mrb[23].mxu1  ;;  %v10370_v7 = vsel %vm10369_vm4, %v41111_v59, -inf }
 0xfd3   :  { %10371 = vmax.xlane.f32.xlu0 %v10370_v7  ;;  %v16357_v1 = vsel %vm816_vm3, %v16354_v23, 0  ;;  %v16359_v7 = vsel %vm816_vm3, %v16356_v47, 0 }
 0xfd4   :  { %v16427_v40 = vand.u32 4294901760, %v16357_v1  ;;  %v16362_v38 = vand.u32 4294901760, %v16359_v7 }
 0xfd5   :  { %35567 = vmatmul.mubr.f32.vlgmr.msra.gmra.mrb[30].mxu1 %v13670_v48 }
 0xfd6   :  { %35570 = vmatpush3.xpose.msra.mxu1 %v13682_v0  ;;  %35571 = vmatprep.mubr.msk.f32.mxu1 %vm39741_vm1, %v43804_v9  ;;  %v16428_v13 = vsub.f32 %v16357_v1, %v16427_v40  ;;  %v16439_v4 = vsub.f32 %v16359_v7, %v16362_v38 }
 0xfd7   :  { %35574 = vmatprep.subr.mxu1 %v43804_v9 }
 0xfdd   :  { %35572 = vmatmul.mubr.f32.vlgmr.msra.gmra.mrb[30].mxu1 %v13671_v42 }
 0xfde   :  { %35575 = vmatpush3.xpose.msra.mxu1 %v13605_v25  ;;  %35576 = vmatprep.mubr.msk.f32.mxu1 %vm39741_vm1, %v43804_v9 }
 0xfdf   :  { %35579 = vmatprep.subr.mxu1 %v43804_v9 }
 0xfe5   :  { %35577 = vmatmul.mubr.f32.vlgmr.msra.gmra.mrb[30].mxu1 %v13672_v16 }
 0xfe6   :  { %35580 = vmatpush3.xpose.msra.mxu1 %v13683_v37  ;;  %35581 = vmatprep.mubr.msk.f32.mxu1 %vm39741_vm1, %v43804_v9 }
 0xfe7   :  { %35584 = vmatprep.subr.mxu1 %v43804_v9 }
 0xfed   :  { %35582 = vmatmul.mubr.f32.vlgmr.msra.gmra.mrb[30].mxu1 %v13670_v48 }
 0xfee   :  { %35585 = vmatpush3.xpose.msra.mxu1 %v13605_v25  ;;  %35586 = vmatprep.mubr.msk.f32.mxu1 %vm39741_vm1, %v43804_v9  ;;  %v15444_v25 = vand.u32 4294901760, %v15441_v41 }
 0xfef   :  { %35619 = vmatprep.subr.mxu1 %v43804_v9 }
 0xff0   :  { %v15521_v0 = vsub.f32 %v15441_v41, %v15444_v25 }
 0xff2   :  { %v15522_v63 = vand.u32 4294901760, %v15521_v0 }
 0xff4   :  { %v15523_v37 = vsub.f32 %v15521_v0, %v15522_v63 }
 0xff5   :  { %35587 = vmatmul.mubr.f32.vlgmr.msra.gmra.mrb[30].mxu1 %v13670_v48  ;;  %v15509_v48 = vand.u32 4294901760, %v15439_v57 }
 0xff6   :  { %35620 = vmatpush3.xpose.msra.mxu1 %v14523_v49  ;;  %35621 = vmatprep.mubr.msk.f32.mxu1 %vm39741_vm1, %v43804_v9  ;;  %v15524_v58 = vand.u32 4294901760, %v15523_v37 }
 0xff7   :  { %35624 = vmatprep.subr.mxu1 %v43804_v9  ;;  %v15510_v42 = vsub.f32 %v15439_v57, %v15509_v48 }
 0xff9   :  { %35622 = vmatmul.mubr.f32.vlgmr.msra.gmra.mrb[32].mxu1 %v14592_v51  ;;  %v15511_v54 = vand.u32 4294901760, %v15510_v42 }
 0xffa   :  { %35625 = vmatpush3.xpose.msra.mxu1 %v14603_v52  ;;  %35626 = vmatprep.mubr.msk.f32.mxu1 %vm39741_vm1, %v43804_v9 }
 0xffb   :  { %35629 = vmatprep.subr.mxu1 %v43804_v9  ;;  %v15512_v16 = vsub.f32 %v15510_v42, %v15511_v54 }
 0xffd   :  { %v15513_v44 = vand.u32 4294901760, %v15512_v16 }
0x1001   :  { %35627 = vmatmul.mubr.f32.vlgmr.msra.gmra.mrb[32].mxu1 %v14588_v56 }
0x1002   :  { %35630 = vmatpush3.xpose.msra.mxu1 %v14600_v60  ;;  %35631 = vmatprep.mubr.msk.f32.mxu1 %vm39741_vm1, %v43804_v9  ;;  %v16429_v60 = vand.u32 4294901760, %v16428_v13 }
0x1003   :  { %35634 = vmatprep.subr.mxu1 %v43804_v9 }
0x1009   :  { %35632 = vmatmul.mubr.f32.vlgmr.msra.gmra.mrb[32].mxu1 %v14589_v43 }
0x100a   :  { %35635 = vmatpush3.xpose.msra.mxu1 %v14523_v49  ;;  %35636 = vmatprep.mubr.msk.f32.mxu1 %vm39741_vm1, %v43804_v9 }
0x100b   :  { %35639 = vmatprep.subr.mxu1 %v43804_v9 }
0x1011   :  { %35637 = vmatmul.mubr.f32.vlgmr.msra.gmra.mrb[32].mxu1 %v14590_v17  ;;  %v16440_v17 = vand.u32 4294901760, %v16439_v4 }
0x1012   :  { %35640 = vmatpush3.xpose.msra.mxu1 %v14601_v26  ;;  %35641 = vmatprep.mubr.msk.f32.mxu1 %vm39741_vm1, %v43804_v9  ;;  %v16430_v26 = vsub.f32 %v16428_v13, %v16429_v60 }
0x1013   :  { %35644 = vmatprep.subr.mxu1 %v43804_v9  ;;  %v16441_v61 = vsub.f32 %v16439_v4, %v16440_v17 }
0x1014   :  { %v16431_v28 = vand.u32 4294901760, %v16430_v26 }
0x1015   :  { %v16442_v51 = vand.u32 4294901760, %v16441_v61 }
0x1019   :  { %35642 = vmatmul.mubr.f32.vlgmr.msra.gmra.mrb[32].mxu1 %v14588_v56 }
0x101a   :  { %35645 = vmatpush3.xpose.msra.mxu1 %v14523_v49  ;;  %35646 = vmatprep.mubr.msk.f32.mxu1 %vm39741_vm1, %v43804_v9 }
0x101b   :  { %35679 = vmatprep.subr.mxu1 %v43804_v9 }
0x1021   :  { %35647 = vmatmul.mubr.f32.vlgmr.msra.gmra.mrb[32].mxu1 %v14588_v56 }
0x1022   :  { %35680 = vmatpush3.xpose.msra.mxu1 %v15444_v25  ;;  %35681 = vmatprep.mubr.msk.f32.mxu1 %vm39741_vm1, %v43804_v9 }
0x1023   :  { %35684 = vmatprep.subr.mxu1 %v43804_v9 }
0x1025   :  { %35682 = vmatmul.mubr.f32.vlgmr.msra.gmra.mrb[34].mxu1 %v15513_v44 }
0x1026   :  { %35685 = vmatpush3.xpose.msra.mxu1 %v15524_v58  ;;  %35686 = vmatprep.mubr.msk.f32.mxu1 %vm39741_vm1, %v43804_v9 }
0x1027   :  { %35689 = vmatprep.subr.mxu1 %v43804_v9 }
0x102d   :  { %35687 = vmatmul.mubr.f32.vlgmr.msra.gmra.mrb[34].mxu1 %v15509_v48 }
0x102e   :  { %35690 = vmatpush3.xpose.msra.mxu1 %v15521_v0  ;;  %35691 = vmatprep.mubr.msk.f32.mxu1 %vm39741_vm1, %v43804_v9 }
0x102f   :  { %35694 = vmatprep.subr.mxu1 %v43804_v9 }
0x1035   :  { %35692 = vmatmul.mubr.f32.vlgmr.msra.gmra.mrb[34].mxu1 %v15510_v42 }
0x1036   :  { %35695 = vmatpush3.xpose.msra.mxu1 %v15444_v25  ;;  %35696 = vmatprep.mubr.msk.f32.mxu1 %vm39741_vm1, %v43804_v9 }
0x1037   :  { %35699 = vmatprep.subr.mxu1 %v43804_v9 }
0x103d   :  { %35697 = vmatmul.mubr.f32.vlgmr.msra.gmra.mrb[34].mxu1 %v15511_v54 }
0x103e   :  { %35700 = vmatpush3.xpose.msra.mxu1 %v15522_v63  ;;  %35701 = vmatprep.mubr.msk.f32.mxu1 %vm39741_vm1, %v43804_v9 }
0x103f   :  { %35704 = vmatprep.subr.mxu1 %v43804_v9 }
0x1044   :  { %v11286_v56 = vpop.f32.mrb[24].mxu1 }
0x1045   :  { %v35408_v49 = vpop.f32.mrb[25].mxu1  ;;  %35702 = vmatmul.mubr.f32.vlgmr.msra.gmra.mrb[34].mxu1 %v15509_v48  ;;  %v11290_v43 = vsel %vm10369_vm4, %v11286_v56, -inf }
0x1046   :  { %35705 = vmatpush3.xpose.msra.mxu1 %v15444_v25  ;;  %11291 = vmax.xlane.f32.xlu1 %v11290_v43 }
0x1047   :  { %35706 = vmatprep.mubr.msk.f32.mxu1 %vm39741_vm1, %v43804_v9  ;;  %35739 = vmatprep.subr.mxu1 %v43804_v9 }
0x104d   :  { %35707 = vmatmul.mubr.f32.vlgmr.msra.gmra.mrb[34].mxu1 %v15509_v48 }
0x104e   :  { %35740 = vmatpush3.xpose.msra.mxu1 %v16362_v38  ;;  %35741 = vmatprep.mubr.msk.f32.mxu1 %vm39741_vm1, %v43804_v9 }
0x104f   :  { %35744 = vmatprep.subr.mxu1 %v43804_v9 }
0x1051   :  { %35742 = vmatmul.mubr.f32.vlgmr.msra.gmra.mrb[36].mxu1 %v16431_v28 }
0x1052   :  { %35745 = vmatpush3.xpose.msra.mxu1 %v16442_v51  ;;  %35746 = vmatprep.mubr.msk.f32.mxu1 %vm39741_vm1, %v43804_v9 }
0x1053   :  { %35749 = vmatprep.subr.mxu1 %v43804_v9 }
0x1057   :  { %10381 = vrot.lane.b32.xlu1 %v41001_v12, %s39742_s24 }
0x1059   :  { %35747 = vmatmul.mubr.f32.vlgmr.msra.gmra.mrb[36].mxu1 %v16427_v40 }
0x105a   :  { %35750 = vmatpush3.xpose.msra.mxu1 %v16439_v4  ;;  %35751 = vmatprep.mubr.msk.f32.mxu1 %vm39741_vm1, %v43804_v9 }
0x105b   :  { %35754 = vmatprep.subr.mxu1 %v43804_v9 }
0x1060   :  { %v10372_v52 = vpop.xlane.xlu0 %10371 }
0x1061   :  { %v10373_v57 = vsub.f32 %v41111_v59, %v10372_v52  ;;  %35752 = vmatmul.mubr.f32.vlgmr.msra.gmra.mrb[36].mxu1 %v16428_v13 }
0x1062   :  { %35755 = vmatpush3.xpose.msra.mxu1 %v16362_v38  ;;  %35756 = vmatprep.mubr.msk.f32.mxu1 %vm39741_vm1, %v43804_v9 }
0x1063   :  { %v10374_v41 = vmul.f32 1.442695, %v10373_v57  ;;  %35759 = vmatprep.subr.mxu1 %v43804_v9 }
0x1065   :  { %39573 = vpow2.f32 %v10374_v41 }
0x1069   :  { %35757 = vmatmul.mubr.f32.vlgmr.msra.gmra.mrb[36].mxu1 %v16429_v60 }
0x106a   :  { %35760 = vmatpush3.xpose.msra.mxu1 %v16440_v17  ;;  %35761 = vmatprep.mubr.msk.f32.mxu1 %vm39741_vm1, %v43804_v9 }
0x106b   :  { %35764 = vmatprep.subr.mxu1 %v43804_v9 }
0x106f   :  { %v39574_v48 = vpop.eup %39573 }
0x1070   :  { %v12207_v25 = vpop.f32.mrb[26].mxu1  ;;  %v10376_v59 = vsel %vm10369_vm4, %v39574_v48, 0.0 }
0x1071   :  { %35762 = vmatmul.mubr.f32.vlgmr.msra.gmra.mrb[36].mxu1 %v16427_v40  ;;  %10377 = vadd.xlane.f32.xlu0 %v10376_v59  ;;  %v35468_v42 = vpop.f32.mrb[27].mxu1  ;;  %v12211_v0 = vsel %vm10369_vm4, %v12207_v25, -inf }
0x1072   :  { %35765 = vmatpush3.xpose.msra.mxu1 %v16362_v38  ;;  %35766 = vmatprep.mubr.msk.f32.mxu1 %vm39741_vm1, %v43804_v9 }
0x1075   :  { %12212 = vmax.xlane.f32.xlu0 %v12211_v0 }
0x1079   :  { %35767 = vmatmul.mubr.f32.vlgmr.msra.gmra.mrb[36].mxu1 %v16427_v40 }
0x109c   :  { %v41195_v54 = vpop.f32.mrb[28].mxu1 }
0x109d   :  { %v35528_v63 = vpop.f32.mrb[29].mxu1  ;;  %v13129_v16 = vsel %vm10369_vm4, %v41195_v54, -inf }
0x109e   :  { %13130 = vmax.xlane.f32.xlu0 %v13129_v16 }
0x10c8   :  { %v41199_v37 = vpop.f32.mrb[30].mxu1 }
0x10c9   :  { %v35588_v44 = vpop.f32.mrb[31].mxu1 }
0x10d3   :  { %v11292_v58 = vpop.xlane.xlu1 %11291 }
0x10d4   :  { %v11293_v23 = vsub.f32 %v11286_v56, %v11292_v58 }
0x10d6   :  { %v11294_v47 = vmul.f32 1.442695, %v11293_v23 }
0x10d7   :  { %v10382_v1 = vpop.permute.xlu1 %10381 }
0x10d8   :  { %39575 = vpow2.f32 %v11294_v47  ;;  %v10388_v7 = vsel %vm10387_vm6, %v10382_v1, 0 }
0x10d9   :  { %v10391_v38 = vand.u32 4294901760, %v10388_v7 }
0x10db   :  { %35350 = vmatpush3.msra.mxu0 %v10391_v38  ;;  %v10468_v61 = vsub.f32 %v10388_v7, %v10391_v38 }
0x10dc   :  { %35354 = vmatprep.subr.mxu0 %v43804_v9 }
0x10dd   :  { %v10469_v57 = vand.u32 4294901760, %v10468_v61 }
0x10df   :  { %v10470_v0 = vsub.f32 %v10468_v61, %v10469_v57 }
0x10e1   :  { %v10471_v16 = vand.u32 4294901760, %v10470_v0 }
0x10e2   :  { %v41203_v40 = vpop.eup %39575 }
0x10e3   :  { %v11296_v13 = vsel %vm10369_vm4, %v41203_v40, 0.0 }
0x10e4   :  { %11297 = vadd.xlane.f32.xlu0 %v11296_v13 }
0x10f4   :  { %v41207_v4 = vpop.f32.mrb[32].mxu1 }
0x10f5   :  { %v35648_v49 = vpop.f32.mrb[33].mxu1  ;;  %v14968_v44 = vsel %vm10369_vm4, %v41207_v4, -inf }
0x10fa   :  { %11301 = vrot.lane.b32.xlu0 %v41001_v12, %s39746_s27 }
0x10fe   :  { %v10378_v56 = vpop.xlane.xlu0 %10377 }
0x10ff   :  { %39577 = vrcp.f32 %v10378_v56 }
0x1102   :  { %v12213_v43 = vpop.xlane.xlu0 %12212 }
0x1103   :  { %v12214_v60 = vsub.f32 %v12207_v25, %v12213_v43 }
0x1105   :  { %v12215_v17 = vmul.f32 1.442695, %v12214_v60 }
0x1107   :  { %39579 = vpow2.f32 %v12215_v17 }
0x1109   :  { %v39578_v26 = vpop.eup %39577 }
0x110a   :  { %v10380_v28 = vmul.f32 %v39578_v26, %v39574_v48  ;;  %v14050_v48 = vsel %vm10369_vm4, %v41199_v37, -inf }
0x110c   :  { %v10385_v51 = vsel %vm10383_vm7, %v10380_v28, 0 }
0x110d   :  { %v10456_v52 = vand.u32 4294901760, %v10385_v51 }
0x110f   :  { %v10457_v41 = vsub.f32 %v10385_v51, %v10456_v52 }
0x1111   :  { %v41212_v59 = vpop.eup %39579  ;;  %v10458_v42 = vand.u32 4294901760, %v10457_v41 }
0x1112   :  { %v12217_v12 = vsel %vm10369_vm4, %v41212_v59, 0.0 }
0x1113   :  { %12218 = vadd.xlane.f32.xlu1 %v12217_v12  ;;  %v10459_v25 = vsub.f32 %v10457_v41, %v10458_v42 }
0x1115   :  { %v10460_v63 = vand.u32 4294901760, %v10459_v25 }
0x1117   :  { %35352 = vmatmul.mubr.f32.vlgmr.msra.gmra.mrb[20].mxu0 %v10460_v63 }
0x1118   :  { %35355 = vmatpush3.msra.mxu0 %v10471_v16  ;;  %35356 = vmatprep.mubr.msk.f32.mxu0 %vm39741_vm1, %v43804_v9 }
0x1119   :  { %14051 = vmax.xlane.f32.xlu0 %v14050_v48  ;;  %35359 = vmatprep.subr.mxu0 %v43804_v9 }
0x111d   :  { %14969 = vmax.xlane.f32.xlu0 %v14968_v44 }
0x111f   :  { %35357 = vmatmul.mubr.f32.vlgmr.msra.gmra.mrb[20].mxu0 %v10456_v52 }
0x1120   :  { %35360 = vmatpush3.msra.mxu0 %v10468_v61  ;;  %v41223_v58 = vpop.f32.mrb[34].mxu1  ;;  %35361 = vmatprep.mubr.msk.f32.mxu0 %vm39741_vm1, %v43804_v9 }
0x1121   :  { %v35708_v23 = vpop.f32.mrb[35].mxu1  ;;  %35364 = vmatprep.subr.mxu0 %v43804_v9 }
0x1124   :  { %12222 = vrot.lane.b32.xlu1 %v41008_v8, %s39742_s24 }
0x1127   :  { %35362 = vmatmul.mubr.f32.vlgmr.msra.gmra.mrb[20].mxu0 %v10457_v41 }
0x1128   :  { %35365 = vmatpush3.msra.mxu0 %v10391_v38  ;;  %35366 = vmatprep.mubr.msk.f32.mxu0 %vm39741_vm1, %v43804_v9 }
0x1129   :  { %35369 = vmatprep.subr.mxu0 %v43804_v9 }
0x112b   :  { %v13131_v47 = vpop.xlane.xlu0 %13130 }
0x112c   :  { %v13132_v1 = vsub.f32 %v41195_v54, %v13131_v47 }
0x112e   :  { %v13133_v7 = vmul.f32 1.442695, %v13132_v1 }
0x112f   :  { %35367 = vmatmul.mubr.f32.vlgmr.msra.gmra.mrb[20].mxu0 %v10458_v42 }
0x1130   :  { %39581 = vpow2.f32 %v13133_v7  ;;  %35370 = vmatpush3.msra.mxu0 %v10469_v57  ;;  %35371 = vmatprep.mubr.msk.f32.mxu0 %vm39741_vm1, %v43804_v9 }
0x1131   :  { %35374 = vmatprep.subr.mxu0 %v43804_v9 }
0x1137   :  { %35372 = vmatmul.mubr.f32.vlgmr.msra.gmra.mrb[20].mxu0 %v10456_v52 }
0x1138   :  { %35375 = vmatpush3.msra.mxu0 %v10391_v38  ;;  %35376 = vmatprep.mubr.msk.f32.mxu0 %vm39741_vm1, %v43804_v9  ;;  %v15889_v38 = vsel %vm10369_vm4, %v41223_v58, -inf }
0x1139   :  { %35409 = vmatprep.subr.mxu0 %v43804_v9 }
0x113a   :  { %v41240_v13 = vpop.eup %39581 }
0x113b   :  { %v13135_v54 = vsel %vm10369_vm4, %v41240_v13, 0.0 }
0x113c   :  { %13136 = vadd.xlane.f32.xlu0 %v13135_v54 }
0x113f   :  { %35377 = vmatmul.mubr.f32.vlgmr.msra.gmra.mrb[20].mxu0 %v10456_v52 }
0x1140   :  { %35411 = vmatprep.mubr.msk.f32.mxu0 %vm39741_vm1, %v43804_v9 }
0x114c   :  { %v41246_v49 = vpop.f32.mrb[36].mxu1 }
0x114d   :  { %v35768_v56 = vpop.f32.mrb[37].mxu1 }
0x1152   :  { %13140 = vrot.lane.b32.xlu0 %v41008_v8, %s39746_s27 }
0x1171   :  { %v11298_v43 = vpop.xlane.xlu0 %11297  ;;  %15890 = vmax.xlane.f32.xlu0 %v15889_v38 }
0x1172   :  { %39583 = vrcp.f32 %v11298_v43 }
0x1175   :  { %v11302_v60 = vpop.permute.xlu0 %11301 }
0x1176   :  { %v11306_v17 = vsel %vm10387_vm6, %v11302_v60, 0 }
0x1177   :  { %v11309_v26 = vand.u32 4294901760, %v11306_v17 }
0x1179   :  { %35410 = vmatpush3.msra.mxu0 %v11309_v26  ;;  %v11386_v51 = vsub.f32 %v11306_v17, %v11309_v26 }
0x117a   :  { %35414 = vmatprep.subr.mxu0 %v43804_v9 }
0x117b   :  { %v11387_v57 = vand.u32 4294901760, %v11386_v51 }
0x117c   :  { %v39584_v61 = vpop.eup %39583 }
0x117d   :  { %v11300_v28 = vmul.f32 %v39584_v61, %v41203_v40  ;;  %v11388_v0 = vsub.f32 %v11386_v51, %v11387_v57 }
0x117f   :  { %v11304_v52 = vsel %vm10383_vm7, %v11300_v28, 0  ;;  %v11389_v63 = vand.u32 4294901760, %v11388_v0 }
0x1180   :  { %v11374_v8 = vand.u32 4294901760, %v11304_v52 }
0x1182   :  { %v11375_v41 = vsub.f32 %v11304_v52, %v11374_v8 }
0x1184   :  { %v11376_v42 = vand.u32 4294901760, %v11375_v41 }
0x1186   :  { %v11377_v12 = vsub.f32 %v11375_v41, %v11376_v42 }
0x1188   :  { %v11378_v25 = vand.u32 4294901760, %v11377_v12 }
0x118a   :  { %35412 = vmatmul.mubr.f32.vlgmr.msra.gmra.mrb[22].mxu0 %v11378_v25 }
0x118b   :  { %35415 = vmatpush3.msra.mxu0 %v11389_v63  ;;  %35416 = vmatprep.mubr.msk.f32.mxu0 %vm39741_vm1, %v43804_v9 }
0x118c   :  { %35419 = vmatprep.subr.mxu0 %v43804_v9 }
0x1192   :  { %35417 = vmatmul.mubr.f32.vlgmr.msra.gmra.mrb[22].mxu0 %v11374_v8 }
0x1193   :  { %35420 = vmatpush3.msra.mxu0 %v11386_v51  ;;  %35421 = vmatprep.mubr.msk.f32.mxu0 %vm39741_vm1, %v43804_v9 }
0x1194   :  { %35424 = vmatprep.subr.mxu0 %v43804_v9 }
0x119a   :  { %35422 = vmatmul.mubr.f32.vlgmr.msra.gmra.mrb[22].mxu0 %v11375_v41 }
0x119b   :  { %35425 = vmatpush3.msra.mxu0 %v11309_v26  ;;  %35426 = vmatprep.mubr.msk.f32.mxu0 %vm39741_vm1, %v43804_v9 }
0x119c   :  { %35429 = vmatprep.subr.mxu0 %v43804_v9 }
0x11a0   :  { %v12219_v40 = vpop.xlane.xlu1 %12218 }
0x11a1   :  { %39585 = vrcp.f32 %v12219_v40 }
0x11a2   :  { %35427 = vmatmul.mubr.f32.vlgmr.msra.gmra.mrb[22].mxu0 %v11376_v42 }
0x11a3   :  { %35430 = vmatpush3.msra.mxu0 %v11387_v57  ;;  %35431 = vmatprep.mubr.msk.f32.mxu0 %vm39741_vm1, %v43804_v9 }
0x11a4   :  { %v12223_v16 = vpop.permute.xlu1 %12222  ;;  %35434 = vmatprep.subr.mxu0 %v43804_v9 }
0x11a5   :  { %v12227_v48 = vsel %vm10387_vm6, %v12223_v16, 0 }
0x11a6   :  { %v14052_v44 = vpop.xlane.xlu0 %14051  ;;  %v12230_v47 = vand.u32 4294901760, %v12227_v48 }
0x11a7   :  { %v14053_v23 = vsub.f32 %v41199_v37, %v14052_v44 }
0x11a8   :  { %v12307_v43 = vsub.f32 %v12227_v48, %v12230_v47 }
0x11a9   :  { %v14054_v1 = vmul.f32 1.442695, %v14053_v23 }
0x11aa   :  { %35432 = vmatmul.mubr.f32.vlgmr.msra.gmra.mrb[22].mxu0 %v11374_v8  ;;  %v14970_v7 = vpop.xlane.xlu0 %14969  ;;  %v12308_v61 = vand.u32 4294901760, %v12307_v43 }
0x11ab   :  { %v39586_v54 = vpop.eup %39585  ;;  %39587 = vpow2.f32 %v14054_v1  ;;  %35435 = vmatpush3.msra.mxu0 %v11309_v26  ;;  %v14971_v56 = vsub.f32 %v41207_v4, %v14970_v7  ;;  %35436 = vmatprep.mubr.msk.f32.mxu0 %vm39741_vm1, %v43804_v9 }
0x11ac   :  { %v12221_v38 = vmul.f32 %v39586_v54, %v41212_v59  ;;  %35469 = vmatprep.subr.mxu0 %v43804_v9  ;;  %v12309_v26 = vsub.f32 %v12307_v43, %v12308_v61 }
0x11ad   :  { %v14972_v60 = vmul.f32 1.442695, %v14971_v56 }
0x11ae   :  { %v12225_v37 = vsel %vm10383_vm7, %v12221_v38, 0  ;;  %v12310_v41 = vand.u32 4294901760, %v12309_v26  ;;  %v39688_v26 = vld [vmem:[%s43776_s8 + $0x20] sm:$0xff] }
0x11af   :  { %39589 = vpow2.f32 %v14972_v60  ;;  %v12295_v17 = vand.u32 4294901760, %v12225_v37 }
0x11b1   :  { %v12296_v28 = vsub.f32 %v12225_v37, %v12295_v17 }
0x11b2   :  { %35437 = vmatmul.mubr.f32.vlgmr.msra.gmra.mrb[22].mxu0 %v11374_v8 }
0x11b3   :  { %35470 = vmatpush3.msra.mxu0 %v12230_v47  ;;  %35471 = vmatprep.mubr.msk.f32.mxu0 %vm39741_vm1, %v43804_v9  ;;  %v12297_v4 = vand.u32 4294901760, %v12296_v28 }
0x11b4   :  { %35474 = vmatprep.subr.mxu0 %v43804_v9 }
0x11b5   :  { %v41279_v59 = vpop.eup %39587  ;;  %v12298_v51 = vsub.f32 %v12296_v28, %v12297_v4 }
0x11b6   :  { %v14056_v52 = vsel %vm10369_vm4, %v41279_v59, 0.0 }
0x11b7   :  { %14057 = vadd.xlane.f32.xlu1 %v14056_v52  ;;  %v12299_v57 = vand.u32 4294901760, %v12298_v51  ;;  %v39689_v51 = vld [vmem:[%s43776_s8 + $0x38] sm:$0xff] }
0x11b9   :  { %v41283_v42 = vpop.eup %39589  ;;  %35472 = vmatmul.mubr.f32.vlgmr.msra.gmra.mrb[24].mxu0 %v12299_v57 }
0x11ba   :  { %35475 = vmatpush3.msra.mxu0 %v12310_v41  ;;  %v14974_v8 = vsel %vm10369_vm4, %v41283_v42, 0.0  ;;  %35476 = vmatprep.mubr.msk.f32.mxu0 %vm39741_vm1, %v43804_v9 }
0x11bb   :  { %14975 = vadd.xlane.f32.xlu0 %v14974_v8  ;;  %35479 = vmatprep.subr.mxu0 %v43804_v9 }
0x11c1   :  { %35477 = vmatmul.mubr.f32.vlgmr.msra.gmra.mrb[24].mxu0 %v12295_v17 }
0x11c2   :  { %35480 = vmatpush3.msra.mxu0 %v12307_v43  ;;  %35481 = vmatprep.mubr.msk.f32.mxu0 %vm39741_vm1, %v43804_v9 }
0x11c3   :  { %35484 = vmatprep.subr.mxu0 %v43804_v9 }
0x11c8   :  { %14061 = vrot.lane.b32.xlu1 %v41014_v29, %s39742_s24 }
0x11c9   :  { %35482 = vmatmul.mubr.f32.vlgmr.msra.gmra.mrb[24].mxu0 %v12296_v28  ;;  %v13137_v0 = vpop.xlane.xlu0 %13136 }
0x11ca   :  { %35485 = vmatpush3.msra.mxu0 %v12230_v47  ;;  %39591 = vrcp.f32 %v13137_v0  ;;  %35486 = vmatprep.mubr.msk.f32.mxu0 %vm39741_vm1, %v43804_v9 }
0x11cb   :  { %35489 = vmatprep.subr.mxu0 %v43804_v9 }
0x11cd   :  { %v13141_v12 = vpop.permute.xlu0 %13140 }
0x11ce   :  { %v13145_v25 = vsel %vm10387_vm6, %v13141_v12, 0 }
0x11cf   :  { %v13148_v40 = vand.u32 4294901760, %v13145_v25 }
0x11d1   :  { %35487 = vmatmul.mubr.f32.vlgmr.msra.gmra.mrb[24].mxu0 %v12297_v4  ;;  %14979 = vrot.lane.b32.xlu0 %v41014_v29, %s39746_s27  ;;  %v13225_v44 = vsub.f32 %v13145_v25, %v13148_v40  ;;  %v39687_v4 = vld [vmem:[%s43776_s8 + $0x8] sm:$0xff] }
0x11d2   :  { %35490 = vmatpush3.msra.mxu0 %v12308_v61  ;;  %35491 = vmatprep.mubr.msk.f32.mxu0 %vm39741_vm1, %v43804_v9 }
0x11d3   :  { %35494 = vmatprep.subr.mxu0 %v43804_v9  ;;  %v13226_v1 = vand.u32 4294901760, %v13225_v44 }
0x11d4   :  { %v39592_v63 = vpop.eup %39591 }
0x11d5   :  { %v13139_v16 = vmul.f32 %v39592_v63, %v41240_v13  ;;  %v13227_v56 = vsub.f32 %v13225_v44, %v13226_v1 }
0x11d7   :  { %v13143_v48 = vsel %vm10383_vm7, %v13139_v16, 0  ;;  %v13228_v38 = vand.u32 4294901760, %v13227_v56 }
0x11d8   :  { %v13213_v23 = vand.u32 4294901760, %v13143_v48 }
0x11d9   :  { %35492 = vmatmul.mubr.f32.vlgmr.msra.gmra.mrb[24].mxu0 %v12295_v17 }
0x11da   :  { %35495 = vmatpush3.msra.mxu0 %v12230_v47  ;;  %35496 = vmatprep.mubr.msk.f32.mxu0 %vm39741_vm1, %v43804_v9  ;;  %v13214_v29 = vsub.f32 %v13143_v48, %v13213_v23  ;;  %v16807_v47 = vsel %vm10369_vm4, %v41246_v49, -inf }
0x11db   :  { %35529 = vmatprep.subr.mxu0 %v43804_v9 }
0x11dc   :  { %v13215_v7 = vand.u32 4294901760, %v13214_v29 }
0x11de   :  { %v13216_v54 = vsub.f32 %v13214_v29, %v13215_v7 }
0x11e0   :  { %v13217_v13 = vand.u32 4294901760, %v13216_v54 }
0x11e1   :  { %35497 = vmatmul.mubr.f32.vlgmr.msra.gmra.mrb[24].mxu0 %v12295_v17 }
0x11e2   :  { %35530 = vmatpush3.msra.mxu0 %v13148_v40  ;;  %35531 = vmatprep.mubr.msk.f32.mxu0 %vm39741_vm1, %v43804_v9 }
0x11e3   :  { %35534 = vmatprep.subr.mxu0 %v43804_v9 }
0x11e5   :  { %35532 = vmatmul.mubr.f32.vlgmr.msra.gmra.mrb[26].mxu0 %v13217_v13 }
0x11e6   :  { %35535 = vmatpush3.msra.mxu0 %v13228_v38  ;;  %35536 = vmatprep.mubr.msk.f32.mxu0 %vm39741_vm1, %v43804_v9 }
0x11e7   :  { %35539 = vmatprep.subr.mxu0 %v43804_v9 }
0x11ec   :  { %16808 = vmax.xlane.f32.xlu1 %v16807_v47 }
0x11ed   :  { %35537 = vmatmul.mubr.f32.vlgmr.msra.gmra.mrb[26].mxu0 %v13213_v23 }
0x11ee   :  { %35540 = vmatpush3.msra.mxu0 %v13225_v44  ;;  %35541 = vmatprep.mubr.msk.f32.mxu0 %vm39741_vm1, %v43804_v9 }
0x11ef   :  { %35544 = vmatprep.subr.mxu0 %v43804_v9 }
0x11f5   :  { %35542 = vmatmul.mubr.f32.vlgmr.msra.gmra.mrb[26].mxu0 %v13214_v29 }
0x11f6   :  { %35545 = vmatpush3.msra.mxu0 %v13148_v40  ;;  %35546 = vmatprep.mubr.msk.f32.mxu0 %vm39741_vm1, %v43804_v9 }
0x11f7   :  { %35549 = vmatprep.subr.mxu0 %v43804_v9 }
0x11fd   :  { %35547 = vmatmul.mubr.f32.vlgmr.msra.gmra.mrb[26].mxu0 %v13215_v7  ;;  %15900 = vrot.lane.b32.xlu1 %v41021_v46, %s39742_s24 }
0x11fe   :  { %35550 = vmatpush3.msra.mxu0 %v13226_v1  ;;  %v15891_v43 = vpop.xlane.xlu0 %15890  ;;  %35551 = vmatprep.mubr.msk.f32.mxu0 %vm39741_vm1, %v43804_v9 }
0x11ff   :  { %v15892_v60 = vsub.f32 %v41223_v58, %v15891_v43  ;;  %35554 = vmatprep.subr.mxu0 %v43804_v9 }
0x1201   :  { %v15893_v37 = vmul.f32 1.442695, %v15892_v60 }
0x1203   :  { %39593 = vpow2.f32 %v15893_v37 }
0x1205   :  { %35552 = vmatmul.mubr.f32.vlgmr.msra.gmra.mrb[26].mxu0 %v13213_v23 }
0x1206   :  { %35555 = vmatpush3.msra.mxu0 %v13148_v40  ;;  %35556 = vmatprep.mubr.msk.f32.mxu0 %vm39741_vm1, %v43804_v9 }
0x1207   :  { %35589 = vmatprep.subr.mxu0 %v43804_v9 }
0x120d   :  { %v41332_v17 = vpop.eup %39593  ;;  %35557 = vmatmul.mubr.f32.vlgmr.msra.gmra.mrb[26].mxu0 %v13213_v23 }
0x120e   :  { %v15895_v61 = vsel %vm10369_vm4, %v41332_v17, 0.0  ;;  %35591 = vmatprep.mubr.msk.f32.mxu0 %vm39741_vm1, %v43804_v9 }
0x120f   :  { %15896 = vadd.xlane.f32.xlu0 %v15895_v61 }
0x1212   :  { %v41338_v58 = vpop.f32.mrb[20].mxu0 }
0x1213   :  { %v35378_v28 = vpop.f32.mrb[21].mxu0 }
0x1225   :  { %16818 = vrot.lane.b32.xlu0 %v41021_v46, %s39746_s27 }
0x1229   :  { %17284 = vrot.lane.b32.xlu0 %v39687_v4, %s39746_s27 }
0x122d   :  { %17286 = vrot.lane.b32.xlu0 %v39688_v26, %s39746_s27 }
0x1231   :  { %17288 = vrot.lane.b32.xlu0 %v39689_v51, %s39746_s27 }
0x1244   :  { %v14058_v52 = vpop.xlane.xlu1 %14057 }
0x1245   :  { %39595 = vrcp.f32 %v14058_v52 }
0x1248   :  { %v14062_v46 = vpop.permute.xlu1 %14061  ;;  %v14976_v7 = vpop.xlane.xlu0 %14975 }
0x1249   :  { %v14066_v57 = vsel %vm10387_vm6, %v14062_v46, 0  ;;  %39597 = vrcp.f32 %v14976_v7 }
0x124a   :  { %v14069_v41 = vand.u32 4294901760, %v14066_v57 }
0x124c   :  { %35590 = vmatpush3.msra.mxu0 %v14069_v41  ;;  %v14146_v12 = vsub.f32 %v14066_v57, %v14069_v41  ;;  %v14980_v56 = vpop.permute.xlu0 %14979 }
0x124d   :  { %35594 = vmatprep.subr.mxu0 %v43804_v9  ;;  %v14984_v38 = vsel %vm10387_vm6, %v14980_v56, 0 }
0x124e   :  { %v14147_v40 = vand.u32 4294901760, %v14146_v12  ;;  %v14987_v43 = vand.u32 4294901760, %v14984_v38 }
0x124f   :  { %v39596_v8 = vpop.eup %39595 }
0x1250   :  { %v14060_v0 = vmul.f32 %v39596_v8, %v41279_v59  ;;  %v14148_v44 = vsub.f32 %v14146_v12, %v14147_v40  ;;  %v15064_v61 = vsub.f32 %v14984_v38, %v14987_v43 }
0x1252   :  { %v14064_v25 = vsel %vm10383_vm7, %v14060_v0, 0  ;;  %v14149_v1 = vand.u32 4294901760, %v14148_v44  ;;  %v15065_v26 = vand.u32 4294901760, %v15064_v61  ;;  %v39692_v44 = vld [vmem:[%s43776_s8 + $0x98] sm:$0xff] }
0x1253   :  { %v14134_v63 = vand.u32 4294901760, %v14064_v25  ;;  %v39598_v59 = vpop.eup %39597 }
0x1254   :  { %v14978_v54 = vmul.f32 %v39598_v59, %v41283_v42  ;;  %v15066_v52 = vsub.f32 %v15064_v61, %v15065_v26 }
0x1255   :  { %v14135_v16 = vsub.f32 %v14064_v25, %v14134_v63 }
0x1256   :  { %v14982_v13 = vsel %vm10383_vm7, %v14978_v54, 0  ;;  %v15067_v8 = vand.u32 4294901760, %v15066_v52 }
0x1257   :  { %v14136_v48 = vand.u32 4294901760, %v14135_v16  ;;  %v41373_v47 = vand.u32 4294901760, %v14982_v13 }
0x1259   :  { %v14137_v23 = vsub.f32 %v14135_v16, %v14136_v48  ;;  %v15053_v42 = vsub.f32 %v14982_v13, %v41373_v47 }
0x125b   :  { %v14138_v29 = vand.u32 4294901760, %v14137_v23  ;;  %v15054_v4 = vand.u32 4294901760, %v15053_v42 }
0x125d   :  { %35592 = vmatmul.mubr.f32.vlgmr.msra.gmra.mrb[28].mxu0 %v14138_v29  ;;  %v15055_v51 = vsub.f32 %v15053_v42, %v15054_v4 }
0x125e   :  { %35595 = vmatpush3.msra.mxu0 %v14149_v1  ;;  %35596 = vmatprep.mubr.msk.f32.mxu0 %vm39741_vm1, %v43804_v9 }
0x125f   :  { %35599 = vmatprep.subr.mxu0 %v43804_v9  ;;  %v15056_v57 = vand.u32 4294901760, %v15055_v51 }
0x1265   :  { %35597 = vmatmul.mubr.f32.vlgmr.msra.gmra.mrb[28].mxu0 %v14134_v63 }
0x1266   :  { %35600 = vmatpush3.msra.mxu0 %v14146_v12  ;;  %35601 = vmatprep.mubr.msk.f32.mxu0 %vm39741_vm1, %v43804_v9  ;;  %v39690_v12 = vld [vmem:[%s43776_s8 + $0x50] sm:$0xff] }
0x1267   :  { %35604 = vmatprep.subr.mxu0 %v43804_v9 }
0x126d   :  { %35602 = vmatmul.mubr.f32.vlgmr.msra.gmra.mrb[28].mxu0 %v14135_v16 }
0x126e   :  { %35605 = vmatpush3.msra.mxu0 %v14069_v41  ;;  %35606 = vmatprep.mubr.msk.f32.mxu0 %vm39741_vm1, %v43804_v9 }
0x126f   :  { %35609 = vmatprep.subr.mxu0 %v43804_v9 }
0x1275   :  { %35607 = vmatmul.mubr.f32.vlgmr.msra.gmra.mrb[28].mxu0 %v14136_v48 }
0x1276   :  { %35610 = vmatpush3.msra.mxu0 %v14147_v40  ;;  %35611 = vmatprep.mubr.msk.f32.mxu0 %vm39741_vm1, %v43804_v9  ;;  %v39691_v40 = vld [vmem:[%s43776_s8 + $0x68] sm:$0xff] }
0x1277   :  { %35614 = vmatprep.subr.mxu0 %v43804_v9 }
0x1279   :  { %v16809_v60 = vpop.xlane.xlu1 %16808 }
0x127a   :  { %v16810_v37 = vsub.f32 %v41246_v49, %v16809_v60 }
0x127c   :  { %v16811_v28 = vmul.f32 1.442695, %v16810_v37 }
0x127d   :  { %35612 = vmatmul.mubr.f32.vlgmr.msra.gmra.mrb[28].mxu0 %v14134_v63 }
0x127e   :  { %39599 = vpow2.f32 %v16811_v28  ;;  %35615 = vmatpush3.msra.mxu0 %v14069_v41  ;;  %35616 = vmatprep.mubr.msk.f32.mxu0 %vm39741_vm1, %v43804_v9 }
0x127f   :  { %35649 = vmatprep.subr.mxu0 %v43804_v9 }
0x1285   :  { %v11750_v46 = vpop.f32.mrb[22].mxu0  ;;  %35617 = vmatmul.mubr.f32.vlgmr.msra.gmra.mrb[28].mxu0 %v14134_v63  ;;  %v15901_v63 = vpop.permute.xlu1 %15900 }
0x1286   :  { %35650 = vmatpush3.msra.mxu0 %v14987_v43  ;;  %11755 = vrot.lane.b32.xlu0 %v11750_v46, %s39746_s27  ;;  %v35438_v49 = vpop.f32.mrb[23].mxu0  ;;  %v15905_v48 = vsel %vm10387_vm6, %v15901_v63, 0 }
0x1287   :  { %35651 = vmatprep.mubr.msk.f32.mxu0 %vm39741_vm1, %v43804_v9  ;;  %35654 = vmatprep.subr.mxu0 %v43804_v9  ;;  %v15908_v23 = vand.u32 4294901760, %v15905_v48 }
0x1288   :  { %v41384_v41 = vpop.eup %39599 }
0x1289   :  { %35652 = vmatmul.mubr.f32.vlgmr.msra.gmra.mrb[30].mxu0 %v15056_v57  ;;  %v16813_v0 = vsel %vm10369_vm4, %v41384_v41, 0.0  ;;  %v15985_v7 = vsub.f32 %v15905_v48, %v15908_v23 }
0x128a   :  { %35655 = vmatpush3.msra.mxu0 %v15067_v8  ;;  %16814 = vadd.xlane.f32.xlu1 %v16813_v0 }
0x128b   :  { %35656 = vmatprep.mubr.msk.f32.mxu0 %vm39741_vm1, %v43804_v9  ;;  %35659 = vmatprep.subr.mxu0 %v43804_v9  ;;  %v15986_v37 = vand.u32 4294901760, %v15985_v7 }
0x1291   :  { %35657 = vmatmul.mubr.f32.vlgmr.msra.gmra.mrb[30].mxu0 %v41373_v47 }
0x1292   :  { %35660 = vmatpush3.msra.mxu0 %v15064_v61  ;;  %35661 = vmatprep.mubr.msk.f32.mxu0 %vm39741_vm1, %v43804_v9  ;;  %v15987_v61 = vsub.f32 %v15985_v7, %v15986_v37 }
0x1293   :  { %35664 = vmatprep.subr.mxu0 %v43804_v9 }
0x1294   :  { %v15988_v51 = vand.u32 4294901760, %v15987_v61  ;;  %v41500_v61 = vpack.c.bf16 %v17960_v24, %v17957_v30 }
0x1299   :  { %35662 = vmatmul.mubr.f32.vlgmr.msra.gmra.mrb[30].mxu0 %v15053_v42 }
0x129a   :  { %35665 = vmatpush3.msra.mxu0 %v14987_v43  ;;  %35666 = vmatprep.mubr.msk.f32.mxu0 %vm39741_vm1, %v43804_v9 }
0x129b   :  { %35669 = vmatprep.subr.mxu0 %v43804_v9  ;;  %17290 = vrot.lane.b32.xlu1 %v39690_v12, %s39746_s27 }
0x129c   :  { %v15897_v25 = vpop.xlane.xlu0 %15896 }
0x129d   :  { %39601 = vrcp.f32 %v15897_v25 }
0x129f   :  { %17292 = vrot.lane.b32.xlu1 %v39691_v40, %s39746_s27 }
0x12a0   :  { %v16819_v16 = vpop.permute.xlu0 %16818 }
0x12a1   :  { %35667 = vmatmul.mubr.f32.vlgmr.msra.gmra.mrb[30].mxu0 %v15054_v4 }
0x12a2   :  { %35670 = vmatpush3.msra.mxu0 %v15065_v26  ;;  %35671 = vmatprep.mubr.msk.f32.mxu0 %vm39741_vm1, %v43804_v9 }
0x12a3   :  { %35674 = vmatprep.subr.mxu0 %v43804_v9  ;;  %17296 = vrot.lane.b32.xlu1 %v39692_v44, %s39746_s27 }
0x12a4   :  { %v41414_v29 = vpop.permute.xlu0 %17284 }
0x12a5   :  { %v17315_v56 = vand.u32 4294901760, %v41414_v29 }
0x12a7   :  { %v39602_v1 = vpop.eup %39601 }
0x12a8   :  { %v15899_v59 = vmul.f32 %v39602_v1, %v41332_v17  ;;  %v41417_v54 = vpop.permute.xlu0 %17286 }
0x12a9   :  { %35672 = vmatmul.mubr.f32.vlgmr.msra.gmra.mrb[30].mxu0 %v41373_v47  ;;  %v17318_v13 = vand.u32 4294901760, %v41417_v54 }
0x12aa   :  { %35675 = vmatpush3.msra.mxu0 %v14987_v43  ;;  %35676 = vmatprep.mubr.msk.f32.mxu0 %vm39741_vm1, %v43804_v9  ;;  %v15903_v38 = vsel %vm10383_vm7, %v15899_v59, 0 }
0x12ab   :  { %35709 = vmatprep.subr.mxu0 %v43804_v9  ;;  %v15973_v60 = vand.u32 4294901760, %v15903_v38  ;;  %v41430_v17 = vpack.c.bf16 %v17318_v13, %v17315_v56 }
0x12ad   :  { %v15974_v42 = vsub.f32 %v15903_v38, %v15973_v60  ;;  %37774 = vmatprep.subr.bf16.mxu1 %v41430_v17 }
0x12ae   :  { %37776 = vmatpush3.bf16.msra.mxu1 %v41430_v17 }
0x12af   :  { %v15975_v43 = vand.u32 4294901760, %v15974_v42 }
0x12b1   :  { %35677 = vmatmul.mubr.f32.vlgmr.msra.gmra.mrb[30].mxu0 %v41373_v47  ;;  %v15976_v28 = vsub.f32 %v15974_v42, %v15975_v43  ;;  %v16823_v47 = vsel %vm10387_vm6, %v16819_v16, 0 }
0x12b2   :  { %35710 = vmatpush3.msra.mxu0 %v15908_v23  ;;  %35711 = vmatprep.mubr.msk.f32.mxu0 %vm39741_vm1, %v43804_v9  ;;  %v16826_v46 = vand.u32 4294901760, %v16823_v47 }
0x12b3   :  { %35714 = vmatprep.subr.mxu0 %v43804_v9  ;;  %v15977_v4 = vand.u32 4294901760, %v15976_v28 }
0x12b4   :  { %v41438_v26 = vpop.f32.mrb[24].mxu0  ;;  %v16903_v12 = vsub.f32 %v16823_v47, %v16826_v46 }
0x12b5   :  { %v35498_v52 = vpop.f32.mrb[25].mxu0  ;;  %35712 = vmatmul.mubr.f32.vlgmr.msra.gmra.mrb[32].mxu0 %v15977_v4 }
0x12b6   :  { %35715 = vmatpush3.msra.mxu0 %v15988_v51  ;;  %35716 = vmatprep.mubr.msk.f32.mxu0 %vm39741_vm1, %v43804_v9  ;;  %v16904_v16 = vand.u32 4294901760, %v16903_v12 }
0x12b7   :  { %35719 = vmatprep.subr.mxu0 %v43804_v9 }
0x12bd   :  { %35717 = vmatmul.mubr.f32.vlgmr.msra.gmra.mrb[32].mxu0 %v15973_v60 }
0x12be   :  { %35720 = vmatpush3.msra.mxu0 %v15985_v7  ;;  %35721 = vmatprep.mubr.msk.f32.mxu0 %vm39741_vm1, %v43804_v9 }
0x12bf   :  { %35724 = vmatprep.subr.mxu0 %v43804_v9 }
0x12c5   :  { %35722 = vmatmul.mubr.f32.vlgmr.msra.gmra.mrb[32].mxu0 %v15974_v42 }
0x12c6   :  { %35725 = vmatpush3.msra.mxu0 %v15908_v23  ;;  %35726 = vmatprep.mubr.msk.f32.mxu0 %vm39741_vm1, %v43804_v9 }
0x12c7   :  { %35729 = vmatprep.subr.mxu0 %v43804_v9 }
0x12cd   :  { %35727 = vmatmul.mubr.f32.vlgmr.msra.gmra.mrb[32].mxu0 %v15975_v43  ;;  %v18043_v43 = vsub.f32 %v40864_v21, %v18042_v31  ;;  %v18051_v31 = vand.u32 4294901760, %v18050_v55 }
0x12ce   :  { %35730 = vmatpush3.msra.mxu0 %v15986_v37  ;;  %35731 = vmatprep.mubr.msk.f32.mxu0 %vm39741_vm1, %v43804_v9 }
0x12cf   :  { %35734 = vmatprep.subr.mxu0 %v43804_v9  ;;  %v18044_v21 = vand.u32 4294901760, %v18043_v43 }
0x12d1   :  { %v41510_v19 = vpack.c.bf16 %v18051_v31, %v18044_v21 }
0x12d5   :  { %35732 = vmatmul.mubr.f32.vlgmr.msra.gmra.mrb[32].mxu0 %v15973_v60 }
0x12d6   :  { %35735 = vmatpush3.msra.mxu0 %v15908_v23  ;;  %35736 = vmatprep.mubr.msk.f32.mxu0 %vm39741_vm1, %v43804_v9  ;;  %v16905_v23 = vsub.f32 %v16903_v12, %v16904_v16 }
0x12d7   :  { %35769 = vmatprep.subr.mxu0 %v43804_v9 }
0x12d8   :  { %v16906_v59 = vand.u32 4294901760, %v16905_v23 }
0x12dd   :  { %35737 = vmatmul.mubr.f32.vlgmr.msra.gmra.mrb[32].mxu0 %v15973_v60  ;;  %v41480_v60 = vpack.c.bf16 %v17954_v62, %v17951_v14 }
0x12de   :  { %35770 = vmatpush3.msra.mxu0 %v16826_v46  ;;  %35771 = vmatprep.mubr.msk.f32.mxu0 %vm39741_vm1, %v43804_v9 }
0x12df   :  { %35774 = vmatprep.subr.mxu0 %v43804_v9 }
0x12e0   :  { %v13589_v49 = vpop.f32.mrb[26].mxu0 }
0x12e1   :  { %13594 = vrot.lane.b32.xlu0 %v13589_v49, %s39746_s27  ;;  %v35558_v57 = vpop.f32.mrb[27].mxu0 }
0x1317   :  { %v16815_v8 = vpop.xlane.xlu1 %16814 }
0x1318   :  { %39603 = vrcp.f32 %v16815_v8 }
0x1322   :  { %v39604_v0 = vpop.eup %39603 }
0x1323   :  { %v16817_v25 = vmul.f32 %v39604_v0, %v41384_v41  ;;  %v41471_v41 = vpop.permute.xlu0 %17288  ;;  %v17409_v0 = vsub.f32 %v41414_v29, %v17315_v56  ;;  %v39693_v29 = vld [vmem:[%s43776_s8 + $0x80] sm:$0xff] }
0x1324   :  { %v17321_v49 = vand.u32 4294901760, %v41471_v41 }
0x1325   :  { %v16821_v63 = vsel %vm10383_vm7, %v16817_v25, 0  ;;  %v17410_v25 = vand.u32 4294901760, %v17409_v0 }
0x1326   :  { %v16891_v40 = vand.u32 4294901760, %v16821_v63 }
0x1327   :  { %v11756_v38 = vpop.permute.xlu0 %11755 }
0x1328   :  { %v16892_v48 = vsub.f32 %v16821_v63, %v16891_v40  ;;  %v11758_v11 = vsel %vm816_vm3, %v41338_v58, %v11756_v38 }
0x132a   :  { %v16893_v44 = vand.u32 4294901760, %v16892_v48 }
0x132c   :  { %v16894_v1 = vsub.f32 %v16892_v48, %v16893_v44 }
0x132e   :  { %v16895_v7 = vand.u32 4294901760, %v16894_v1 }
0x1330   :  { %35772 = vmatmul.mubr.f32.vlgmr.msra.gmra.mrb[34].mxu0 %v16895_v7 }
0x1331   :  { %35775 = vmatpush3.msra.mxu0 %v16906_v59  ;;  %35776 = vmatprep.mubr.msk.f32.mxu0 %vm39741_vm1, %v43804_v9 }
0x1332   :  { %35779 = vmatprep.subr.mxu0 %v43804_v9 }
0x1338   :  { %35777 = vmatmul.mubr.f32.vlgmr.msra.gmra.mrb[34].mxu0 %v16891_v40 }
0x1339   :  { %35780 = vmatpush3.msra.mxu0 %v16903_v12  ;;  %35781 = vmatprep.mubr.msk.f32.mxu0 %vm39741_vm1, %v43804_v9  ;;  %v17416_v12 = vsub.f32 %v41417_v54, %v17318_v13  ;;  %v39694_v54 = vld [vmem:[%s43776_s8 + $0xb0] sm:$0xff] }
0x133a   :  { %35784 = vmatprep.subr.mxu0 %v43804_v9 }
0x133b   :  { %v17417_v63 = vand.u32 4294901760, %v17416_v12 }
0x133d   :  { %v41532_v1 = vpack.c.bf16 %v17417_v63, %v17410_v25 }
0x1340   :  { %35782 = vmatmul.mubr.f32.vlgmr.msra.gmra.mrb[34].mxu0 %v16892_v48  ;;  %v41530_v48 = vpack.c.bf16 %v17416_v12, %v17409_v0 }
0x1341   :  { %35785 = vmatpush3.msra.mxu0 %v16826_v46  ;;  %35786 = vmatprep.mubr.msk.f32.mxu0 %vm39741_vm1, %v43804_v9 }
0x1342   :  { %35789 = vmatprep.subr.mxu0 %v43804_v9 }
0x1348   :  { %35787 = vmatmul.mubr.f32.vlgmr.msra.gmra.mrb[34].mxu0 %v16893_v44 }
0x1349   :  { %35790 = vmatpush3.msra.mxu0 %v16904_v16  ;;  %35791 = vmatprep.mubr.msk.f32.mxu0 %vm39741_vm1, %v43804_v9  ;;  %v17418_v16 = vsub.f32 %v17416_v12, %v17417_v63 }
0x134a   :  { %35794 = vmatprep.subr.mxu0 %v43804_v9 }
0x134b   :  { %v17419_v23 = vand.u32 4294901760, %v17418_v16 }
0x1350   :  { %35792 = vmatmul.mubr.f32.vlgmr.msra.gmra.mrb[34].mxu0 %v16891_v40 }
0x1351   :  { %35795 = vmatpush3.msra.mxu0 %v16826_v46  ;;  %35796 = vmatprep.mubr.msk.f32.mxu0 %vm39741_vm1, %v43804_v9  ;;  %v17291_v46 = vpop.permute.xlu1 %17290 }
0x1352   :  { %37870 = vmatprep.subr.bf16.mxu0 %v41480_v60  ;;  %v17324_v57 = vand.u32 4294901760, %v17291_v46 }
0x1353   :  { %v13595_v37 = vpop.permute.xlu0 %13594 }
0x1354   :  { %v13597_v42 = vsel %vm816_vm3, %v41438_v26, %v13595_v37  ;;  %v41520_v8 = vpack.c.bf16 %v17324_v57, %v17321_v49  ;;  %v41546_v43 = vsub.f32 %v17291_v46, %v17324_v57 }
0x1355   :  { %v17277_v62 = vrot.slane %v13597_v42, 4  ;;  %v17293_v13 = vpop.permute.xlu1 %17292  ;;  %v41544_v42 = vsub.f32 %v41471_v41, %v17321_v49 }
0x1356   :  { %37778 = vmatprep.subr.bf16.mxu1 %v41520_v8 }
0x1357   :  { %v17282_v14 = vsel %vm1283_vm2, %v11758_v11, %v17277_v62  ;;  %37780 = vmatpush3.bf16.msra.mxu1 %v41520_v8 }
0x1358   :  { %v17309_v28 = vsel %vm98_vm0, %v17282_v14, 0  ;;  %v14510_v4 = vpop.f32.mrb[28].mxu0  ;;  %35797 = vmatmul.mubr.f32.vlgmr.msra.gmra.mrb[34].mxu0 %v16891_v40  ;;  %v17411_v40 = vsub.f32 %v17409_v0, %v17410_v25  ;;  %v17327_v14 = vand.u32 4294901760, %v17293_v13 }
0x1359   :  { %v41503_v26 = vand.u32 4294901760, %v17309_v28  ;;  %37872 = vmatpush3.bf16.msra.mxu0 %v41480_v60  ;;  %v35618_v15 = vpop.f32.mrb[29].mxu0  ;;  %v17297_v21 = vpop.permute.xlu1 %17296 }
0x135a   :  { %37874 = vmatprep.subr.bf16.mxu0 %v41500_v61  ;;  %v17412_v44 = vand.u32 4294901760, %v17411_v40  ;;  %v17424_v15 = vand.u32 4294901760, %v41544_v42 }
0x135b   :  { %v41508_v34 = vsub.f32 %v17309_v28, %v41503_v26 }
0x135c   :  { %v37789_v7 = vpack.c.bf16 %v17419_v23, %v17412_v44  ;;  %v17425_v12 = vsub.f32 %v41544_v42, %v17424_v15 }
0x135d   :  { %37876 = vmatpush3.bf16.msra.mxu0 %v41500_v61  ;;  %v17389_v30 = vand.u32 4294901760, %v41508_v34 }
0x135e   :  { %37878 = vmatprep.subr.bf16.mxu0 %v41510_v19 }
0x135f   :  { %v17390_v50 = vsub.f32 %v41508_v34, %v17389_v30 }
0x1361   :  { %v17391_v24 = vand.u32 4294901760, %v17390_v50  ;;  %v17431_v50 = vand.u32 4294901760, %v41546_v43 }
0x1363   :  { %35815 = vmatprep.mubr.f32.mxu1 %v17391_v24  ;;  %v17432_v25 = vsub.f32 %v41546_v43, %v17431_v50 }
0x1384   :  { %v15428_v58 = vpop.f32.mrb[30].mxu0 }
0x1385   :  { %15433 = vrot.lane.b32.xlu0 %v15428_v58, %s39746_s27  ;;  %v35678_v51 = vpop.f32.mrb[31].mxu0 }
0x1386   :  { %v41556_v51 = vsub.f32 %v17293_v13, %v17327_v14 }
0x1388   :  { %v17438_v40 = vand.u32 4294901760, %v41556_v51 }
0x13b0   :  { %v16349_v52 = vpop.f32.mrb[32].mxu0 }
0x13b1   :  { %v35738_v47 = vpop.f32.mrb[33].mxu0 }
0x13f7   :  { %v15434_v56 = vpop.permute.xlu0 %15433 }
0x13f8   :  { %v15436_v11 = vsel %vm816_vm3, %v14510_v4, %v15434_v56 }
0x142b   :  { %v17267_v59 = vpop.f32.mrb[34].mxu0 }
0x142c   :  { %17272 = vrot.lane.b32.xlu0 %v17267_v59, %s39746_s27  ;;  %v35798_v38 = vpop.f32.mrb[35].mxu0 }
0x1430   :  { %17294 = vrot.lane.b32.xlu0 %v39693_v29, %s39746_s27  ;;  %v17426_v29 = vand.u32 4294901760, %v17425_v12  ;;  %v19131_v12 = vld [vmem:[%s43779_s11 + $0x68] sm:$0xff] }
0x1434   :  { %17298 = vrot.lane.b32.xlu0 %v39694_v54, %s39746_s27  ;;  %v17433_v54 = vand.u32 4294901760, %v17432_v25 }
0x149e   :  { %v17273_v37 = vpop.permute.xlu0 %17272 }
0x149f   :  { %v17275_v55 = vsel %vm816_vm3, %v16349_v52, %v17273_v37  ;;  %v17333_v52 = vand.u32 4294901760, %v17297_v21 }
0x14a0   :  { %v17280_v62 = vrot.slane %v17275_v55, 4  ;;  %v17439_v55 = vsub.f32 %v41556_v51, %v17438_v40 }
0x14a1   :  { %v41576_v16 = vsub.f32 %v17297_v21, %v17333_v52 }
0x14a2   :  { %v17283_v28 = vsel %vm1283_vm2, %v15436_v11, %v17280_v62  ;;  %v17295_v31 = vpop.permute.xlu0 %17294  ;;  %v37793_v62 = vpack.c.bf16 %v17433_v54, %v17426_v29 }
0x14a3   :  { %v17312_v24 = vsel %vm98_vm0, %v17283_v28, 0  ;;  %v17330_v41 = vand.u32 4294901760, %v17295_v31  ;;  %v17452_v37 = vand.u32 4294901760, %v41576_v16  ;;  %v17440_v28 = vand.u32 4294901760, %v17439_v55 }
0x14a4   :  { %v41554_v58 = vand.u32 4294901760, %v17312_v24 }
0x14a5   :  { %v41558_v47 = vpack.c.bf16 %v17330_v41, %v17327_v14  ;;  %v41560_v4 = vsub.f32 %v17295_v31, %v17330_v41  ;;  %v17453_v21 = vsub.f32 %v41576_v16, %v17452_v37 }
0x14a6   :  { %v41563_v46 = vsub.f32 %v17312_v24, %v41554_v58  ;;  %v17299_v49 = vpop.permute.xlu0 %17298 }
0x14a7   :  { %v17445_v57 = vand.u32 4294901760, %v41560_v4  ;;  %v17336_v0 = vand.u32 4294901760, %v17299_v49  ;;  %37782 = vmatprep.subr.bf16.mxu1 %v41558_v47  ;;  %v17454_v41 = vand.u32 4294901760, %v17453_v21 }
0x14a8   :  { %37784 = vmatpush3.bf16.msra.mxu1 %v41558_v47  ;;  %v17399_v63 = vand.u32 4294901760, %v41563_v46 }
0x14a9   :  { %v41578_v44 = vpack.c.bf16 %v17336_v0, %v17333_v52  ;;  %v41580_v23 = vsub.f32 %v17299_v49, %v17336_v0  ;;  %v17446_v56 = vsub.f32 %v41560_v4, %v17445_v57  ;;  %v37813_v49 = vpack.c.bf16 %v41560_v4, %v41556_v51 }
0x14aa   :  { %v17400_v59 = vsub.f32 %v41563_v46, %v17399_v63 }
0x14ab   :  { %v17459_v38 = vand.u32 4294901760, %v41580_v23  ;;  %37786 = vmatprep.subr.bf16.mxu1 %v41578_v44  ;;  %v17447_v11 = vand.u32 4294901760, %v17446_v56  ;;  %v37817_v0 = vpack.c.bf16 %v41580_v23, %v41576_v16 }
0x14ac   :  { %37788 = vmatpush3.bf16.msra.mxu1 %v41578_v44  ;;  %v17401_v13 = vand.u32 4294901760, %v17400_v59  ;;  %v19133_v59 = vld [vmem:[%s43779_s11 + $0x78] sm:$0xff] }
0x14ad   :  { %37790 = vmatprep.subr.bf16.mxu1 %v37789_v7  ;;  %v17460_v14 = vsub.f32 %v41580_v23, %v17459_v38  ;;  %v37797_v31 = vpack.c.bf16 %v17447_v11, %v17440_v28  ;;  %v19130_v23 = vld [vmem:[%s43779_s11 + $0x60] sm:$0xff]  ;;  %v19181_v11 = vand.u32 4294901760, %v19131_v12  ;;  %v19187_v21 = vand.u32 4294901760, %v19133_v59 }
0x14ae   :  { %v19183_v28 = vand.u32 4294901760, %v19130_v23 }
0x14af   :  { %35816 = vmatmul.mubr.f32.vlgmr.msra.gmra.mrb[38].mxu1 %v17401_v13  ;;  %v17461_v24 = vand.u32 4294901760, %v17460_v14  ;;  %v19137_v13 = vld [vmem:[%s43779_s11 + $0x98] sm:$0xff] }
0x14b0   :  { %37792 = vmatpush3.bf16.msra.mxu1 %v37789_v7  ;;  %35834 = vmatprep.mubr.f32.mxu1 %v41503_v26  ;;  %v37809_v7 = vpack.c.bf16 %v41546_v43, %v41544_v42  ;;  %v19121_v43 = vld [vmem:[%s43779_s11 + $0x18] sm:$0xff] }
0x14b1   :  { %37794 = vmatprep.subr.bf16.mxu1 %v37793_v62  ;;  %v37801_v52 = vpack.c.bf16 %v17461_v24, %v17454_v41  ;;  %v19171_v51 = vand.u32 4294901760, %v19121_v43  ;;  %v19189_v24 = vand.u32 4294901760, %v19137_v13  ;;  %v19136_v41 = vld [vmem:[%s43779_s11 + $0x90] sm:$0xff] }
0x14b3   :  { %v41682_v29 = vsub.f32 %v19121_v43, %v19171_v51  ;;  %v41726_v43 = vsub.f32 %v19137_v13, %v19189_v24 }
0x14b4   :  { %37796 = vmatpush3.bf16.msra.mxu1 %v37793_v62 }
0x14b5   :  { %37798 = vmatprep.subr.bf16.mxu1 %v37797_v31 }
0x14b8   :  { %37800 = vmatpush3.bf16.msra.mxu1 %v37797_v31  ;;  %v19140_v31 = vld [vmem:[%s43779_s11 + $0xb0] sm:$0xff] }
0x14b9   :  { %37802 = vmatprep.subr.bf16.mxu1 %v37801_v52 }
0x14bc   :  { %37804 = vmatpush3.bf16.msra.mxu1 %v37801_v52 }
0x14bd   :  { %37806 = vmatprep.subr.bf16.mxu1 %v41530_v48 }
0x14bf   :  { %35835 = vmatmul.mubr.f32.vlgmr.msra.gmra.mrb[38].mxu1 %v41554_v58 }
0x14c0   :  { %37808 = vmatpush3.bf16.msra.mxu1 %v41530_v48  ;;  %35853 = vmatprep.mubr.f32.mxu1 %v41508_v34  ;;  %v37841_v34 = vpack.c.bf16 %v17431_v50, %v17424_v15  ;;  %v37849_v48 = vpack.c.bf16 %v17459_v38, %v17452_v37  ;;  %v19125_v50 = vld [vmem:[%s43779_s11 + $0x38] sm:$0xff] }
0x14c1   :  { %37810 = vmatprep.subr.bf16.mxu1 %v37809_v7 }
0x14c4   :  { %37812 = vmatpush3.bf16.msra.mxu1 %v37809_v7 }
0x14c5   :  { %37814 = vmatprep.subr.bf16.mxu1 %v37813_v49 }
0x14c8   :  { %37816 = vmatpush3.bf16.msra.mxu1 %v37813_v49 }
0x14c9   :  { %37818 = vmatprep.subr.bf16.mxu1 %v37817_v0 }
0x14cc   :  { %37820 = vmatpush3.bf16.msra.mxu1 %v37817_v0  ;;  %v41708_v0 = vsub.f32 %v19131_v12, %v19181_v11 }
0x14cd   :  { %37822 = vmatprep.subr.bf16.mxu1 %v41430_v17 }
0x14cf   :  { %35854 = vmatmul.mubr.f32.vlgmr.msra.gmra.mrb[38].mxu1 %v41563_v46  ;;  %v19124_v46 = vld [vmem:[%s43779_s11 + $0x30] sm:$0xff] }
0x14d0   :  { %37824 = vmatpush3.bf16.msra.mxu1 %v41430_v17  ;;  %35872 = vmatprep.mubr.f32.mxu1 %v17389_v30  ;;  %v37845_v30 = vpack.c.bf16 %v17445_v57, %v17438_v40  ;;  %v19127_v57 = vld [vmem:[%s43779_s11 + $0x48] sm:$0xff]  ;;  %v19175_v55 = vand.u32 4294901760, %v19124_v46 }
0x14d1   :  { %37826 = vmatprep.subr.bf16.mxu1 %v41520_v8  ;;  %v19179_v62 = vand.u32 4294901760, %v19127_v57 }
0x14d2   :  { %v41704_v7 = vsub.f32 %v19124_v46, %v19175_v55 }
0x14d3   :  { %v41702_v52 = vpack.c.bf16 %v19179_v62, %v19175_v55  ;;  %v41706_v49 = vsub.f32 %v19127_v57, %v19179_v62 }
0x14d4   :  { %37828 = vmatpush3.bf16.msra.mxu1 %v41520_v8 }
0x14d5   :  { %37830 = vmatprep.subr.bf16.mxu1 %v41558_v47 }
0x14d8   :  { %37832 = vmatpush3.bf16.msra.mxu1 %v41558_v47 }
0x14d9   :  { %37834 = vmatprep.subr.bf16.mxu1 %v41578_v44 }
0x14dc   :  { %37836 = vmatpush3.bf16.msra.mxu1 %v41578_v44 }
0x14dd   :  { %37838 = vmatprep.subr.bf16.mxu1 %v41532_v1 }
0x14df   :  { %35873 = vmatmul.mubr.f32.vlgmr.msra.gmra.mrb[38].mxu1 %v17399_v63 }
0x14e0   :  { %37840 = vmatpush3.bf16.msra.mxu1 %v41532_v1  ;;  %35891 = vmatprep.mubr.f32.mxu1 %v41503_v26 }
0x14e1   :  { %37842 = vmatprep.subr.bf16.mxu1 %v37841_v34 }
0x14e4   :  { %37844 = vmatpush3.bf16.msra.mxu1 %v37841_v34  ;;  %v19139_v34 = vld [vmem:[%s43779_s11 + $0xa8] sm:$0xff] }
0x14e5   :  { %37846 = vmatprep.subr.bf16.mxu1 %v37845_v30 }
0x14e8   :  { %37848 = vmatpush3.bf16.msra.mxu1 %v37845_v30  ;;  %v19114_v30 = vld [vmem:[%s43769_s1] sm:$0xff] }
0x14e9   :  { %37850 = vmatprep.subr.bf16.mxu1 %v37849_v48 }
0x14ec   :  { %37852 = vmatpush3.bf16.msra.mxu1 %v37849_v48 }
0x14ed   :  { %37854 = vmatprep.subr.bf16.mxu1 %v41430_v17 }
0x14ef   :  { %35892 = vmatmul.mubr.f32.vlgmr.msra.gmra.mrb[38].mxu1 %v41554_v58 }
0x14f0   :  { %37856 = vmatpush3.bf16.msra.mxu1 %v41430_v17  ;;  %35910 = vmatprep.mubr.f32.mxu1 %v41503_v26  ;;  %v19119_v17 = vld [vmem:[%s43779_s11 + $0x8] sm:$0xff]  ;;  %v19122_v26 = vld [vmem:[%s43779_s11 + $0x20] sm:$0xff] }
0x14f1   :  { %37858 = vmatprep.subr.bf16.mxu1 %v41520_v8  ;;  %v19165_v1 = vand.u32 4294901760, %v19119_v17  ;;  %v19169_v42 = vand.u32 4294901760, %v19122_v26 }
0x14f3   :  { %v41663_v25 = vpack.c.bf16 %v19169_v42, %v19165_v1  ;;  %v41665_v63 = vsub.f32 %v19119_v17, %v19165_v1  ;;  %v41667_v40 = vsub.f32 %v19122_v26, %v19169_v42  ;;  %v41720_v26 = vpack.c.bf16 %v19187_v21, %v19183_v28 }
0x14f4   :  { %37860 = vmatpush3.bf16.msra.mxu1 %v41520_v8  ;;  %v19118_v8 = vld [vmem:[%s43779_s11] sm:$0xff]  ;;  %v41724_v1 = vsub.f32 %v19133_v59, %v19187_v21  ;;  %v19193_v42 = vand.u32 4294901760, %v19140_v31 }
0x14f5   :  { %37862 = vmatprep.subr.bf16.mxu1 %v41558_v47  ;;  %v19167_v15 = vand.u32 4294901760, %v19118_v8 }
0x14f6   :  { %v41735_v46 = vsub.f32 %v19140_v31, %v19193_v42 }
0x14f7   :  { %v41669_v16 = vsub.f32 %v19118_v8, %v19167_v15  ;;  %v41680_v38 = vpack.c.bf16 %v19171_v51, %v19167_v15  ;;  %v41722_v8 = vsub.f32 %v19130_v23, %v19183_v28  ;;  %v19191_v15 = vand.u32 4294901760, %v19136_v41 }
0x14f8   :  { %37864 = vmatpush3.bf16.msra.mxu1 %v41558_v47  ;;  %v19173_v47 = vand.u32 4294901760, %v19125_v50  ;;  %v43802_v51 = vand.u32 4294901760, %v41667_v40 }
0x14f9   :  { %37866 = vmatprep.subr.bf16.mxu1 %v41578_v44  ;;  %v41737_v57 = vsub.f32 %v19136_v41, %v19191_v15  ;;  %v43793_v62 = vand.u32 4294901760, %v41669_v16 }
0x14fa   :  { %v41686_v56 = vsub.f32 %v19125_v50, %v19173_v47  ;;  %v19195_v50 = vand.u32 4294901760, %v19139_v34  ;;  %v19283_v13 = vsub.f32 %v41667_v40, %v43802_v51 }
0x14fc   :  { %37868 = vmatpush3.bf16.msra.mxu1 %v41578_v44  ;;  %v19134_v44 = vld [vmem:[%s43779_s11 + $0x80] sm:$0xff]  ;;  %v41743_v23 = vsub.f32 %v19139_v34, %v19195_v50  ;;  %v19284_v21 = vand.u32 4294901760, %v19283_v13  ;;  %v19277_v34 = vsub.f32 %v41669_v16, %v43793_v62 }
0x14fd   :  { %38014 = vmatprep.subr.bf16.mxu1 %v41663_v25  ;;  %v19185_v14 = vand.u32 4294901760, %v19134_v44 }
0x14fe   :  { %v19278_v35 = vand.u32 4294901760, %v19277_v34  ;;  %v19115_v34 = vld [vmem:[%s43769_s1 + $0x8] sm:$0xff] }
0x14ff   :  { %35911 = vmatmul.mubr.f32.vlgmr.msra.gmra.mrb[38].mxu1 %v41554_v58  ;;  %v19128_v58 = vld [vmem:[%s43779_s11 + $0x50] sm:$0xff]  ;;  %v41716_v48 = vpack.c.bf16 %v19185_v14, %v19181_v11  ;;  %v41718_v17 = vsub.f32 %v19134_v44, %v19185_v14  ;;  %v41741_v44 = vpack.c.bf16 %v19195_v50, %v19191_v15  ;;  %v43792_v11 = vand.u32 4294901760, %v41682_v29 }
0x1500   :  { %19245 = vmatprep.mubr.f32.mxu1 %v43804_v9  ;;  %v19177_v4 = vand.u32 4294901760, %v19128_v58  ;;  %38016 = vmatpush1.bf16.msra.mxu1 %v41680_v38  ;;  %v43790_v14 = vand.u32 4294901760, %v41686_v56 }
0x1501   :  { %v43795_v62 = vand.u32 4294901760, %v41718_v17 }
0x1502   :  { %v41684_v54 = vpack.c.bf16 %v19177_v4, %v19173_v47  ;;  %v41692_v37 = vsub.f32 %v19128_v58, %v19177_v4  ;;  %v43803_v58 = vand.u32 4294901760, %v41665_v63  ;;  %v19161_v47 = vsel %vm98_vm0, %v19114_v30, 0 }
0x1503   :  { %v41733_v4 = vpack.c.bf16 %v19193_v42, %v19189_v24  ;;  %v41739_v12 = vand.u32 4294901760, %v19161_v47  ;;  %v43791_v24 = vand.u32 4294901760, %v41704_v7  ;;  %v19289_v30 = vsub.f32 %v41682_v29, %v43792_v11 }
0x1504   :  { %38018 = vmatprep.subr.bf16.mxu1 %v41684_v54  ;;  %v19271_v59 = vsub.f32 %v41665_v63, %v43803_v58  ;;  %v43789_v31 = vand.u32 4294901760, %v41692_v37  ;;  %v19295_v42 = vsub.f32 %v41686_v56, %v43790_v14  ;;  %v43796_v14 = vand.u32 4294901760, %v41708_v0 }
0x1505   :  { %38020 = vmatpush1.bf16.msra.mxu1 %v41702_v52  ;;  %v41752_v55 = vsub.f32 %v19161_v47, %v41739_v12  ;;  %v19301_v47 = vsub.f32 %v41704_v7, %v43791_v24  ;;  %v19290_v36 = vand.u32 4294901760, %v19289_v30 }
0x1506   :  { %38022 = vmatprep.subr.bf16.mxu1 %v41716_v48  ;;  %v19272_v28 = vand.u32 4294901760, %v19271_v59  ;;  %v19307_v50 = vsub.f32 %v41692_v37, %v43789_v31  ;;  %v43799_v59 = vand.u32 4294901760, %v41706_v49  ;;  %v19296_v6 = vand.u32 4294901760, %v19295_v42 }
0x1507   :  { %v43794_v41 = vand.u32 4294901760, %v41752_v55  ;;  %v38031_v11 = vpack.c.bf16 %v19290_v36, %v19278_v35  ;;  %v19331_v36 = vsub.f32 %v41718_v17, %v43795_v62 }
0x1508   :  { %v38029_v15 = vpack.c.bf16 %v19284_v21, %v19272_v28  ;;  %v19308_v28 = vand.u32 4294901760, %v19307_v50  ;;  %v19302_v21 = vand.u32 4294901760, %v19301_v47  ;;  %v19313_v31 = vsub.f32 %v41706_v49, %v43799_v59 }
0x1509   :  { %38024 = vmatpush1.bf16.msra.mxu1 %v41720_v26  ;;  %v19249_v13 = vsub.f32 %v41752_v55, %v43794_v41  ;;  %v43797_v41 = vand.u32 4294901760, %v41722_v8  ;;  %v19319_v50 = vsub.f32 %v41708_v0, %v43796_v14  ;;  %v43798_v47 = vand.u32 4294901760, %v41724_v1 }
0x150a   :  { %38026 = vmatprep.subr.bf16.mxu1 %v41733_v4  ;;  %v38033_v30 = vpack.c.bf16 %v19308_v28, %v19296_v6  ;;  %v19314_v42 = vand.u32 4294901760, %v19313_v31  ;;  %v43801_v6 = vand.u32 4294901760, %v41735_v46  ;;  %v19332_v62 = vand.u32 4294901760, %v19331_v36 }
0x150b   :  { %v19250_v24 = vand.u32 4294901760, %v19249_v13  ;;  %v19325_v35 = vsub.f32 %v41722_v8, %v43797_v41  ;;  %v19320_v13 = vand.u32 4294901760, %v19319_v50  ;;  %v19337_v28 = vsub.f32 %v41724_v1, %v43798_v47 }
0x150c   :  { %v38035_v31 = vpack.c.bf16 %v19314_v42, %v19302_v21  ;;  %v19348_v50 = vand.u32 4294901760, %v41737_v57  ;;  %v19360_v47 = vand.u32 4294901760, %v41743_v23 }
0x150d   :  { %38028 = vmatpush1.bf16.msra.mxu1 %v41741_v44  ;;  %v19326_v14 = vand.u32 4294901760, %v19325_v35  ;;  %v19338_v21 = vand.u32 4294901760, %v19337_v28  ;;  %v38037_v59 = vpack.c.bf16 %v19332_v62, %v19320_v13  ;;  %v43824_v13 = vmov 0.0  }
0x150e   :  { %38030 = vmatprep.subr.bf16.mxu1 %v38029_v15  ;;  %v43800_v15 = vand.u32 4294901760, %v41726_v43  ;;  %v19361_v28 = vsub.f32 %v41743_v23, %v19360_v47 }
0x150f   :  { %v38039_v36 = vpack.c.bf16 %v19338_v21, %v19326_v14  ;;  %v43825_v21 = vand.u32 4294901760, %v41665_v63 }
0x1510   :  { %19251 = vmatmul.mubr.f32.vlgmr.msra.gmra.mrb[40].mxu1 %v19250_v24  ;;  %v19163_v24 = vsel %vm98_vm0, %v19115_v34, 0  ;;  %v19343_v41 = vsub.f32 %v41726_v43, %v43800_v15  ;;  %v19349_v15 = vsub.f32 %v41737_v57, %v19348_v50 }
0x1511   :  { %38032 = vmatpush1.bf16.msra.mxu1 %v38031_v11  ;;  %19256 = vmatprep.mubr.f32.mxu1 %v43804_v9  ;;  %v19355_v11 = vsub.f32 %v41735_v46, %v43801_v6  ;;  %v41814_v42 = vand.u32 4294901760, %v19163_v24  ;;  %v19362_v9 = vand.u32 4294901760, %v19361_v28 }
0x1512   :  { %38034 = vmatprep.subr.bf16.mxu1 %v38033_v30  ;;  %v19344_v34 = vand.u32 4294901760, %v19343_v41  ;;  %v19350_v58 = vand.u32 4294901760, %v19349_v15  ;;  %v38055_v15 = vpack.c.bf16 %v41724_v1, %v41722_v8 }
0x1513   :  { %v19356_v30 = vand.u32 4294901760, %v19355_v11  ;;  %v19258_v35 = vsub.f32 %v19163_v24, %v41814_v42  ;;  %v38047_v24 = vpack.c.bf16 %v41682_v29, %v41669_v16  ;;  %v38059_v11 = vpack.c.bf16 %v41743_v23, %v41737_v57 }
0x1514   :  { %v38043_v41 = vpack.c.bf16 %v19362_v9, %v19350_v58  ;;  %v38051_v9 = vpack.c.bf16 %v41706_v49, %v41704_v7  ;;  %v38053_v58 = vpack.c.bf16 %v41718_v17, %v41708_v0 }
0x1515   :  { %38036 = vmatpush1.bf16.msra.mxu1 %v38035_v31  ;;  %v38041_v6 = vpack.c.bf16 %v19356_v30, %v19344_v34  ;;  %v19259_v51 = vand.u32 4294901760, %v19258_v35  ;;  %v38045_v31 = vpack.c.bf16 %v41667_v40, %v41665_v63  ;;  %v43826_v34 = vand.u32 4294901760, %v41667_v40 }
0x1516   :  { %38038 = vmatprep.subr.bf16.mxu1 %v38037_v59  ;;  %v38049_v59 = vpack.c.bf16 %v41692_v37, %v41686_v56  ;;  %v43832_v63 = vand.u32 4294901760, %v41704_v7  ;;  %v43833_v40 = vand.u32 4294901760, %v41706_v49  ;;  %v43838_v7 = vand.u32 4294901760, %v41726_v43 }
0x1517   :  { %v19260_v62 = vsub.f32 %v19258_v35, %v19259_v51  ;;  %v38077_v30 = vpack.c.bf16 %v43826_v34, %v43825_v21  ;;  %v43839_v49 = vand.u32 4294901760, %v41735_v46 }
0x1519   :  { %38040 = vmatpush1.bf16.msra.mxu1 %v38039_v36  ;;  %v19261_v14 = vand.u32 4294901760, %v19260_v62  ;;  %v43827_v36 = vand.u32 4294901760, %v41669_v16  ;;  %v43829_v62 = vand.u32 4294901760, %v41686_v56  ;;  %v43834_v16 = vand.u32 4294901760, %v41708_v0 }
0x151a   :  { %38042 = vmatprep.subr.bf16.mxu1 %v38041_v6  ;;  %v38057_v6 = vpack.c.bf16 %v41735_v46, %v41726_v43  ;;  %v38091_v0 = vpack.c.bf16 %v19360_v47, %v19348_v50 }
0x151b   :  { %19262 = vmatmul.mubr.f32.gmra.mrb[42].mxu1 %v19261_v14 }
0x151c   :  { %19412 = vmatprep.mubr.f32.mxu1 %v43824_v13 }
0x151d   :  { %38044 = vmatpush1.bf16.msra.mxu1 %v38043_v41  ;;  %v43830_v41 = vand.u32 4294901760, %v41692_v37  ;;  %v43836_v37 = vand.u32 4294901760, %v41722_v8 }
0x151e   :  { %38046 = vmatprep.subr.bf16.mxu1 %v38045_v31  ;;  %v43831_v31 = vand.u32 4294901760, %v41752_v55 }
0x151f   :  { %v38081_v14 = vpack.c.bf16 %v43830_v41, %v43829_v62 }
0x1520   :  { %19414 = vmatmul.mubr.f32.vlgmr.msra.gmra.mrb[40].mxu1 %v41739_v12 }
0x1521   :  { %38048 = vmatpush1.bf16.msra.mxu1 %v38047_v24  ;;  %19419 = vmatprep.mubr.f32.mxu1 %v43824_v13  ;;  %v38083_v24 = vpack.c.bf16 %v43833_v40, %v43832_v63 }
0x1522   :  { %38050 = vmatprep.subr.bf16.mxu1 %v38049_v59 }
0x1524   :  { %19421 = vmatmul.mubr.f32.gmra.mrb[42].mxu1 %v41814_v42 }
0x1525   :  { %38052 = vmatpush1.bf16.msra.mxu1 %v38051_v9  ;;  %19523 = vmatprep.mubr.f32.mxu1 %v43824_v13  ;;  %v38089_v9 = vpack.c.bf16 %v43839_v49, %v43838_v7 }
0x1526   :  { %38054 = vmatprep.subr.bf16.mxu1 %v38053_v58 }
0x1529   :  { %38056 = vmatpush1.bf16.msra.mxu1 %v38055_v15 }
0x152a   :  { %38058 = vmatprep.subr.bf16.mxu1 %v38057_v6  ;;  %v41920_v6 = vld [vmem:[%s43778_s10] sm:$0xff] }
0x152d   :  { %38060 = vmatpush1.bf16.msra.mxu1 %v38059_v11  ;;  %v17927_v11 = vrot.slane %v41920_v6, %v40408_v10 }
0x152e   :  { %38062 = vmatprep.subr.bf16.mxu1 %v41663_v25 }
0x1530   :  { %19526 = vmatmul.mubr.f32.vlgmr.msra.gmra.mrb[40].mxu1 %v41752_v55  ;;  %v43837_v55 = vand.u32 4294901760, %v41724_v1 }
0x1531   :  { %38064 = vmatpush1.bf16.msra.mxu1 %v41680_v38  ;;  %19531 = vmatprep.mubr.f32.mxu1 %v43824_v13 }
0x1532   :  { %38066 = vmatprep.subr.bf16.mxu1 %v41684_v54  ;;  %v38087_v59 = vpack.c.bf16 %v43837_v55, %v43836_v37 }
0x1534   :  { %19534 = vmatmul.mubr.f32.gmra.mrb[42].mxu1 %v19258_v35  ;;  %v43828_v35 = vand.u32 4294901760, %v41682_v29  ;;  %v43835_v29 = vand.u32 4294901760, %v41718_v17 }
0x1535   :  { %38068 = vmatpush1.bf16.msra.mxu1 %v41702_v52  ;;  %19620 = vmatprep.mubr.f32.mxu1 %v43824_v13 }
0x1536   :  { %38070 = vmatprep.subr.bf16.mxu1 %v41716_v48  ;;  %v38079_v28 = vpack.c.bf16 %v43828_v35, %v43827_v36  ;;  %v38085_v56 = vpack.c.bf16 %v43835_v29, %v43834_v16 }
0x1539   :  { %38072 = vmatpush1.bf16.msra.mxu1 %v41720_v26 }
0x153a   :  { %38074 = vmatprep.subr.bf16.mxu1 %v41733_v4 }
0x153d   :  { %38076 = vmatpush1.bf16.msra.mxu1 %v41741_v44 }
0x153e   :  { %38078 = vmatprep.subr.bf16.mxu1 %v38077_v30  ;;  %v17933_v30 = vrot.slane %v41920_v6, %v40428_v45 }
0x1540   :  { %19624 = vmatmul.mubr.f32.vlgmr.msra.gmra.mrb[40].mxu1 %v43831_v31 }
0x1541   :  { %38080 = vmatpush1.bf16.msra.mxu1 %v38079_v28  ;;  %19629 = vmatprep.mubr.f32.mxu1 %v43824_v13 }
0x1542   :  { %38082 = vmatprep.subr.bf16.mxu1 %v38081_v14 }
0x1544   :  { %19633 = vmatmul.mubr.f32.gmra.mrb[42].mxu1 %v19259_v51 }
0x1545   :  { %38084 = vmatpush1.bf16.msra.mxu1 %v38083_v24  ;;  %19751 = vmatprep.mubr.f32.mxu1 %v43824_v13 }
0x1546   :  { %38086 = vmatprep.subr.bf16.mxu1 %v38085_v56 }
0x1549   :  { %38088 = vmatpush1.bf16.msra.mxu1 %v38087_v59 }
0x154a   :  { %38090 = vmatprep.subr.bf16.mxu1 %v38089_v9 }
0x154d   :  { %38092 = vmatpush1.bf16.msra.mxu1 %v38091_v0 }
0x154e   :  { %38094 = vmatprep.subr.bf16.mxu1 %v41663_v25 }
0x1550   :  { %19753 = vmatmul.mubr.f32.vlgmr.msra.gmra.mrb[40].mxu1 %v41739_v12 }
0x1551   :  { %38096 = vmatpush1.bf16.msra.mxu1 %v41680_v38  ;;  %19758 = vmatprep.mubr.f32.mxu1 %v43824_v13 }
0x1552   :  { %38098 = vmatprep.subr.bf16.mxu1 %v41684_v54 }
0x1554   :  { %19760 = vmatmul.mubr.f32.gmra.mrb[42].mxu1 %v41814_v42 }
0x1555   :  { %38100 = vmatpush1.bf16.msra.mxu1 %v41702_v52  ;;  %19846 = vmatprep.mubr.f32.mxu1 %v43824_v13 }
0x1556   :  { %38102 = vmatprep.subr.bf16.mxu1 %v41716_v48 }
0x1559   :  { %38104 = vmatpush1.bf16.msra.mxu1 %v41720_v26 }
0x155a   :  { %38106 = vmatprep.subr.bf16.mxu1 %v41733_v4 }
0x155d   :  { %38108 = vmatpush1.bf16.msra.mxu1 %v41741_v44 }
0x155e   :  { %36183 = vmatprep.subr.mxu1 %v43824_v13 }
0x1560   :  { %19848 = vmatmul.mubr.f32.vlgmr.msra.gmra.mrb[40].mxu1 %v41739_v12 }
0x1561   :  { %19853 = vmatprep.mubr.f32.mxu1 %v43824_v13 }
0x1564   :  { %19855 = vmatmul.mubr.f32.gmra.mrb[42].mxu1 %v41814_v42 }
0x1565   :  { %36185 = vmatprep.mubr.msk.f32.mxu1 %vm39741_vm1, %v43824_v13 }
0x15d2   :  { %v35912_v25 = vpop.f32.mrb[38].mxu1 }
0x15d3   :  { %v38827_v38 = vadd.f32 %v35912_v25, %v40905_v5  ;;  %v17884_v54 = vpop.f32.mrb[39].mxu1 }
0x15d4   :  { %v38828_v52 = vadd.f32 %v17884_v54, %v40899_v27 }
0x15d5   :  { %v17897_v48 = vsel %vm816_vm3, %v38827_v38, 0.0  ;;  %v17903_v1 = vmul.f32 %v38827_v38, %v38827_v38 }
0x15d6   :  { %17898 = vadd.xlane.f32.xlu0 %v17897_v48  ;;  %v17894_v17 = vsel %vm816_vm3, %v38828_v52, 0.0  ;;  %v17902_v26 = vmul.f32 %v38828_v52, %v38828_v52 }
0x15d7   :  { %17895 = vadd.xlane.f32.xlu1 %v17894_v17  ;;  %v17907_v43 = vsel %vm816_vm3, %v17903_v1, 0.0 }
0x15d8   :  { %v17904_v8 = vsel %vm816_vm3, %v17902_v26, 0.0  ;;  %v69_v26 = vld [vmem:[%s43776_s8 + $0x70] sm:$0xff] }
0x15d9   :  { %v18503_v1 = vand.u32 4294901760, %v69_v26 }
0x15da   :  { %17905 = vadd.xlane.f32.xlu0 %v17904_v8  ;;  %v72_v8 = vld [vmem:[%s43776_s8 + $0x88] sm:$0xff] }
0x15de   :  { %17908 = vadd.xlane.f32.xlu0 %v17907_v43  ;;  %v18506_v43 = vand.u32 4294901760, %v72_v8 }
0x1633   :  { %v41939_v25 = vpop.f32.mrb[40].mxu1 }
0x1634   :  { %19871 = vrot.lane.b32.xlu1 %v41939_v25, %s39742_s24 }
0x1638   :  { %20786 = vrot.lane.b32.xlu1 %v41939_v25, %s39746_s27 }
0x1663   :  { %v17899_v51 = vpop.xlane.xlu0 %17898 }
0x1664   :  { %v17896_v4 = vpop.xlane.xlu1 %17895  ;;  %v17901_v27 = vmul.f32 0.03125, %v17899_v51  ;;  %v41997_v51 = vpack.c.bf16 %v18506_v43, %v18503_v1 }
0x1665   :  { %v17900_v5 = vmul.f32 0.03125, %v17896_v4 }
0x1666   :  { %v17915_v47 = vmul.f32 %v17901_v27, %v17901_v27  ;;  %v17913_v35 = vsub.f32 %v38827_v38, %v17901_v27  ;;  %v41944_v38 = vpop.f32.mrb[41].mxu1 }
0x1667   :  { %v17914_v46 = vmul.f32 %v17900_v5, %v17900_v5  ;;  %v17906_v57 = vpop.xlane.xlu0 %17905  ;;  %v17912_v21 = vsub.f32 %v38828_v52, %v17900_v5 }
0x1668   :  { %v17910_v12 = vmul.f32 0.03125, %v17906_v57  ;;  %v78_v57 = vld [vmem:[%s43776_s8 + $0xb8] sm:$0xff] }
0x166a   :  { %v17916_v44 = vsub.f32 %v17910_v12, %v17914_v46  ;;  %v75_v46 = vld [vmem:[%s43776_s8 + $0xa0] sm:$0xff]  ;;  %v18512_v12 = vand.u32 4294901760, %v78_v57 }
0x166b   :  { %v17909_v23 = vpop.xlane.xlu0 %17908  ;;  %v18509_v27 = vand.u32 4294901760, %v75_v46 }
0x166c   :  { %v17918_v42 = vadd.f32 1e-06, %v17916_v44  ;;  %v17911_v50 = vmul.f32 0.03125, %v17909_v23 }
0x166e   :  { %39605 = vrsqrt.f32 %v17918_v42  ;;  %v17917_v58 = vsub.f32 %v17911_v50, %v17915_v47  ;;  %v42007_v47 = vpack.c.bf16 %v18512_v12, %v18509_v27 }
0x1670   :  { %v17919_v15 = vadd.f32 1e-06, %v17917_v58 }
0x1672   :  { %39607 = vrsqrt.f32 %v17919_v15 }
0x1678   :  { %v39606_v34 = vpop.eup %39605 }
0x1679   :  { %v17922_v36 = vmul.f32 %v39606_v34, %v17912_v21 }
0x167b   :  { %v17928_v28 = vmul.f32 %v17927_v11, %v17922_v36 }
0x167c   :  { %v39608_v62 = vpop.eup %39607 }
0x167d   :  { %v17923_v41 = vmul.f32 %v39608_v62, %v17913_v35  ;;  %v41926_v14 = vadd.f32 %v17933_v30, %v17928_v28  ;;  %v18613_v35 = vsub.f32 %v69_v26, %v18503_v1 }
0x167f   :  { %v17945_v31 = vsel %vm816_vm3, %v41926_v14, 0  ;;  %v17929_v63 = vmul.f32 %v17927_v11, %v17923_v41  ;;  %v18620_v41 = vsub.f32 %v72_v8, %v18506_v43 }
0x1680   :  { %v18019_v40 = vand.u32 4294901760, %v17945_v31 }
0x1681   :  { %v41930_v24 = vadd.f32 %v17933_v30, %v17929_v63  ;;  %v37957_v26 = vpack.c.bf16 %v18620_v41, %v18613_v35 }
0x1682   :  { %v18020_v16 = vsub.f32 %v17945_v31, %v18019_v40  ;;  %v18614_v31 = vand.u32 4294901760, %v18613_v35 }
0x1683   :  { %v17948_v29 = vsel %vm816_vm3, %v41930_v24, 0 }
0x1684   :  { %v18021_v56 = vand.u32 4294901760, %v18020_v16  ;;  %v18029_v37 = vand.u32 4294901760, %v17948_v29 }
0x1686   :  { %v18022_v55 = vsub.f32 %v18020_v16, %v18021_v56  ;;  %v18030_v59 = vsub.f32 %v17948_v29, %v18029_v37  ;;  %v18615_v29 = vsub.f32 %v18613_v35, %v18614_v31 }
0x1688   :  { %v18023_v7 = vand.u32 4294901760, %v18022_v55  ;;  %v18031_v49 = vand.u32 4294901760, %v18030_v59 }
0x168a   :  { %35921 = vmatprep.mubr.f32.mxu0 %v18023_v7  ;;  %v18032_v9 = vsub.f32 %v18030_v59, %v18031_v49  ;;  %v18616_v7 = vand.u32 4294901760, %v18615_v29 }
0x168c   :  { %v18033_v0 = vand.u32 4294901760, %v18032_v9 }
0x168e   :  { %35922 = vmatmul.mubr.f32.vlgmr.msra.gmra.mrb[36].mxu0 %v18033_v0 }
0x168f   :  { %37880 = vmatpush3.bf16.msra.mxu0 %v41510_v19  ;;  %35932 = vmatprep.mubr.f32.mxu0 %v18019_v40  ;;  %v41947_v19 = vpop.f32.mrb[42].mxu1 }
0x1690   :  { %37882 = vmatprep.subr.bf16.mxu0 %v40907_v53  ;;  %21715 = vrot.lane.b32.xlu1 %v41947_v19, %s39742_s24 }
0x1693   :  { %37884 = vmatpush3.bf16.msra.mxu0 %v40907_v53 }
0x1694   :  { %37886 = vmatprep.subr.bf16.mxu0 %v40876_v32  ;;  %22627 = vrot.lane.b32.xlu1 %v41947_v19, %s39745_s4 }
0x1696   :  { %35933 = vmatmul.mubr.f32.vlgmr.msra.gmra.mrb[36].mxu0 %v18029_v37 }
0x1697   :  { %37888 = vmatpush3.bf16.msra.mxu0 %v40876_v32  ;;  %35943 = vmatprep.mubr.f32.mxu0 %v18020_v16  ;;  %v41952_v32 = vpop.f32.mrb[43].mxu1  ;;  %v18621_v16 = vand.u32 4294901760, %v18620_v41 }
0x1698   :  { %37890 = vmatprep.subr.bf16.mxu0 %v40897_v18  ;;  %22629 = vrot.lane.b32.xlu1 %v41947_v19, %s39746_s27 }
0x1699   :  { %v18622_v55 = vsub.f32 %v18620_v41, %v18621_v16 }
0x169b   :  { %37892 = vmatpush3.bf16.msra.mxu0 %v40897_v18  ;;  %v60_v18 = vld [vmem:[%s43776_s8 + $0x28] sm:$0xff]  ;;  %v18623_v9 = vand.u32 4294901760, %v18622_v55 }
0x169c   :  { %37894 = vmatprep.subr.bf16.mxu0 %v41480_v60  ;;  %v18494_v53 = vand.u32 4294901760, %v60_v18 }
0x169e   :  { %35944 = vmatmul.mubr.f32.vlgmr.msra.gmra.mrb[36].mxu0 %v18030_v59  ;;  %v18592_v5 = vsub.f32 %v60_v18, %v18494_v53  ;;  %v18634_v59 = vsub.f32 %v78_v57, %v18512_v12  ;;  %v37941_v18 = vpack.c.bf16 %v18623_v9, %v18616_v7  ;;  %v17938_v57 = vsub.s32 4, %v40162_v2 }
0x169f   :  { %37896 = vmatpush3.bf16.msra.mxu0 %v41480_v60  ;;  %35954 = vmatprep.mubr.f32.mxu0 %v18021_v56  ;;  %v18627_v56 = vsub.f32 %v75_v46, %v18509_v27  ;;  %v37989_v46 = vpack.c.bf16 %v18621_v16, %v18614_v31 }
0x16a0   :  { %37898 = vmatprep.subr.bf16.mxu0 %v41500_v61  ;;  %v18593_v23 = vand.u32 4294901760, %v18592_v5  ;;  %v18635_v0 = vand.u32 4294901760, %v18634_v59  ;;  %v17939_v12 = vrot.slane %v41920_v6, %v17938_v57 }
0x16a1   :  { %v37961_v8 = vpack.c.bf16 %v18634_v59, %v18627_v56 }
0x16a2   :  { %v18594_v50 = vsub.f32 %v18592_v5, %v18593_v23 }
0x16a3   :  { %37900 = vmatpush3.bf16.msra.mxu0 %v41500_v61 }
0x16a4   :  { %37902 = vmatprep.subr.bf16.mxu0 %v40887_v22  ;;  %v18595_v21 = vand.u32 4294901760, %v18594_v50 }
0x16a6   :  { %35955 = vmatmul.mubr.f32.vlgmr.msra.gmra.mrb[36].mxu0 %v18031_v49  ;;  %v18628_v49 = vand.u32 4294901760, %v18627_v56 }
0x16a7   :  { %37904 = vmatpush3.bf16.msra.mxu0 %v40887_v22  ;;  %35965 = vmatprep.mubr.f32.mxu0 %v18019_v40  ;;  %v57_v22 = vld [vmem:[%s43776_s8 + $0x10] sm:$0xff] }
0x16a8   :  { %37906 = vmatprep.subr.bf16.mxu0 %v40901_v39  ;;  %v37993_v27 = vpack.c.bf16 %v18635_v0, %v18628_v49 }
0x16ab   :  { %37908 = vmatpush3.bf16.msra.mxu0 %v40901_v39  ;;  %v18491_v39 = vand.u32 4294901760, %v57_v22 }
0x16ac   :  { %37910 = vmatprep.subr.bf16.mxu0 %v41480_v60 }
0x16ad   :  { %v41977_v54 = vpack.c.bf16 %v18494_v53, %v18491_v39  ;;  %v18585_v4 = vsub.f32 %v57_v22, %v18491_v39  ;;  %v18629_v22 = vsub.f32 %v18627_v56, %v18628_v49  ;;  %v18636_v39 = vsub.f32 %v18634_v59, %v18635_v0  ;;  %v19116_v0 = vld [vmem:[%s43773_s5] sm:$0x3]  ;;  %s39748_s5 = smov 120  }
0x16ae   :  { %35966 = vmatmul.mubr.f32.vlgmr.msra.gmra.mrb[36].mxu0 %v18029_v37  ;;  %vm19861_vm8 = vcmp.gt.f32.partialorder %v19116_v0, 0.5 }
0x16af   :  { %37912 = vmatpush3.bf16.msra.mxu0 %v41480_v60  ;;  %35976 = vmatprep.mubr.f32.mxu0 %v18019_v40  ;;  %v63_v60 = vld [vmem:[%s43776_s8 + $0x40] sm:$0xff]  ;;  %v18586_v44 = vand.u32 4294901760, %v18585_v4  ;;  %v18630_v53 = vand.u32 4294901760, %v18629_v22  ;;  %v43840_v22 = vmov 0  }
0x16b0   :  { %37914 = vmatprep.subr.bf16.mxu0 %v41500_v61  ;;  %v18497_v52 = vand.u32 4294901760, %v63_v60 }
0x16b1   :  { %v18587_v42 = vsub.f32 %v18585_v4, %v18586_v44  ;;  %v37981_v1 = vpack.c.bf16 %v18593_v23, %v18586_v44 }
0x16b2   :  { %v18599_v58 = vsub.f32 %v63_v60, %v18497_v52  ;;  %v18637_v60 = vand.u32 4294901760, %v18636_v39 }
0x16b3   :  { %37916 = vmatpush3.bf16.msra.mxu0 %v41500_v61  ;;  %v66_v61 = vld [vmem:[%s43776_s8 + $0x58] sm:$0xff]  ;;  %v18588_v11 = vand.u32 4294901760, %v18587_v42 }
0x16b4   :  { %37918 = vmatprep.subr.bf16.mxu0 %v41977_v54  ;;  %v18500_v48 = vand.u32 4294901760, %v66_v61  ;;  %v18600_v34 = vand.u32 4294901760, %v18599_v58 }
0x16b5   :  { %v37933_v36 = vpack.c.bf16 %v18595_v21, %v18588_v11 }
0x16b6   :  { %35977 = vmatmul.mubr.f32.vlgmr.msra.gmra.mrb[36].mxu0 %v18029_v37  ;;  %v41987_v17 = vpack.c.bf16 %v18500_v48, %v18497_v52  ;;  %v18606_v15 = vsub.f32 %v66_v61, %v18500_v48  ;;  %v18601_v28 = vsub.f32 %v18599_v58, %v18600_v34  ;;  %v37945_v61 = vpack.c.bf16 %v18637_v60, %v18630_v53 }
0x16b7   :  { %37920 = vmatpush3.bf16.msra.mxu0 %v41977_v54  ;;  %v37949_v52 = vpack.c.bf16 %v18592_v5, %v18585_v4  ;;  %v43841_v53 = vmov -1e+09  }
0x16b8   :  { %37922 = vmatprep.subr.bf16.mxu0 %v41987_v17  ;;  %v18607_v30 = vand.u32 4294901760, %v18606_v15  ;;  %v18602_v63 = vand.u32 4294901760, %v18601_v28  ;;  %v37953_v48 = vpack.c.bf16 %v18606_v15, %v18599_v58 }
0x16ba   :  { %v18608_v62 = vsub.f32 %v18606_v15, %v18607_v30  ;;  %v37985_v43 = vpack.c.bf16 %v18607_v30, %v18600_v34 }
0x16bb   :  { %37924 = vmatpush3.bf16.msra.mxu0 %v41987_v17 }
0x16bc   :  { %37926 = vmatprep.subr.bf16.mxu0 %v41997_v51  ;;  %v18609_v40 = vand.u32 4294901760, %v18608_v62 }
0x16be   :  { %v37937_v37 = vpack.c.bf16 %v18609_v40, %v18602_v63  ;;  %v19872_v63 = vpop.permute.xlu1 %19871 }
0x16bf   :  { %37928 = vmatpush3.bf16.msra.mxu0 %v41997_v51  ;;  %v19875_v40 = vsel %vm816_vm3, %v19872_v63, 0 }
0x16c0   :  { %37930 = vmatprep.subr.bf16.mxu0 %v42007_v47  ;;  %v19878_v29 = vand.u32 4294901760, %v19875_v40 }
0x16c2   :  { %v19955_v56 = vsub.f32 %v19875_v40, %v19878_v29 }
0x16c3   :  { %37932 = vmatpush3.bf16.msra.mxu0 %v42007_v47 }
0x16c4   :  { %37934 = vmatprep.subr.bf16.mxu0 %v37933_v36  ;;  %v19956_v55 = vand.u32 4294901760, %v19955_v56 }
0x16c6   :  { %v19957_v59 = vsub.f32 %v19955_v56, %v19956_v55 }
0x1789   :  { %v35978_v42 = vpop.f32.mrb[36].mxu0 }
0x178a   :  { %v38829_v50 = vadd.f32 %v35978_v42, %v17939_v12  ;;  %v18468_v11 = vpop.f32.mrb[37].mxu0 }
0x178b   :  { %v38830_v21 = vadd.f32 %v18468_v11, %v17939_v12 }
0x178c   :  { %v18479_v28 = vmax.f32 %v38829_v50, 0.0 }
0x178d   :  { %v18478_v62 = vmax.f32 %v38830_v21, 0.0 }
0x178e   :  { %v18488_v4 = vsel %vm98_vm0, %v18479_v28, 0 }
0x178f   :  { %v42016_v5 = vand.u32 4294901760, %v18488_v4  ;;  %v18485_v44 = vsel %vm98_vm0, %v18478_v62, 0 }
0x1790   :  { %v18563_v23 = vand.u32 4294901760, %v18485_v44 }
0x1791   :  { %v18574_v58 = vsub.f32 %v18488_v4, %v42016_v5 }
0x1792   :  { %v18564_v15 = vsub.f32 %v18485_v44, %v18563_v23 }
0x1793   :  { %v18575_v34 = vand.u32 4294901760, %v18574_v58 }
0x1794   :  { %v18565_v30 = vand.u32 4294901760, %v18564_v15 }
0x1795   :  { %v18576_v35 = vsub.f32 %v18574_v58, %v18575_v34 }
0x1796   :  { %v18566_v6 = vsub.f32 %v18564_v15, %v18565_v30 }
0x1797   :  { %v18577_v31 = vand.u32 4294901760, %v18576_v35 }
0x1798   :  { %v18567_v41 = vand.u32 4294901760, %v18566_v6 }
0x179a   :  { %35995 = vmatprep.mubr.f32.mxu0 %v18567_v41 }
0x179b   :  { %35996 = vmatmul.mubr.f32.vlgmr.msra.gmra.mrb[38].mxu0 %v18577_v31 }
0x179c   :  { %37936 = vmatpush3.bf16.msra.mxu0 %v37933_v36  ;;  %36014 = vmatprep.mubr.f32.mxu0 %v18563_v23  ;;  %v19873_v36 = vsel %vm816_vm3, %v41939_v25, 0 }
0x179d   :  { %37938 = vmatprep.subr.bf16.mxu0 %v37937_v37  ;;  %v19943_v16 = vand.u32 4294901760, %v19873_v36 }
0x17a0   :  { %37940 = vmatpush3.bf16.msra.mxu0 %v37937_v37 }
0x17a1   :  { %37942 = vmatprep.subr.bf16.mxu0 %v37941_v18 }
0x17a4   :  { %37944 = vmatpush3.bf16.msra.mxu0 %v37941_v18  ;;  %v42076_v18 = vsel %vm19861_vm8, 1, %v43840_v22 }
0x17a5   :  { %37946 = vmatprep.subr.bf16.mxu0 %v37945_v61  ;;  %v19866_v39 = vrot.slane %v42076_v18, %v40165_v3 }
0x17a7   :  { %vm19867_vm10 = vcmp.eq.s32.totalorder %v19866_v39, 1 }
0x17a8   :  { %37948 = vmatpush3.bf16.msra.mxu0 %v37945_v61  ;;  %vm19868_vm11 = vmand %vm40173_vm5, %vm19867_vm10 }
0x17a9   :  { %37950 = vmatprep.subr.bf16.mxu0 %v37949_v52  ;;  %v42083_v60 = vsel %vm19868_vm11, 0.0, %v43841_v53 }
0x17ab   :  { %36015 = vmatmul.mubr.f32.vlgmr.msra.gmra.mrb[38].mxu0 %v42016_v5 }
0x17ac   :  { %37952 = vmatpush3.bf16.msra.mxu0 %v37949_v52  ;;  %36033 = vmatprep.mubr.f32.mxu0 %v18564_v15 }
0x17ad   :  { %37954 = vmatprep.subr.bf16.mxu0 %v37953_v48 }
0x17b0   :  { %37956 = vmatpush3.bf16.msra.mxu0 %v37953_v48 }
0x17b1   :  { %37958 = vmatprep.subr.bf16.mxu0 %v37957_v26 }
0x17b4   :  { %37960 = vmatpush3.bf16.msra.mxu0 %v37957_v26 }
0x17b5   :  { %37962 = vmatprep.subr.bf16.mxu0 %v37961_v8 }
0x17b8   :  { %37964 = vmatpush3.bf16.msra.mxu0 %v37961_v8 }
0x17b9   :  { %37966 = vmatprep.subr.bf16.mxu0 %v41977_v54 }
0x17bb   :  { %36034 = vmatmul.mubr.f32.vlgmr.msra.gmra.mrb[38].mxu0 %v18574_v58 }
0x17bc   :  { %37968 = vmatpush3.bf16.msra.mxu0 %v41977_v54  ;;  %36052 = vmatprep.mubr.f32.mxu0 %v18565_v30 }
0x17bd   :  { %37970 = vmatprep.subr.bf16.mxu0 %v41987_v17 }
0x17c0   :  { %37972 = vmatpush3.bf16.msra.mxu0 %v41987_v17 }
0x17c1   :  { %37974 = vmatprep.subr.bf16.mxu0 %v41997_v51 }
0x17c4   :  { %37976 = vmatpush3.bf16.msra.mxu0 %v41997_v51 }
0x17c5   :  { %37978 = vmatprep.subr.bf16.mxu0 %v42007_v47 }
0x17c8   :  { %37980 = vmatpush3.bf16.msra.mxu0 %v42007_v47 }
0x17c9   :  { %37982 = vmatprep.subr.bf16.mxu0 %v37981_v1 }
0x17cb   :  { %36053 = vmatmul.mubr.f32.vlgmr.msra.gmra.mrb[38].mxu0 %v18575_v34  ;;  %v20787_v34 = vpop.permute.xlu1 %20786 }
0x17cc   :  { %37984 = vmatpush3.bf16.msra.mxu0 %v37981_v1  ;;  %36071 = vmatprep.mubr.f32.mxu0 %v18563_v23  ;;  %v20790_v35 = vsel %vm816_vm3, %v20787_v34, 0  ;;  %v39697_v34 = vld [vmem:[%s43779_s11 + $0x20] sm:$0xff] }
0x17cd   :  { %37986 = vmatprep.subr.bf16.mxu0 %v37985_v43  ;;  %v20793_v41 = vand.u32 4294901760, %v20790_v35 }
0x17d0   :  { %37988 = vmatpush3.bf16.msra.mxu0 %v37985_v43 }
0x17d1   :  { %37990 = vmatprep.subr.bf16.mxu0 %v37989_v46 }
0x17d4   :  { %37992 = vmatpush3.bf16.msra.mxu0 %v37989_v46 }
0x17d5   :  { %37994 = vmatprep.subr.bf16.mxu0 %v37993_v27 }
0x17d8   :  { %37996 = vmatpush3.bf16.msra.mxu0 %v37993_v27 }
0x17d9   :  { %37998 = vmatprep.subr.bf16.mxu0 %v41977_v54 }
0x17db   :  { %36072 = vmatmul.mubr.f32.vlgmr.msra.gmra.mrb[38].mxu0 %v42016_v5 }
0x17dc   :  { %38000 = vmatpush3.bf16.msra.mxu0 %v41977_v54  ;;  %36090 = vmatprep.mubr.f32.mxu0 %v18563_v23  ;;  %v19944_v54 = vsub.f32 %v19873_v36, %v19943_v16  ;;  %v20870_v36 = vsub.f32 %v20790_v35, %v20793_v41 }
0x17dd   :  { %38002 = vmatprep.subr.bf16.mxu0 %v41987_v17 }
0x17de   :  { %v19945_v37 = vand.u32 4294901760, %v19944_v54  ;;  %v20871_v40 = vand.u32 4294901760, %v20870_v36 }
0x17e0   :  { %38004 = vmatpush3.bf16.msra.mxu0 %v41987_v17  ;;  %v19946_v17 = vsub.f32 %v19944_v54, %v19945_v37 }
0x17e1   :  { %38006 = vmatprep.subr.bf16.mxu0 %v41997_v51 }
0x17e2   :  { %v19947_v7 = vand.u32 4294901760, %v19946_v17 }
0x17e4   :  { %38008 = vmatpush3.bf16.msra.mxu0 %v41997_v51  ;;  %v19958_v51 = vand.u32 4294901760, %v19957_v59 }
0x17e5   :  { %38010 = vmatprep.subr.bf16.mxu0 %v42007_v47 }
0x17e8   :  { %38012 = vmatpush3.bf16.msra.mxu0 %v42007_v47  ;;  %v42062_v47 = vand.u32 4294901760, %v41944_v38 }
0x17e9   :  { %36093 = vmatprep.subr.mxu0 %v43824_v13 }
0x17ea   :  { %v20416_v50 = vsub.f32 %v41944_v38, %v42062_v47 }
0x17eb   :  { %36091 = vmatmul.mubr.f32.vlgmr.msra.gmra.mrb[38].mxu0 %v42016_v5 }
0x17ec   :  { %36095 = vmatprep.mubr.msk.f32.mxu0 %vm39741_vm1, %v43824_v13  ;;  %v20417_v62 = vand.u32 4294901760, %v20416_v50 }
0x17ee   :  { %v20418_v44 = vsub.f32 %v20416_v50, %v20417_v62 }
0x17f0   :  { %v20419_v15 = vand.u32 4294901760, %v20418_v44 }
0x17f1   :  { %36094 = vmatpush3.xpose.msra.mxu0 %v19878_v29 }
0x17f2   :  { %36098 = vmatprep.subr.mxu0 %v43824_v13 }
0x17f4   :  { %36096 = vmatmul.mubr.f32.vlgmr.msra.gmra.mrb[40].mxu0 %v19947_v7 }
0x17f5   :  { %36099 = vmatpush3.xpose.msra.mxu0 %v19958_v51  ;;  %36100 = vmatprep.mubr.msk.f32.mxu0 %vm39741_vm1, %v43824_v13 }
0x17f6   :  { %36103 = vmatprep.subr.mxu0 %v43824_v13 }
0x17fc   :  { %36101 = vmatmul.mubr.f32.vlgmr.msra.gmra.mrb[40].mxu0 %v19943_v16 }
0x17fd   :  { %36104 = vmatpush3.xpose.msra.mxu0 %v19955_v56  ;;  %36105 = vmatprep.mubr.msk.f32.mxu0 %vm39741_vm1, %v43824_v13 }
0x17fe   :  { %36108 = vmatprep.subr.mxu0 %v43824_v13 }
0x1804   :  { %36106 = vmatmul.mubr.f32.vlgmr.msra.gmra.mrb[40].mxu0 %v19944_v54 }
0x1805   :  { %36109 = vmatpush3.xpose.msra.mxu0 %v19878_v29  ;;  %36110 = vmatprep.mubr.msk.f32.mxu0 %vm39741_vm1, %v43824_v13 }
0x1806   :  { %36113 = vmatprep.subr.mxu0 %v43824_v13 }
0x180c   :  { %36111 = vmatmul.mubr.f32.vlgmr.msra.gmra.mrb[40].mxu0 %v19945_v37  ;;  %v21717_v37 = vsel %vm816_vm3, %v41947_v19, 0 }
0x180d   :  { %36114 = vmatpush3.xpose.msra.mxu0 %v19956_v55  ;;  %36115 = vmatprep.mubr.msk.f32.mxu0 %vm39741_vm1, %v43824_v13  ;;  %v21716_v55 = vpop.permute.xlu1 %21715  ;;  %v21787_v59 = vand.u32 4294901760, %v21717_v37 }
0x180e   :  { %36118 = vmatprep.subr.mxu0 %v43824_v13  ;;  %v21719_v17 = vsel %vm816_vm3, %v21716_v55, 0 }
0x180f   :  { %v21722_v7 = vand.u32 4294901760, %v21719_v17  ;;  %v21788_v51 = vsub.f32 %v21717_v37, %v21787_v59 }
0x1811   :  { %v21789_v19 = vand.u32 4294901760, %v21788_v51 }
0x1813   :  { %v21790_v22 = vsub.f32 %v21788_v51, %v21789_v19 }
0x1814   :  { %36116 = vmatmul.mubr.f32.vlgmr.msra.gmra.mrb[40].mxu0 %v19943_v16 }
0x1815   :  { %36119 = vmatpush3.xpose.msra.mxu0 %v19878_v29  ;;  %36120 = vmatprep.mubr.msk.f32.mxu0 %vm39741_vm1, %v43824_v13  ;;  %v20872_v29 = vsub.f32 %v20870_v36, %v20871_v40 }
0x1816   :  { %36123 = vmatprep.subr.mxu0 %v43824_v13 }
0x1817   :  { %v20873_v56 = vand.u32 4294901760, %v20872_v29 }
0x181c   :  { %36121 = vmatmul.mubr.f32.vlgmr.msra.gmra.mrb[40].mxu0 %v19943_v16 }
0x181d   :  { %36124 = vmatpush3.msra.mxu0 %v42062_v47  ;;  %36125 = vmatprep.mubr.msk.f32.mxu0 %vm39741_vm1, %v43824_v13 }
0x181e   :  { %36128 = vmatprep.subr.mxu0 %v43824_v13 }
0x18be   :  { %v42068_v49 = vpop.f32.mrb[38].mxu0 }
0x18bf   :  { %v42070_v9 = vpop.f32.mrb[39].mxu0 }
0x18ef   :  { %v20319_v61 = vpop.f32.mrb[40].mxu0 }
0x18f0   :  { %v38833_v52 = vadd.f32 %v20319_v61, %v42083_v60  ;;  %v36122_v48 = vpop.f32.mrb[41].mxu0  ;;  %v21791_v61 = vand.u32 4294901760, %v21790_v22 }
0x18f1   :  { %v22628_v48 = vpop.permute.xlu1 %22627 }
0x18f2   :  { %v20324_v26 = vsel %vm20323_vm12, %v38833_v52, -inf }
0x18f3   :  { %20325 = vmax.xlane.f32.xlu0 %v20324_v26 }
0x18f5   :  { %v22630_v26 = vpop.permute.xlu1 %22629 }
0x1980   :  { %v20326_v8 = vpop.xlane.xlu0 %20325 }
0x1981   :  { %v20327_v1 = vsub.f32 %v38833_v52, %v20326_v8  ;;  %v22631_v8 = vsel %vm816_vm3, %v22628_v48, 0 }
0x1983   :  { %v20328_v43 = vmul.f32 1.442695, %v20327_v1  ;;  %v22633_v1 = vsel %vm816_vm3, %v22630_v26, 0 }
0x1985   :  { %39609 = vpow2.f32 %v20328_v43  ;;  %v22701_v43 = vand.u32 4294901760, %v22631_v8 }
0x198f   :  { %v39610_v46 = vpop.eup %39609 }
0x1990   :  { %v20330_v27 = vsel %vm20323_vm12, %v39610_v46, 0.0 }
0x1991   :  { %20331 = vadd.xlane.f32.xlu0 %v20330_v27  ;;  %v22702_v27 = vsub.f32 %v22631_v8, %v22701_v43 }
0x19a7   :  { %20784 = vrot.lane.b32.xlu0 %v41939_v25, %s39745_s4 }
0x1a1e   :  { %v20332_v12 = vpop.xlane.xlu0 %20331 }
0x1a1f   :  { %39611 = vrcp.f32 %v20332_v12 }
0x1a22   :  { %v20785_v25 = vpop.permute.xlu0 %20784 }
0x1a23   :  { %v20788_v30 = vsel %vm816_vm3, %v20785_v25, 0  ;;  %v39696_v25 = vld [vmem:[%s43779_s11 + $0x8] sm:$0xff] }
0x1a24   :  { %v20858_v6 = vand.u32 4294901760, %v20788_v30 }
0x1a26   :  { %v20859_v31 = vsub.f32 %v20788_v30, %v20858_v6  ;;  %v39698_v30 = vld [vmem:[%s43779_s11 + $0x38] sm:$0xff] }
0x1a28   :  { %v20860_v63 = vand.u32 4294901760, %v20859_v31 }
0x1a29   :  { %v39612_v42 = vpop.eup %39611 }
0x1a2a   :  { %v20334_v11 = vmul.f32 %v39612_v42, %v39610_v46  ;;  %v20861_v16 = vsub.f32 %v20859_v31, %v20860_v63  ;;  %v22636_v46 = vand.u32 4294901760, %v22633_v1  ;;  %v22703_v42 = vand.u32 4294901760, %v22702_v27 }
0x1a2c   :  { %v20336_v21 = vsel %vm20323_vm12, %v20334_v11, 0  ;;  %v20862_v54 = vand.u32 4294901760, %v20861_v16  ;;  %v22713_v12 = vsub.f32 %v22633_v1, %v22636_v46  ;;  %v22704_v11 = vsub.f32 %v22702_v27, %v22703_v42 }
0x1a2d   :  { %v20404_v28 = vand.u32 4294901760, %v20336_v21 }
0x1a2f   :  { %v20405_v4 = vsub.f32 %v20336_v21, %v20404_v28 }
0x1a31   :  { %v20406_v5 = vand.u32 4294901760, %v20405_v4 }
0x1a33   :  { %v20407_v23 = vsub.f32 %v20405_v4, %v20406_v5 }
0x1a35   :  { %v20408_v58 = vand.u32 4294901760, %v20407_v23 }
0x1a37   :  { %36126 = vmatmul.mubr.f32.vlgmr.msra.gmra.mrb[42].mxu0 %v20408_v58 }
0x1a38   :  { %36129 = vmatpush3.msra.mxu0 %v20419_v15  ;;  %36130 = vmatprep.mubr.msk.f32.mxu0 %vm39741_vm1, %v43824_v13 }
0x1a39   :  { %36133 = vmatprep.subr.mxu0 %v43824_v13 }
0x1a3f   :  { %36131 = vmatmul.mubr.f32.vlgmr.msra.gmra.mrb[42].mxu0 %v20404_v28 }
0x1a40   :  { %36134 = vmatpush3.msra.mxu0 %v20416_v50  ;;  %36135 = vmatprep.mubr.msk.f32.mxu0 %vm39741_vm1, %v43824_v13  ;;  %v22714_v50 = vand.u32 4294901760, %v22713_v12 }
0x1a41   :  { %36138 = vmatprep.subr.mxu0 %v43824_v13 }
0x1a42   :  { %v22715_v21 = vsub.f32 %v22713_v12, %v22714_v50 }
0x1a47   :  { %36136 = vmatmul.mubr.f32.vlgmr.msra.gmra.mrb[42].mxu0 %v20405_v4 }
0x1a48   :  { %36139 = vmatpush3.msra.mxu0 %v42062_v47  ;;  %36140 = vmatprep.mubr.msk.f32.mxu0 %vm39741_vm1, %v43824_v13 }
0x1a49   :  { %36143 = vmatprep.subr.mxu0 %v43824_v13 }
0x1a4f   :  { %36141 = vmatmul.mubr.f32.vlgmr.msra.gmra.mrb[42].mxu0 %v20406_v5 }
0x1a50   :  { %36144 = vmatpush3.msra.mxu0 %v20417_v62  ;;  %36145 = vmatprep.mubr.msk.f32.mxu0 %vm39741_vm1, %v43824_v13  ;;  %v22716_v62 = vand.u32 4294901760, %v22715_v21 }
0x1a51   :  { %36148 = vmatprep.subr.mxu0 %v43824_v13 }
0x1a57   :  { %36146 = vmatmul.mubr.f32.vlgmr.msra.gmra.mrb[42].mxu0 %v20404_v28 }
0x1a58   :  { %36149 = vmatpush3.msra.mxu0 %v42062_v47  ;;  %36150 = vmatprep.mubr.msk.f32.mxu0 %vm39741_vm1, %v43824_v13  ;;  %v21799_v47 = vsub.f32 %v21719_v17, %v21722_v7 }
0x1a59   :  { %36153 = vmatprep.subr.mxu0 %v43824_v13 }
0x1a5a   :  { %v21800_v0 = vand.u32 4294901760, %v21799_v47 }
0x1a5c   :  { %v21801_v39 = vsub.f32 %v21799_v47, %v21800_v0 }
0x1a5e   :  { %v21802_v52 = vand.u32 4294901760, %v21801_v39 }
0x1a5f   :  { %36151 = vmatmul.mubr.f32.vlgmr.msra.gmra.mrb[42].mxu0 %v20404_v28  ;;  %v22705_v28 = vand.u32 4294901760, %v22704_v11 }
0x1a60   :  { %36154 = vmatpush3.xpose.msra.mxu0 %v20793_v41  ;;  %36155 = vmatprep.mubr.msk.f32.mxu0 %vm39741_vm1, %v43824_v13 }
0x1a61   :  { %36158 = vmatprep.subr.mxu0 %v43824_v13 }
0x1a63   :  { %36156 = vmatmul.mubr.f32.vlgmr.msra.gmra.mrb[44].mxu0 %v20862_v54 }
0x1a64   :  { %36159 = vmatpush3.xpose.msra.mxu0 %v20873_v56  ;;  %36160 = vmatprep.mubr.msk.f32.mxu0 %vm39741_vm1, %v43824_v13 }
0x1a65   :  { %36163 = vmatprep.subr.mxu0 %v43824_v13 }
0x1a6b   :  { %36161 = vmatmul.mubr.f32.vlgmr.msra.gmra.mrb[44].mxu0 %v20858_v6 }
0x1a6c   :  { %36164 = vmatpush3.xpose.msra.mxu0 %v20870_v36  ;;  %36165 = vmatprep.mubr.msk.f32.mxu0 %vm39741_vm1, %v43824_v13 }
0x1a6d   :  { %36168 = vmatprep.subr.mxu0 %v43824_v13 }
0x1a73   :  { %36166 = vmatmul.mubr.f32.vlgmr.msra.gmra.mrb[44].mxu0 %v20859_v31 }
0x1a74   :  { %36169 = vmatpush3.xpose.msra.mxu0 %v20793_v41  ;;  %36170 = vmatprep.mubr.msk.f32.mxu0 %vm39741_vm1, %v43824_v13 }
0x1a75   :  { %36173 = vmatprep.subr.mxu0 %v43824_v13 }
0x1a7b   :  { %36171 = vmatmul.mubr.f32.vlgmr.msra.gmra.mrb[44].mxu0 %v20860_v63 }
0x1a7c   :  { %36174 = vmatpush3.xpose.msra.mxu0 %v20871_v40  ;;  %36175 = vmatprep.mubr.msk.f32.mxu0 %vm39741_vm1, %v43824_v13 }
0x1a7d   :  { %36178 = vmatprep.subr.mxu0 %v43824_v13 }
0x1a83   :  { %36176 = vmatmul.mubr.f32.vlgmr.msra.gmra.mrb[44].mxu0 %v20858_v6 }
0x1a84   :  { %36179 = vmatpush3.xpose.msra.mxu0 %v20793_v41  ;;  %36180 = vmatprep.mubr.msk.f32.mxu0 %vm39741_vm1, %v43824_v13 }
0x1a85   :  { %36213 = vmatprep.subr.mxu0 %v43824_v13 }
0x1a8b   :  { %36181 = vmatmul.mubr.f32.vlgmr.msra.gmra.mrb[44].mxu0 %v20858_v6 }
0x1a8c   :  { %36214 = vmatpush3.xpose.msra.mxu0 %v21722_v7  ;;  %36215 = vmatprep.mubr.msk.f32.mxu0 %vm39741_vm1, %v43824_v13 }
0x1a8d   :  { %36218 = vmatprep.subr.mxu0 %v43824_v13 }
0x1a8f   :  { %36216 = vmatmul.mubr.f32.vlgmr.msra.gmra.mrb[46].mxu0 %v21791_v61 }
0x1a90   :  { %36219 = vmatpush3.xpose.msra.mxu0 %v21802_v52  ;;  %36220 = vmatprep.mubr.msk.f32.mxu0 %vm39741_vm1, %v43824_v13 }
0x1a91   :  { %36223 = vmatprep.subr.mxu0 %v43824_v13 }
0x1a97   :  { %36221 = vmatmul.mubr.f32.vlgmr.msra.gmra.mrb[46].mxu0 %v21787_v59 }
0x1a98   :  { %36224 = vmatpush3.xpose.msra.mxu0 %v21799_v47  ;;  %36225 = vmatprep.mubr.msk.f32.mxu0 %vm39741_vm1, %v43824_v13 }
0x1a99   :  { %36228 = vmatprep.subr.mxu0 %v43824_v13 }
0x1a9f   :  { %36226 = vmatmul.mubr.f32.vlgmr.msra.gmra.mrb[46].mxu0 %v21788_v51 }
0x1aa0   :  { %36229 = vmatpush3.xpose.msra.mxu0 %v21722_v7  ;;  %36230 = vmatprep.mubr.msk.f32.mxu0 %vm39741_vm1, %v43824_v13 }
0x1aa1   :  { %36233 = vmatprep.subr.mxu0 %v43824_v13 }
0x1aa7   :  { %36231 = vmatmul.mubr.f32.vlgmr.msra.gmra.mrb[46].mxu0 %v21789_v19 }
0x1aa8   :  { %36234 = vmatpush3.xpose.msra.mxu0 %v21800_v0  ;;  %36235 = vmatprep.mubr.msk.f32.mxu0 %vm39741_vm1, %v43824_v13 }
0x1aa9   :  { %36238 = vmatprep.subr.mxu0 %v43824_v13 }
0x1aaf   :  { %36236 = vmatmul.mubr.f32.vlgmr.msra.gmra.mrb[46].mxu0 %v21787_v59 }
0x1ab0   :  { %36239 = vmatpush3.xpose.msra.mxu0 %v21722_v7  ;;  %36240 = vmatprep.mubr.msk.f32.mxu0 %vm39741_vm1, %v43824_v13 }
0x1ab1   :  { %36273 = vmatprep.subr.mxu0 %v43824_v13 }
0x1ab7   :  { %36241 = vmatmul.mubr.f32.vlgmr.msra.gmra.mrb[46].mxu0 %v21787_v59 }
0x1ab8   :  { %36274 = vmatpush3.xpose.msra.mxu0 %v22636_v46  ;;  %36275 = vmatprep.mubr.msk.f32.mxu0 %vm39741_vm1, %v43824_v13 }
0x1ab9   :  { %36278 = vmatprep.subr.mxu0 %v43824_v13 }
0x1abb   :  { %36276 = vmatmul.mubr.f32.vlgmr.msra.gmra.mrb[48].mxu0 %v22705_v28 }
0x1abc   :  { %36279 = vmatpush3.xpose.msra.mxu0 %v22716_v62  ;;  %36280 = vmatprep.mubr.msk.f32.mxu0 %vm39741_vm1, %v43824_v13 }
0x1abd   :  { %36283 = vmatprep.subr.mxu0 %v43824_v13 }
0x1ac3   :  { %36281 = vmatmul.mubr.f32.vlgmr.msra.gmra.mrb[48].mxu0 %v22701_v43 }
0x1ac4   :  { %36284 = vmatpush3.xpose.msra.mxu0 %v22713_v12  ;;  %36285 = vmatprep.mubr.msk.f32.mxu0 %vm39741_vm1, %v43824_v13 }
0x1ac5   :  { %36288 = vmatprep.subr.mxu0 %v43824_v13 }
0x1acb   :  { %36286 = vmatmul.mubr.f32.vlgmr.msra.gmra.mrb[48].mxu0 %v22702_v27 }
0x1acc   :  { %36289 = vmatpush3.xpose.msra.mxu0 %v22636_v46  ;;  %36290 = vmatprep.mubr.msk.f32.mxu0 %vm39741_vm1, %v43824_v13 }
0x1acd   :  { %36293 = vmatprep.subr.mxu0 %v43824_v13 }
0x1ad3   :  { %36291 = vmatmul.mubr.f32.vlgmr.msra.gmra.mrb[48].mxu0 %v22703_v42 }
0x1ad4   :  { %36294 = vmatpush3.xpose.msra.mxu0 %v22714_v50  ;;  %36295 = vmatprep.mubr.msk.f32.mxu0 %vm39741_vm1, %v43824_v13 }
0x1ad5   :  { %36298 = vmatprep.subr.mxu0 %v43824_v13 }
0x1adb   :  { %36296 = vmatmul.mubr.f32.vlgmr.msra.gmra.mrb[48].mxu0 %v22701_v43 }
0x1adc   :  { %36299 = vmatpush3.xpose.msra.mxu0 %v22636_v46  ;;  %36300 = vmatprep.mubr.msk.f32.mxu0 %vm39741_vm1, %v43824_v13 }
0x1ae3   :  { %36301 = vmatmul.mubr.f32.vlgmr.msra.gmra.mrb[48].mxu0 %v22701_v43 }
0x1b32   :  { %v42170_v4 = vpop.f32.mrb[42].mxu0 }
0x1b33   :  { %v36152_v5 = vpop.f32.mrb[43].mxu0 }
0x1b34   :  { %v39701_v5 = vld [vmem:[%s43779_s11 + $0x68] sm:$0xff] }
0x1b5e   :  { %v21234_v44 = vpop.f32.mrb[44].mxu0 }
0x1b5f   :  { %v38834_v23 = vadd.f32 %v21234_v44, %v42083_v60  ;;  %v36182_v58 = vpop.f32.mrb[45].mxu0  ;;  %v21710_v60 = vrot.slane %v42076_v18, %v40390_v20  ;;  %v39700_v18 = vld [vmem:[%s43779_s11 + $0x80] sm:$0xff]  ;;  %v22182_v44 = vand.u32 4294901760, %v41952_v32 }
0x1b61   :  { %v21238_v15 = vsel %vm20323_vm12, %v38834_v23, -inf  ;;  %vm21711_vm13 = vcmp.eq.s32.totalorder %v21710_v60, 1  ;;  %v22259_v58 = vsub.f32 %v41952_v32, %v22182_v44 }
0x1b62   :  { %21239 = vmax.xlane.f32.xlu1 %v21238_v15  ;;  %vm21712_vm14 = vmand %vm40173_vm5, %vm21711_vm13 }
0x1b63   :  { %v21713_v35 = vsel %vm21712_vm14, 0.0, %v43841_v53  ;;  %v22260_v60 = vand.u32 4294901760, %v22259_v58 }
0x1b73   :  { %21250 = vrot.lane.b32.xlu1 %v41944_v38, %s39745_s4  ;;  %v39699_v38 = vld [vmem:[%s43779_s11 + $0x50] sm:$0xff] }
0x1b77   :  { %23558 = vrot.lane.b32.xlu1 %v39696_v25, %s39742_s24 }
0x1b7b   :  { %23560 = vrot.lane.b32.xlu1 %v39697_v34, %s39742_s24 }
0x1b7f   :  { %23562 = vrot.lane.b32.xlu1 %v39698_v30, %s39742_s24 }
0x1b83   :  { %23564 = vrot.lane.b32.xlu1 %v39699_v38, %s39742_s24 }
0x1b87   :  { %23568 = vrot.lane.b32.xlu1 %v39700_v18, %s39742_s24  ;;  %v22261_v18 = vsub.f32 %v22259_v58, %v22260_v60 }
0x1b8a   :  { %v22163_v6 = vpop.f32.mrb[46].mxu0 }
0x1b8b   :  { %v38835_v41 = vadd.f32 %v22163_v6, %v21713_v35  ;;  %v36242_v31 = vpop.f32.mrb[47].mxu0  ;;  %v22262_v6 = vand.u32 4294901760, %v22261_v18 }
0x1b8d   :  { %v22167_v36 = vsel %vm20323_vm12, %v38835_v41, -inf }
0x1b8e   :  { %22168 = vmax.xlane.f32.xlu0 %v22167_v36 }
0x1bb6   :  { %v23077_v63 = vpop.f32.mrb[48].mxu0 }
0x1bb7   :  { %v38836_v40 = vadd.f32 %v23077_v63, %v21713_v35  ;;  %v36302_v16 = vpop.f32.mrb[49].mxu0 }
0x1bb9   :  { %v23081_v17 = vsel %vm20323_vm12, %v38836_v40, -inf }
0x1bef   :  { %v21240_v29 = vpop.xlane.xlu1 %21239 }
0x1bf0   :  { %v21241_v33 = vsub.f32 %v38834_v23, %v21240_v29 }
0x1bf2   :  { %v21242_v54 = vmul.f32 1.442695, %v21241_v33 }
0x1bf3   :  { %v21251_v56 = vpop.permute.xlu1 %21250 }
0x1bf4   :  { %39613 = vpow2.f32 %v21242_v54  ;;  %v21257_v37 = vand.u32 4294901760, %v21251_v56 }
0x1bf6   :  { %36184 = vmatpush3.msra.mxu1 %v21257_v37  ;;  %v21334_v48 = vsub.f32 %v21251_v56, %v21257_v37 }
0x1bf7   :  { %36188 = vmatprep.subr.mxu1 %v43824_v13 }
0x1bf8   :  { %v21335_v43 = vand.u32 4294901760, %v21334_v48 }
0x1bfa   :  { %v21336_v50 = vsub.f32 %v21334_v48, %v21335_v43 }
0x1bfc   :  { %v21337_v28 = vand.u32 4294901760, %v21336_v50 }
0x1bfe   :  { %v39614_v55 = vpop.eup %39613 }
0x1bff   :  { %v21244_v53 = vsel %vm20323_vm12, %v39614_v55, 0.0 }
0x1c00   :  { %21245 = vadd.xlane.f32.xlu0 %v21244_v53 }
0x1c04   :  { %23082 = vmax.xlane.f32.xlu0 %v23081_v17 }
0x1c1b   :  { %v22169_v59 = vpop.xlane.xlu0 %22168 }
0x1c1c   :  { %v22170_v7 = vsub.f32 %v38835_v41, %v22169_v59 }
0x1c1e   :  { %v22171_v51 = vmul.f32 1.442695, %v22170_v7  ;;  %v23559_v7 = vpop.permute.xlu1 %23558 }
0x1c20   :  { %39615 = vpow2.f32 %v22171_v51 }
0x1c22   :  { %v23561_v51 = vpop.permute.xlu1 %23560 }
0x1c2a   :  { %v39616_v47 = vpop.eup %39615 }
0x1c2b   :  { %v22173_v19 = vsel %vm20323_vm12, %v39616_v47, 0.0 }
0x1c2c   :  { %22174 = vadd.xlane.f32.xlu0 %v22173_v19  ;;  %v23592_v19 = vand.u32 4294901760, %v23561_v51 }
0x1c8d   :  { %v21246_v0 = vpop.xlane.xlu0 %21245 }
0x1c8e   :  { %39617 = vrcp.f32 %v21246_v0 }
0x1c91   :  { %v23083_v22 = vpop.xlane.xlu0 %23082 }
0x1c92   :  { %v23084_v39 = vsub.f32 %v38836_v40, %v23083_v22  ;;  %v23690_v22 = vsub.f32 %v23561_v51, %v23592_v19  ;;  %v42322_v51 = vld [vmem:[%s43769_s1 + $0x8] sm:$0xff] }
0x1c94   :  { %v23085_v61 = vmul.f32 1.442695, %v23084_v39  ;;  %v23563_v39 = vpop.permute.xlu1 %23562  ;;  %v23691_v18 = vand.u32 4294901760, %v23690_v22 }
0x1c96   :  { %39619 = vpow2.f32 %v23085_v61  ;;  %v23595_v61 = vand.u32 4294901760, %v23563_v39 }
0x1c98   :  { %v39618_v52 = vpop.eup %39617 }
0x1c99   :  { %v21248_v26 = vmul.f32 %v39618_v52, %v39614_v55  ;;  %v23697_v52 = vsub.f32 %v23563_v39, %v23595_v61 }
0x1c9b   :  { %v21254_v8 = vsel %vm20323_vm12, %v21248_v26, 0 }
0x1c9c   :  { %v21322_v1 = vand.u32 4294901760, %v21254_v8 }
0x1c9e   :  { %v21323_v46 = vsub.f32 %v21254_v8, %v21322_v1 }
0x1ca0   :  { %v42207_v27 = vpop.eup %39619  ;;  %v21324_v12 = vand.u32 4294901760, %v21323_v46 }
0x1ca1   :  { %v23087_v42 = vsel %vm20323_vm12, %v42207_v27, 0.0 }
0x1ca2   :  { %23088 = vadd.xlane.f32.xlu0 %v23087_v42  ;;  %v21325_v11 = vsub.f32 %v21323_v46, %v21324_v12 }
0x1ca4   :  { %v21326_v21 = vand.u32 4294901760, %v21325_v11 }
0x1ca6   :  { %36186 = vmatmul.mubr.f32.vlgmr.msra.gmra.mrb[44].mxu1 %v21326_v21 }
0x1ca7   :  { %36189 = vmatpush3.msra.mxu1 %v21337_v28  ;;  %36190 = vmatprep.mubr.msk.f32.mxu1 %vm39741_vm1, %v43824_v13 }
0x1ca8   :  { %36193 = vmatprep.subr.mxu1 %v43824_v13 }
0x1cae   :  { %36191 = vmatmul.mubr.f32.vlgmr.msra.gmra.mrb[44].mxu1 %v21322_v1 }
0x1caf   :  { %36194 = vmatpush3.msra.mxu1 %v21334_v48  ;;  %36195 = vmatprep.mubr.msk.f32.mxu1 %vm39741_vm1, %v43824_v13  ;;  %v23565_v48 = vpop.permute.xlu1 %23564 }
0x1cb0   :  { %36198 = vmatprep.subr.mxu1 %v43824_v13  ;;  %v23598_v26 = vand.u32 4294901760, %v23565_v48 }
0x1cb2   :  { %v42271_v8 = vpack.c.bf16 %v23598_v26, %v23595_v61 }
0x1cb3   :  { %v23569_v42 = vpop.permute.xlu1 %23568 }
0x1cb4   :  { %v23604_v11 = vand.u32 4294901760, %v23569_v42 }
0x1cb6   :  { %36196 = vmatmul.mubr.f32.vlgmr.msra.gmra.mrb[44].mxu1 %v21323_v46 }
0x1cb7   :  { %36199 = vmatpush3.msra.mxu1 %v21257_v37  ;;  %36200 = vmatprep.mubr.msk.f32.mxu1 %vm39741_vm1, %v43824_v13 }
0x1cb8   :  { %23093 = vrot.lane.b32.xlu0 %v41952_v32, %s39745_s4  ;;  %36203 = vmatprep.subr.mxu1 %v43824_v13 }
0x1cb9   :  { %v22175_v62 = vpop.xlane.xlu0 %22174 }
0x1cba   :  { %39621 = vrcp.f32 %v22175_v62 }
0x1cbc   :  { %23566 = vrot.lane.b32.xlu0 %v39701_v5, %s39742_s24 }
0x1cbe   :  { %36201 = vmatmul.mubr.f32.vlgmr.msra.gmra.mrb[44].mxu1 %v21324_v12  ;;  %v42288_v12 = vld [vmem:[%s43769_s1] sm:$0xff] }
0x1cbf   :  { %36204 = vmatpush3.msra.mxu1 %v21335_v43  ;;  %36205 = vmatprep.mubr.msk.f32.mxu1 %vm39741_vm1, %v43824_v13 }
0x1cc0   :  { %36208 = vmatprep.subr.mxu1 %v43824_v13 }
0x1cc4   :  { %v39622_v23 = vpop.eup %39621 }
0x1cc5   :  { %v22177_v15 = vmul.f32 %v39622_v23, %v39616_v47  ;;  %v23589_v47 = vand.u32 4294901760, %v23559_v7 }
0x1cc6   :  { %36206 = vmatmul.mubr.f32.vlgmr.msra.gmra.mrb[44].mxu1 %v21322_v1 }
0x1cc7   :  { %36209 = vmatpush3.msra.mxu1 %v21257_v37  ;;  %36210 = vmatprep.mubr.msk.f32.mxu1 %vm39741_vm1, %v43824_v13  ;;  %v22179_v25 = vsel %vm20323_vm12, %v22177_v15, 0  ;;  %v42264_v0 = vpack.c.bf16 %v23592_v19, %v23589_v47 }
0x1cc8   :  { %36243 = vmatprep.subr.mxu1 %v43824_v13  ;;  %v22247_v34 = vand.u32 4294901760, %v22179_v25 }
0x1cc9   :  { %38110 = vmatprep.subr.bf16.mxu0 %v42264_v0 }
0x1cca   :  { %v22248_v30 = vsub.f32 %v22179_v25, %v22247_v34  ;;  %38112 = vmatpush3.bf16.msra.mxu0 %v42264_v0 }
0x1ccb   :  { %38114 = vmatprep.subr.bf16.mxu0 %v42271_v8 }
0x1ccc   :  { %v22249_v38 = vand.u32 4294901760, %v22248_v30 }
0x1cce   :  { %36211 = vmatmul.mubr.f32.vlgmr.msra.gmra.mrb[44].mxu1 %v21322_v1  ;;  %v22250_v35 = vsub.f32 %v22248_v30, %v22249_v38  ;;  %v23704_v1 = vsub.f32 %v23565_v48, %v23598_v26  ;;  %38116 = vmatpush3.bf16.msra.mxu0 %v42271_v8 }
0x1ccf   :  { %36244 = vmatpush3.msra.mxu1 %v22182_v44  ;;  %36245 = vmatprep.mubr.msk.f32.mxu1 %vm39741_vm1, %v43824_v13 }
0x1cd0   :  { %36248 = vmatprep.subr.mxu1 %v43824_v13  ;;  %v22251_v32 = vand.u32 4294901760, %v22250_v35 }
0x1cd2   :  { %36246 = vmatmul.mubr.f32.vlgmr.msra.gmra.mrb[46].mxu1 %v22251_v32  ;;  %v23692_v32 = vsub.f32 %v23690_v22, %v23691_v18 }
0x1cd3   :  { %36249 = vmatpush3.msra.mxu1 %v22262_v6  ;;  %36250 = vmatprep.mubr.msk.f32.mxu1 %vm39741_vm1, %v43824_v13 }
0x1cd4   :  { %36253 = vmatprep.subr.mxu1 %v43824_v13 }
0x1cda   :  { %36251 = vmatmul.mubr.f32.vlgmr.msra.gmra.mrb[46].mxu1 %v22247_v34 }
0x1cdb   :  { %36254 = vmatpush3.msra.mxu1 %v22259_v58  ;;  %36255 = vmatprep.mubr.msk.f32.mxu1 %vm39741_vm1, %v43824_v13 }
0x1cdc   :  { %36258 = vmatprep.subr.mxu1 %v43824_v13 }
0x1ce2   :  { %36256 = vmatmul.mubr.f32.vlgmr.msra.gmra.mrb[46].mxu1 %v22248_v30  ;;  %v23683_v30 = vsub.f32 %v23559_v7, %v23589_v47  ;;  %v39704_v7 = vld [vmem:[%s43779_s11 + $0xb0] sm:$0xff] }
0x1ce3   :  { %36259 = vmatpush3.msra.mxu1 %v22182_v44  ;;  %36260 = vmatprep.mubr.msk.f32.mxu1 %vm39741_vm1, %v43824_v13 }
0x1ce4   :  { %36263 = vmatprep.subr.mxu1 %v43824_v13  ;;  %v23684_v35 = vand.u32 4294901760, %v23683_v30  ;;  %v42308_v6 = vpack.c.bf16 %v23690_v22, %v23683_v30  ;;  %v42326_v22 = vsub.f32 %v23569_v42, %v23604_v11 }
0x1cea   :  { %36261 = vmatmul.mubr.f32.vlgmr.msra.gmra.mrb[46].mxu1 %v22249_v38 }
0x1ceb   :  { %36264 = vmatpush3.msra.mxu1 %v22260_v60  ;;  %36265 = vmatprep.mubr.msk.f32.mxu1 %vm39741_vm1, %v43824_v13 }
0x1cec   :  { %36268 = vmatprep.subr.mxu1 %v43824_v13 }
0x1cf2   :  { %36266 = vmatmul.mubr.f32.vlgmr.msra.gmra.mrb[46].mxu1 %v22247_v34 }
0x1cf3   :  { %36269 = vmatpush3.msra.mxu1 %v22182_v44  ;;  %36270 = vmatprep.mubr.msk.f32.mxu1 %vm39741_vm1, %v43824_v13 }
0x1cf4   :  { %36303 = vmatprep.subr.mxu1 %v43824_v13 }
0x1cfa   :  { %36271 = vmatmul.mubr.f32.vlgmr.msra.gmra.mrb[46].mxu1 %v22247_v34 }
0x1cfb   :  { %36305 = vmatprep.mubr.msk.f32.mxu1 %vm39741_vm1, %v43824_v13 }
0x1d2f   :  { %v23089_v41 = vpop.xlane.xlu0 %23088 }
0x1d30   :  { %39623 = vrcp.f32 %v23089_v41  ;;  %v23698_v41 = vand.u32 4294901760, %v23697_v52 }
0x1d33   :  { %v23094_v31 = vpop.permute.xlu0 %23093 }
0x1d34   :  { %v23100_v36 = vand.u32 4294901760, %v23094_v31 }
0x1d36   :  { %36304 = vmatpush3.msra.mxu1 %v23100_v36  ;;  %v23177_v16 = vsub.f32 %v23094_v31, %v23100_v36  ;;  %v23705_v31 = vand.u32 4294901760, %v23704_v1 }
0x1d37   :  { %36308 = vmatprep.subr.mxu1 %v43824_v13  ;;  %v23567_v50 = vpop.permute.xlu0 %23566 }
0x1d38   :  { %v23178_v54 = vand.u32 4294901760, %v23177_v16  ;;  %v23601_v21 = vand.u32 4294901760, %v23567_v50 }
0x1d3a   :  { %v39624_v63 = vpop.eup %39623  ;;  %v23179_v55 = vsub.f32 %v23177_v16, %v23178_v54  ;;  %v42292_v28 = vpack.c.bf16 %v23604_v11, %v23601_v21  ;;  %v42328_v39 = vsub.f32 %v23567_v50, %v23601_v21 }
0x1d3b   :  { %v23091_v40 = vmul.f32 %v39624_v63, %v42207_v27  ;;  %v39702_v27 = vld [vmem:[%s43779_s11 + $0x98] sm:$0xff]  ;;  %v23693_v63 = vand.u32 4294901760, %v23692_v32 }
0x1d3c   :  { %v23180_v59 = vand.u32 4294901760, %v23179_v55  ;;  %38118 = vmatprep.subr.bf16.mxu0 %v42292_v28  ;;  %v42312_v55 = vpack.c.bf16 %v23705_v31, %v23698_v41 }
0x1d3d   :  { %v23097_v29 = vsel %vm20323_vm12, %v23091_v40, 0  ;;  %38120 = vmatpush3.bf16.msra.mxu0 %v42292_v28  ;;  %v42310_v40 = vpack.c.bf16 %v23691_v18, %v23684_v35 }
0x1d3e   :  { %v23165_v33 = vand.u32 4294901760, %v23097_v29 }
0x1d40   :  { %v23166_v56 = vsub.f32 %v23097_v29, %v23165_v33  ;;  %v23699_v29 = vsub.f32 %v23697_v52, %v23698_v41 }
0x1d42   :  { %v23167_v37 = vand.u32 4294901760, %v23166_v56 }
0x1d44   :  { %v23168_v53 = vsub.f32 %v23166_v56, %v23167_v37 }
0x1d46   :  { %v23169_v17 = vand.u32 4294901760, %v23168_v53 }
0x1d48   :  { %36306 = vmatmul.mubr.f32.vlgmr.msra.gmra.mrb[48].mxu1 %v23169_v17 }
0x1d49   :  { %36309 = vmatpush3.msra.mxu1 %v23180_v59  ;;  %36310 = vmatprep.mubr.msk.f32.mxu1 %vm39741_vm1, %v43824_v13 }
0x1d4a   :  { %36313 = vmatprep.subr.mxu1 %v43824_v13 }
0x1d50   :  { %36311 = vmatmul.mubr.f32.vlgmr.msra.gmra.mrb[48].mxu1 %v23165_v33 }
0x1d51   :  { %36314 = vmatpush3.msra.mxu1 %v23177_v16  ;;  %36315 = vmatprep.mubr.msk.f32.mxu1 %vm39741_vm1, %v43824_v13 }
0x1d52   :  { %36318 = vmatprep.subr.mxu1 %v43824_v13 }
0x1d58   :  { %36316 = vmatmul.mubr.f32.vlgmr.msra.gmra.mrb[48].mxu1 %v23166_v56  ;;  %v23700_v56 = vand.u32 4294901760, %v23699_v29 }
0x1d59   :  { %36319 = vmatpush3.msra.mxu1 %v23100_v36  ;;  %36320 = vmatprep.mubr.msk.f32.mxu1 %vm39741_vm1, %v43824_v13 }
0x1d5a   :  { %36323 = vmatprep.subr.mxu1 %v43824_v13 }
0x1d60   :  { %36321 = vmatmul.mubr.f32.vlgmr.msra.gmra.mrb[48].mxu1 %v23167_v37 }
0x1d61   :  { %36324 = vmatpush3.msra.mxu1 %v23178_v54  ;;  %36325 = vmatprep.mubr.msk.f32.mxu1 %vm39741_vm1, %v43824_v13  ;;  %v38145_v54 = vpack.c.bf16 %v23704_v1, %v23697_v52 }
0x1d62   :  { %36328 = vmatprep.subr.mxu1 %v43824_v13 }
0x1d68   :  { %36326 = vmatmul.mubr.f32.vlgmr.msra.gmra.mrb[48].mxu1 %v23165_v33 }
0x1d69   :  { %36329 = vmatpush3.msra.mxu1 %v23100_v36  ;;  %36330 = vmatprep.mubr.msk.f32.mxu1 %vm39741_vm1, %v43824_v13 }
0x1d70   :  { %36331 = vmatmul.mubr.f32.vlgmr.msra.gmra.mrb[48].mxu1 %v23165_v33  ;;  %v23706_v33 = vsub.f32 %v23704_v1, %v23705_v31 }
0x1d72   :  { %v23707_v37 = vand.u32 4294901760, %v23706_v33  ;;  %v19148_v33 = vld [vmem:[%s43780_s12 + $0x30] sm:$0xff] }
0x1d74   :  { %v38129_v53 = vpack.c.bf16 %v23707_v37, %v23700_v56 }
0x1da1   :  { %v21698_v43 = vpop.f32.mrb[44].mxu1 }
0x1da2   :  { %21703 = vrot.lane.b32.xlu1 %v21698_v43, %s39746_s27  ;;  %v36212_v46 = vpop.f32.mrb[45].mxu1  ;;  %v23719_v43 = vand.u32 4294901760, %v42326_v22 }
0x1da3   :  { %v23712_v46 = vand.u32 4294901760, %v42328_v39 }
0x1da4   :  { %v23720_v21 = vsub.f32 %v42326_v22, %v23719_v43 }
0x1da6   :  { %23570 = vrot.lane.b32.xlu1 %v39702_v27, %s39742_s24 }
0x1daa   :  { %19153 = vrot.lane.b32.xlu1 %v42288_v12, %s39745_s4 }
0x1dcd   :  { %v22623_v62 = vpop.f32.mrb[46].mxu1 }
0x1dce   :  { %v36272_v5 = vpop.f32.mrb[47].mxu1 }
0x1e14   :  { %v21704_v44 = vpop.permute.xlu1 %21703 }
0x1e15   :  { %v21706_v23 = vsel %vm816_vm3, %v42170_v4, %v21704_v44  ;;  %v23685_v4 = vsub.f32 %v23683_v30, %v23684_v35  ;;  %v23721_v35 = vand.u32 4294901760, %v23720_v21 }
0x1e16   :  { %v23583_v58 = vsel %vm98_vm0, %v21706_v23, 0 }
0x1e17   :  { %v42299_v15 = vand.u32 4294901760, %v23583_v58  ;;  %v23686_v36 = vand.u32 4294901760, %v23685_v4 }
0x1e18   :  { %v23571_v47 = vpop.permute.xlu1 %23570 }
0x1e19   :  { %v42302_v25 = vsub.f32 %v23583_v58, %v42299_v15  ;;  %v38125_v16 = vpack.c.bf16 %v23693_v63, %v23686_v36  ;;  %v23607_v48 = vand.u32 4294901760, %v23571_v47  ;;  %v38149_v63 = vpack.c.bf16 %v42326_v22, %v42328_v39 }
0x1e1b   :  { %v23663_v34 = vand.u32 4294901760, %v42302_v25  ;;  %v23725_v44 = vsub.f32 %v23571_v47, %v23607_v48 }
0x1e1d   :  { %v23664_v60 = vsub.f32 %v42302_v25, %v23663_v34 }
0x1e1f   :  { %v23665_v38 = vand.u32 4294901760, %v23664_v60  ;;  %v23726_v60 = vand.u32 4294901760, %v23725_v44 }
0x1e21   :  { %36349 = vmatprep.mubr.f32.mxu0 %v23665_v38  ;;  %v23727_v32 = vsub.f32 %v23725_v44, %v23726_v60 }
0x1e23   :  { %v23728_v31 = vand.u32 4294901760, %v23727_v32 }
0x1e43   :  { %v23541_v17 = vpop.f32.mrb[48].mxu1 }
0x1e44   :  { %23546 = vrot.lane.b32.xlu0 %v23541_v17, %s39746_s27  ;;  %v36332_v59 = vpop.f32.mrb[49].mxu1 }
0x1e48   :  { %23572 = vrot.lane.b32.xlu0 %v39704_v7, %s39742_s24 }
0x1e4c   :  { %19155 = vrot.lane.b32.xlu0 %v42322_v51, %s39745_s4 }
0x1eb6   :  { %v23547_v19 = vpop.permute.xlu0 %23546 }
0x1eb7   :  { %v23549_v61 = vsel %vm816_vm3, %v22623_v62, %v23547_v19  ;;  %v23713_v62 = vsub.f32 %v42328_v39, %v23712_v46 }
0x1eb8   :  { %v23586_v52 = vsel %vm98_vm0, %v23549_v61, 0 }
0x1eb9   :  { %v42332_v26 = vand.u32 4294901760, %v23586_v52  ;;  %v23714_v18 = vand.u32 4294901760, %v23713_v62 }
0x1eba   :  { %v23573_v1 = vpop.permute.xlu0 %23572 }
0x1ebb   :  { %v23672_v27 = vsub.f32 %v23586_v52, %v42332_v26  ;;  %v23610_v5 = vand.u32 4294901760, %v23573_v1  ;;  %v38133_v4 = vpack.c.bf16 %v23721_v35, %v23714_v18 }
0x1ebd   :  { %v23673_v42 = vand.u32 4294901760, %v23672_v27  ;;  %v42337_v11 = vpack.c.bf16 %v23610_v5, %v23607_v48  ;;  %v23732_v50 = vsub.f32 %v23573_v1, %v23610_v5  ;;  %v19145_v48 = vld [vmem:[%s43780_s12 + $0x18] sm:$0xff]  ;;  %v19147_v1 = vld [vmem:[%s43780_s12 + $0x28] sm:$0xff] }
0x1ebe   :  { %v19156_v37 = vpop.permute.xlu0 %19155 }
0x1ebf   :  { %v23733_v23 = vand.u32 4294901760, %v23732_v50  ;;  %38122 = vmatprep.subr.bf16.mxu0 %v42337_v11  ;;  %v23674_v58 = vsub.f32 %v23672_v27, %v23673_v42 }
0x1ec0   :  { %38124 = vmatpush3.bf16.msra.mxu0 %v42337_v11 }
0x1ec1   :  { %38126 = vmatprep.subr.bf16.mxu0 %v38125_v16  ;;  %v23675_v30 = vand.u32 4294901760, %v23674_v58  ;;  %v23734_v38 = vsub.f32 %v23732_v50, %v23733_v23 }
0x1ec3   :  { %36350 = vmatmul.mubr.f32.vlgmr.msra.gmra.mrb[50].mxu0 %v23675_v30  ;;  %v23735_v41 = vand.u32 4294901760, %v23734_v38 }
0x1ec4   :  { %38128 = vmatpush3.bf16.msra.mxu0 %v38125_v16  ;;  %36368 = vmatprep.mubr.f32.mxu0 %v42299_v15  ;;  %v38153_v16 = vpack.c.bf16 %v23732_v50, %v23725_v44 }
0x1ec5   :  { %38130 = vmatprep.subr.bf16.mxu0 %v38129_v53  ;;  %v38137_v36 = vpack.c.bf16 %v23735_v41, %v23728_v31 }
0x1ec8   :  { %38132 = vmatpush3.bf16.msra.mxu0 %v38129_v53  ;;  %v19160_v53 = vadd.f32 %v42322_v51, %v19156_v37 }
0x1ec9   :  { %38134 = vmatprep.subr.bf16.mxu0 %v38133_v4 }
0x1ecc   :  { %38136 = vmatpush3.bf16.msra.mxu0 %v38133_v4 }
0x1ecd   :  { %38138 = vmatprep.subr.bf16.mxu0 %v38137_v36 }
0x1ed0   :  { %38140 = vmatpush3.bf16.msra.mxu0 %v38137_v36 }
0x1ed1   :  { %38142 = vmatprep.subr.bf16.mxu0 %v42308_v6 }
0x1ed3   :  { %36369 = vmatmul.mubr.f32.vlgmr.msra.gmra.mrb[50].mxu0 %v42332_v26 }
0x1ed4   :  { %38144 = vmatpush3.bf16.msra.mxu0 %v42308_v6  ;;  %36387 = vmatprep.mubr.f32.mxu0 %v42302_v25  ;;  %v38181_v25 = vpack.c.bf16 %v23719_v43, %v23712_v46  ;;  %v19149_v43 = vld [vmem:[%s43780_s12 + $0x38] sm:$0xff] }
0x1ed5   :  { %38146 = vmatprep.subr.bf16.mxu0 %v38145_v54 }
0x1ed8   :  { %38148 = vmatpush3.bf16.msra.mxu0 %v38145_v54  ;;  %v24226_v54 = vand.u32 4294901760, %v19148_v33 }
0x1ed9   :  { %38150 = vmatprep.subr.bf16.mxu0 %v38149_v63 }
0x1eda   :  { %v24328_v44 = vsub.f32 %v19148_v33, %v24226_v54 }
0x1edc   :  { %38152 = vmatpush3.bf16.msra.mxu0 %v38149_v63 }
0x1edd   :  { %38154 = vmatprep.subr.bf16.mxu0 %v38153_v16 }
0x1ee0   :  { %38156 = vmatpush3.bf16.msra.mxu0 %v38153_v16 }
0x1ee1   :  { %38158 = vmatprep.subr.bf16.mxu0 %v42264_v0 }
0x1ee3   :  { %36388 = vmatmul.mubr.f32.vlgmr.msra.gmra.mrb[50].mxu0 %v23672_v27 }
0x1ee4   :  { %38160 = vmatpush3.bf16.msra.mxu0 %v42264_v0  ;;  %36406 = vmatprep.mubr.f32.mxu0 %v23663_v34  ;;  %v38185_v34 = vpack.c.bf16 %v23733_v23, %v23726_v60  ;;  %v24329_v60 = vand.u32 4294901760, %v24328_v44 }
0x1ee5   :  { %38162 = vmatprep.subr.bf16.mxu0 %v42271_v8 }
0x1ee6   :  { %v24330_v18 = vsub.f32 %v24328_v44, %v24329_v60 }
0x1ee8   :  { %38164 = vmatpush3.bf16.msra.mxu0 %v42271_v8  ;;  %v24331_v32 = vand.u32 4294901760, %v24330_v18 }
0x1ee9   :  { %38166 = vmatprep.subr.bf16.mxu0 %v42292_v28 }
0x1eec   :  { %38168 = vmatpush3.bf16.msra.mxu0 %v42292_v28 }
0x1eed   :  { %38170 = vmatprep.subr.bf16.mxu0 %v42337_v11 }
0x1ef0   :  { %38172 = vmatpush3.bf16.msra.mxu0 %v42337_v11 }
0x1ef1   :  { %38174 = vmatprep.subr.bf16.mxu0 %v42310_v40 }
0x1ef3   :  { %36407 = vmatmul.mubr.f32.vlgmr.msra.gmra.mrb[50].mxu0 %v23673_v42 }
0x1ef4   :  { %38176 = vmatpush3.bf16.msra.mxu0 %v42310_v40  ;;  %36425 = vmatprep.mubr.f32.mxu0 %v42299_v15  ;;  %v19146_v40 = vld [vmem:[%s43780_s12 + $0x20] sm:$0xff] }
0x1ef5   :  { %38178 = vmatprep.subr.bf16.mxu0 %v42312_v55  ;;  %v24223_v29 = vand.u32 4294901760, %v19146_v40 }
0x1ef7   :  { %v42395_v56 = vpack.c.bf16 %v24226_v54, %v24223_v29  ;;  %v24321_v5 = vsub.f32 %v19146_v40, %v24223_v29 }
0x1ef8   :  { %38180 = vmatpush3.bf16.msra.mxu0 %v42312_v55  ;;  %v19154_v55 = vpop.permute.xlu1 %19153 }
0x1ef9   :  { %38182 = vmatprep.subr.bf16.mxu0 %v38181_v25  ;;  %v19159_v17 = vadd.f32 %v42288_v12, %v19154_v55  ;;  %v24322_v58 = vand.u32 4294901760, %v24321_v5  ;;  %v42442_v31 = vpack.c.bf16 %v24328_v44, %v24321_v5 }
0x1efb   :  { %v24323_v38 = vsub.f32 %v24321_v5, %v24322_v58  ;;  %v42446_v63 = vpack.c.bf16 %v24329_v60, %v24322_v58 }
0x1efc   :  { %38184 = vmatpush3.bf16.msra.mxu0 %v38181_v25 }
0x1efd   :  { %38186 = vmatprep.subr.bf16.mxu0 %v38185_v34  ;;  %v24324_v35 = vand.u32 4294901760, %v24323_v38 }
0x1eff   :  { %v42438_v4 = vpack.c.bf16 %v24331_v32, %v24324_v35 }
0x1f00   :  { %38188 = vmatpush3.bf16.msra.mxu0 %v38185_v34 }
0x1f01   :  { %38190 = vmatprep.subr.bf16.mxu0 %v42264_v0 }
0x1f03   :  { %36426 = vmatmul.mubr.f32.vlgmr.msra.gmra.mrb[50].mxu0 %v42332_v26 }
0x1f04   :  { %38192 = vmatpush3.bf16.msra.mxu0 %v42264_v0  ;;  %36444 = vmatprep.mubr.f32.mxu0 %v42299_v15  ;;  %v19142_v0 = vld [vmem:[%s43780_s12] sm:$0xff] }
0x1f05   :  { %38194 = vmatprep.subr.bf16.mxu0 %v42271_v8 }
0x1f08   :  { %38196 = vmatpush3.bf16.msra.mxu0 %v42271_v8  ;;  %v24217_v8 = vand.u32 4294901760, %v19142_v0 }
0x1f09   :  { %38198 = vmatprep.subr.bf16.mxu0 %v42292_v28 }
0x1f0a   :  { %v24307_v46 = vsub.f32 %v19142_v0, %v24217_v8 }
0x1f0c   :  { %38200 = vmatpush3.bf16.msra.mxu0 %v42292_v28  ;;  %v19144_v28 = vld [vmem:[%s43780_s12 + $0x10] sm:$0xff]  ;;  %v24308_v42 = vand.u32 4294901760, %v24307_v46 }
0x1f0d   :  { %38202 = vmatprep.subr.bf16.mxu0 %v42337_v11  ;;  %v24220_v15 = vand.u32 4294901760, %v19144_v28 }
0x1f0e   :  { %v24309_v50 = vsub.f32 %v24307_v46, %v24308_v42 }
0x1f0f   :  { %v42385_v6 = vpack.c.bf16 %v24220_v15, %v24217_v8  ;;  %v24314_v27 = vsub.f32 %v19144_v28, %v24220_v15 }
0x1f10   :  { %38204 = vmatpush3.bf16.msra.mxu0 %v42337_v11  ;;  %v24310_v62 = vand.u32 4294901760, %v24309_v50 }
0x1f11   :  { %36579 = vmatprep.subr.mxu0 %v43824_v13  ;;  %38206 = vmatprep.subr.bf16.mxu1 %v42385_v6  ;;  %v24315_v11 = vand.u32 4294901760, %v24314_v27  ;;  %v42440_v41 = vpack.c.bf16 %v24314_v27, %v24307_v46 }
0x1f12   :  { %38208 = vmatpush3.bf16.msra.mxu1 %v42385_v6 }
0x1f13   :  { %36445 = vmatmul.mubr.f32.vlgmr.msra.gmra.mrb[50].mxu0 %v42332_v26  ;;  %38210 = vmatprep.subr.bf16.mxu1 %v42395_v56  ;;  %v19143_v26 = vld [vmem:[%s43780_s12 + $0x8] sm:$0xff]  ;;  %v24316_v21 = vsub.f32 %v24314_v27, %v24315_v11  ;;  %v42444_v36 = vpack.c.bf16 %v24315_v11, %v24308_v42 }
0x1f14   :  { %36581 = vmatprep.mubr.msk.f32.mxu0 %vm39741_vm1, %v43824_v13 }
0x1f15   :  { %v24317_v23 = vand.u32 4294901760, %v24316_v21 }
0x1f16   :  { %38212 = vmatpush3.bf16.msra.mxu1 %v42395_v56 }
0x1f17   :  { %v42435_v30 = vpack.c.bf16 %v24317_v23, %v24310_v62 }
0x1f19   :  { %38214 = vmatprep.subr.bf16.mxu1 %v42435_v30 }
0x1fe6   :  { %v36446_v59 = vpop.f32.mrb[50].mxu0 }
0x1fe7   :  { %v42401_v7 = vadd.f32 %v36446_v59, %v19160_v53  ;;  %v24158_v47 = vpop.f32.mrb[51].mxu0 }
0x1fe8   :  { %v42403_v19 = vadd.f32 %v24158_v47, %v19159_v17 }
0x1fe9   :  { %v24171_v22 = vsel %vm816_vm3, %v42401_v7, 0.0  ;;  %v24177_v12 = vmul.f32 %v42401_v7, %v42401_v7 }
0x1fea   :  { %24172 = vadd.xlane.f32.xlu0 %v24171_v22  ;;  %v24168_v39 = vsel %vm816_vm3, %v42403_v19, 0.0  ;;  %v24176_v61 = vmul.f32 %v42403_v19, %v42403_v19 }
0x1feb   :  { %24169 = vadd.xlane.f32.xlu1 %v24168_v39  ;;  %v24181_v52 = vsel %vm816_vm3, %v24177_v12, 0.0  ;;  %v19150_v12 = vld [vmem:[%s43781_s13] sm:$0xff] }
0x1fec   :  { %v24178_v51 = vsel %vm816_vm3, %v24176_v61, 0.0  ;;  %v24201_v5 = vrot.slane %v19150_v12, %v40165_v3  ;;  %v24207_v38 = vrot.slane %v19150_v12, %v40390_v20 }
0x1fee   :  { %24179 = vadd.xlane.f32.xlu0 %v24178_v51 }
0x1ff2   :  { %24182 = vadd.xlane.f32.xlu0 %v24181_v52 }
0x1ffc   :  { %24752 = vrot.lane.b32.xlu1 %v19142_v0, %s39742_s24 }
0x2000   :  { %24756 = vrot.lane.b32.xlu1 %v19144_v28, %s39742_s24 }
0x2004   :  { %24758 = vrot.lane.b32.xlu1 %v19145_v48, %s39742_s24 }
0x2008   :  { %24754 = vrot.lane.b32.xlu0 %v19143_v26, %s39742_s24  ;;  %24760 = vrot.lane.b32.xlu1 %v19146_v40, %s39742_s24 }
0x200c   :  { %24762 = vrot.lane.b32.xlu0 %v19147_v1, %s39742_s24  ;;  %24764 = vrot.lane.b32.xlu1 %v19148_v33, %s39742_s24 }
0x2010   :  { %24766 = vrot.lane.b32.xlu0 %v19149_v43, %s39742_s24 }
0x2077   :  { %v24173_v16 = vpop.xlane.xlu0 %24172 }
0x2078   :  { %v24170_v25 = vpop.xlane.xlu1 %24169  ;;  %v24175_v28 = vmul.f32 0.03125, %v24173_v16 }
0x2079   :  { %v24174_v34 = vmul.f32 0.03125, %v24170_v25 }
0x207a   :  { %v24189_v54 = vmul.f32 %v24175_v28, %v24175_v28  ;;  %v24187_v35 = vsub.f32 %v42401_v7, %v24175_v28 }
0x207b   :  { %v24188_v0 = vmul.f32 %v24174_v34, %v24174_v34  ;;  %v24180_v8 = vpop.xlane.xlu0 %24179  ;;  %v24186_v42 = vsub.f32 %v42403_v19, %v24174_v34 }
0x207c   :  { %v24184_v15 = vmul.f32 0.03125, %v24180_v8  ;;  %v42448_v40 = vpop.permute.xlu1 %24752 }
0x207e   :  { %v24190_v29 = vsub.f32 %v24184_v15, %v24188_v0 }
0x207f   :  { %v24183_v33 = vpop.xlane.xlu0 %24182 }
0x2080   :  { %v24192_v37 = vadd.f32 1e-06, %v24190_v29  ;;  %v24185_v55 = vmul.f32 0.03125, %v24183_v33  ;;  %v42450_v53 = vpop.permute.xlu1 %24756 }
0x2082   :  { %39625 = vrsqrt.f32 %v24192_v37  ;;  %v24191_v17 = vsub.f32 %v24185_v55, %v24189_v54 }
0x2083   :  { %v42452_v59 = vpop.permute.xlu0 %24754 }
0x2084   :  { %v24193_v47 = vadd.f32 1e-06, %v24191_v17  ;;  %v29609_v22 = vand.u32 4294901760, %v42452_v59  ;;  %v42455_v39 = vpop.permute.xlu1 %24758 }
0x2085   :  { %v29612_v61 = vand.u32 4294901760, %v42455_v39 }
0x2086   :  { %39627 = vrsqrt.f32 %v24193_v47  ;;  %v29699_v51 = vsub.f32 %v42452_v59, %v29609_v22 }
0x2087   :  { %v42462_v52 = vpack.c.bf16 %v29612_v61, %v29609_v22  ;;  %v29706_v48 = vsub.f32 %v42455_v39, %v29612_v61  ;;  %v42465_v26 = vpop.permute.xlu0 %24762 }
0x2088   :  { %v29700_v1 = vand.u32 4294901760, %v29699_v51  ;;  %v29615_v43 = vand.u32 4294901760, %v42465_v26 }
0x2089   :  { %v29707_v46 = vand.u32 4294901760, %v29706_v48  ;;  %v42468_v27 = vpack.c.bf16 %v29706_v48, %v29699_v51 }
0x208a   :  { %v29713_v44 = vsub.f32 %v42465_v26, %v29615_v43  ;;  %v29701_v50 = vsub.f32 %v29699_v51, %v29700_v1 }
0x208b   :  { %v42475_v11 = vpop.permute.xlu0 %24766  ;;  %v29708_v21 = vsub.f32 %v29706_v48, %v29707_v46  ;;  %v42477_v62 = vpack.c.bf16 %v29707_v46, %v29700_v1 }
0x208c   :  { %v39626_v23 = vpop.eup %39625  ;;  %v29618_v58 = vand.u32 4294901760, %v42475_v11  ;;  %v29714_v18 = vand.u32 4294901760, %v29713_v44  ;;  %v29702_v32 = vand.u32 4294901760, %v29701_v50 }
0x208d   :  { %v24196_v60 = vmul.f32 %v39626_v23, %v24186_v42  ;;  %v29709_v16 = vand.u32 4294901760, %v29708_v21 }
0x208e   :  { %v29720_v3 = vsub.f32 %v42475_v11, %v29618_v58  ;;  %v29715_v29 = vsub.f32 %v29713_v44, %v29714_v18 }
0x208f   :  { %v24202_v19 = vmul.f32 %v24201_v5, %v24196_v60  ;;  %v42487_v15 = vpack.c.bf16 %v29709_v16, %v29702_v32 }
0x2090   :  { %v39628_v25 = vpop.eup %39627  ;;  %v29721_v34 = vand.u32 4294901760, %v29720_v3  ;;  %v42491_v37 = vpack.c.bf16 %v29720_v3, %v29713_v44  ;;  %v29716_v7 = vand.u32 4294901760, %v29715_v29 }
0x2091   :  { %v24197_v0 = vmul.f32 %v39628_v25, %v24187_v35  ;;  %v42485_v8 = vadd.f32 %v24207_v38, %v24202_v19 }
0x2092   :  { %v29722_v54 = vsub.f32 %v29720_v3, %v29721_v34  ;;  %v42495_v47 = vpack.c.bf16 %v29721_v34, %v29714_v18 }
0x2093   :  { %v24211_v20 = vsel %vm816_vm3, %v42485_v8, 0  ;;  %v24203_v33 = vmul.f32 %v24201_v5, %v24197_v0  ;;  %v43842_v0 = vmov 0.0|0.0  }
0x2094   :  { %v24285_v55 = vand.u32 4294901760, %v24211_v20  ;;  %v29723_v17 = vand.u32 4294901760, %v29722_v54 }
0x2095   :  { %v42493_v28 = vadd.f32 %v24207_v38, %v24203_v33 }
0x2096   :  { %v24286_v22 = vsub.f32 %v24211_v20, %v24285_v55  ;;  %v42499_v51 = vpack.c.bf16 %v29723_v17, %v29716_v7 }
0x2097   :  { %v24214_v61 = vsel %vm816_vm3, %v42493_v28, 0 }
0x2098   :  { %v24287_v12 = vand.u32 4294901760, %v24286_v22  ;;  %v42501_v48 = vand.u32 4294901760, %v24214_v61 }
0x209a   :  { %v24288_v1 = vsub.f32 %v24286_v22, %v24287_v12  ;;  %v24296_v46 = vsub.f32 %v24214_v61, %v42501_v48 }
0x209c   :  { %v24289_v5 = vand.u32 4294901760, %v24288_v1  ;;  %v24297_v44 = vand.u32 4294901760, %v24296_v46 }
0x209e   :  { %36455 = vmatprep.mubr.f32.mxu1 %v24289_v5  ;;  %v24298_v42 = vsub.f32 %v24296_v46, %v24297_v44 }
0x20a0   :  { %v24299_v50 = vand.u32 4294901760, %v24298_v42 }
0x20a2   :  { %36456 = vmatmul.mubr.f32.vlgmr.msra.gmra.mrb[50].mxu1 %v24299_v50 }
0x20a3   :  { %38216 = vmatpush3.bf16.msra.mxu1 %v42435_v30  ;;  %36466 = vmatprep.mubr.f32.mxu1 %v24285_v55  ;;  %v24761_v30 = vpop.permute.xlu1 %24760 }
0x20a4   :  { %38218 = vmatprep.subr.bf16.mxu1 %v42438_v4  ;;  %v24770_v18 = vsel %vm98_vm0, %v24761_v30, %v42465_v26  ;;  %v39712_v26 = vld [vmem:[%s43779_s11 + $0x98] sm:$0xff] }
0x20a7   :  { %38220 = vmatpush3.bf16.msra.mxu1 %v42438_v4  ;;  %v19117_v4 = vld [vmem:[%s43771_s3] sm:$0xff]  ;;  %v24765_v21 = vpop.permute.xlu1 %24764 }
0x20a8   :  { %38222 = vmatprep.subr.bf16.mxu1 %v42440_v41  ;;  %v24777_v23 = vsel %vm816_vm3, %v19117_v4, 0 }
0x20aa   :  { %36467 = vmatmul.mubr.f32.vlgmr.msra.gmra.mrb[50].mxu1 %v42501_v48 }
0x20ab   :  { %38224 = vmatpush3.bf16.msra.mxu1 %v42440_v41  ;;  %36477 = vmatprep.mubr.f32.mxu1 %v24286_v22  ;;  %v24768_v41 = vsel %vm98_vm0, %v42448_v40, %v42452_v59  ;;  %v24771_v40 = vsel %vm98_vm0, %v24765_v21, %v42475_v11  ;;  %v42533_v59 = vand.u32 4294901760, %v24777_v23 }
0x20ac   :  { %38226 = vmatprep.subr.bf16.mxu1 %v42442_v31  ;;  %v24780_v60 = vand.u32 4294901760, %v24768_v41  ;;  %v24789_v3 = vand.u32 4294901760, %v24771_v40 }
0x20ad   :  { %v24849_v35 = vsub.f32 %v24777_v23, %v42533_v59 }
0x20ae   :  { %v24881_v25 = vsub.f32 %v24771_v40, %v24789_v3 }
0x20af   :  { %38228 = vmatpush3.bf16.msra.mxu1 %v42442_v31  ;;  %v24769_v31 = vsel %vm98_vm0, %v42450_v53, %v42455_v39  ;;  %v24860_v53 = vsub.f32 %v24768_v41, %v24780_v60  ;;  %v24786_v39 = vand.u32 4294901760, %v24770_v18 }
0x20b0   :  { %38230 = vmatprep.subr.bf16.mxu1 %v42385_v6  ;;  %v24783_v38 = vand.u32 4294901760, %v24769_v31  ;;  %v24882_v54 = vand.u32 4294901760, %v24881_v25 }
0x20b1   :  { %v24861_v19 = vand.u32 4294901760, %v24860_v53  ;;  %v24874_v16 = vsub.f32 %v24770_v18, %v24786_v39  ;;  %v38257_v17 = vpack.c.bf16 %v24789_v3, %v24786_v39 }
0x20b2   :  { %36478 = vmatmul.mubr.f32.vlgmr.msra.gmra.mrb[50].mxu1 %v24296_v46  ;;  %v38254_v29 = vpack.c.bf16 %v24783_v38, %v24780_v60 }
0x20b3   :  { %38232 = vmatpush3.bf16.msra.mxu1 %v42385_v6  ;;  %36488 = vmatprep.mubr.f32.mxu1 %v24287_v12  ;;  %v24862_v34 = vsub.f32 %v24860_v53, %v24861_v19  ;;  %v24875_v33 = vand.u32 4294901760, %v24874_v16 }
0x20b4   :  { %38234 = vmatprep.subr.bf16.mxu1 %v42395_v56 }
0x20b5   :  { %v24876_v7 = vsub.f32 %v24874_v16, %v24875_v33  ;;  %v38281_v50 = vpack.c.bf16 %v24882_v54, %v24875_v33 }
0x20b7   :  { %38236 = vmatpush3.bf16.msra.mxu1 %v42395_v56  ;;  %v24877_v12 = vand.u32 4294901760, %v24876_v7 }
0x20b8   :  { %38238 = vmatprep.subr.bf16.mxu1 %v42444_v36 }
0x20ba   :  { %36489 = vmatmul.mubr.f32.vlgmr.msra.gmra.mrb[50].mxu1 %v24297_v44  ;;  %v38269_v44 = vpack.c.bf16 %v24881_v25, %v24874_v16 }
0x20bb   :  { %38240 = vmatpush3.bf16.msra.mxu1 %v42444_v36  ;;  %36499 = vmatprep.mubr.f32.mxu1 %v24285_v55  ;;  %v24867_v36 = vsub.f32 %v24769_v31, %v24783_v38 }
0x20bc   :  { %38242 = vmatprep.subr.bf16.mxu1 %v42446_v63 }
0x20bd   :  { %v24868_v32 = vand.u32 4294901760, %v24867_v36  ;;  %v38266_v5 = vpack.c.bf16 %v24867_v36, %v24860_v53 }
0x20bf   :  { %38244 = vmatpush3.bf16.msra.mxu1 %v42446_v63  ;;  %v24850_v63 = vand.u32 4294901760, %v24849_v35  ;;  %v24869_v20 = vsub.f32 %v24867_v36, %v24868_v32  ;;  %v38278_v42 = vpack.c.bf16 %v24868_v32, %v24861_v19 }
0x20c0   :  { %38246 = vmatprep.subr.bf16.mxu1 %v42385_v6 }
0x20c1   :  { %v24870_v22 = vand.u32 4294901760, %v24869_v20 }
0x20c2   :  { %36500 = vmatmul.mubr.f32.vlgmr.msra.gmra.mrb[50].mxu1 %v42501_v48 }
0x20c3   :  { %38248 = vmatpush3.bf16.msra.mxu1 %v42385_v6  ;;  %36510 = vmatprep.mubr.f32.mxu1 %v24285_v55  ;;  %v24851_v6 = vsub.f32 %v24849_v35, %v24850_v63  ;;  %v24863_v55 = vand.u32 4294901760, %v24862_v34 }
0x20c4   :  { %38250 = vmatprep.subr.bf16.mxu1 %v42395_v56 }
0x20c5   :  { %v24852_v61 = vand.u32 4294901760, %v24851_v6  ;;  %v38260_v46 = vpack.c.bf16 %v24870_v22, %v24863_v55 }
0x20c7   :  { %38252 = vmatpush3.bf16.msra.mxu1 %v42395_v56  ;;  %v24883_v56 = vsub.f32 %v24881_v25, %v24882_v54 }
0x20c8   :  { %38253 = vmatprep.subr.bf16.mxu1 %v43842_v0 }
0x20c9   :  { %v24884_v1 = vand.u32 4294901760, %v24883_v56 }
0x20ca   :  { %36511 = vmatmul.mubr.f32.vlgmr.msra.gmra.mrb[50].mxu1 %v42501_v48 }
0x20cb   :  { %38255 = vmatpush3.bf16.msra.mxu1 %v38254_v29  ;;  %36521 = vmatprep.mubr.msk.f32.mxu1 %vm39741_vm1, %v43824_v13  ;;  %v38263_v48 = vpack.c.bf16 %v24884_v1, %v24877_v12 }
0x20cc   :  { %38256 = vmatprep.subr.bf16.mxu1 %v43842_v0 }
0x20cf   :  { %38258 = vmatpush3.bf16.msra.mxu1 %v38257_v17 }
0x20d0   :  { %38259 = vmatprep.subr.bf16.mxu1 %v43842_v0 }
0x20d2   :  { %36522 = vmatmul.mubr.f32.vlgmr.msra.gmra.mrb[52].mxu1 %v24852_v61 }
0x20d3   :  { %38261 = vmatpush3.bf16.msra.mxu1 %v38260_v46  ;;  %36532 = vmatprep.mubr.msk.f32.mxu1 %vm39741_vm1, %v43824_v13 }
0x20d4   :  { %38262 = vmatprep.subr.bf16.mxu1 %v43842_v0 }
0x20d7   :  { %38264 = vmatpush3.bf16.msra.mxu1 %v38263_v48 }
0x20d8   :  { %38265 = vmatprep.subr.bf16.mxu1 %v43842_v0 }
0x20da   :  { %36533 = vmatmul.mubr.f32.vlgmr.msra.gmra.mrb[52].mxu1 %v42533_v59 }
0x20db   :  { %38267 = vmatpush3.bf16.msra.mxu1 %v38266_v5  ;;  %36543 = vmatprep.mubr.msk.f32.mxu1 %vm39741_vm1, %v43824_v13 }
0x20dc   :  { %38268 = vmatprep.subr.bf16.mxu1 %v43842_v0 }
0x20df   :  { %38270 = vmatpush3.bf16.msra.mxu1 %v38269_v44 }
0x20e0   :  { %38271 = vmatprep.subr.bf16.mxu1 %v43842_v0 }
0x20e2   :  { %36544 = vmatmul.mubr.f32.vlgmr.msra.gmra.mrb[52].mxu1 %v24849_v35 }
0x20e3   :  { %38273 = vmatpush3.bf16.msra.mxu1 %v38254_v29  ;;  %36554 = vmatprep.mubr.msk.f32.mxu1 %vm39741_vm1, %v43824_v13 }
0x20e4   :  { %38274 = vmatprep.subr.bf16.mxu1 %v43842_v0 }
0x20e7   :  { %38276 = vmatpush3.bf16.msra.mxu1 %v38257_v17 }
0x20e8   :  { %38277 = vmatprep.subr.bf16.mxu1 %v43842_v0 }
0x20ea   :  { %36555 = vmatmul.mubr.f32.vlgmr.msra.gmra.mrb[52].mxu1 %v24850_v63 }
0x20eb   :  { %38279 = vmatpush3.bf16.msra.mxu1 %v38278_v42  ;;  %36565 = vmatprep.mubr.msk.f32.mxu1 %vm39741_vm1, %v43824_v13 }
0x20ec   :  { %38280 = vmatprep.subr.bf16.mxu1 %v43842_v0 }
0x20ef   :  { %38282 = vmatpush3.bf16.msra.mxu1 %v38281_v50 }
0x20f0   :  { %38283 = vmatprep.subr.bf16.mxu1 %v43842_v0 }
0x20f2   :  { %36566 = vmatmul.mubr.f32.vlgmr.msra.gmra.mrb[52].mxu1 %v42533_v59 }
0x20f3   :  { %38285 = vmatpush3.bf16.msra.mxu1 %v38254_v29  ;;  %36576 = vmatprep.mubr.msk.f32.mxu1 %vm39741_vm1, %v43824_v13 }
0x20f4   :  { %38286 = vmatprep.subr.bf16.mxu1 %v43842_v0 }
0x20f7   :  { %38288 = vmatpush3.bf16.msra.mxu1 %v38257_v17 }
0x20f8   :  { %36609 = vmatprep.subr.mxu1 %v43824_v13 }
0x20fa   :  { %36577 = vmatmul.mubr.f32.vlgmr.msra.gmra.mrb[52].mxu1 %v42533_v59 }
0x20fb   :  { %36611 = vmatprep.mubr.msk.f32.mxu1 %vm39741_vm1, %v43824_v13 }
0x219d   :  { %v42573_v30 = vpop.f32.mrb[50].mxu1 }
0x219e   :  { %v24734_v4 = vpop.f32.mrb[51].mxu1  ;;  %v27105_v56 = vsel %vm816_vm3, %v42573_v30, 0 }
0x219f   :  { %26180 = vrot.lane.b32.xlu1 %v24734_v4, %s39745_s4  ;;  %v25265_v41 = vsel %vm816_vm3, %v24734_v4, 0  ;;  %v27175_v61 = vand.u32 4294901760, %v27105_v56 }
0x21a0   :  { %v25336_v31 = vand.u32 4294901760, %v25265_v41 }
0x21a1   :  { %v27176_v1 = vsub.f32 %v27105_v56, %v27175_v61 }
0x21a2   :  { %v25337_v21 = vsub.f32 %v25265_v41, %v25336_v31 }
0x21a3   :  { %28019 = vrot.lane.b32.xlu1 %v42573_v30, %s39745_s4  ;;  %v27177_v48 = vand.u32 4294901760, %v27176_v1 }
0x21a4   :  { %v25338_v23 = vand.u32 4294901760, %v25337_v21 }
0x21a5   :  { %v27178_v44 = vsub.f32 %v27176_v1, %v27177_v48 }
0x21a6   :  { %v25339_v38 = vsub.f32 %v25337_v21, %v25338_v23 }
0x21a7   :  { %v27179_v50 = vand.u32 4294901760, %v27178_v44 }
0x21a8   :  { %v25340_v39 = vand.u32 4294901760, %v25339_v38 }
0x21cd   :  { %v42579_v60 = vpop.f32.mrb[52].mxu1 }
0x21ce   :  { %26182 = vrot.lane.b32.xlu0 %v42579_v60, %s39745_s4  ;;  %v36578_v18 = vpop.f32.mrb[53].mxu1  ;;  %v25268_v40 = vsel %vm816_vm3, %v42579_v60, 0  ;;  %v42586_v53 = vrot.slane %v42579_v60, 4 }
0x21cf   :  { %v25271_v59 = vand.u32 4294901760, %v25268_v40 }
0x21d0   :  { %v27107_v22 = vsel %vm816_vm3, %v42586_v53, 0 }
0x21d1   :  { %36580 = vmatpush3.xpose.msra.mxu0 %v25271_v59  ;;  %v25348_v36 = vsub.f32 %v25268_v40, %v25271_v59  ;;  %v27110_v12 = vand.u32 4294901760, %v27107_v22 }
0x21d2   :  { %28021 = vrot.lane.b32.xlu0 %v42586_v53, %s39745_s4  ;;  %36584 = vmatprep.subr.mxu0 %v43824_v13 }
0x21d3   :  { %v25349_v3 = vand.u32 4294901760, %v25348_v36  ;;  %v27187_v46 = vsub.f32 %v27107_v22, %v27110_v12 }
0x21d4   :  { %36582 = vmatmul.mubr.f32.vlgmr.msra.gmra.mrb[52].mxu0 %v25340_v39 }
0x21d5   :  { %v25350_v35 = vsub.f32 %v25348_v36, %v25349_v3  ;;  %36586 = vmatprep.mubr.msk.f32.mxu0 %vm39741_vm1, %v43824_v13  ;;  %v27188_v5 = vand.u32 4294901760, %v27187_v46 }
0x21d7   :  { %v25351_v19 = vand.u32 4294901760, %v25350_v35  ;;  %v27189_v42 = vsub.f32 %v27187_v46, %v27188_v5 }
0x21d9   :  { %36585 = vmatpush3.xpose.msra.mxu0 %v25351_v19  ;;  %v27190_v30 = vand.u32 4294901760, %v27189_v42 }
0x21da   :  { %36589 = vmatprep.subr.mxu0 %v43824_v13 }
0x21dc   :  { %36587 = vmatmul.mubr.f32.vlgmr.msra.gmra.mrb[52].mxu0 %v25336_v31 }
0x21dd   :  { %36590 = vmatpush3.xpose.msra.mxu0 %v25348_v36  ;;  %36591 = vmatprep.mubr.msk.f32.mxu0 %vm39741_vm1, %v43824_v13 }
0x21de   :  { %36594 = vmatprep.subr.mxu0 %v43824_v13 }
0x21e4   :  { %36592 = vmatmul.mubr.f32.vlgmr.msra.gmra.mrb[52].mxu0 %v25337_v21 }
0x21e5   :  { %36595 = vmatpush3.xpose.msra.mxu0 %v25271_v59  ;;  %36596 = vmatprep.mubr.msk.f32.mxu0 %vm39741_vm1, %v43824_v13 }
0x21e6   :  { %36599 = vmatprep.subr.mxu0 %v43824_v13 }
0x21ec   :  { %36597 = vmatmul.mubr.f32.vlgmr.msra.gmra.mrb[52].mxu0 %v25338_v23 }
0x21ed   :  { %36600 = vmatpush3.xpose.msra.mxu0 %v25349_v3  ;;  %36601 = vmatprep.mubr.msk.f32.mxu0 %vm39741_vm1, %v43824_v13 }
0x21ee   :  { %36604 = vmatprep.subr.mxu0 %v43824_v13 }
0x21f4   :  { %36602 = vmatmul.mubr.f32.vlgmr.msra.gmra.mrb[52].mxu0 %v25336_v31 }
0x21f5   :  { %36605 = vmatpush3.xpose.msra.mxu0 %v25271_v59  ;;  %36606 = vmatprep.mubr.msk.f32.mxu0 %vm39741_vm1, %v43824_v13 }
0x21f6   :  { %36639 = vmatprep.subr.mxu0 %v43824_v13 }
0x21fc   :  { %36607 = vmatmul.mubr.f32.vlgmr.msra.gmra.mrb[52].mxu0 %v25336_v31 }
0x21fd   :  { %36641 = vmatprep.mubr.msk.f32.mxu0 %vm39741_vm1, %v43824_v13 }
0x2211   :  { %v26181_v32 = vpop.permute.xlu1 %26180 }
0x2212   :  { %v26184_v16 = vsel %vm816_vm3, %v26181_v32, 0 }
0x2213   :  { %v26254_v25 = vand.u32 4294901760, %v26184_v16 }
0x2215   :  { %v26255_v63 = vsub.f32 %v26184_v16, %v26254_v25  ;;  %v28020_v4 = vpop.permute.xlu1 %28019 }
0x2216   :  { %v28023_v31 = vsel %vm816_vm3, %v28020_v4, 0 }
0x2217   :  { %v26256_v34 = vand.u32 4294901760, %v26255_v63  ;;  %v28093_v23 = vand.u32 4294901760, %v28023_v31 }
0x2219   :  { %v26257_v29 = vsub.f32 %v26255_v63, %v26256_v34  ;;  %v28094_v18 = vsub.f32 %v28023_v31, %v28093_v23 }
0x221b   :  { %v26258_v6 = vand.u32 4294901760, %v26257_v29  ;;  %v28095_v59 = vand.u32 4294901760, %v28094_v18 }
0x221d   :  { %v28096_v39 = vsub.f32 %v28094_v18, %v28095_v59 }
0x221f   :  { %v28097_v35 = vand.u32 4294901760, %v28096_v39 }
0x2240   :  { %v26183_v0 = vpop.permute.xlu0 %26182 }
0x2241   :  { %v26186_v20 = vsel %vm816_vm3, %v26183_v0, 0 }
0x2242   :  { %v26189_v33 = vand.u32 4294901760, %v26186_v20 }
0x2244   :  { %v26266_v54 = vsub.f32 %v26186_v20, %v26189_v33  ;;  %36640 = vmatpush3.xpose.msra.mxu0 %v26189_v33  ;;  %v28022_v41 = vpop.permute.xlu0 %28021 }
0x2245   :  { %36644 = vmatprep.subr.mxu0 %v43824_v13  ;;  %v28025_v21 = vsel %vm816_vm3, %v28022_v41, 0 }
0x2246   :  { %v26267_v55 = vand.u32 4294901760, %v26266_v54  ;;  %v28028_v38 = vand.u32 4294901760, %v28025_v21 }
0x2247   :  { %36642 = vmatmul.mubr.f32.vlgmr.msra.gmra.mrb[54].mxu0 %v26258_v6 }
0x2248   :  { %v26268_v7 = vsub.f32 %v26266_v54, %v26267_v55  ;;  %36646 = vmatprep.mubr.msk.f32.mxu0 %vm39741_vm1, %v43824_v13  ;;  %v28105_v40 = vsub.f32 %v28025_v21, %v28028_v38 }
0x224a   :  { %v26269_v17 = vand.u32 4294901760, %v26268_v7  ;;  %v28106_v36 = vand.u32 4294901760, %v28105_v40 }
0x224c   :  { %36645 = vmatpush3.xpose.msra.mxu0 %v26269_v17  ;;  %v28107_v3 = vsub.f32 %v28105_v40, %v28106_v36 }
0x224d   :  { %36649 = vmatprep.subr.mxu0 %v43824_v13 }
0x224e   :  { %v28108_v19 = vand.u32 4294901760, %v28107_v3 }
0x224f   :  { %36647 = vmatmul.mubr.f32.vlgmr.msra.gmra.mrb[54].mxu0 %v26254_v25 }
0x2250   :  { %36650 = vmatpush3.xpose.msra.mxu0 %v26266_v54  ;;  %36651 = vmatprep.mubr.msk.f32.mxu0 %vm39741_vm1, %v43824_v13 }
0x2251   :  { %36654 = vmatprep.subr.mxu0 %v43824_v13 }
0x2257   :  { %36652 = vmatmul.mubr.f32.vlgmr.msra.gmra.mrb[54].mxu0 %v26255_v63 }
0x2258   :  { %36655 = vmatpush3.xpose.msra.mxu0 %v26189_v33  ;;  %36656 = vmatprep.mubr.msk.f32.mxu0 %vm39741_vm1, %v43824_v13 }
0x2259   :  { %36659 = vmatprep.subr.mxu0 %v43824_v13 }
0x225f   :  { %36657 = vmatmul.mubr.f32.vlgmr.msra.gmra.mrb[54].mxu0 %v26256_v34 }
0x2260   :  { %36660 = vmatpush3.xpose.msra.mxu0 %v26267_v55  ;;  %36661 = vmatprep.mubr.msk.f32.mxu0 %vm39741_vm1, %v43824_v13 }
0x2261   :  { %36664 = vmatprep.subr.mxu0 %v43824_v13 }
0x2267   :  { %36662 = vmatmul.mubr.f32.vlgmr.msra.gmra.mrb[54].mxu0 %v26254_v25 }
0x2268   :  { %36665 = vmatpush3.xpose.msra.mxu0 %v26189_v33  ;;  %36666 = vmatprep.mubr.msk.f32.mxu0 %vm39741_vm1, %v43824_v13 }
0x2269   :  { %36699 = vmatprep.subr.mxu0 %v43824_v13 }
0x226f   :  { %36667 = vmatmul.mubr.f32.vlgmr.msra.gmra.mrb[54].mxu0 %v26254_v25 }
0x2270   :  { %36700 = vmatpush3.xpose.msra.mxu0 %v27110_v12  ;;  %36701 = vmatprep.mubr.msk.f32.mxu0 %vm39741_vm1, %v43824_v13 }
0x2271   :  { %36704 = vmatprep.subr.mxu0 %v43824_v13 }
0x2273   :  { %36702 = vmatmul.mubr.f32.vlgmr.msra.gmra.mrb[56].mxu0 %v27179_v50 }
0x2274   :  { %36705 = vmatpush3.xpose.msra.mxu0 %v27190_v30  ;;  %36706 = vmatprep.mubr.msk.f32.mxu0 %vm39741_vm1, %v43824_v13 }
0x2275   :  { %36709 = vmatprep.subr.mxu0 %v43824_v13 }
0x227b   :  { %36707 = vmatmul.mubr.f32.vlgmr.msra.gmra.mrb[56].mxu0 %v27175_v61 }
0x227c   :  { %36710 = vmatpush3.xpose.msra.mxu0 %v27187_v46  ;;  %36711 = vmatprep.mubr.msk.f32.mxu0 %vm39741_vm1, %v43824_v13 }
0x227d   :  { %36714 = vmatprep.subr.mxu0 %v43824_v13 }
0x2283   :  { %36712 = vmatmul.mubr.f32.vlgmr.msra.gmra.mrb[56].mxu0 %v27176_v1 }
0x2284   :  { %36715 = vmatpush3.xpose.msra.mxu0 %v27110_v12  ;;  %36716 = vmatprep.mubr.msk.f32.mxu0 %vm39741_vm1, %v43824_v13 }
0x2285   :  { %36719 = vmatprep.subr.mxu0 %v43824_v13 }
0x228b   :  { %36717 = vmatmul.mubr.f32.vlgmr.msra.gmra.mrb[56].mxu0 %v27177_v48 }
0x228c   :  { %36720 = vmatpush3.xpose.msra.mxu0 %v27188_v5  ;;  %36721 = vmatprep.mubr.msk.f32.mxu0 %vm39741_vm1, %v43824_v13 }
0x228d   :  { %36724 = vmatprep.subr.mxu0 %v43824_v13 }
0x2293   :  { %36722 = vmatmul.mubr.f32.vlgmr.msra.gmra.mrb[56].mxu0 %v27175_v61 }
0x2294   :  { %36725 = vmatpush3.xpose.msra.mxu0 %v27110_v12  ;;  %36726 = vmatprep.mubr.msk.f32.mxu0 %vm39741_vm1, %v43824_v13 }
0x2295   :  { %36759 = vmatprep.subr.mxu0 %v43824_v13 }
0x229b   :  { %36727 = vmatmul.mubr.f32.vlgmr.msra.gmra.mrb[56].mxu0 %v27175_v61 }
0x229c   :  { %36760 = vmatpush3.xpose.msra.mxu0 %v28028_v38  ;;  %36761 = vmatprep.mubr.msk.f32.mxu0 %vm39741_vm1, %v43824_v13 }
0x229d   :  { %36764 = vmatprep.subr.mxu0 %v43824_v13 }
0x229f   :  { %36762 = vmatmul.mubr.f32.vlgmr.msra.gmra.mrb[58].mxu0 %v28097_v35 }
0x22a0   :  { %36765 = vmatpush3.xpose.msra.mxu0 %v28108_v19  ;;  %36766 = vmatprep.mubr.msk.f32.mxu0 %vm39741_vm1, %v43824_v13 }
0x22a1   :  { %36769 = vmatprep.subr.mxu0 %v43824_v13 }
0x22a7   :  { %36767 = vmatmul.mubr.f32.vlgmr.msra.gmra.mrb[58].mxu0 %v28093_v23 }
0x22a8   :  { %36770 = vmatpush3.xpose.msra.mxu0 %v28105_v40  ;;  %36771 = vmatprep.mubr.msk.f32.mxu0 %vm39741_vm1, %v43824_v13 }
0x22a9   :  { %36774 = vmatprep.subr.mxu0 %v43824_v13 }
0x22af   :  { %36772 = vmatmul.mubr.f32.vlgmr.msra.gmra.mrb[58].mxu0 %v28094_v18 }
0x22b0   :  { %36775 = vmatpush3.xpose.msra.mxu0 %v28028_v38  ;;  %36776 = vmatprep.mubr.msk.f32.mxu0 %vm39741_vm1, %v43824_v13 }
0x22b1   :  { %36779 = vmatprep.subr.mxu0 %v43824_v13 }
0x22b7   :  { %36777 = vmatmul.mubr.f32.vlgmr.msra.gmra.mrb[58].mxu0 %v28095_v59 }
0x22b8   :  { %36780 = vmatpush3.xpose.msra.mxu0 %v28106_v36  ;;  %36781 = vmatprep.mubr.msk.f32.mxu0 %vm39741_vm1, %v43824_v13 }
0x22b9   :  { %36784 = vmatprep.subr.mxu0 %v43824_v13 }
0x22bf   :  { %36782 = vmatmul.mubr.f32.vlgmr.msra.gmra.mrb[58].mxu0 %v28093_v23 }
0x22c0   :  { %36785 = vmatpush3.xpose.msra.mxu0 %v28028_v38  ;;  %36786 = vmatprep.mubr.msk.f32.mxu0 %vm39741_vm1, %v43824_v13 }
0x22c7   :  { %36787 = vmatmul.mubr.f32.vlgmr.msra.gmra.mrb[58].mxu0 %v28093_v23 }
0x22cf   :  { %v25712_v32 = vpop.f32.mrb[52].mxu0 }
0x22d0   :  { %v36608_v16 = vpop.f32.mrb[53].mxu0  ;;  %v25716_v25 = vsel %vm1279_vm9, %v25712_v32, -inf }
0x22d1   :  { %25717 = vmax.xlane.f32.xlu1 %v25716_v25  ;;  %v39706_v25 = vld [vmem:[%s43779_s11 + $0x20] sm:$0xff] }
0x22e2   :  { %25727 = vrot.lane.b32.xlu1 %v42579_v60, %s39742_s24 }
0x2342   :  { %v26630_v63 = vpop.f32.mrb[54].mxu0 }
0x2343   :  { %v36668_v34 = vpop.f32.mrb[55].mxu0  ;;  %v26634_v0 = vsel %vm1279_vm9, %v26630_v63, -inf }
0x2344   :  { %26635 = vmax.xlane.f32.xlu0 %v26634_v0  ;;  %v39709_v34 = vld [vmem:[%s43779_s11 + $0x68] sm:$0xff]  ;;  %v39710_v0 = vld [vmem:[%s43779_s11 + $0x80] sm:$0xff] }
0x235e   :  { %v25718_v29 = vpop.xlane.xlu1 %25717 }
0x235f   :  { %v25719_v20 = vsub.f32 %v25712_v32, %v25718_v29 }
0x2361   :  { %v25720_v33 = vmul.f32 1.442695, %v25719_v20 }
0x2362   :  { %v25728_v54 = vpop.permute.xlu1 %25727 }
0x2363   :  { %39629 = vpow2.f32 %v25720_v33  ;;  %v25732_v6 = vsel %vm1283_vm2, %v25728_v54, 0 }
0x2364   :  { %v42672_v55 = vand.u32 4294901760, %v25732_v6 }
0x2366   :  { %36610 = vmatpush3.msra.mxu1 %v42672_v55  ;;  %v25812_v23 = vsub.f32 %v25732_v6, %v42672_v55 }
0x2367   :  { %36614 = vmatprep.subr.mxu1 %v43824_v13 }
0x2368   :  { %v25813_v59 = vand.u32 4294901760, %v25812_v23 }
0x236a   :  { %v25814_v3 = vsub.f32 %v25812_v23, %v25813_v59 }
0x236c   :  { %v25815_v16 = vand.u32 4294901760, %v25814_v3 }
0x236d   :  { %v39630_v7 = vpop.eup %39629 }
0x236e   :  { %v27551_v17 = vpop.f32.mrb[56].mxu0  ;;  %v25722_v56 = vsel %vm1279_vm9, %v39630_v7, 0.0 }
0x236f   :  { %v36728_v22 = vpop.f32.mrb[57].mxu0  ;;  %25723 = vadd.xlane.f32.xlu0 %v25722_v56  ;;  %v27555_v61 = vsel %vm1279_vm9, %v27551_v17, -inf }
0x2373   :  { %27556 = vmax.xlane.f32.xlu0 %v27555_v61 }
0x239a   :  { %v42678_v12 = vpop.f32.mrb[58].mxu0 }
0x239b   :  { %v36788_v1 = vpop.f32.mrb[59].mxu0  ;;  %v28473_v50 = vsel %vm1279_vm9, %v42678_v12, -inf }
0x23d1   :  { %v26636_v46 = vpop.xlane.xlu0 %26635 }
0x23d2   :  { %v26637_v48 = vsub.f32 %v26630_v63, %v26636_v46  ;;  %v39707_v63 = vld [vmem:[%s43779_s11 + $0x38] sm:$0xff] }
0x23d4   :  { %v26638_v5 = vmul.f32 1.442695, %v26637_v48 }
0x23d6   :  { %39631 = vpow2.f32 %v26638_v5 }
0x23e0   :  { %v42680_v44 = vpop.eup %39631 }
0x23e1   :  { %v26640_v42 = vsel %vm1279_vm9, %v42680_v44, 0.0 }
0x23e2   :  { %26641 = vadd.xlane.f32.xlu0 %v26640_v42 }
0x23e6   :  { %28474 = vmax.xlane.f32.xlu0 %v28473_v50 }
0x23fc   :  { %26645 = vrot.lane.b32.xlu0 %v42579_v60, %s39746_s27  ;;  %v25724_v30 = vpop.xlane.xlu0 %25723 }
0x23fd   :  { %39633 = vrcp.f32 %v25724_v30 }
0x2400   :  { %27566 = vrot.lane.b32.xlu0 %v42586_v53, %s39742_s24  ;;  %v27557_v4 = vpop.xlane.xlu0 %27556 }
0x2401   :  { %v27558_v41 = vsub.f32 %v27551_v17, %v27557_v4 }
0x2403   :  { %v27559_v31 = vmul.f32 1.442695, %v27558_v41  ;;  %v39711_v41 = vld [vmem:[%s43779_s11 + $0x8] sm:$0xff] }
0x2405   :  { %39635 = vpow2.f32 %v27559_v31 }
0x2407   :  { %v39634_v21 = vpop.eup %39633 }
0x2408   :  { %v25726_v38 = vmul.f32 %v39634_v21, %v39630_v7 }
0x240a   :  { %v25730_v18 = vsel %vm1279_vm9, %v25726_v38, 0 }
0x240b   :  { %v25800_v40 = vand.u32 4294901760, %v25730_v18 }
0x240d   :  { %v25801_v36 = vsub.f32 %v25730_v18, %v25800_v40 }
0x240f   :  { %v42692_v39 = vpop.eup %39635  ;;  %v25802_v60 = vand.u32 4294901760, %v25801_v36 }
0x2410   :  { %v27561_v35 = vsel %vm1279_vm9, %v42692_v39, 0.0 }
0x2411   :  { %27562 = vadd.xlane.f32.xlu1 %v27561_v35  ;;  %v25803_v19 = vsub.f32 %v25801_v36, %v25802_v60 }
0x2413   :  { %v25804_v32 = vand.u32 4294901760, %v25803_v19 }
0x2415   :  { %36612 = vmatmul.mubr.f32.vlgmr.msra.gmra.mrb[54].mxu1 %v25804_v32 }
0x2416   :  { %36615 = vmatpush3.msra.mxu1 %v25815_v16  ;;  %36616 = vmatprep.mubr.msk.f32.mxu1 %vm39741_vm1, %v43824_v13 }
0x2417   :  { %36619 = vmatprep.subr.mxu1 %v43824_v13 }
0x241d   :  { %36617 = vmatmul.mubr.f32.vlgmr.msra.gmra.mrb[54].mxu1 %v25800_v40 }
0x241e   :  { %36620 = vmatpush3.msra.mxu1 %v25812_v23  ;;  %36621 = vmatprep.mubr.msk.f32.mxu1 %vm39741_vm1, %v43824_v13 }
0x241f   :  { %36624 = vmatprep.subr.mxu1 %v43824_v13 }
0x2422   :  { %28484 = vrot.lane.b32.xlu1 %v42586_v53, %s39746_s27  ;;  %v39708_v53 = vld [vmem:[%s43779_s11 + $0x50] sm:$0xff] }
0x2425   :  { %36622 = vmatmul.mubr.f32.vlgmr.msra.gmra.mrb[54].mxu1 %v25801_v36 }
0x2426   :  { %36625 = vmatpush3.msra.mxu1 %v42672_v55  ;;  %36626 = vmatprep.mubr.msk.f32.mxu1 %vm39741_vm1, %v43824_v13 }
0x2427   :  { %36629 = vmatprep.subr.mxu1 %v43824_v13  ;;  %28944 = vrot.lane.b32.xlu1 %v39706_v25, %s39746_s27 }
0x242b   :  { %28946 = vrot.lane.b32.xlu1 %v39707_v63, %s39746_s27 }
0x242d   :  { %36627 = vmatmul.mubr.f32.vlgmr.msra.gmra.mrb[54].mxu1 %v25802_v60 }
0x242e   :  { %36630 = vmatpush3.msra.mxu1 %v25813_v59  ;;  %36631 = vmatprep.mubr.msk.f32.mxu1 %vm39741_vm1, %v43824_v13 }
0x242f   :  { %36634 = vmatprep.subr.mxu1 %v43824_v13  ;;  %28948 = vrot.lane.b32.xlu1 %v39708_v53, %s39746_s27 }
0x2433   :  { %28950 = vrot.lane.b32.xlu1 %v39709_v34, %s39746_s27 }
0x2435   :  { %36632 = vmatmul.mubr.f32.vlgmr.msra.gmra.mrb[54].mxu1 %v25800_v40 }
0x2436   :  { %36635 = vmatpush3.msra.mxu1 %v42672_v55  ;;  %36636 = vmatprep.mubr.msk.f32.mxu1 %vm39741_vm1, %v43824_v13 }
0x2437   :  { %36669 = vmatprep.subr.mxu1 %v43824_v13  ;;  %28952 = vrot.lane.b32.xlu1 %v39710_v0, %s39746_s27 }
0x243d   :  { %36637 = vmatmul.mubr.f32.vlgmr.msra.gmra.mrb[54].mxu1 %v25800_v40 }
0x243e   :  { %36671 = vmatprep.mubr.msk.f32.mxu1 %vm39741_vm1, %v43824_v13 }
0x246f   :  { %v26642_v29 = vpop.xlane.xlu0 %26641 }
0x2470   :  { %39637 = vrcp.f32 %v26642_v29 }
0x2473   :  { %v28475_v20 = vpop.xlane.xlu0 %28474 }
0x2474   :  { %v28476_v33 = vsub.f32 %v42678_v12, %v28475_v20 }
0x2476   :  { %v28477_v54 = vmul.f32 1.442695, %v28476_v33 }
0x2477   :  { %v26646_v6 = vpop.permute.xlu0 %26645 }
0x2478   :  { %39639 = vpow2.f32 %v28477_v54  ;;  %v26650_v55 = vsel %vm1283_vm2, %v26646_v6, 0 }
0x2479   :  { %v26653_v7 = vand.u32 4294901760, %v26650_v55 }
0x247a   :  { %v39638_v17 = vpop.eup %39637 }
0x247b   :  { %v26644_v56 = vmul.f32 %v39638_v17, %v42680_v44  ;;  %v26730_v22 = vsub.f32 %v26650_v55, %v26653_v7  ;;  %36670 = vmatpush3.msra.mxu1 %v26653_v7  ;;  %v27567_v21 = vpop.permute.xlu0 %27566 }
0x247c   :  { %36674 = vmatprep.subr.mxu1 %v43824_v13  ;;  %v27571_v23 = vsel %vm1283_vm2, %v27567_v21, 0 }
0x247d   :  { %v26648_v61 = vsel %vm1279_vm9, %v26644_v56, 0  ;;  %v26731_v46 = vand.u32 4294901760, %v26730_v22  ;;  %v27574_v38 = vand.u32 4294901760, %v27571_v23 }
0x247e   :  { %v26718_v1 = vand.u32 4294901760, %v26648_v61 }
0x247f   :  { %v26732_v42 = vsub.f32 %v26730_v22, %v26731_v46  ;;  %v27651_v40 = vsub.f32 %v27571_v23, %v27574_v38  ;;  %v42819_v23 = vpack.c.bf16 %v29618_v58, %v29615_v43 }
0x2480   :  { %v26719_v48 = vsub.f32 %v26648_v61, %v26718_v1 }
0x2481   :  { %v26733_v44 = vand.u32 4294901760, %v26732_v42  ;;  %v27652_v3 = vand.u32 4294901760, %v27651_v40 }
0x2482   :  { %v42742_v5 = vpop.eup %39639  ;;  %v26720_v12 = vand.u32 4294901760, %v26719_v48 }
0x2483   :  { %v28479_v50 = vsel %vm1279_vm9, %v42742_v5, 0.0  ;;  %v27653_v32 = vsub.f32 %v27651_v40, %v27652_v3 }
0x2484   :  { %28480 = vadd.xlane.f32.xlu0 %v28479_v50  ;;  %v26721_v30 = vsub.f32 %v26719_v48, %v26720_v12 }
0x2485   :  { %v27654_v63 = vand.u32 4294901760, %v27653_v32 }
0x2486   :  { %v26722_v4 = vand.u32 4294901760, %v26721_v30 }
0x2488   :  { %36672 = vmatmul.mubr.f32.vlgmr.msra.gmra.mrb[56].mxu1 %v26722_v4 }
0x2489   :  { %36675 = vmatpush3.msra.mxu1 %v26733_v44  ;;  %36676 = vmatprep.mubr.msk.f32.mxu1 %vm39741_vm1, %v43824_v13 }
0x248a   :  { %36679 = vmatprep.subr.mxu1 %v43824_v13 }
0x2490   :  { %36677 = vmatmul.mubr.f32.vlgmr.msra.gmra.mrb[56].mxu1 %v26718_v1 }
0x2491   :  { %36680 = vmatpush3.msra.mxu1 %v26730_v22  ;;  %36681 = vmatprep.mubr.msk.f32.mxu1 %vm39741_vm1, %v43824_v13 }
0x2492   :  { %36684 = vmatprep.subr.mxu1 %v43824_v13 }
0x2498   :  { %36682 = vmatmul.mubr.f32.vlgmr.msra.gmra.mrb[56].mxu1 %v26719_v48 }
0x2499   :  { %36685 = vmatpush3.msra.mxu1 %v26653_v7  ;;  %36686 = vmatprep.mubr.msk.f32.mxu1 %vm39741_vm1, %v43824_v13 }
0x249a   :  { %36689 = vmatprep.subr.mxu1 %v43824_v13  ;;  %28942 = vrot.lane.b32.xlu0 %v39711_v41, %s39746_s27 }
0x249e   :  { %v27563_v31 = vpop.xlane.xlu1 %27562 }
0x249f   :  { %39641 = vrcp.f32 %v27563_v31 }
0x24a0   :  { %36687 = vmatmul.mubr.f32.vlgmr.msra.gmra.mrb[56].mxu1 %v26720_v12 }
0x24a1   :  { %36690 = vmatpush3.msra.mxu1 %v26731_v46  ;;  %36691 = vmatprep.mubr.msk.f32.mxu1 %vm39741_vm1, %v43824_v13 }
0x24a2   :  { %36694 = vmatprep.subr.mxu1 %v43824_v13 }
0x24a8   :  { %36692 = vmatmul.mubr.f32.vlgmr.msra.gmra.mrb[56].mxu1 %v26718_v1 }
0x24a9   :  { %v39642_v18 = vpop.eup %39641  ;;  %36695 = vmatpush3.msra.mxu1 %v26653_v7  ;;  %36696 = vmatprep.mubr.msk.f32.mxu1 %vm39741_vm1, %v43824_v13 }
0x24aa   :  { %v27565_v59 = vmul.f32 %v39642_v18, %v42692_v39  ;;  %36729 = vmatprep.subr.mxu1 %v43824_v13  ;;  %v28485_v39 = vpop.permute.xlu1 %28484 }
0x24ab   :  { %v28489_v53 = vsel %vm1283_vm2, %v28485_v39, 0 }
0x24ac   :  { %v27569_v36 = vsel %vm1279_vm9, %v27565_v59, 0  ;;  %v28492_v34 = vand.u32 4294901760, %v28489_v53 }
0x24ad   :  { %v27639_v60 = vand.u32 4294901760, %v27569_v36 }
0x24ae   :  { %v28569_v54 = vsub.f32 %v28489_v53, %v28492_v34 }
0x24af   :  { %v27640_v35 = vsub.f32 %v27569_v36, %v27639_v60 }
0x24b0   :  { %36697 = vmatmul.mubr.f32.vlgmr.msra.gmra.mrb[56].mxu1 %v26718_v1  ;;  %v28570_v17 = vand.u32 4294901760, %v28569_v54 }
0x24b1   :  { %36730 = vmatpush3.msra.mxu1 %v27574_v38  ;;  %36731 = vmatprep.mubr.msk.f32.mxu1 %vm39741_vm1, %v43824_v13  ;;  %v27641_v19 = vand.u32 4294901760, %v27640_v35 }
0x24b2   :  { %36734 = vmatprep.subr.mxu1 %v43824_v13  ;;  %v28571_v61 = vsub.f32 %v28569_v54, %v28570_v17 }
0x24b3   :  { %v27642_v16 = vsub.f32 %v27640_v35, %v27641_v19 }
0x24b4   :  { %v28572_v48 = vand.u32 4294901760, %v28571_v61 }
0x24b5   :  { %v27643_v25 = vand.u32 4294901760, %v27642_v16 }
0x24b7   :  { %36732 = vmatmul.mubr.f32.vlgmr.msra.gmra.mrb[58].mxu1 %v27643_v25 }
0x24b8   :  { %36735 = vmatpush3.msra.mxu1 %v27654_v63  ;;  %36736 = vmatprep.mubr.msk.f32.mxu1 %vm39741_vm1, %v43824_v13 }
0x24b9   :  { %36739 = vmatprep.subr.mxu1 %v43824_v13 }
0x24bf   :  { %36737 = vmatmul.mubr.f32.vlgmr.msra.gmra.mrb[58].mxu1 %v27639_v60 }
0x24c0   :  { %36740 = vmatpush3.msra.mxu1 %v27651_v40  ;;  %36741 = vmatprep.mubr.msk.f32.mxu1 %vm39741_vm1, %v43824_v13 }
0x24c1   :  { %36744 = vmatprep.subr.mxu1 %v43824_v13 }
0x24c7   :  { %36742 = vmatmul.mubr.f32.vlgmr.msra.gmra.mrb[58].mxu1 %v27640_v35 }
0x24c8   :  { %36745 = vmatpush3.msra.mxu1 %v27574_v38  ;;  %36746 = vmatprep.mubr.msk.f32.mxu1 %vm39741_vm1, %v43824_v13 }
0x24c9   :  { %36749 = vmatprep.subr.mxu1 %v43824_v13 }
0x24cf   :  { %36747 = vmatmul.mubr.f32.vlgmr.msra.gmra.mrb[58].mxu1 %v27641_v19 }
0x24d0   :  { %36750 = vmatpush3.msra.mxu1 %v27652_v3  ;;  %36751 = vmatprep.mubr.msk.f32.mxu1 %vm39741_vm1, %v43824_v13 }
0x24d1   :  { %36754 = vmatprep.subr.mxu1 %v43824_v13 }
0x24d7   :  { %36752 = vmatmul.mubr.f32.vlgmr.msra.gmra.mrb[58].mxu1 %v27639_v60 }
0x24d8   :  { %36755 = vmatpush3.msra.mxu1 %v27574_v38  ;;  %36756 = vmatprep.mubr.msk.f32.mxu1 %vm39741_vm1, %v43824_v13 }
0x24d9   :  { %36789 = vmatprep.subr.mxu1 %v43824_v13 }
0x24df   :  { %36757 = vmatmul.mubr.f32.vlgmr.msra.gmra.mrb[58].mxu1 %v27639_v60 }
0x24e0   :  { %36790 = vmatpush3.msra.mxu1 %v28492_v34  ;;  %36791 = vmatprep.mubr.msk.f32.mxu1 %vm39741_vm1, %v43824_v13 }
0x24e1   :  { %36794 = vmatprep.subr.mxu1 %v43824_v13 }
0x2510   :  { %v42790_v0 = vpop.f32.mrb[54].mxu1 }
0x2511   :  { %v28481_v29 = vpop.xlane.xlu0 %28480  ;;  %v36638_v20 = vpop.f32.mrb[55].mxu1 }
0x2512   :  { %39643 = vrcp.f32 %v28481_v29 }
0x2515   :  { %v28943_v43 = vpop.permute.xlu0 %28942 }
0x2516   :  { %v28973_v58 = vand.u32 4294901760, %v28943_v43 }
0x251c   :  { %v39644_v33 = vpop.eup %39643 }
0x251d   :  { %v28483_v6 = vmul.f32 %v39644_v33, %v42742_v5  ;;  %v28945_v5 = vpop.permute.xlu1 %28944 }
0x251e   :  { %v28976_v11 = vand.u32 4294901760, %v28945_v5 }
0x251f   :  { %v28487_v55 = vsel %vm1279_vm9, %v28483_v6, 0 }
0x2520   :  { %v28557_v7 = vand.u32 4294901760, %v28487_v55  ;;  %v42832_v40 = vpack.c.bf16 %v28976_v11, %v28973_v58  ;;  %v29074_v53 = vsub.f32 %v28945_v5, %v28976_v11 }
0x2521   :  { %v28947_v12 = vpop.permute.xlu1 %28946 }
0x2522   :  { %v28558_v56 = vsub.f32 %v28487_v55, %v28557_v7  ;;  %v28979_v42 = vand.u32 4294901760, %v28947_v12  ;;  %38290 = vmatprep.subr.bf16.mxu0 %v42832_v40  ;;  %v29075_v33 = vand.u32 4294901760, %v29074_v53 }
0x2523   :  { %38292 = vmatpush3.bf16.msra.mxu0 %v42832_v40 }
0x2524   :  { %v28559_v22 = vand.u32 4294901760, %v28558_v56  ;;  %v42800_v50 = vsub.f32 %v28947_v12, %v28979_v42  ;;  %v29076_v55 = vsub.f32 %v29074_v53, %v29075_v33 }
0x2525   :  { %v28949_v30 = vpop.permute.xlu1 %28948 }
0x2526   :  { %v28560_v1 = vsub.f32 %v28558_v56, %v28559_v22  ;;  %v28982_v4 = vand.u32 4294901760, %v28949_v30 }
0x2528   :  { %v28561_v46 = vand.u32 4294901760, %v28560_v1  ;;  %v42805_v44 = vsub.f32 %v28949_v30, %v28982_v4  ;;  %v42830_v18 = vpack.c.bf16 %v28982_v4, %v28979_v42 }
0x2529   :  { %v28951_v41 = vpop.permute.xlu1 %28950 }
0x252a   :  { %36792 = vmatmul.mubr.f32.vlgmr.msra.gmra.mrb[60].mxu1 %v28561_v46  ;;  %v28985_v31 = vand.u32 4294901760, %v28951_v41  ;;  %38294 = vmatprep.subr.bf16.mxu0 %v42830_v18  ;;  %v29089_v6 = vand.u32 4294901760, %v42805_v44  ;;  %v29077_v46 = vand.u32 4294901760, %v29076_v55  ;;  %v38325_v12 = vpack.c.bf16 %v42805_v44, %v42800_v50 }
0x252b   :  { %36795 = vmatpush3.msra.mxu1 %v28572_v48  ;;  %36796 = vmatprep.mubr.msk.f32.mxu1 %vm39741_vm1, %v43824_v13 }
0x252c   :  { %36799 = vmatprep.subr.mxu1 %v43824_v13  ;;  %v42807_v21 = vsub.f32 %v28951_v41, %v28985_v31  ;;  %38296 = vmatpush3.bf16.msra.mxu0 %v42830_v18 }
0x252d   :  { %v28953_v59 = vpop.permute.xlu1 %28952 }
0x252e   :  { %v28988_v36 = vand.u32 4294901760, %v28953_v59  ;;  %v29096_v42 = vand.u32 4294901760, %v42807_v21 }
0x2530   :  { %v42836_v60 = vpack.c.bf16 %v28988_v36, %v28985_v31  ;;  %v29102_v61 = vsub.f32 %v28953_v59, %v28988_v36 }
0x2532   :  { %36797 = vmatmul.mubr.f32.vlgmr.msra.gmra.mrb[60].mxu1 %v28557_v7  ;;  %38298 = vmatprep.subr.bf16.mxu0 %v42836_v60  ;;  %v29103_v30 = vand.u32 4294901760, %v29102_v61 }
0x2533   :  { %36800 = vmatpush3.msra.mxu1 %v28569_v54  ;;  %36801 = vmatprep.mubr.msk.f32.mxu1 %vm39741_vm1, %v43824_v13 }
0x2534   :  { %36804 = vmatprep.subr.mxu1 %v43824_v13  ;;  %38300 = vmatpush3.bf16.msra.mxu0 %v42836_v60  ;;  %v42867_v59 = vpack.c.bf16 %v29103_v30, %v29096_v42 }
0x253a   :  { %36802 = vmatmul.mubr.f32.vlgmr.msra.gmra.mrb[60].mxu1 %v28558_v56 }
0x253b   :  { %36805 = vmatpush3.msra.mxu1 %v28492_v34  ;;  %36806 = vmatprep.mubr.msk.f32.mxu1 %vm39741_vm1, %v43824_v13 }
0x253c   :  { %36809 = vmatprep.subr.mxu1 %v43824_v13 }
0x2542   :  { %36807 = vmatmul.mubr.f32.vlgmr.msra.gmra.mrb[60].mxu1 %v28559_v22  ;;  %v29090_v22 = vsub.f32 %v42805_v44, %v29089_v6  ;;  %v39713_v44 = vld [vmem:[%s43779_s11 + $0xb0] sm:$0xff] }
0x2543   :  { %36810 = vmatpush3.msra.mxu1 %v28570_v17  ;;  %36811 = vmatprep.mubr.msk.f32.mxu1 %vm39741_vm1, %v43824_v13 }
0x2544   :  { %36814 = vmatprep.subr.mxu1 %v43824_v13  ;;  %v29091_v41 = vand.u32 4294901760, %v29090_v22 }
0x254a   :  { %36812 = vmatmul.mubr.f32.vlgmr.msra.gmra.mrb[60].mxu1 %v28557_v7 }
0x254b   :  { %36815 = vmatpush3.msra.mxu1 %v28492_v34  ;;  %36816 = vmatprep.mubr.msk.f32.mxu1 %vm39741_vm1, %v43824_v13  ;;  %v29067_v34 = vsub.f32 %v28943_v43, %v28973_v58  ;;  %v38329_v43 = vpack.c.bf16 %v29102_v61, %v42807_v21  ;;  %vm31810_vm1 = vcmask 785408  }
0x254c   :  { %38386 = vmatprep.subr.bf16.mxu1 %v42462_v52 }
0x254d   :  { %v29068_v54 = vand.u32 4294901760, %v29067_v34  ;;  %v38321_v17 = vpack.c.bf16 %v29074_v53, %v29067_v34 }
0x254f   :  { %v42858_v48 = vpack.c.bf16 %v29075_v33, %v29068_v54 }
0x2552   :  { %36817 = vmatmul.mubr.f32.vlgmr.msra.gmra.mrb[60].mxu1 %v28557_v7  ;;  %v29069_v7 = vsub.f32 %v29067_v34, %v29068_v54 }
0x2553   :  { %38388 = vmatpush3.bf16.msra.mxu1 %v42462_v52 }
0x2554   :  { %38390 = vmatprep.subr.bf16.mxu1 %v42819_v23  ;;  %v29070_v1 = vand.u32 4294901760, %v29069_v7 }
0x2556   :  { %v38305_v5 = vpack.c.bf16 %v29077_v46, %v29070_v1 }
0x2557   :  { %38392 = vmatpush3.bf16.msra.mxu1 %v42819_v23 }
0x2558   :  { %38394 = vmatprep.subr.bf16.mxu1 %v42487_v15 }
0x2583   :  { %v27094_v38 = vpop.f32.mrb[56].mxu1 }
0x2584   :  { %27099 = vrot.lane.b32.xlu1 %v27094_v38, %s39746_s27  ;;  %v36698_v13 = vpop.f32.mrb[57].mxu1 }
0x2585   :  { %v29097_v13 = vsub.f32 %v42807_v21, %v29096_v42 }
0x2587   :  { %v29098_v11 = vand.u32 4294901760, %v29097_v13 }
0x2588   :  { %28954 = vrot.lane.b32.xlu1 %v39712_v26, %s39746_s27  ;;  %v29104_v26 = vsub.f32 %v29102_v61, %v29103_v30 }
0x258a   :  { %v29105_v58 = vand.u32 4294901760, %v29104_v26 }
0x258c   :  { %v38313_v36 = vpack.c.bf16 %v29105_v58, %v29098_v11 }
0x25b2   :  { %v28015_v3 = vpop.f32.mrb[58].mxu1 }
0x25b3   :  { %v36758_v35 = vpop.f32.mrb[59].mxu1 }
0x25f6   :  { %v27100_v19 = vpop.permute.xlu1 %27099 }
0x25f7   :  { %v27102_v32 = vsel %vm816_vm3, %v42790_v0, %v27100_v19  ;;  %v29082_v0 = vand.u32 4294901760, %v42800_v50 }
0x25f8   :  { %v28967_v16 = vsel %vm98_vm0, %v27102_v32, 0 }
0x25f9   :  { %v42845_v25 = vand.u32 4294901760, %v28967_v16  ;;  %v29083_v56 = vsub.f32 %v42800_v50, %v29082_v0  ;;  %v42863_v31 = vpack.c.bf16 %v29089_v6, %v29082_v0 }
0x25fa   :  { %v28955_v32 = vpop.permute.xlu1 %28954 }
0x25fb   :  { %v42848_v63 = vsub.f32 %v28967_v16, %v42845_v25  ;;  %v29084_v4 = vand.u32 4294901760, %v29083_v56  ;;  %v28991_v34 = vand.u32 4294901760, %v28955_v32 }
0x25fd   :  { %v29047_v39 = vand.u32 4294901760, %v42848_v63  ;;  %v38309_v38 = vpack.c.bf16 %v29091_v41, %v29084_v4  ;;  %v29109_v55 = vsub.f32 %v28955_v32, %v28991_v34 }
0x25ff   :  { %v29048_v29 = vsub.f32 %v42848_v63, %v29047_v39 }
0x2601   :  { %v29049_v20 = vand.u32 4294901760, %v29048_v29 }
0x2603   :  { %36835 = vmatprep.mubr.f32.mxu0 %v29049_v20 }
0x2625   :  { %v28933_v35 = vpop.f32.mrb[60].mxu1 }
0x2626   :  { %28938 = vrot.lane.b32.xlu0 %v28933_v35, %s39746_s27  ;;  %v36818_v50 = vpop.f32.mrb[61].mxu1 }
0x262a   :  { %28956 = vrot.lane.b32.xlu0 %v39713_v44, %s39746_s27 }
0x2698   :  { %v28939_v19 = vpop.permute.xlu0 %28938 }
0x2699   :  { %v28941_v16 = vsel %vm816_vm3, %v28015_v3, %v28939_v19  ;;  %v29110_v3 = vand.u32 4294901760, %v29109_v55 }
0x269a   :  { %v28970_v21 = vsel %vm98_vm0, %v28941_v16, 0 }
0x269b   :  { %v42876_v53 = vand.u32 4294901760, %v28970_v21  ;;  %v29111_v1 = vsub.f32 %v29109_v55, %v29110_v3 }
0x269c   :  { %v28957_v29 = vpop.permute.xlu0 %28956 }
0x269d   :  { %v29056_v20 = vsub.f32 %v28970_v21, %v42876_v53  ;;  %v28994_v33 = vand.u32 4294901760, %v28957_v29  ;;  %v29112_v42 = vand.u32 4294901760, %v29111_v1 }
0x269f   :  { %v29057_v54 = vand.u32 4294901760, %v29056_v20  ;;  %v29116_v0 = vsub.f32 %v28957_v29, %v28994_v33  ;;  %v42879_v6 = vpack.c.bf16 %v28994_v33, %v28991_v34 }
0x26a1   :  { %v29117_v7 = vand.u32 4294901760, %v29116_v0  ;;  %38302 = vmatprep.subr.bf16.mxu0 %v42879_v6  ;;  %v29058_v56 = vsub.f32 %v29056_v20, %v29057_v54 }
0x26a2   :  { %38304 = vmatpush3.bf16.msra.mxu0 %v42879_v6 }
0x26a3   :  { %38306 = vmatprep.subr.bf16.mxu0 %v38305_v5  ;;  %v29059_v22 = vand.u32 4294901760, %v29058_v56  ;;  %v29118_v61 = vsub.f32 %v29116_v0, %v29117_v7 }
0x26a5   :  { %36836 = vmatmul.mubr.f32.vlgmr.msra.gmra.mrb[60].mxu0 %v29059_v22  ;;  %v29119_v46 = vand.u32 4294901760, %v29118_v61 }
0x26a6   :  { %38308 = vmatpush3.bf16.msra.mxu0 %v38305_v5  ;;  %36854 = vmatprep.mubr.f32.mxu0 %v42845_v25  ;;  %v38333_v5 = vpack.c.bf16 %v29116_v0, %v29109_v55 }
0x26a7   :  { %38310 = vmatprep.subr.bf16.mxu0 %v38309_v38  ;;  %v38317_v30 = vpack.c.bf16 %v29119_v46, %v29112_v42 }
0x26aa   :  { %38312 = vmatpush3.bf16.msra.mxu0 %v38309_v38 }
0x26ab   :  { %38314 = vmatprep.subr.bf16.mxu0 %v38313_v36 }
0x26ae   :  { %38316 = vmatpush3.bf16.msra.mxu0 %v38313_v36  ;;  %v30773_v36 = vld [vmem:[%s43774_s6 + $0x8] sm:$0xff] }
0x26af   :  { %38318 = vmatprep.subr.bf16.mxu0 %v38317_v30 }
0x26b2   :  { %38320 = vmatpush3.bf16.msra.mxu0 %v38317_v30 }
0x26b3   :  { %38322 = vmatprep.subr.bf16.mxu0 %v38321_v17 }
0x26b5   :  { %36855 = vmatmul.mubr.f32.vlgmr.msra.gmra.mrb[60].mxu0 %v42876_v53 }
0x26b6   :  { %38324 = vmatpush3.bf16.msra.mxu0 %v38321_v17  ;;  %36873 = vmatprep.mubr.f32.mxu0 %v42848_v63  ;;  %v38365_v63 = vpack.c.bf16 %v29117_v7, %v29110_v3 }
0x26b7   :  { %38326 = vmatprep.subr.bf16.mxu0 %v38325_v12 }
0x26ba   :  { %38328 = vmatpush3.bf16.msra.mxu0 %v38325_v12 }
0x26bb   :  { %38330 = vmatprep.subr.bf16.mxu0 %v38329_v43 }
0x26be   :  { %38332 = vmatpush3.bf16.msra.mxu0 %v38329_v43 }
0x26bf   :  { %38334 = vmatprep.subr.bf16.mxu0 %v38333_v5 }
0x26c2   :  { %38336 = vmatpush3.bf16.msra.mxu0 %v38333_v5 }
0x26c3   :  { %38338 = vmatprep.subr.bf16.mxu0 %v42832_v40 }
0x26c5   :  { %36874 = vmatmul.mubr.f32.vlgmr.msra.gmra.mrb[60].mxu0 %v29056_v20 }
0x26c6   :  { %38340 = vmatpush3.bf16.msra.mxu0 %v42832_v40  ;;  %36892 = vmatprep.mubr.f32.mxu0 %v29047_v39  ;;  %v18482_v39 = vsub.s32 5, %v40162_v2 }
0x26c7   :  { %38342 = vmatprep.subr.bf16.mxu0 %v42830_v18 }
0x26ca   :  { %38344 = vmatpush3.bf16.msra.mxu0 %v42830_v18 }
0x26cb   :  { %38346 = vmatprep.subr.bf16.mxu0 %v42836_v60 }
0x26ce   :  { %38348 = vmatpush3.bf16.msra.mxu0 %v42836_v60 }
0x26cf   :  { %38350 = vmatprep.subr.bf16.mxu0 %v42879_v6 }
0x26d2   :  { %38352 = vmatpush3.bf16.msra.mxu0 %v42879_v6 }
0x26d3   :  { %38354 = vmatprep.subr.bf16.mxu0 %v42858_v48 }
0x26d5   :  { %36893 = vmatmul.mubr.f32.vlgmr.msra.gmra.mrb[60].mxu0 %v29057_v54 }
0x26d6   :  { %38356 = vmatpush3.bf16.msra.mxu0 %v42858_v48  ;;  %36911 = vmatprep.mubr.f32.mxu0 %v42845_v25 }
0x26d7   :  { %38358 = vmatprep.subr.bf16.mxu0 %v42863_v31 }
0x26da   :  { %38360 = vmatpush3.bf16.msra.mxu0 %v42863_v31 }
0x26db   :  { %38362 = vmatprep.subr.bf16.mxu0 %v42867_v59 }
0x26de   :  { %38364 = vmatpush3.bf16.msra.mxu0 %v42867_v59  ;;  %v30772_v59 = vld [vmem:[%s43774_s6] sm:$0xff] }
0x26df   :  { %38366 = vmatprep.subr.bf16.mxu0 %v38365_v63  ;;  %v30775_v35 = vsel %vm20323_vm12, %v30772_v59, 0 }
0x26e0   :  { %v42964_v50 = vand.u32 4294901760, %v30775_v35 }
0x26e2   :  { %38368 = vmatpush3.bf16.msra.mxu0 %v38365_v63  ;;  %v42967_v44 = vsub.f32 %v30775_v35, %v42964_v50  ;;  %v30778_v63 = vsel %vm20323_vm12, %v30773_v36, 0 }
0x26e3   :  { %38370 = vmatprep.subr.bf16.mxu0 %v42832_v40 }
0x26e4   :  { %v30848_v19 = vand.u32 4294901760, %v42967_v44 }
0x26e5   :  { %36912 = vmatmul.mubr.f32.vlgmr.msra.gmra.mrb[60].mxu0 %v42876_v53 }
0x26e6   :  { %38372 = vmatpush3.bf16.msra.mxu0 %v42832_v40  ;;  %36930 = vmatprep.mubr.f32.mxu0 %v42845_v25  ;;  %v42918_v40 = vld [vmem:[%s43778_s10] sm:$0xff]  ;;  %v30849_v32 = vsub.f32 %v42967_v44, %v30848_v19 }
0x26e7   :  { %38374 = vmatprep.subr.bf16.mxu0 %v42830_v18 }
0x26e8   :  { %v30850_v16 = vand.u32 4294901760, %v30849_v32 }
0x26ea   :  { %38376 = vmatpush3.bf16.msra.mxu0 %v42830_v18  ;;  %v18483_v18 = vrot.slane %v42918_v40, %v18482_v39 }
0x26eb   :  { %38378 = vmatprep.subr.bf16.mxu0 %v42836_v60 }
0x26ec   :  { %v38832_v25 = vadd.f32 %v42070_v9, %v18483_v18  ;;  %v38831_v41 = vadd.f32 %v42068_v49, %v18483_v18 }
0x26ee   :  { %38380 = vmatpush3.bf16.msra.mxu0 %v42836_v60  ;;  %v42934_v31 = vadd.f32 %v38832_v25, %v41926_v14  ;;  %v42944_v13 = vadd.f32 %v38831_v41, %v41930_v24  ;;  %v42977_v25 = vld [vmem:[%s43781_s13] sm:$0xff] }
0x26ef   :  { %38382 = vmatprep.subr.bf16.mxu0 %v42879_v6 }
0x26f0   :  { %v19072_v14 = vsel %vm816_vm3, %v42934_v31, 0.0  ;;  %v19080_v26 = vmul.f32 %v42934_v31, %v42934_v31  ;;  %v19075_v43 = vsel %vm816_vm3, %v42944_v13, 0.0  ;;  %v19081_v24 = vmul.f32 %v42944_v13, %v42944_v13 }
0x26f2   :  { %38384 = vmatpush3.bf16.msra.mxu0 %v42879_v6  ;;  %v19082_v11 = vsel %vm816_vm3, %v19080_v26, 0.0  ;;  %v19085_v58 = vsel %vm816_vm3, %v19081_v24, 0.0 }
0x26f5   :  { %36931 = vmatmul.mubr.f32.vlgmr.msra.gmra.mrb[60].mxu0 %v42876_v53 }
0x26f6   :  { %37115 = vmatprep.mubr.f32.mxu0 %v30850_v16 }
0x27c8   :  { %v36932_v60 = vpop.f32.mrb[60].mxu0 }
0x27c9   :  { %v42925_v17 = vadd.f32 %v36932_v60, %v42493_v28  ;;  %v29542_v48 = vpop.f32.mrb[61].mxu0  ;;  %v29585_v60 = vrot.slane %v42977_v25, %v40408_v10 }
0x27ca   :  { %v42928_v12 = vadd.f32 %v29542_v48, %v42485_v8  ;;  %v42981_v48 = vand.u32 4294901760, %v30778_v63 }
0x27cb   :  { %v29555_v4 = vsel %vm816_vm3, %v42925_v17, 0.0  ;;  %v29561_v8 = vmul.f32 %v42925_v17, %v42925_v17 }
0x27cc   :  { %29556 = vadd.xlane.f32.xlu0 %v29555_v4  ;;  %v29552_v9 = vsel %vm816_vm3, %v42928_v12, 0.0  ;;  %v29560_v28 = vmul.f32 %v42928_v12, %v42928_v12 }
0x27cd   :  { %29553 = vadd.xlane.f32.xlu1 %v29552_v9  ;;  %v29565_v49 = vsel %vm816_vm3, %v29561_v8, 0.0  ;;  %v29591_v9 = vrot.slane %v42977_v25, %v40428_v45  ;;  %v19104_v8 = vsub.s32 6, %v40162_v2 }
0x27ce   :  { %v29562_v38 = vsel %vm816_vm3, %v29560_v28, 0.0 }
0x27cf   :  { %v19105_v45 = vrot.slane %v42918_v40, %v19104_v8 }
0x27d0   :  { %29563 = vadd.xlane.f32.xlu0 %v29562_v38 }
0x27d1   :  { %19073 = vadd.xlane.f32.xlu1 %v19072_v14  ;;  %v42988_v14 = vsub.f32 %v30778_v63, %v42981_v48 }
0x27d3   :  { %v30858_v32 = vand.u32 4294901760, %v42988_v14 }
0x27d4   :  { %29566 = vadd.xlane.f32.xlu0 %v29565_v49 }
0x27d5   :  { %19076 = vadd.xlane.f32.xlu1 %v19075_v43 }
0x27d8   :  { %19083 = vadd.xlane.f32.xlu0 %v19082_v11 }
0x27dc   :  { %19086 = vadd.xlane.f32.xlu0 %v19085_v58 }
0x27e6   :  { %31269 = vrot.lane.b32.xlu1 %v30772_v59, %s39748_s5 }
0x27f2   :  { %31271 = vrot.lane.b32.xlu0 %v30773_v36, %s39748_s5 }
0x2859   :  { %v29557_v21 = vpop.xlane.xlu0 %29556 }
0x285a   :  { %v29554_v53 = vpop.xlane.xlu1 %29553  ;;  %v29559_v33 = vmul.f32 0.03125, %v29557_v21 }
0x285b   :  { %v29558_v34 = vmul.f32 0.03125, %v29554_v53 }
0x285c   :  { %v29573_v7 = vmul.f32 %v29559_v33, %v29559_v33  ;;  %v29571_v49 = vsub.f32 %v42925_v17, %v29559_v33 }
0x285d   :  { %v29572_v29 = vmul.f32 %v29558_v34, %v29558_v34  ;;  %v29564_v20 = vpop.xlane.xlu0 %29563  ;;  %v29570_v4 = vsub.f32 %v42928_v12, %v29558_v34  ;;  %v19110_v12 = vsub.s32 7, %v40162_v2 }
0x285e   :  { %v29568_v54 = vmul.f32 0.03125, %v29564_v20  ;;  %v19074_v0 = vpop.xlane.xlu1 %19073 }
0x285f   :  { %v19078_v3 = vmul.f32 0.03125, %v19074_v0  ;;  %v19111_v34 = vrot.slane %v42918_v40, %v19110_v12  ;;  %v30859_v0 = vsub.f32 %v42988_v14, %v30858_v32 }
0x2860   :  { %v29574_v6 = vsub.f32 %v29568_v54, %v29572_v29 }
0x2861   :  { %v29567_v55 = vpop.xlane.xlu0 %29566  ;;  %v19092_v46 = vmul.f32 %v19078_v3, %v19078_v3  ;;  %v19090_v36 = vsub.f32 %v42934_v31, %v19078_v3 }
0x2862   :  { %v29576_v56 = vadd.f32 1e-06, %v29574_v6  ;;  %v29569_v22 = vmul.f32 0.03125, %v29567_v55  ;;  %v19077_v38 = vpop.xlane.xlu1 %19076 }
0x2863   :  { %v19079_v11 = vmul.f32 0.03125, %v19077_v38 }
0x2864   :  { %39645 = vrsqrt.f32 %v29576_v56  ;;  %v29575_v61 = vsub.f32 %v29569_v22, %v29573_v7 }
0x2865   :  { %v19084_v1 = vpop.xlane.xlu0 %19083  ;;  %v19093_v21 = vmul.f32 %v19079_v11, %v19079_v11 }
0x2866   :  { %v29577_v42 = vadd.f32 1e-06, %v29575_v61  ;;  %v19088_v30 = vmul.f32 0.03125, %v19084_v1  ;;  %v30860_v1 = vand.u32 4294901760, %v30859_v0 }
0x2868   :  { %39647 = vrsqrt.f32 %v29577_v42  ;;  %v19094_v5 = vsub.f32 %v19088_v30, %v19092_v46 }
0x2869   :  { %v19087_v26 = vpop.xlane.xlu0 %19086 }
0x286a   :  { %v19096_v18 = vadd.f32 1e-06, %v19094_v5  ;;  %v19089_v59 = vmul.f32 0.03125, %v19087_v26 }
0x286c   :  { %39649 = vrsqrt.f32 %v19096_v18  ;;  %v19095_v33 = vsub.f32 %v19089_v59, %v19093_v21 }
0x286e   :  { %v39646_v41 = vpop.eup %39645  ;;  %v19097_v3 = vadd.f32 1e-06, %v19095_v33  ;;  %v19135_v33 = vld [vmem:[%s43779_s11 + $0x88] sm:$0xff] }
0x286f   :  { %v29580_v28 = vmul.f32 %v39646_v41, %v29570_v4 }
0x2870   :  { %39651 = vrsqrt.f32 %v19097_v3 }
0x2871   :  { %v29586_v43 = vmul.f32 %v29585_v60, %v29580_v28 }
0x2872   :  { %v39648_v10 = vpop.eup %39647 }
0x2873   :  { %v29581_v24 = vmul.f32 %v39648_v10, %v29571_v49  ;;  %v42992_v58 = vadd.f32 %v29591_v9, %v29586_v43 }
0x2875   :  { %v29587_v35 = vmul.f32 %v29585_v60, %v29581_v24  ;;  %v29603_v17 = vsel %vm816_vm3, %v42992_v58, 0 }
0x2876   :  { %v39650_v16 = vpop.eup %39649  ;;  %v43001_v53 = vand.u32 4294901760, %v29603_v17 }
0x2877   :  { %v19100_v29 = vmul.f32 %v39650_v16, %v19090_v36  ;;  %v43006_v20 = vadd.f32 %v29591_v9, %v29587_v35  ;;  %v19091_v9 = vsub.f32 %v42944_v13, %v19079_v11  ;;  %v19129_v16 = vld [vmem:[%s43779_s11 + $0x58] sm:$0xff] }
0x2878   :  { %v29678_v31 = vsub.f32 %v29603_v17, %v43001_v53 }
0x2879   :  { %v19106_v54 = vmul.f32 %v19105_v45, %v19100_v29  ;;  %v29606_v6 = vsel %vm816_vm3, %v43006_v20, 0  ;;  %v19132_v29 = vld [vmem:[%s43779_s11 + $0x70] sm:$0xff] }
0x287a   :  { %v29679_v55 = vand.u32 4294901760, %v29678_v31  ;;  %v43014_v7 = vand.u32 4294901760, %v29606_v6  ;;  %v39652_v41 = vpop.eup %39651 }
0x287b   :  { %v19112_v56 = vadd.f32 %v19111_v34, %v19106_v54  ;;  %v30164_v54 = vand.u32 4294901760, %v19135_v33 }
0x287c   :  { %v29680_v40 = vsub.f32 %v29678_v31, %v29679_v55  ;;  %v43017_v22 = vsub.f32 %v29606_v6, %v43014_v7 }
0x287d   :  { %v43019_v61 = vand.u32 4294901760, %v19112_v56 }
0x287e   :  { %v29681_v46 = vand.u32 4294901760, %v29680_v40  ;;  %v29689_v42 = vand.u32 4294901760, %v43017_v22 }
0x287f   :  { %37113 = vmatprep.subr.mxu0 %v43019_v61  ;;  %v30868_v30 = vsub.f32 %v19112_v56, %v43019_v61  ;;  %v19141_v56 = vld [vmem:[%s43779_s11 + $0xb8] sm:$0xff] }
0x2880   :  { %36941 = vmatprep.mubr.f32.mxu1 %v29681_v46  ;;  %37114 = vmatpush3.msra.mxu0 %v43019_v61  ;;  %v29690_v5 = vsub.f32 %v43017_v22, %v29689_v42  ;;  %v30170_v40 = vand.u32 4294901760, %v19141_v56 }
0x2881   :  { %37116 = vmatmul.mubr.f32.vlgmr.msra.gmra.mrb[62].mxu0 %v30860_v1  ;;  %v30869_v63 = vand.u32 4294901760, %v30868_v30 }
0x2882   :  { %v29691_v18 = vand.u32 4294901760, %v29690_v5  ;;  %37120 = vmatprep.mubr.f32.mxu0 %v42964_v50 }
0x2883   :  { %v30870_v60 = vsub.f32 %v30868_v30, %v30869_v63 }
0x2884   :  { %36942 = vmatmul.mubr.f32.vlgmr.msra.gmra.mrb[62].mxu1 %v29691_v18 }
0x2885   :  { %38396 = vmatpush3.bf16.msra.mxu1 %v42487_v15  ;;  %36952 = vmatprep.mubr.f32.mxu1 %v43001_v53  ;;  %v30871_v4 = vand.u32 4294901760, %v30870_v60  ;;  %v19101_v15 = vmul.f32 %v39652_v41, %v19091_v9 }
0x2886   :  { %38398 = vmatprep.subr.bf16.mxu1 %v42499_v51 }
0x2887   :  { %37118 = vmatprep.subr.mxu0 %v30871_v4  ;;  %v19107_v28 = vmul.f32 %v19105_v45, %v19101_v15 }
0x2888   :  { %37119 = vmatpush3.msra.mxu0 %v30871_v4 }
0x2889   :  { %38400 = vmatpush3.bf16.msra.mxu1 %v42499_v51  ;;  %37121 = vmatmul.mubr.f32.vlgmr.msra.gmra.mrb[62].mxu0 %v42981_v48  ;;  %v31270_v51 = vpop.permute.xlu1 %31269  ;;  %v19113_v38 = vadd.f32 %v19111_v34, %v19107_v28 }
0x288a   :  { %38402 = vmatprep.subr.bf16.mxu1 %v42468_v27  ;;  %37123 = vmatprep.subr.mxu0 %v30868_v30  ;;  %v31273_v13 = vsel %vm20323_vm12, %v31270_v51, 0  ;;  %v30278_v51 = vsub.f32 %v19135_v33, %v30164_v54 }
0x288b   :  { %37124 = vmatpush3.msra.mxu0 %v30868_v30  ;;  %37125 = vmatprep.mubr.f32.mxu0 %v42967_v44  ;;  %v31278_v26 = vand.u32 4294901760, %v19113_v38 }
0x288c   :  { %37128 = vmatprep.subr.mxu0 %v43019_v61  ;;  %36953 = vmatmul.mubr.f32.vlgmr.msra.gmra.mrb[62].mxu1 %v43014_v7 }
0x288d   :  { %38404 = vmatpush3.bf16.msra.mxu1 %v42468_v27  ;;  %36963 = vmatprep.mubr.f32.mxu1 %v29678_v31  ;;  %v31272_v27 = vpop.permute.xlu0 %31271  ;;  %v31365_v10 = vsub.f32 %v19113_v38, %v31278_v26  ;;  %v30161_v31 = vand.u32 4294901760, %v19132_v29  ;;  %v30279_v38 = vand.u32 4294901760, %v30278_v51 }
0x288e   :  { %38406 = vmatprep.subr.bf16.mxu1 %v42491_v37  ;;  %v31275_v49 = vsel %vm20323_vm12, %v31272_v27, 0 }
0x288f   :  { %v31353_v44 = vand.u32 4294901760, %v31275_v49  ;;  %v31366_v24 = vand.u32 4294901760, %v31365_v10  ;;  %v43097_v0 = vpack.c.bf16 %v30164_v54, %v30161_v31  ;;  %v30271_v15 = vsub.f32 %v19132_v29, %v30161_v31 }
0x2890   :  { %v29597_v29 = vrot.slane %v42977_v25, %v17938_v57 }
0x2891   :  { %38408 = vmatpush3.bf16.msra.mxu1 %v42491_v37  ;;  %37126 = vmatmul.mubr.f32.vlgmr.msra.gmra.mrb[62].mxu0 %v42988_v14  ;;  %v31343_v37 = vand.u32 4294901760, %v31273_v13  ;;  %v31354_v43 = vsub.f32 %v31275_v49, %v31353_v44  ;;  %v30272_v27 = vand.u32 4294901760, %v30271_v15 }
0x2892   :  { %38410 = vmatprep.subr.bf16.mxu1 %v42462_v52  ;;  %37129 = vmatpush3.msra.mxu0 %v43019_v61 }
0x2893   :  { %37133 = vmatprep.subr.mxu0 %v30869_v63  ;;  %37130 = vmatprep.mubr.f32.mxu0 %v30848_v19  ;;  %v31344_v19 = vsub.f32 %v31273_v13, %v31343_v37  ;;  %v31355_v11 = vand.u32 4294901760, %v31354_v43  ;;  %v30273_v49 = vsub.f32 %v30271_v15, %v30272_v27 }
0x2894   :  { %36964 = vmatmul.mubr.f32.vlgmr.msra.gmra.mrb[62].mxu1 %v43017_v22 }
0x2895   :  { %38412 = vmatpush3.bf16.msra.mxu1 %v42462_v52  ;;  %36974 = vmatprep.mubr.f32.mxu1 %v29679_v55  ;;  %v31345_v14 = vand.u32 4294901760, %v31344_v19 }
0x2896   :  { %38414 = vmatprep.subr.bf16.mxu1 %v42819_v23 }
0x2897   :  { %v31346_v45 = vsub.f32 %v31344_v19, %v31345_v14 }
0x2899   :  { %38416 = vmatpush3.bf16.msra.mxu1 %v42819_v23  ;;  %37131 = vmatmul.mubr.f32.vlgmr.msra.gmra.mrb[62].mxu0 %v30858_v32  ;;  %v31347_v59 = vand.u32 4294901760, %v31346_v45  ;;  %v19126_v32 = vld [vmem:[%s43779_s11 + $0x40] sm:$0xff] }
0x289a   :  { %38418 = vmatprep.subr.bf16.mxu1 %v42477_v62  ;;  %37134 = vmatpush3.msra.mxu0 %v30869_v63  ;;  %v30155_v21 = vand.u32 4294901760, %v19126_v32 }
0x289b   :  { %37138 = vmatprep.subr.mxu0 %v43019_v61  ;;  %37135 = vmatprep.mubr.f32.mxu0 %v42964_v50 }
0x289c   :  { %36975 = vmatmul.mubr.f32.vlgmr.msra.gmra.mrb[62].mxu1 %v29689_v42  ;;  %v30257_v30 = vsub.f32 %v19126_v32, %v30155_v21 }
0x289d   :  { %38420 = vmatpush3.bf16.msra.mxu1 %v42477_v62  ;;  %36985 = vmatprep.mubr.f32.mxu1 %v43001_v53  ;;  %v31356_v62 = vsub.f32 %v31354_v43, %v31355_v11 }
0x289e   :  { %38422 = vmatprep.subr.bf16.mxu1 %v42495_v47  ;;  %v30258_v60 = vand.u32 4294901760, %v30257_v30 }
0x289f   :  { %v31357_v36 = vand.u32 4294901760, %v31356_v62 }
0x28a0   :  { %v30259_v9 = vsub.f32 %v30257_v30, %v30258_v60 }
0x28a1   :  { %38424 = vmatpush3.bf16.msra.mxu1 %v42495_v47  ;;  %37136 = vmatmul.mubr.f32.vlgmr.msra.gmra.mrb[62].mxu0 %v42981_v48  ;;  %v31367_v47 = vsub.f32 %v31365_v10, %v31366_v24 }
0x28a2   :  { %38426 = vmatprep.subr.bf16.mxu1 %v42462_v52  ;;  %37139 = vmatpush3.msra.mxu0 %v43019_v61  ;;  %v30260_v13 = vand.u32 4294901760, %v30259_v9  ;;  %v43161_v9 = vld [vmem:[%s43782_s14 + $0x30] sm:$0xff] }
0x28a3   :  { %37143 = vmatprep.subr.mxu0 %v31278_v26  ;;  %37140 = vmatprep.mubr.f32.mxu0 %v42964_v50  ;;  %v31368_v35 = vand.u32 4294901760, %v31367_v47 }
0x28a4   :  { %36986 = vmatmul.mubr.f32.vlgmr.msra.gmra.mrb[62].mxu1 %v43014_v7 }
0x28a5   :  { %38428 = vmatpush3.bf16.msra.mxu1 %v42462_v52  ;;  %36996 = vmatprep.mubr.f32.mxu1 %v43001_v53  ;;  %v19120_v52 = vld [vmem:[%s43779_s11 + $0x10] sm:$0xff]  ;;  %v30158_v53 = vand.u32 4294901760, %v19129_v16 }
0x28a6   :  { %38430 = vmatprep.subr.bf16.mxu1 %v42819_v23  ;;  %v30149_v50 = vand.u32 4294901760, %v19120_v52 }
0x28a7   :  { %v43087_v34 = vpack.c.bf16 %v30158_v53, %v30155_v21  ;;  %v30264_v5 = vsub.f32 %v19129_v16, %v30158_v53  ;;  %v38505_v21 = vpack.c.bf16 %v30279_v38, %v30272_v27  ;;  %v43181_v27 = vld [vmem:[%s43782_s14 + $0x50] sm:$0xff] }
0x28a8   :  { %v30243_v6 = vsub.f32 %v19120_v52, %v30149_v50 }
0x28a9   :  { %38432 = vmatpush3.bf16.msra.mxu1 %v42819_v23  ;;  %37141 = vmatmul.mubr.f32.vlgmr.msra.gmra.mrb[62].mxu0 %v42981_v48  ;;  %v19123_v23 = vld [vmem:[%s43779_s11 + $0x28] sm:$0xff]  ;;  %v30265_v4 = vand.u32 4294901760, %v30264_v5 }
0x28aa   :  { %37144 = vmatpush3.msra.mxu0 %v31278_v26  ;;  %37145 = vmatprep.mubr.f32.mxu0 %v31347_v59  ;;  %v30152_v48 = vand.u32 4294901760, %v19123_v23  ;;  %v30244_v22 = vand.u32 4294901760, %v30243_v6 }
0x28ab   :  { %37148 = vmatprep.subr.mxu0 %v31368_v35  ;;  %v30266_v28 = vsub.f32 %v30264_v5, %v30265_v4  ;;  %v38501_v16 = vpack.c.bf16 %v30265_v4, %v30258_v60  ;;  %v43135_v60 = vld [vmem:[%s43782_s14] sm:$0xff] }
0x28ac   :  { %36997 = vmatmul.mubr.f32.vlgmr.msra.gmra.mrb[62].mxu1 %v43014_v7  ;;  %v43077_v17 = vpack.c.bf16 %v30152_v48, %v30149_v50  ;;  %v30250_v55 = vsub.f32 %v19123_v23, %v30152_v48  ;;  %v19138_v7 = vld [vmem:[%s43779_s11 + $0xa0] sm:$0xff]  ;;  %v30245_v46 = vsub.f32 %v30243_v6, %v30244_v22  ;;  %v38469_v23 = vpack.c.bf16 %v30264_v5, %v30257_v30 }
0x28ad   :  { %37146 = vmatmul.mubr.f32.vlgmr.msra.gmra.mrb[64].mxu0 %v31357_v36  ;;  %v30167_v3 = vand.u32 4294901760, %v19138_v7  ;;  %v38473_v50 = vpack.c.bf16 %v30278_v51, %v30271_v15  ;;  %v31827_v15 = vand.u32 4294901760, %v43161_v9 }
0x28ae   :  { %37149 = vmatpush3.msra.mxu0 %v31368_v35  ;;  %37150 = vmatprep.mubr.f32.mxu0 %v31343_v37  ;;  %v30251_v61 = vand.u32 4294901760, %v30250_v55  ;;  %v30246_v63 = vand.u32 4294901760, %v30245_v46  ;;  %v38465_v52 = vpack.c.bf16 %v30250_v55, %v30243_v6 }
0x28af   :  { %37153 = vmatprep.subr.mxu0 %v31365_v10  ;;  %38434 = vmatprep.subr.bf16.mxu1 %v43077_v17  ;;  %v43107_v1 = vpack.c.bf16 %v30170_v40, %v30167_v3 }
0x28b0   :  { %38436 = vmatpush3.bf16.msra.mxu1 %v43077_v17  ;;  %v30252_v42 = vsub.f32 %v30250_v55, %v30251_v61  ;;  %v38497_v32 = vpack.c.bf16 %v30251_v61, %v30244_v22 }
0x28b1   :  { %38438 = vmatprep.subr.bf16.mxu1 %v43087_v34 }
0x28b2   :  { %v30253_v18 = vand.u32 4294901760, %v30252_v42 }
0x28b4   :  { %38440 = vmatpush3.bf16.msra.mxu1 %v43087_v34  ;;  %v38449_v41 = vpack.c.bf16 %v30253_v18, %v30246_v63 }
0x28b5   :  { %37151 = vmatmul.mubr.f32.vlgmr.msra.gmra.mrb[64].mxu0 %v31353_v44  ;;  %38442 = vmatprep.subr.bf16.mxu1 %v43097_v0 }
0x28b6   :  { %37154 = vmatpush3.msra.mxu0 %v31365_v10  ;;  %37155 = vmatprep.mubr.f32.mxu0 %v31344_v19  ;;  %v30292_v19 = vsub.f32 %v19141_v56, %v30170_v40  ;;  %v30274_v10 = vand.u32 4294901760, %v30273_v49  ;;  %v43194_v49 = vld [vmem:[%s43782_s14 + $0x80] sm:$0xff] }
0x28b7   :  { %37158 = vmatprep.subr.mxu0 %v31278_v26 }
0x28b8   :  { %38444 = vmatpush3.bf16.msra.mxu1 %v43097_v0 }
0x28b9   :  { %38446 = vmatprep.subr.bf16.mxu1 %v43107_v1 }
0x28bc   :  { %38448 = vmatpush3.bf16.msra.mxu1 %v43107_v1 }
0x28bd   :  { %37156 = vmatmul.mubr.f32.vlgmr.msra.gmra.mrb[64].mxu0 %v31354_v43  ;;  %38450 = vmatprep.subr.bf16.mxu1 %v38449_v41 }
0x28be   :  { %37159 = vmatpush3.msra.mxu0 %v31278_v26  ;;  %37160 = vmatprep.mubr.f32.mxu0 %v31345_v14 }
0x28bf   :  { %37163 = vmatprep.subr.mxu0 %v31366_v24 }
0x28c5   :  { %37161 = vmatmul.mubr.f32.vlgmr.msra.gmra.mrb[64].mxu0 %v31355_v11 }
0x28c6   :  { %37164 = vmatpush3.msra.mxu0 %v31366_v24  ;;  %37165 = vmatprep.mubr.f32.mxu0 %v31343_v37  ;;  %v30293_v24 = vand.u32 4294901760, %v30292_v19 }
0x28c7   :  { %37168 = vmatprep.subr.mxu0 %v31278_v26 }
0x28c8   :  { %v30294_v47 = vsub.f32 %v30292_v19, %v30293_v24 }
0x28ca   :  { %v30295_v36 = vand.u32 4294901760, %v30294_v47 }
0x28cd   :  { %37166 = vmatmul.mubr.f32.vlgmr.msra.gmra.mrb[64].mxu0 %v31353_v44 }
0x28ce   :  { %37169 = vmatpush3.msra.mxu0 %v31278_v26  ;;  %37170 = vmatprep.mubr.f32.mxu0 %v31343_v37  ;;  %v30267_v37 = vand.u32 4294901760, %v30266_v28  ;;  %v30280_v26 = vsub.f32 %v30278_v51, %v30279_v38  ;;  %v43174_v28 = vld [vmem:[%s43782_s14 + $0x40] sm:$0xff]  ;;  %v31833_v38 = vand.u32 4294901760, %v43181_v27 }
0x28d0   :  { %v38453_v43 = vpack.c.bf16 %v30267_v37, %v30260_v13  ;;  %v30281_v14 = vand.u32 4294901760, %v30280_v26  ;;  %v31830_v13 = vand.u32 4294901760, %v43174_v28  ;;  %v43199_v26 = vld [vmem:[%s43782_s14 + $0x60] sm:$0xff] }
0x28d2   :  { %v38457_v45 = vpack.c.bf16 %v30281_v14, %v30274_v10  ;;  %v43188_v37 = vpack.c.bf16 %v31833_v38, %v31830_v13  ;;  %v43213_v14 = vld [vmem:[%s43782_s14 + $0x70] sm:$0xff] }
0x28d5   :  { %37171 = vmatmul.mubr.f32.vlgmr.msra.gmra.mrb[64].mxu0 %v31353_v44  ;;  %v30285_v44 = vsub.f32 %v19138_v7, %v30167_v3 }
0x28d7   :  { %v30286_v11 = vand.u32 4294901760, %v30285_v44  ;;  %v38477_v48 = vpack.c.bf16 %v30292_v19, %v30285_v44  ;;  %v31842_v19 = vand.u32 4294901760, %v43194_v49 }
0x28d9   :  { %v30287_v62 = vsub.f32 %v30285_v44, %v30286_v11  ;;  %v38509_v53 = vpack.c.bf16 %v30293_v24, %v30286_v11  ;;  %v43204_v44 = vld [vmem:[%s43782_s14 + $0x90] sm:$0xff]  ;;  %v31839_v24 = vand.u32 4294901760, %v43213_v14 }
0x28da   :  { %v31845_v10 = vand.u32 4294901760, %v43204_v44 }
0x28db   :  { %v30288_v59 = vand.u32 4294901760, %v30287_v62 }
0x28dc   :  { %v43224_v47 = vpack.c.bf16 %v31845_v10, %v31842_v19 }
0x28dd   :  { %v38461_v35 = vpack.c.bf16 %v30295_v36, %v30288_v59 }
0x297c   :  { %v43215_v11 = vpop.f32.mrb[62].mxu0 }
0x297f   :  { %v36998_v33 = vpop.f32.mrb[62].mxu1 }
0x2980   :  { %v38841_v31 = vadd.f32 %v36998_v33, %v29597_v29  ;;  %v30126_v54 = vpop.f32.mrb[63].mxu1  ;;  %v31787_v33 = vld [vmem:[%s43782_s14 + $0x8] sm:$0xff] }
0x2981   :  { %v38842_v7 = vadd.f32 %v30126_v54, %v29597_v29  ;;  %v31789_v54 = vld [vmem:[%s43782_s14 + $0x18] sm:$0xff] }
0x2982   :  { %v30137_v56 = vmax.f32 %v38841_v31, 0.0  ;;  %v31791_v31 = vld [vmem:[%s43782_s14 + $0x28] sm:$0xff] }
0x2983   :  { %v30136_v3 = vmax.f32 %v38842_v7, 0.0  ;;  %v31793_v7 = vld [vmem:[%s43782_s14 + $0x38] sm:$0xff] }
0x2984   :  { %v30146_v40 = vsel %vm98_vm0, %v30137_v56, 0  ;;  %v31795_v56 = vld [vmem:[%s43782_s14 + $0x48] sm:$0xff] }
0x2985   :  { %v30231_v6 = vand.u32 4294901760, %v30146_v40  ;;  %v30143_v55 = vsel %vm98_vm0, %v30136_v3, 0  ;;  %v31797_v3 = vld [vmem:[%s43782_s14 + $0x58] sm:$0xff] }
0x2986   :  { %v30221_v46 = vand.u32 4294901760, %v30143_v55 }
0x2987   :  { %v30232_v22 = vsub.f32 %v30146_v40, %v30231_v6  ;;  %v31806_v40 = vld [vmem:[%s43782_s14 + $0xa0] sm:$0xff] }
0x2988   :  { %v30222_v61 = vsub.f32 %v30143_v55, %v30221_v46 }
0x2989   :  { %v30233_v42 = vand.u32 4294901760, %v30232_v22 }
0x298a   :  { %v30223_v30 = vand.u32 4294901760, %v30222_v61 }
0x298b   :  { %v30234_v5 = vsub.f32 %v30232_v22, %v30233_v42 }
0x298c   :  { %v30224_v63 = vsub.f32 %v30222_v61, %v30223_v30 }
0x298d   :  { %v30235_v57 = vand.u32 4294901760, %v30234_v5  ;;  %v31803_v5 = vld [vmem:[%s43782_s14 + $0x88] sm:$0xff] }
0x298e   :  { %v30225_v18 = vand.u32 4294901760, %v30224_v63  ;;  %v31805_v63 = vld [vmem:[%s43782_s14 + $0x98] sm:$0xff] }
0x2990   :  { %37015 = vmatprep.mubr.f32.mxu1 %v30225_v18  ;;  %v31807_v18 = vld [vmem:[%s43782_s14 + $0xa8] sm:$0xff] }
0x2991   :  { %37016 = vmatmul.mubr.f32.vlgmr.msra.gmra.mrb[64].mxu1 %v30235_v57 }
0x2992   :  { %38452 = vmatpush3.bf16.msra.mxu1 %v38449_v41  ;;  %37034 = vmatprep.mubr.f32.mxu1 %v30221_v46 }
0x2993   :  { %38454 = vmatprep.subr.bf16.mxu1 %v38453_v43 }
0x2996   :  { %38456 = vmatpush3.bf16.msra.mxu1 %v38453_v43  ;;  %v31836_v43 = vand.u32 4294901760, %v43199_v26 }
0x2997   :  { %38458 = vmatprep.subr.bf16.mxu1 %v38457_v45 }
0x2998   :  { %v43230_v59 = vpack.c.bf16 %v31839_v24, %v31836_v43 }
0x299a   :  { %38460 = vmatpush3.bf16.msra.mxu1 %v38457_v45  ;;  %v43218_v45 = vpop.f32.mrb[63].mxu0 }
0x299b   :  { %38462 = vmatprep.subr.bf16.mxu1 %v38461_v35 }
0x299e   :  { %38464 = vmatpush3.bf16.msra.mxu1 %v38461_v35  ;;  %v30141_v35 = vrot.slane %v42977_v25, %v18482_v39 }
0x299f   :  { %38466 = vmatprep.subr.bf16.mxu1 %v38465_v52 }
0x29a1   :  { %37035 = vmatmul.mubr.f32.vlgmr.msra.gmra.mrb[64].mxu1 %v30231_v6 }
0x29a2   :  { %38468 = vmatpush3.bf16.msra.mxu1 %v38465_v52  ;;  %37053 = vmatprep.mubr.f32.mxu1 %v30222_v61  ;;  %v43306_v61 = vld [vmem:[%s43782_s14 + $0xb0] sm:$0xff] }
0x29a3   :  { %38470 = vmatprep.subr.bf16.mxu1 %v38469_v23 }
0x29a6   :  { %38472 = vmatpush3.bf16.msra.mxu1 %v38469_v23 }
0x29a7   :  { %38474 = vmatprep.subr.bf16.mxu1 %v38473_v50 }
0x29a8   :  { %v37172_v62 = vpop.f32.mrb[64].mxu0 }
0x29a9   :  { %v31756_v36 = vpop.f32.mrb[65].mxu0 }
0x29aa   :  { %38476 = vmatpush3.bf16.msra.mxu1 %v38473_v50 }
0x29ab   :  { %38478 = vmatprep.subr.bf16.mxu1 %v38477_v48 }
0x29ae   :  { %38480 = vmatpush3.bf16.msra.mxu1 %v38477_v48 }
0x29af   :  { %38482 = vmatprep.subr.bf16.mxu1 %v43077_v17 }
0x29b1   :  { %37054 = vmatmul.mubr.f32.vlgmr.msra.gmra.mrb[64].mxu1 %v30232_v22  ;;  %v31801_v22 = vld [vmem:[%s43782_s14 + $0x78] sm:$0xff] }
0x29b2   :  { %38484 = vmatpush3.bf16.msra.mxu1 %v43077_v17  ;;  %37072 = vmatprep.mubr.f32.mxu1 %v30223_v30 }
0x29b3   :  { %38486 = vmatprep.subr.bf16.mxu1 %v43087_v34 }
0x29b6   :  { %38488 = vmatpush3.bf16.msra.mxu1 %v43087_v34 }
0x29b7   :  { %38490 = vmatprep.subr.bf16.mxu1 %v43097_v0 }
0x29ba   :  { %38492 = vmatpush3.bf16.msra.mxu1 %v43097_v0 }
0x29bb   :  { %38494 = vmatprep.subr.bf16.mxu1 %v43107_v1 }
0x29be   :  { %38496 = vmatpush3.bf16.msra.mxu1 %v43107_v1 }
0x29bf   :  { %38498 = vmatprep.subr.bf16.mxu1 %v38497_v32 }
0x29c1   :  { %37073 = vmatmul.mubr.f32.vlgmr.msra.gmra.mrb[64].mxu1 %v30233_v42  ;;  %v31851_v42 = vand.u32 4294901760, %v43306_v61 }
0x29c2   :  { %38500 = vmatpush3.bf16.msra.mxu1 %v38497_v32  ;;  %37091 = vmatprep.mubr.f32.mxu1 %v30221_v46 }
0x29c3   :  { %38502 = vmatprep.subr.bf16.mxu1 %v38501_v16 }
0x29c6   :  { %38504 = vmatpush3.bf16.msra.mxu1 %v38501_v16 }
0x29c7   :  { %38506 = vmatprep.subr.bf16.mxu1 %v38505_v21 }
0x29ca   :  { %38508 = vmatpush3.bf16.msra.mxu1 %v38505_v21 }
0x29cb   :  { %38510 = vmatprep.subr.bf16.mxu1 %v38509_v53 }
0x29ce   :  { %38512 = vmatpush3.bf16.msra.mxu1 %v38509_v53 }
0x29cf   :  { %38514 = vmatprep.subr.bf16.mxu1 %v43077_v17 }
0x29d1   :  { %37092 = vmatmul.mubr.f32.vlgmr.msra.gmra.mrb[64].mxu1 %v30231_v6 }
0x29d2   :  { %38516 = vmatpush3.bf16.msra.mxu1 %v43077_v17  ;;  %37110 = vmatprep.mubr.f32.mxu1 %v30221_v46  ;;  %v31818_v17 = vand.u32 4294901760, %v43135_v60  ;;  %v31799_v46 = vld [vmem:[%s43782_s14 + $0x68] sm:$0xff] }
0x29d3   :  { %38518 = vmatprep.subr.bf16.mxu1 %v43087_v34 }
0x29d6   :  { %38520 = vmatpush3.bf16.msra.mxu1 %v43087_v34  ;;  %v43141_v34 = vld [vmem:[%s43782_s14 + $0x10] sm:$0xff] }
0x29d7   :  { %38522 = vmatprep.subr.bf16.mxu1 %v43097_v0  ;;  %v31821_v4 = vand.u32 4294901760, %v43141_v34 }
0x29da   :  { %38524 = vmatpush3.bf16.msra.mxu1 %v43097_v0  ;;  %v43148_v0 = vpack.c.bf16 %v31821_v4, %v31818_v17 }
0x29db   :  { %38526 = vmatprep.subr.bf16.mxu1 %v43107_v1 }
0x29dc   :  { %38530 = vmatprep.subr.bf16.mxu0 %v43148_v0 }
0x29dd   :  { %38532 = vmatpush3.bf16.msra.mxu0 %v43148_v0 }
0x29de   :  { %38528 = vmatpush3.bf16.msra.mxu1 %v43107_v1  ;;  %v43155_v1 = vld [vmem:[%s43782_s14 + $0x20] sm:$0xff] }
0x29df   :  { %v31824_v41 = vand.u32 4294901760, %v43155_v1 }
0x29e1   :  { %37111 = vmatmul.mubr.f32.vlgmr.msra.gmra.mrb[64].mxu1 %v30231_v6  ;;  %v43168_v51 = vpack.c.bf16 %v31827_v15, %v31824_v41  ;;  %v31848_v6 = vand.u32 4294901760, %v31806_v40 }
0x29e3   :  { %38534 = vmatprep.subr.bf16.mxu0 %v43168_v51  ;;  %v43292_v55 = vsub.f32 %v31806_v40, %v31848_v6  ;;  %v43314_v30 = vpack.c.bf16 %v31851_v42, %v31848_v6  ;;  %v43343_v6 = vsub.f32 %v43135_v60, %v31818_v17  ;;  %v43368_v17 = vsub.f32 %v43181_v27, %v31833_v38 }
0x29e4   :  { %38536 = vmatpush3.bf16.msra.mxu0 %v43168_v51 }
0x29e5   :  { %38538 = vmatprep.subr.bf16.mxu0 %v43188_v37  ;;  %43843 = vst [vmem:[#allocation5_spill] sm:$0xff] %v43292_v55 }
0x29e8   :  { %38540 = vmatpush3.bf16.msra.mxu0 %v43188_v37 }
0x29e9   :  { %38542 = vmatprep.subr.bf16.mxu0 %v43230_v59 }
0x29ec   :  { %38544 = vmatpush3.bf16.msra.mxu0 %v43230_v59 }
0x29ed   :  { %38546 = vmatprep.subr.bf16.mxu0 %v43224_v47 }
0x29f0   :  { %38548 = vmatpush3.bf16.msra.mxu0 %v43224_v47 }
0x29f1   :  { %38550 = vmatprep.subr.bf16.mxu0 %v43314_v30 }
0x29f4   :  { %38552 = vmatpush3.bf16.msra.mxu0 %v43314_v30 }
0x2ab4   :  { %v37112_v52 = vpop.f32.mrb[64].mxu1 }
0x2ab5   :  { %v38843_v23 = vadd.f32 %v37112_v52, %v30141_v35  ;;  %v30718_v50 = vpop.f32.mrb[65].mxu1 }
0x2ab6   :  { %v38844_v48 = vadd.f32 %v30718_v50, %v30141_v35 }
0x2ab7   :  { %v43240_v32 = vadd.f32 %v38843_v23, %v43006_v20 }
0x2ab8   :  { %v43243_v16 = vadd.f32 %v38844_v48, %v42992_v58 }
0x2ab9   :  { %v30733_v21 = vsel %vm816_vm3, %v43240_v32, 0.0  ;;  %v30739_v53 = vmul.f32 %v43240_v32, %v43240_v32 }
0x2aba   :  { %30734 = vadd.xlane.f32.xlu0 %v30733_v21  ;;  %v30730_v39 = vsel %vm816_vm3, %v43243_v16, 0.0  ;;  %v30738_v29 = vmul.f32 %v43243_v16, %v43243_v16 }
0x2abb   :  { %30731 = vadd.xlane.f32.xlu1 %v30730_v39  ;;  %v30743_v20 = vsel %vm816_vm3, %v30739_v53, 0.0 }
0x2abc   :  { %v30740_v58 = vsel %vm816_vm3, %v30738_v29, 0.0 }
0x2abe   :  { %30744 = vadd.xlane.f32.xlu0 %v30743_v20 }
0x2abf   :  { %30741 = vadd.xlane.f32.xlu1 %v30740_v58 }
0x2ad0   :  { %32475 = vrot.lane.b32.xlu1 %v43135_v60, %s39746_s27  ;;  %v43363_v60 = vsub.f32 %v43174_v28, %v31830_v13  ;;  %v43817_v13 = vand.u32 4294901760, %v43343_v6 }
0x2ad4   :  { %32477 = vrot.lane.b32.xlu0 %v31787_v33, %s39746_s27  ;;  %32479 = vrot.lane.b32.xlu1 %v43141_v34, %s39746_s27 }
0x2ad8   :  { %32485 = vrot.lane.b32.xlu0 %v31791_v31, %s39746_s27  ;;  %32481 = vrot.lane.b32.xlu1 %v31789_v54, %s39746_s27 }
0x2adc   :  { %32489 = vrot.lane.b32.xlu0 %v31793_v7, %s39746_s27  ;;  %32483 = vrot.lane.b32.xlu1 %v43155_v1, %s39746_s27 }
0x2ae0   :  { %32493 = vrot.lane.b32.xlu0 %v31795_v56, %s39746_s27  ;;  %32487 = vrot.lane.b32.xlu1 %v43161_v9, %s39746_s27 }
0x2ae4   :  { %32497 = vrot.lane.b32.xlu0 %v31797_v3, %s39746_s27  ;;  %32491 = vrot.lane.b32.xlu1 %v43174_v28, %s39746_s27 }
0x2ae8   :  { %32501 = vrot.lane.b32.xlu0 %v31799_v46, %s39746_s27  ;;  %32495 = vrot.lane.b32.xlu1 %v43181_v27, %s39746_s27  ;;  %v43348_v46 = vsub.f32 %v43141_v34, %v31821_v4  ;;  %v43374_v4 = vsub.f32 %v43199_v26, %v31836_v43 }
0x2aea   :  { %v43816_v27 = vand.u32 4294901760, %v43348_v46 }
0x2aec   :  { %32505 = vrot.lane.b32.xlu0 %v31801_v22, %s39746_s27  ;;  %32499 = vrot.lane.b32.xlu1 %v43199_v26, %s39746_s27 }
0x2af0   :  { %32507 = vrot.lane.b32.xlu0 %v43194_v49, %s39746_s27  ;;  %32503 = vrot.lane.b32.xlu1 %v43213_v14, %s39746_s27 }
0x2af4   :  { %32511 = vrot.lane.b32.xlu0 %v43204_v44, %s39746_s27  ;;  %31768 = vrot.lane.b32.xlu1 %v31756_v36, %s39746_s27 }
0x2af8   :  { %31770 = vrot.lane.b32.xlu0 %v37172_v62, %s39746_s27  ;;  %32509 = vrot.lane.b32.xlu1 %v31803_v5, %s39746_s27  ;;  %v43353_v5 = vsub.f32 %v43155_v1, %v31824_v41  ;;  %v43379_v1 = vsub.f32 %v43213_v14, %v31839_v24  ;;  %v30769_v24 = vrot.slane %v42977_v25, %v19110_v12 }
0x2afc   :  { %32513 = vrot.lane.b32.xlu1 %v31805_v63, %s39746_s27  ;;  %32517 = vrot.lane.b32.xlu0 %v31807_v18, %s39746_s27 }
0x2b00   :  { %32515 = vrot.lane.b32.xlu1 %v31806_v40, %s39746_s27 }
0x2b47   :  { %v30735_v57 = vpop.xlane.xlu0 %30734 }
0x2b48   :  { %v30737_v36 = vmul.f32 0.03125, %v30735_v57  ;;  %v30732_v35 = vpop.xlane.xlu1 %30731  ;;  %v43358_v57 = vsub.f32 %v43161_v9, %v31827_v15  ;;  %v30763_v9 = vrot.slane %v42977_v25, %v19104_v8 }
0x2b49   :  { %v30736_v62 = vmul.f32 0.03125, %v30732_v35 }
0x2b4a   :  { %v30751_v23 = vmul.f32 %v30737_v36, %v30737_v36  ;;  %v30749_v15 = vsub.f32 %v43240_v32, %v30737_v36  ;;  %v31918_v36 = vsub.f32 %v43343_v6, %v43817_v13 }
0x2b4b   :  { %v30745_v52 = vpop.xlane.xlu0 %30744  ;;  %v30750_v21 = vmul.f32 %v30736_v62, %v30736_v62  ;;  %v30748_v26 = vsub.f32 %v43243_v16, %v30736_v62  ;;  %v31925_v16 = vsub.f32 %v43348_v46, %v43816_v27 }
0x2b4c   :  { %v30747_v50 = vmul.f32 0.03125, %v30745_v52  ;;  %v30742_v48 = vpop.xlane.xlu1 %30741 }
0x2b4d   :  { %v30746_v53 = vmul.f32 0.03125, %v30742_v48 }
0x2b4e   :  { %v30753_v39 = vsub.f32 %v30747_v50, %v30751_v23 }
0x2b4f   :  { %v30752_v29 = vsub.f32 %v30746_v53, %v30750_v21  ;;  %v32478_v20 = vpop.permute.xlu0 %32477  ;;  %v31919_v21 = vand.u32 4294901760, %v31918_v36  ;;  %v31926_v53 = vand.u32 4294901760, %v31925_v16  ;;  %v43432_v36 = vsub.f32 %v43194_v49, %v31842_v19 }
0x2b50   :  { %v30755_v58 = vadd.f32 1e-06, %v30753_v39  ;;  %v32476_v33 = vpop.permute.xlu1 %32475 }
0x2b51   :  { %v30754_v31 = vadd.f32 1e-06, %v30752_v29  ;;  %v32523_v54 = vsel %vm816_vm3, %v32476_v33, %v32478_v20  ;;  %v43815_v33 = vand.u32 4294901760, %v43353_v5 }
0x2b52   :  { %39653 = vrsqrt.f32 %v30755_v58  ;;  %v32548_v7 = vand.u32 4294901760, %v32523_v54 }
0x2b53   :  { %39655 = vrsqrt.f32 %v30754_v31  ;;  %v32486_v56 = vpop.permute.xlu0 %32485 }
0x2b54   :  { %v32646_v3 = vsub.f32 %v32523_v54, %v32548_v7  ;;  %v32480_v40 = vpop.permute.xlu1 %32479 }
0x2b56   :  { %v32647_v22 = vand.u32 4294901760, %v32646_v3 }
0x2b57   :  { %v32490_v63 = vpop.permute.xlu0 %32489 }
0x2b58   :  { %v32482_v18 = vpop.permute.xlu1 %32481  ;;  %v32648_v28 = vsub.f32 %v32646_v3, %v32647_v22 }
0x2b59   :  { %v32524_v34 = vsel %vm816_vm3, %v32480_v40, %v32482_v18 }
0x2b5a   :  { %v32551_v41 = vand.u32 4294901760, %v32524_v34  ;;  %v32649_v12 = vand.u32 4294901760, %v32648_v28 }
0x2b5b   :  { %v32494_v23 = vpop.permute.xlu0 %32493 }
0x2b5c   :  { %v39654_v38 = vpop.eup %39653  ;;  %v43388_v43 = vpack.c.bf16 %v32551_v41, %v32548_v7  ;;  %v32653_v35 = vsub.f32 %v32524_v34, %v32551_v41  ;;  %v32484_v14 = vpop.permute.xlu1 %32483  ;;  %v43406_v7 = vpack.c.bf16 %v31926_v53, %v31919_v21  ;;  %v31932_v41 = vsub.f32 %v43353_v5, %v43815_v33 }
0x2b5d   :  { %v39656_v52 = vpop.eup %39655  ;;  %v32525_v8 = vsel %vm816_vm3, %v32484_v14, %v32486_v56  ;;  %v30759_v32 = vmul.f32 %v39654_v38, %v30749_v15  ;;  %v43814_v56 = vand.u32 4294901760, %v43358_v57 }
0x2b5e   :  { %v32654_v62 = vand.u32 4294901760, %v32653_v35  ;;  %v32554_v50 = vand.u32 4294901760, %v32525_v8  ;;  %v30758_v48 = vmul.f32 %v39656_v52, %v30748_v26  ;;  %38674 = vmatprep.subr.bf16.mxu1 %v43388_v43  ;;  %v43401_v2 = vpack.c.bf16 %v32653_v35, %v32646_v3  ;;  %38554 = vmatprep.subr.bf16.mxu0 %v43406_v7 }
0x2b5f   :  { %v30765_v25 = vmul.f32 %v30763_v9, %v30759_v32  ;;  %38676 = vmatpush3.bf16.msra.mxu1 %v43388_v43  ;;  %v32498_v15 = vpop.permute.xlu0 %32497 }
0x2b60   :  { %v32660_v39 = vsub.f32 %v32525_v8, %v32554_v50  ;;  %v32488_v29 = vpop.permute.xlu1 %32487  ;;  %v30764_v20 = vmul.f32 %v30763_v9, %v30758_v48  ;;  %v32655_v58 = vsub.f32 %v32653_v35, %v32654_v62  ;;  %v43417_v9 = vpack.c.bf16 %v32654_v62, %v32647_v22  ;;  %v31809_v35 = vld [vmem:[%s43782_s14 + $0xb8] sm:$0xff] }
0x2b61   :  { %v32526_v31 = vsel %vm816_vm3, %v32488_v29, %v32490_v63  ;;  %v30771_v54 = vadd.f32 %v30769_v24, %v30765_v25  ;;  %v31939_v63 = vsub.f32 %v43358_v57, %v43814_v56  ;;  %v31933_v8 = vand.u32 4294901760, %v31932_v41 }
0x2b62   :  { %v32661_v3 = vand.u32 4294901760, %v32660_v39  ;;  %v32557_v40 = vand.u32 4294901760, %v32526_v31  ;;  %v30770_v18 = vadd.f32 %v30769_v24, %v30764_v20  ;;  %v32656_v34 = vand.u32 4294901760, %v32655_v58 }
0x2b63   :  { %31778 = vrot.lane.b32.xlu0 %v30771_v54, %s39742_s24  ;;  %v31940_v32 = vand.u32 4294901760, %v31939_v63  ;;  %v43813_v22 = vand.u32 4294901760, %v43363_v60  ;;  %v43809_v29 = vand.u32 4294901760, %v43374_v4  ;;  %v43458_v63 = vsub.f32 %v43204_v44, %v31845_v10 }
0x2b64   :  { %v43419_v28 = vpack.c.bf16 %v32557_v40, %v32554_v50  ;;  %v32667_v38 = vsub.f32 %v32526_v31, %v32557_v40  ;;  %31776 = vrot.lane.b32.xlu1 %v30770_v18, %s39742_s24  ;;  %v32492_v26 = vpop.permute.xlu1 %32491  ;;  %v43425_v14 = vpack.c.bf16 %v32656_v34, %v32649_v12  ;;  %v32662_v24 = vsub.f32 %v32660_v39, %v32661_v3 }
0x2b65   :  { %v32527_v52 = vsel %vm816_vm3, %v32492_v26, %v32494_v23  ;;  %v43811_v50 = vand.u32 4294901760, %v43368_v17  ;;  %v43438_v48 = vpack.c.bf16 %v31940_v32, %v31933_v8  ;;  %v31946_v25 = vsub.f32 %v43363_v60, %v43813_v22 }
0x2b66   :  { %v32668_v16 = vand.u32 4294901760, %v32667_v38  ;;  %v32560_v62 = vand.u32 4294901760, %v32527_v52  ;;  %38678 = vmatprep.subr.bf16.mxu1 %v43419_v28  ;;  %v32663_v23 = vand.u32 4294901760, %v32662_v24  ;;  %v43443_v12 = vpack.c.bf16 %v32667_v38, %v32660_v39  ;;  %v32502_v39 = vpop.permute.xlu0 %32501 }
0x2b67   :  { %32521 = vrot.lane.b32.xlu0 %v31809_v35, %s39746_s27  ;;  %38680 = vmatpush3.bf16.msra.mxu1 %v43419_v28  ;;  %v31953_v53 = vsub.f32 %v43368_v17, %v43811_v50  ;;  %v31947_v58 = vand.u32 4294901760, %v31946_v25  ;;  %v43808_v31 = vand.u32 4294901760, %v43379_v1  ;;  %v43807_v25 = vand.u32 4294901760, %v43432_v36 }
0x2b68   :  { %v32674_v49 = vsub.f32 %v32527_v52, %v32560_v62  ;;  %32519 = vrot.lane.b32.xlu1 %v43306_v61, %s39746_s27  ;;  %v32496_v19 = vpop.permute.xlu1 %32495  ;;  %v32669_v21 = vsub.f32 %v32667_v38, %v32668_v16  ;;  %v43453_v54 = vpack.c.bf16 %v32668_v16, %v32661_v3  ;;  %v43463_v38 = vsub.f32 %v43306_v61, %v31851_v42 }
0x2b69   :  { %v32528_v20 = vsel %vm816_vm3, %v32496_v19, %v32498_v15  ;;  %v31954_v41 = vand.u32 4294901760, %v31953_v53  ;;  %v31960_v3 = vsub.f32 %v43374_v4, %v43809_v29  ;;  %v31967_v15 = vsub.f32 %v43379_v1, %v43808_v31 }
0x2b6a   :  { %v32675_v40 = vand.u32 4294901760, %v32674_v49  ;;  %v32563_v18 = vand.u32 4294901760, %v32528_v20  ;;  %v32670_v34 = vand.u32 4294901760, %v32669_v21  ;;  %43844 = vst [vmem:[#allocation6_spill] sm:$0xff] %v43463_v38  ;;  %v32506_v53 = vpop.permute.xlu0 %32505 }
0x2b6b   :  { %v43476_v8 = vpack.c.bf16 %v31954_v41, %v31947_v58  ;;  %v31961_v61 = vand.u32 4294901760, %v31960_v3  ;;  %v31968_v42 = vand.u32 4294901760, %v31967_v15  ;;  %v43812_v15 = vand.u32 4294901760, %v43463_v38 }
0x2b6c   :  { %v43471_v26 = vpack.c.bf16 %v32563_v18, %v32560_v62  ;;  %v32681_v35 = vsub.f32 %v32528_v20, %v32563_v18  ;;  %v32500_v24 = vpop.permute.xlu1 %32499  ;;  %v43473_v52 = vpack.c.bf16 %v32670_v34, %v32663_v23  ;;  %v32676_v44 = vsub.f32 %v32674_v49, %v32675_v40 }
0x2b6d   :  { %v32529_v10 = vsel %vm816_vm3, %v32500_v24, %v32502_v39  ;;  %v43481_v19 = vpack.c.bf16 %v31968_v42, %v31961_v61  ;;  %v43806_v23 = vand.u32 4294901760, %v43458_v63  ;;  %v31974_v18 = vsub.f32 %v43432_v36, %v43807_v25 }
0x2b6e   :  { %v32682_v32 = vand.u32 4294901760, %v32681_v35  ;;  %v32566_v16 = vand.u32 4294901760, %v32529_v10  ;;  %38682 = vmatprep.subr.bf16.mxu1 %v43471_v26  ;;  %v32677_v62 = vand.u32 4294901760, %v32676_v44  ;;  %v43484_v21 = vpack.c.bf16 %v32681_v35, %v32674_v49 }
0x2b6f   :  { %38684 = vmatpush3.bf16.msra.mxu1 %v43471_v26  ;;  %v43810_v34 = vand.u32 4294901760, %v43292_v55  ;;  %v31981_v3 = vsub.f32 %v43458_v63, %v43806_v23 }
0x2b70   :  { %v32688_v20 = vsub.f32 %v32529_v10, %v32566_v16  ;;  %v32504_v58 = vpop.permute.xlu1 %32503  ;;  %v32683_v39 = vsub.f32 %v32681_v35, %v32682_v32  ;;  %v43495_v49 = vpack.c.bf16 %v32682_v32, %v32675_v40  ;;  %v31975_v35 = vand.u32 4294901760, %v31974_v18 }
0x2b71   :  { %v32530_v41 = vsel %vm816_vm3, %v32504_v58, %v32506_v53  ;;  %v31982_v61 = vand.u32 4294901760, %v31981_v3  ;;  %v31988_v42 = vsub.f32 %v43292_v55, %v43810_v34  ;;  %v31995_v53 = vsub.f32 %v43463_v38, %v43812_v15  ;;  %v32508_v3 = vpop.permute.xlu0 %32507 }
0x2b72   :  { %v32689_v24 = vand.u32 4294901760, %v32688_v20  ;;  %v32569_v44 = vand.u32 4294901760, %v32530_v41  ;;  %v32684_v10 = vand.u32 4294901760, %v32683_v39 }
0x2b73   :  { %v43509_v39 = vpack.c.bf16 %v31982_v61, %v31975_v35  ;;  %v31989_v18 = vand.u32 4294901760, %v31988_v42  ;;  %v31996_v34 = vand.u32 4294901760, %v31995_v53  ;;  %v43522_v61 = vpack.c.bf16 %v43348_v46, %v43343_v6 }
0x2b74   :  { %v43503_v58 = vpack.c.bf16 %v32569_v44, %v32566_v16  ;;  %v32695_v23 = vsub.f32 %v32530_v41, %v32569_v44  ;;  %v31769_v25 = vpop.permute.xlu1 %31768  ;;  %v43505_v31 = vpack.c.bf16 %v32684_v10, %v32677_v62  ;;  %v32690_v32 = vsub.f32 %v32688_v20, %v32689_v24 }
0x2b75   :  { %v31782_v40 = vsel %vm816_vm3, %v43218_v45, %v31769_v25  ;;  %v43515_v44 = vpack.c.bf16 %v31996_v34, %v31989_v18  ;;  %v32512_v42 = vpop.permute.xlu0 %32511 }
0x2b76   :  { %v32696_v29 = vand.u32 4294901760, %v32695_v23  ;;  %38686 = vmatprep.subr.bf16.mxu1 %v43503_v58  ;;  %v43512_v50 = vpack.c.bf16 %v32695_v23, %v32688_v20  ;;  %v32691_v41 = vand.u32 4294901760, %v32690_v32 }
0x2b77   :  { %38688 = vmatpush3.bf16.msra.mxu1 %v43503_v58 }
0x2b78   :  { %v32510_v16 = vpop.permute.xlu1 %32509  ;;  %v32697_v62 = vsub.f32 %v32695_v23, %v32696_v29  ;;  %v43517_v10 = vpack.c.bf16 %v32696_v29, %v32689_v24  ;;  %v43529_v29 = vpack.c.bf16 %v43358_v57, %v43353_v5 }
0x2b79   :  { %v32531_v45 = vsel %vm816_vm3, %v32508_v3, %v32510_v16  ;;  %v31771_v22 = vpop.permute.xlu0 %31770 }
0x2b7a   :  { %43845 = vst [vmem:[#allocation7_spill] sm:$0xff] %v43517_v10  ;;  %v32572_v25 = vand.u32 4294901760, %v32531_v45  ;;  %v32698_v35 = vand.u32 4294901760, %v32697_v62 }
0x2b7c   :  { %v32702_v20 = vsub.f32 %v32531_v45, %v32572_v25  ;;  %v32514_v53 = vpop.permute.xlu1 %32513  ;;  %v43524_v15 = vpack.c.bf16 %v32698_v35, %v32691_v41  ;;  %v43539_v41 = vpack.c.bf16 %v43368_v17, %v43363_v60 }
0x2b7d   :  { %v32532_v32 = vsel %vm816_vm3, %v32512_v42, %v32514_v53 }
0x2b7e   :  { %v32703_v23 = vand.u32 4294901760, %v32702_v20  ;;  %v32575_v34 = vand.u32 4294901760, %v32532_v32 }
0x2b80   :  { %v43531_v24 = vpack.c.bf16 %v32575_v34, %v32572_v25  ;;  %v32709_v18 = vsub.f32 %v32532_v32, %v32575_v34  ;;  %v32704_v3 = vsub.f32 %v32702_v20, %v32703_v23  ;;  %v43545_v25 = vpack.c.bf16 %v43379_v1, %v43374_v4 }
0x2b81   :  { %v43555_v34 = vpack.c.bf16 %v43463_v38, %v43292_v55 }
0x2b82   :  { %v32710_v16 = vand.u32 4294901760, %v32709_v18  ;;  %38690 = vmatprep.subr.bf16.mxu1 %v43531_v24  ;;  %v43534_v62 = vpack.c.bf16 %v32709_v18, %v32702_v20  ;;  %v32705_v45 = vand.u32 4294901760, %v32704_v3  ;;  %v43551_v20 = vpack.c.bf16 %v43458_v63, %v43432_v36  ;;  %v32518_v3 = vpop.permute.xlu0 %32517 }
0x2b83   :  { %38692 = vmatpush3.bf16.msra.mxu1 %v43531_v24 }
0x2b84   :  { %v32711_v35 = vsub.f32 %v32709_v18, %v32710_v16  ;;  %v43541_v42 = vpack.c.bf16 %v32710_v16, %v32703_v23  ;;  %v32516_v18 = vpop.permute.xlu1 %32515  ;;  %v31783_v23 = vsel %vm816_vm3, %v43215_v11, %v31771_v22 }
0x2b85   :  { %v32533_v13 = vsel %vm816_vm3, %v32516_v18, %v32518_v3 }
0x2b86   :  { %43846 = vst [vmem:[#allocation8_spill] sm:$0xff] %v43541_v42  ;;  %v32712_v53 = vand.u32 4294901760, %v32711_v35 }
0x2b88   :  { %v43547_v32 = vpack.c.bf16 %v32712_v53, %v32705_v45 }
0x2bd5   :  { %v31779_v16 = vpop.permute.xlu0 %31778 }
0x2bd6   :  { %v31785_v35 = vsel %vm98_vm0, %v31783_v23, %v31779_v16  ;;  %v31777_v45 = vpop.permute.xlu1 %31776  ;;  %v32578_v23 = vand.u32 4294901760, %v32533_v13 }
0x2bd7   :  { %v31815_v53 = vsel %vm31810_vm1, %v31785_v35, 0  ;;  %v31784_v56 = vsel %vm98_vm0, %v31782_v40, %v31777_v45 }
0x2bd8   :  { %v43561_v33 = vand.u32 4294901760, %v31815_v53  ;;  %v31812_v27 = vsel %vm31810_vm1, %v31784_v56, 0  ;;  %v43590_v45 = vsub.f32 %v32533_v13, %v32578_v23 }
0x2bd9   :  { %v43564_v42 = vand.u32 4294901760, %v31812_v27  ;;  %v32522_v38 = vpop.permute.xlu0 %32521 }
0x2bda   :  { %v43567_v55 = vsub.f32 %v31815_v53, %v43561_v33  ;;  %v32520_v10 = vpop.permute.xlu1 %32519 }
0x2bdb   :  { %v31895_v11 = vsub.f32 %v31812_v27, %v43564_v42  ;;  %v32534_v22 = vsel %vm816_vm3, %v32520_v10, %v32522_v38 }
0x2bdc   :  { %v43572_v16 = vand.u32 4294901760, %v43567_v55  ;;  %v32581_v40 = vand.u32 4294901760, %v32534_v22 }
0x2bdd   :  { %v43574_v35 = vand.u32 4294901760, %v31895_v11 }
0x2bde   :  { %v43576_v56 = vpack.c.bf16 %v32581_v40, %v32578_v23  ;;  %v31907_v3 = vsub.f32 %v43567_v55, %v43572_v16  ;;  %v43584_v10 = vsub.f32 %v32534_v22, %v32581_v40 }
0x2bdf   :  { %v31897_v18 = vsub.f32 %v31895_v11, %v43574_v35 }
0x2be0   :  { %38694 = vmatprep.subr.bf16.mxu1 %v43576_v56  ;;  %v31908_v38 = vand.u32 4294901760, %v31907_v3  ;;  %v32724_v53 = vand.u32 4294901760, %v43584_v10 }
0x2be1   :  { %38696 = vmatpush3.bf16.msra.mxu1 %v43576_v56  ;;  %v31898_v27 = vand.u32 4294901760, %v31897_v18 }
0x2be2   :  { %38698 = vmatprep.subr.bf16.mxu1 %v43425_v14  ;;  %v32725_v13 = vsub.f32 %v43584_v10, %v32724_v53 }
0x2be3   :  { %37197 = vmatprep.mubr.f32.mxu0 %v31898_v27  ;;  %37359 = vmatprep.mubr.f32.mxu1 %v31898_v27 }
0x2be4   :  { %37198 = vmatmul.mubr.f32.vlgmr.msra.gmra.mrb[66].mxu0 %v31908_v38  ;;  %37360 = vmatmul.mubr.f32.vlgmr.msra.gmra.mrb[66].mxu1 %v31908_v38 }
0x2be5   :  { %38556 = vmatpush3.bf16.msra.mxu0 %v43406_v7  ;;  %37224 = vmatprep.mubr.f32.mxu0 %v43564_v42  ;;  %v32717_v7 = vand.u32 4294901760, %v43590_v45 }
0x2be6   :  { %38700 = vmatpush3.bf16.msra.mxu1 %v43425_v14  ;;  %37386 = vmatprep.mubr.f32.mxu1 %v43564_v42 }
0x2be7   :  { %38702 = vmatprep.subr.bf16.mxu1 %v43473_v52  ;;  %38558 = vmatprep.subr.bf16.mxu0 %v43438_v48  ;;  %v32718_v14 = vsub.f32 %v43590_v45, %v32717_v7 }
0x2be9   :  { %38560 = vmatpush3.bf16.msra.mxu0 %v43438_v48  ;;  %v32726_v48 = vand.u32 4294901760, %v32725_v13 }
0x2bea   :  { %38704 = vmatpush3.bf16.msra.mxu1 %v43473_v52  ;;  %38562 = vmatprep.subr.bf16.mxu0 %v43476_v8  ;;  %v32719_v52 = vand.u32 4294901760, %v32718_v14 }
0x2beb   :  { %38706 = vmatprep.subr.bf16.mxu1 %v43505_v31 }
0x2bed   :  { %38564 = vmatpush3.bf16.msra.mxu0 %v43476_v8  ;;  %v43849_v8 = vand.u32 4294901760, %v43353_v5 }
0x2bee   :  { %38708 = vmatpush3.bf16.msra.mxu1 %v43505_v31  ;;  %38566 = vmatprep.subr.bf16.mxu0 %v43481_v19  ;;  %v38717_v31 = vpack.c.bf16 %v32726_v48, %v32719_v52 }
0x2bef   :  { %38710 = vmatprep.subr.bf16.mxu1 %v43524_v15 }
0x2bf1   :  { %38568 = vmatpush3.bf16.msra.mxu0 %v43481_v19  ;;  %v43850_v19 = vand.u32 4294901760, %v43358_v57  ;;  %v43853_v57 = vand.u32 4294901760, %v43374_v4  ;;  %v43858_v4 = vld [vmem:[#allocation5_spill] sm:$0xff] }
0x2bf2   :  { %38712 = vmatpush3.bf16.msra.mxu1 %v43524_v15  ;;  %38570 = vmatprep.subr.bf16.mxu0 %v43509_v39  ;;  %v43854_v15 = vand.u32 4294901760, %v43379_v1  ;;  %v43859_v1 = vand.u32 4294901760, %v43858_v4 }
0x2bf3   :  { %38714 = vmatprep.subr.bf16.mxu1 %v43547_v32 }
0x2bf5   :  { %38572 = vmatpush3.bf16.msra.mxu0 %v43509_v39  ;;  %v38637_v39 = vpack.c.bf16 %v43854_v15, %v43853_v57 }
0x2bf6   :  { %38716 = vmatpush3.bf16.msra.mxu1 %v43547_v32  ;;  %38574 = vmatprep.subr.bf16.mxu0 %v43515_v44 }
0x2bf7   :  { %38718 = vmatprep.subr.bf16.mxu1 %v38717_v31 }
0x2bf9   :  { %38576 = vmatpush3.bf16.msra.mxu0 %v43515_v44  ;;  %v43857_v44 = vld [vmem:[#allocation7_spill] sm:$0xff] }
0x2bfa   :  { %38720 = vmatpush3.bf16.msra.mxu1 %v38717_v31  ;;  %38578 = vmatprep.subr.bf16.mxu0 %v43522_v61 }
0x2bfb   :  { %38722 = vmatprep.subr.bf16.mxu1 %v43401_v2 }
0x2bfc   :  { %37225 = vmatmul.mubr.f32.vlgmr.msra.gmra.mrb[66].mxu0 %v43561_v33 }
0x2bfd   :  { %38580 = vmatpush3.bf16.msra.mxu0 %v43522_v61  ;;  %37251 = vmatprep.mubr.f32.mxu0 %v31895_v11  ;;  %v43860_v61 = vld [vmem:[#allocation6_spill] sm:$0xff] }
0x2bfe   :  { %37387 = vmatmul.mubr.f32.vlgmr.msra.gmra.mrb[66].mxu1 %v43561_v33  ;;  %38582 = vmatprep.subr.bf16.mxu0 %v43529_v29 }
0x2bff   :  { %38724 = vmatpush3.bf16.msra.mxu1 %v43401_v2  ;;  %37413 = vmatprep.mubr.f32.mxu1 %v31895_v11  ;;  %v38741_v2 = vpack.c.bf16 %v43584_v10, %v43590_v45 }
0x2c00   :  { %38726 = vmatprep.subr.bf16.mxu1 %v43443_v12 }
0x2c01   :  { %38584 = vmatpush3.bf16.msra.mxu0 %v43529_v29  ;;  %v43861_v29 = vand.u32 4294901760, %v43860_v61 }
0x2c02   :  { %38586 = vmatprep.subr.bf16.mxu0 %v43539_v41 }
0x2c03   :  { %38728 = vmatpush3.bf16.msra.mxu1 %v43443_v12 }
0x2c04   :  { %38730 = vmatprep.subr.bf16.mxu1 %v43484_v21 }
0x2c05   :  { %38588 = vmatpush3.bf16.msra.mxu0 %v43539_v41 }
0x2c06   :  { %38590 = vmatprep.subr.bf16.mxu0 %v43545_v25 }
0x2c07   :  { %38732 = vmatpush3.bf16.msra.mxu1 %v43484_v21  ;;  %v38629_v21 = vpack.c.bf16 %v43850_v19, %v43849_v8 }
0x2c08   :  { %38734 = vmatprep.subr.bf16.mxu1 %v43512_v50 }
0x2c09   :  { %38592 = vmatpush3.bf16.msra.mxu0 %v43545_v25  ;;  %v33191_v25 = vld [vmem:[%s43775_s7] sm:$0xff] }
0x2c0a   :  { %38594 = vmatprep.subr.bf16.mxu0 %v43551_v20 }
0x2c0b   :  { %38736 = vmatpush3.bf16.msra.mxu1 %v43512_v50  ;;  %v43848_v50 = vand.u32 4294901760, %v43348_v46  ;;  %v43852_v46 = vand.u32 4294901760, %v43368_v17  ;;  %v43856_v17 = vand.u32 4294901760, %v43458_v63 }
0x2c0c   :  { %38738 = vmatprep.subr.bf16.mxu1 %v43534_v62 }
0x2c0d   :  { %38596 = vmatpush3.bf16.msra.mxu0 %v43551_v20 }
0x2c0e   :  { %38598 = vmatprep.subr.bf16.mxu0 %v43555_v34 }
0x2c0f   :  { %38740 = vmatpush3.bf16.msra.mxu1 %v43534_v62  ;;  %v43862_v62 = vld [vmem:[#allocation8_spill] sm:$0xff] }
0x2c10   :  { %38742 = vmatprep.subr.bf16.mxu1 %v38741_v2 }
0x2c11   :  { %38600 = vmatpush3.bf16.msra.mxu0 %v43555_v34 }
0x2c12   :  { %38602 = vmatprep.subr.bf16.mxu0 %v43148_v0 }
0x2c13   :  { %38744 = vmatpush3.bf16.msra.mxu1 %v38741_v2 }
0x2c14   :  { %38746 = vmatprep.subr.bf16.mxu1 %v43388_v43  ;;  %37252 = vmatmul.mubr.f32.vlgmr.msra.gmra.mrb[66].mxu0 %v43567_v55 }
0x2c15   :  { %38604 = vmatpush3.bf16.msra.mxu0 %v43148_v0  ;;  %37278 = vmatprep.mubr.f32.mxu0 %v43574_v35 }
0x2c16   :  { %37414 = vmatmul.mubr.f32.vlgmr.msra.gmra.mrb[66].mxu1 %v43567_v55  ;;  %38606 = vmatprep.subr.bf16.mxu0 %v43168_v51  ;;  %v43847_v55 = vand.u32 4294901760, %v43343_v6  ;;  %v43851_v6 = vand.u32 4294901760, %v43363_v60  ;;  %v43855_v60 = vand.u32 4294901760, %v43432_v36  ;;  %v38789_v36 = vpack.c.bf16 %v32724_v53, %v32717_v7 }
0x2c17   :  { %38748 = vmatpush3.bf16.msra.mxu1 %v43388_v43  ;;  %37440 = vmatprep.mubr.f32.mxu1 %v43574_v35 }
0x2c18   :  { %38750 = vmatprep.subr.bf16.mxu1 %v43419_v28  ;;  %v38625_v12 = vpack.c.bf16 %v43848_v50, %v43847_v55  ;;  %v38633_v5 = vpack.c.bf16 %v43852_v46, %v43851_v6 }
0x2c19   :  { %38608 = vmatpush3.bf16.msra.mxu0 %v43168_v51 }
0x2c1a   :  { %38610 = vmatprep.subr.bf16.mxu0 %v43188_v37 }
0x2c1b   :  { %38752 = vmatpush3.bf16.msra.mxu1 %v43419_v28 }
0x2c1c   :  { %38754 = vmatprep.subr.bf16.mxu1 %v43471_v26 }
0x2c1d   :  { %38612 = vmatpush3.bf16.msra.mxu0 %v43188_v37 }
0x2c1e   :  { %38614 = vmatprep.subr.bf16.mxu0 %v43230_v59 }
0x2c1f   :  { %38756 = vmatpush3.bf16.msra.mxu1 %v43471_v26 }
0x2c20   :  { %38758 = vmatprep.subr.bf16.mxu1 %v43503_v58 }
0x2c21   :  { %38616 = vmatpush3.bf16.msra.mxu0 %v43230_v59 }
0x2c22   :  { %38618 = vmatprep.subr.bf16.mxu0 %v43224_v47 }
0x2c23   :  { %38760 = vmatpush3.bf16.msra.mxu1 %v43503_v58 }
0x2c24   :  { %38762 = vmatprep.subr.bf16.mxu1 %v43531_v24 }
0x2c25   :  { %38620 = vmatpush3.bf16.msra.mxu0 %v43224_v47 }
0x2c26   :  { %38622 = vmatprep.subr.bf16.mxu0 %v43314_v30 }
0x2c27   :  { %38764 = vmatpush3.bf16.msra.mxu1 %v43531_v24 }
0x2c28   :  { %38766 = vmatprep.subr.bf16.mxu1 %v43576_v56 }
0x2c29   :  { %38624 = vmatpush3.bf16.msra.mxu0 %v43314_v30 }
0x2c2a   :  { %38626 = vmatprep.subr.bf16.mxu0 %v38625_v12 }
0x2c2b   :  { %38768 = vmatpush3.bf16.msra.mxu1 %v43576_v56 }
0x2c2c   :  { %38770 = vmatprep.subr.bf16.mxu1 %v43417_v9  ;;  %37279 = vmatmul.mubr.f32.vlgmr.msra.gmra.mrb[66].mxu0 %v43572_v16 }
0x2c2d   :  { %38628 = vmatpush3.bf16.msra.mxu0 %v38625_v12  ;;  %37305 = vmatprep.mubr.f32.mxu0 %v43564_v42 }
0x2c2e   :  { %37441 = vmatmul.mubr.f32.vlgmr.msra.gmra.mrb[66].mxu1 %v43572_v16  ;;  %38630 = vmatprep.subr.bf16.mxu0 %v38629_v21 }
0x2c2f   :  { %38772 = vmatpush3.bf16.msra.mxu1 %v43417_v9  ;;  %37467 = vmatprep.mubr.f32.mxu1 %v43564_v42  ;;  %v38641_v9 = vpack.c.bf16 %v43856_v17, %v43855_v60 }
0x2c30   :  { %38774 = vmatprep.subr.bf16.mxu1 %v43453_v54 }
0x2c31   :  { %38632 = vmatpush3.bf16.msra.mxu0 %v38629_v21 }
0x2c32   :  { %38634 = vmatprep.subr.bf16.mxu0 %v38633_v5 }
0x2c33   :  { %38776 = vmatpush3.bf16.msra.mxu1 %v43453_v54  ;;  %v38645_v54 = vpack.c.bf16 %v43861_v29, %v43859_v1 }
0x2c34   :  { %38778 = vmatprep.subr.bf16.mxu1 %v43495_v49 }
0x2c35   :  { %38636 = vmatpush3.bf16.msra.mxu0 %v38633_v5 }
0x2c36   :  { %38638 = vmatprep.subr.bf16.mxu0 %v38637_v39 }
0x2c37   :  { %38780 = vmatpush3.bf16.msra.mxu1 %v43495_v49 }
0x2c38   :  { %38782 = vmatprep.subr.bf16.mxu1 %v43857_v44 }
0x2c39   :  { %38640 = vmatpush3.bf16.msra.mxu0 %v38637_v39 }
0x2c3a   :  { %38642 = vmatprep.subr.bf16.mxu0 %v38641_v9 }
0x2c3b   :  { %38784 = vmatpush3.bf16.msra.mxu1 %v43857_v44 }
0x2c3c   :  { %38786 = vmatprep.subr.bf16.mxu1 %v43862_v62 }
0x2c3d   :  { %38644 = vmatpush3.bf16.msra.mxu0 %v38641_v9 }
0x2c3e   :  { %38646 = vmatprep.subr.bf16.mxu0 %v38645_v54 }
0x2c3f   :  { %38788 = vmatpush3.bf16.msra.mxu1 %v43862_v62 }
0x2c40   :  { %38790 = vmatprep.subr.bf16.mxu1 %v38789_v36 }
0x2c41   :  { %38648 = vmatpush3.bf16.msra.mxu0 %v38645_v54 }
0x2c42   :  { %38650 = vmatprep.subr.bf16.mxu0 %v43148_v0 }
0x2c43   :  { %38792 = vmatpush3.bf16.msra.mxu1 %v38789_v36 }
0x2c44   :  { %38794 = vmatprep.subr.bf16.mxu1 %v43388_v43  ;;  %37306 = vmatmul.mubr.f32.vlgmr.msra.gmra.mrb[66].mxu0 %v43561_v33 }
0x2c45   :  { %38652 = vmatpush3.bf16.msra.mxu0 %v43148_v0  ;;  %37332 = vmatprep.mubr.f32.mxu0 %v43564_v42 }
0x2c46   :  { %37468 = vmatmul.mubr.f32.vlgmr.msra.gmra.mrb[66].mxu1 %v43561_v33  ;;  %38654 = vmatprep.subr.bf16.mxu0 %v43168_v51 }
0x2c47   :  { %38796 = vmatpush3.bf16.msra.mxu1 %v43388_v43  ;;  %37494 = vmatprep.mubr.f32.mxu1 %v43564_v42 }
0x2c48   :  { %38798 = vmatprep.subr.bf16.mxu1 %v43419_v28 }
0x2c49   :  { %38656 = vmatpush3.bf16.msra.mxu0 %v43168_v51 }
0x2c4a   :  { %38658 = vmatprep.subr.bf16.mxu0 %v43188_v37 }
0x2c4b   :  { %38800 = vmatpush3.bf16.msra.mxu1 %v43419_v28 }
0x2c4c   :  { %38802 = vmatprep.subr.bf16.mxu1 %v43471_v26 }
0x2c4d   :  { %38660 = vmatpush3.bf16.msra.mxu0 %v43188_v37 }
0x2c4e   :  { %38662 = vmatprep.subr.bf16.mxu0 %v43230_v59 }
0x2c4f   :  { %38804 = vmatpush3.bf16.msra.mxu1 %v43471_v26 }
0x2c50   :  { %38806 = vmatprep.subr.bf16.mxu1 %v43503_v58 }
0x2c51   :  { %38664 = vmatpush3.bf16.msra.mxu0 %v43230_v59 }
0x2c52   :  { %38666 = vmatprep.subr.bf16.mxu0 %v43224_v47 }
0x2c53   :  { %38808 = vmatpush3.bf16.msra.mxu1 %v43503_v58 }
0x2c54   :  { %38810 = vmatprep.subr.bf16.mxu1 %v43531_v24 }
0x2c55   :  { %38668 = vmatpush3.bf16.msra.mxu0 %v43224_v47 }
0x2c56   :  { %38670 = vmatprep.subr.bf16.mxu0 %v43314_v30 }
0x2c57   :  { %38812 = vmatpush3.bf16.msra.mxu1 %v43531_v24 }
0x2c58   :  { %38814 = vmatprep.subr.bf16.mxu1 %v43576_v56 }
0x2c59   :  { %38672 = vmatpush3.bf16.msra.mxu0 %v43314_v30 }
0x2c5b   :  { %38816 = vmatpush3.bf16.msra.mxu1 %v43576_v56 }
0x2c5c   :  { %37333 = vmatmul.mubr.f32.vlgmr.msra.gmra.mrb[66].mxu0 %v43561_v33 }
0x2c5e   :  { %37495 = vmatmul.mubr.f32.vlgmr.msra.gmra.mrb[66].mxu1 %v43561_v33  ;;  %v33192_v33 = vld [vmem:[%s43775_s7 + $0x8] sm:$0xff]  ;;  %s39749_s7 = smov [#allocation2]  }
0x2d2f   :  { %v37334_v0 = vpop.f32.mrb[66].mxu0 }
0x2d30   :  { %v32439_v51 = vpop.f32.mrb[67].mxu0 }
0x2d31   :  { %v37496_v37 = vpop.f32.mrb[66].mxu1 }
0x2d32   :  { %v33246_v59 = vmul.f32 -1.442695, %v37496_v37  ;;  %v33169_v43 = vpop.f32.mrb[67].mxu1 }
0x2d33   :  { %v33245_v47 = vmul.f32 -1.442695, %v33169_v43 }
0x2d34   :  { %39657 = vpow2.f32 %v33246_v59 }
0x2d35   :  { %39659 = vpow2.f32 %v33245_v47 }
0x2d36   :  { %39661 = vtanh.f32 %v37334_v0 }
0x2d37   :  { %39663 = vtanh.f32 %v32439_v51 }
0x2d3e   :  { %v39658_v28 = vpop.eup %39657 }
0x2d3f   :  { %v39660_v63 = vpop.eup %39659  ;;  %v33186_v26 = vadd.f32 1.0, %v39658_v28 }
0x2d40   :  { %v33185_v30 = vadd.f32 1.0, %v39660_v63  ;;  %v39662_v49 = vpop.eup %39661 }
0x2d41   :  { %39665 = vrcp.f32 %v33186_v26  ;;  %v39664_v58 = vpop.eup %39663 }
0x2d42   :  { %39667 = vrcp.f32 %v33185_v30 }
0x2d4b   :  { %v39666_v24 = vpop.eup %39665 }
0x2d4c   :  { %v39668_v41 = vpop.eup %39667  ;;  %v33194_v42 = vmul.f32 %v39666_v24, %v39662_v49 }
0x2d4d   :  { %v33193_v32 = vmul.f32 %v39668_v41, %v39664_v58 }
0x2d4e   :  { %v33196_v20 = vmul.f32 %v33194_v42, %v33192_v33 }
0x2d4f   :  { %v33195_v34 = vmul.f32 %v33193_v32, %v33191_v25 }
0x2d50   :  { %33201 = vrot.lane.b32.xlu0 %v33196_v20, %s39745_s4 }
0x2d51   :  { %33199 = vrot.lane.b32.xlu1 %v33195_v34, %s39745_s4 }
0x2d54   :  { %33209 = vrot.lane.b32.xlu0 %v33196_v20, %s39742_s24 }
0x2d55   :  { %33207 = vrot.lane.b32.xlu1 %v33195_v34, %s39742_s24  ;;  %s33234_s24 = sshll.u32 %s39749_s7, 4  ;;  %s33235_s24 = int_to_ptr.vmem [resolvable:$true] %s33234_s24 }
0x2d56   :  { %s39716_s4 = scalar_lea.vmem %s33235_s24, 256  ;;  %p39721_p1 = scmp.lt.s32.totalorder %s33235_s24, %s33235_s24 }
0x2d57   :  { %p39717_p0 = scmp.ne.s32.totalorder %s33235_s24, %s39716_s4  ;;  %p39722_p2 = scmp.lt.s32.totalorder %s39716_s4, %s39716_s4 }
0x2d59   :  { %p39723_p3 = por %p39722_p2, %p39721_p1 }
0x2d5b   :  { %p39724_p4 = pnand %p39723_p3, %p39717_p0 }
0x2dc2   :  { %v33202_v11 = vpop.permute.xlu0 %33201 }
0x2dc3   :  { %v33200_v22 = vpop.permute.xlu1 %33199  ;;  %v33206_v23 = vadd.f32 %v33202_v11, %v33196_v20 }
0x2dc4   :  { %v33205_v16 = vadd.f32 %v33200_v22, %v33195_v34 }
0x2dc6   :  { %v33210_v40 = vpop.permute.xlu0 %33209 }
0x2dc7   :  { %v33214_v35 = vadd.f32 %v33210_v40, %v33206_v23  ;;  %v33208_v56 = vpop.permute.xlu1 %33207 }
0x2dc8   :  { %v33213_v3 = vadd.f32 %v33208_v56, %v33205_v16 }
0x2dc9   :  { %v33248_v18 = vmul.f32 -1.442695, %v33214_v35 }
0x2dca   :  { %v33247_v27 = vmul.f32 -1.442695, %v33213_v3 }
0x2dcb   :  { %39669 = vpow2.f32 %v33248_v18 }
0x2dcc   :  { %39671 = vpow2.f32 %v33247_v27 }
0x2dd5   :  { %v39670_v38 = vpop.eup %39669 }
0x2dd6   :  { %v39672_v10 = vpop.eup %39671  ;;  %v33222_v45 = vadd.f32 1.0, %v39670_v38 }
0x2dd7   :  { %v33221_v53 = vadd.f32 1.0, %v39672_v10 }
0x2dd8   :  { %39673 = vrcp.f32 %v33222_v45 }
0x2dd9   :  { %39675 = vrcp.f32 %v33221_v53 }
0x2de2   :  { %v39674_v7 = vpop.eup %39673 }
0x2de3   :  { %v39676_v13 = vpop.eup %39675  ;;  %33228 = vst.msk [vmem:[#allocation2 + $0x8] sm:$0xff] %vm816_vm3, %v39674_v7 }
0x2de4   :  { %33227 = vst.msk [vmem:[#allocation2] sm:$0xff] %vm816_vm3, %v39676_v13 }
0x2de5   :  { %39727 = shalt.err (!%p39724_p4)
}
0x2de6   :  { %s39728_s10 = scalar_lea.hbm %s43783_s15, 256 }
0x2de7   :  { %p39729_p5 = scmp.ne.s32.totalorder %s43783_s15, %s39728_s10  ;;  %p39732_p6 = scmp.lt.u32.totalorder %s39728_s10, %s43783_s15 }
0x2de9   :  { %p39734_p7 = pnand %p39732_p6, %p39729_p5 }
0x2deb   :  { %39737 = shalt.err (!%p39734_p7)
}
0x2dec   :  { %s39750_s6 = smov 128   ;;  %s39751_s1 = smov 8  }
0x2ded   :  { %33240 = dma.vmem_to_hbm [thread:$0]  %s33235_s24, 256, %s43783_s15, [#allocation3], %s39750_s6, %s39750_s6, %s39751_s1  }
0x2dee   :  { %39738 = dma.done.wait [#allocation3], 256  }
0x2def   :  { %39739 = vsyncadd [#allocation3], 4294967040 }
0x2df0   :  { %33244 = vsyncpa [#allocation3], 1 }

</bundles_post_ra>
